<compile_context>
chip_gen: v5e
topology: v5e:2x2
jax: 0.10.0
libtpu: 0.0.40
codegen_flags: <defaults>
</compile_context>

<pallas_src>
import functools

import jax
import jax.numpy as jnp
from jax import lax
from jax.experimental import pallas as pl
from jax.experimental.pallas import tpu as pltpu


# ---------------- atom feature vocab (ogb.utils.features) ----------------
def get_atom_feature_dims():
    return [119, 4, 12, 12, 10, 6, 6, 2, 2]   # sum = 173


D_IN_PAD = 256   # sum(dims)=173 zero-padded to a lane-aligned 256


# ---------------- Pallas kernel: one-hot + MLP + LayerNorm + mask ----------------
def atom_embed_mask_kernel(mask_prob, use_layernorm, hidden, latent, tn, n_feat,
                           x_ref, rand_ref, w1_ref, w2_ref, w3_ref, vec_ref,
                           feat_out_ref, mask_out_ref):
    # x_ref: (tn, n_feat) int32 atom features with per-column vocab offsets
    # already added in the wrapper -> one shared iota, single-pass one-hot.
    x = x_ref[...]

    iota = lax.broadcasted_iota(jnp.int32, (tn, D_IN_PAD), 1)
    m = iota == x[:, 0:1]
    for i in range(1, n_feat):
        m = m | (iota == x[:, i:i + 1])
    oh = m.astype(jnp.float32)                         # one f32 pass, lanes >=173 stay 0

    vec = vec_ref[...]                                 # (8, P) packed small params
    b1 = vec[0:1, :hidden]
    b2 = vec[1:2, :hidden]
    b3 = vec[2:3, :latent]
    gamma = vec[3:4, :latent]
    beta = vec[4:5, :latent]
    mask_vec = vec[5:6, :latent]

    # MLP: Linear+ReLU, Linear+ReLU, Linear
    h = jnp.dot(oh, w1_ref[...], preferred_element_type=jnp.float32) + b1
    h = jnp.maximum(h, 0.0)
    h = jnp.dot(h, w2_ref[...], preferred_element_type=jnp.float32) + b2
    h = jnp.maximum(h, 0.0)
    h = jnp.dot(h, w3_ref[...], preferred_element_type=jnp.float32) + b3

    if use_layernorm:
        # two-pass variance (matches torch LayerNorm numerics; eps inside rsqrt)
        mean = jnp.mean(h, axis=-1, keepdims=True)
        var = jnp.mean((h - mean) ** 2, axis=-1, keepdims=True)
        h = (h - mean) * lax.rsqrt(var + 1e-5) * gamma + beta

    rand = rand_ref[...]                               # (tn, 1) f32 uniforms
    mask_idx = rand < mask_prob                        # (tn, 1) bool
    feat_out_ref[...] = jnp.where(mask_idx, mask_vec, h)
    mask_out_ref[...] = mask_idx.astype(jnp.int32)


# ---------------- wrapper ----------------
def atom_embedding_with_mask(x, params, *, mask_prob, use_layernorm, key,
                             tile_nodes=None):
    """x: (N, n_feat<=9) int32 atom features.

    Returns (mask_feat (N, latent) f32, mask_idx (N, 1) bool).
    """
    dims = get_atom_feature_dims()
    d_in = sum(dims)
    n, n_feat = x.shape
    hidden = params["w1"].shape[1]
    latent = params["w3"].shape[1]

    if tile_nodes is None:
        # >=4 grid steps for small N (keeps both v7x TensorCores pipelined);
        # large tiles for big N to amortize the per-step overhead.
        tile_nodes = 2048 if n >= 8192 else max(8, min(512, pl.cdiv(n, 4)))
    tn = min(tile_nodes, n)
    if tn < n:
        tn = max(8, (tn // 8) * 8)
    grid = (pl.cdiv(n, tn),)
    # NOTE: if N % tn != 0 the last block's padded rows run the compares on
    # padding data; Pallas drops their out-of-range writeback, so results stay
    # correct.

    # Pre-add the vocab offsets so the kernel uses one shared iota.
    offs, o = [], 0
    for d in dims[:n_feat]:
        offs.append(o)
        o += d
    x_off = x.astype(jnp.int32) + jnp.asarray(offs, jnp.int32)[None, :]

    # Zero-pad w1's input rows 173 -> 256 (lane-aligned one-hot / matmul K).
    w1p = jnp.zeros((D_IN_PAD, hidden), jnp.float32).at[:d_in, :].set(
        params["w1"].astype(jnp.float32))

    # Pack the six tiny vectors into one resident (8, P) array.
    P = max(128, ((max(hidden, latent) + 127) // 128) * 128)
    vec = jnp.zeros((8, P), jnp.float32)
    vec = vec.at[0, :hidden].set(params["b1"].reshape(-1))
    vec = vec.at[1, :hidden].set(params["b2"].reshape(-1))
    vec = vec.at[2, :latent].set(params["b3"].reshape(-1))
    vec = vec.at[3, :latent].set(params["gamma"].reshape(-1))
    vec = vec.at[4, :latent].set(params["beta"].reshape(-1))
    vec = vec.at[5, :latent].set(params["mask_feature"].reshape(-1))

    # Per-node uniforms (replaces torch's .uniform_()); tiny HBM stream.
    rand = jax.random.uniform(key, (n, 1), jnp.float32)

    nodes = lambda i: (i, 0)
    fixed = lambda i: (0, 0)

    kernel = functools.partial(atom_embed_mask_kernel, float(mask_prob),
                               bool(use_layernorm), hidden, latent, tn, n_feat)

    flops = 2 * n * (D_IN_PAD * hidden + hidden * hidden + hidden * latent)
    bytes_accessed = (int(x_off.size) * 4 + int(rand.size) * 4
                      + int(w1p.size) * 4 + int(params["w2"].size) * 4
                      + int(params["w3"].size) * 4 + int(vec.size) * 4
                      + n * latent * 4 + n * 4)

    feat, mask_i32 = pl.pallas_call(
        kernel,
        out_shape=(jax.ShapeDtypeStruct((n, latent), jnp.float32),
                   jax.ShapeDtypeStruct((n, 1), jnp.int32)),
        grid=grid,
        in_specs=[
            pl.BlockSpec((tn, n_feat), nodes),        # offset-added atom features
            pl.BlockSpec((tn, 1), nodes),             # per-node uniforms
            pl.BlockSpec((D_IN_PAD, hidden), fixed),  # w1 (padded, resident)
            pl.BlockSpec((hidden, hidden), fixed),    # w2 (resident)
            pl.BlockSpec((hidden, latent), fixed),    # w3 (resident)
            pl.BlockSpec((8, P), fixed),              # packed b1,b2,b3,gamma,beta,mask
        ],
        out_specs=[
            pl.BlockSpec((tn, latent), nodes),
            pl.BlockSpec((tn, 1), nodes),
        ],
        compiler_params=pltpu.CompilerParams(
            dimension_semantics=("parallel",)),
        cost_estimate=pl.CostEstimate(flops=flops, transcendentals=n,
                                      bytes_accessed=bytes_accessed),
    )(x_off, rand, w1p, params["w2"], params["w3"], vec)

    return feat, mask_i32.astype(jnp.bool_)


# ---------------- pure-JAX reference of the un-masked feature path ----------------
def reference_features(x, params, *, use_layernorm):
    dims = get_atom_feature_dims()
    oh = jnp.concatenate([jax.nn.one_hot(x[:, i], d, dtype=jnp.float32)
                          for i, d in enumerate(dims)], axis=1)
    h = jnp.maximum(oh @ params["w1"] + params["b1"], 0.0)
    h = jnp.maximum(h @ params["w2"] + params["b2"], 0.0)
    h = h @ params["w3"] + params["b3"]
    if use_layernorm:
        mean = jnp.mean(h, axis=-1, keepdims=True)
        var = jnp.mean((h - mean) ** 2, axis=-1, keepdims=True)
        h = (h - mean) * lax.rsqrt(var + 1e-5) * params["gamma"] + params["beta"]
    return h


# ---------------- parameter construction ----------------
def init_params(key, d_in, hidden, latent):
    ks = jax.random.split(key, 4)

    def lin(k, fan_in, fan_out):
        bound = 1.0 / (fan_in ** 0.5)
        kw, kb = jax.random.split(k)
        w = jax.random.uniform(kw, (fan_in, fan_out), jnp.float32, -bound, bound)
        b = jax.random.uniform(kb, (1, fan_out), jnp.float32, -bound, bound)
        return w, b

    w1, b1 = lin(ks[0], d_in, hidden)
    w2, b2 = lin(ks[1], hidden, hidden)
    w3, b3 = lin(ks[2], hidden, latent)
    mask_feature = jax.random.normal(ks[3], (1, latent), jnp.float32) * (latent ** -0.5)
    return dict(w1=w1, b1=b1, w2=w2, b2=b2, w3=w3, b3=b3,
                gamma=jnp.ones((1, latent), jnp.float32),
                beta=jnp.zeros((1, latent), jnp.float32),
                mask_feature=mask_feature)


if __name__ == "__main__":
    key = jax.random.PRNGKey(0)
    k_x, k_p, k_mask = jax.random.split(key, 3)

    dims = get_atom_feature_dims()
    N = 1024                    # nodes (atoms) -> 4 tiles of 256
    HIDDEN = 32                 # mlp_hidden_size
    LATENT = 32                 # latent_size
    MASK_PROB = 0.25
    USE_LN = True               # use_layernorm

    # integer atom features, one column per vocab
    cols = [jax.random.randint(jax.random.fold_in(k_x, i), (N, 1), 0, d)
            for i, d in enumerate(dims)]
    x = jnp.concatenate(cols, axis=1).astype(jnp.int32)     # (N, 9)

    params = init_params(k_p, sum(dims), HIDDEN, LATENT)

    feat, mask_idx = atom_embedding_with_mask(
        x, params, mask_prob=MASK_PROB, use_layernorm=USE_LN, key=k_mask)
    jax.block_until_ready(feat)
    jax.block_until_ready(mask_idx)

    assert feat.shape == (N, LATENT) and feat.dtype == jnp.float32
    assert mask_idx.shape == (N, 1) and mask_idx.dtype == jnp.bool_

    # Mask decisions must match the wrapper's uniforms exactly.
    rand = jax.random.uniform(k_mask, (N, 1), jnp.float32)
    assert bool(jnp.all(mask_idx == (rand < MASK_PROB)))

    # Feature path: where(mask, mask_feature, MLP(x)) in pure JAX.
    ref_feat = reference_features(x, params, use_layernorm=USE_LN)
    expected = jnp.where(mask_idx, params["mask_feature"], ref_feat)
    assert jnp.allclose(feat, expected, atol=1e-5, rtol=1e-4), \
        float(jnp.max(jnp.abs(feat - expected)))

    # Both branches should be exercised (P[mask]=0.25, N=1024).
    n_masked = int(jnp.sum(mask_idx))
    assert 0 < n_masked < N

    print("KERNEL_OK")
</pallas_src>

<mosaic_0001>
module attributes {stable_mosaic.version = 11 : i64} {
  func.func @atom_embed_mask_kernel(%arg0: i32, %arg1: memref<256x9xi32, #tpu.memory_space<vmem>>, %arg2: memref<256x1xf32, #tpu.memory_space<vmem>>, %arg3: memref<256x32xf32, #tpu.memory_space<vmem>>, %arg4: memref<32x32xf32, #tpu.memory_space<vmem>>, %arg5: memref<32x32xf32, #tpu.memory_space<vmem>>, %arg6: memref<8x128xf32, #tpu.memory_space<vmem>>, %arg7: memref<256x32xf32, #tpu.memory_space<vmem>>, %arg8: memref<256x1xi32, #tpu.memory_space<vmem>>) attributes {dimension_semantics = [#tpu.dimension_semantics<parallel>], iteration_bounds = array<i64: 4>, scalar_prefetch = 0 : i64, scratch_operands = 0 : i64, tpu.core_type = #tpu.core_type<tc>, window_params = [{transform_indices = @transform_0, window_bounds = array<i64: 256, 9>}, {transform_indices = @transform_1, window_bounds = array<i64: 256, 1>}, {pipeline_mode = #tpu.pipeline_mode<synchronous>, transform_indices = @transform_2, window_bounds = array<i64: 256, 32>}, {pipeline_mode = #tpu.pipeline_mode<synchronous>, transform_indices = @transform_3, window_bounds = array<i64: 32, 32>}, {pipeline_mode = #tpu.pipeline_mode<synchronous>, transform_indices = @transform_4, window_bounds = array<i64: 32, 32>}, {pipeline_mode = #tpu.pipeline_mode<synchronous>, transform_indices = @transform_5, window_bounds = array<i64: 8, 128>}, {transform_indices = @transform_6, window_bounds = array<i64: 256, 32>}, {transform_indices = @transform_7, window_bounds = array<i64: 256, 1>}]} {
    %c0 = arith.constant 0 : index
    %c0_0 = arith.constant 0 : index
    %0 = vector.load %arg1[%c0, %c0_0] : memref<256x9xi32, #tpu.memory_space<vmem>>, vector<256x9xi32>
    %1 = tpu.iota {dimensions = array<i32: 1>} : vector<256x256xi32>
    %2 = vector.extract_strided_slice %0 {offsets = [0, 0], sizes = [256, 1], strides = [1, 1]} : vector<256x9xi32> to vector<256x1xi32>
    %3 = vector.broadcast %2 : vector<256x1xi32> to vector<256x256xi32>
    %4 = arith.cmpi eq, %1, %3 : vector<256x256xi32>
    %5 = vector.extract_strided_slice %0 {offsets = [0, 1], sizes = [256, 1], strides = [1, 1]} : vector<256x9xi32> to vector<256x1xi32>
    %6 = vector.broadcast %5 : vector<256x1xi32> to vector<256x256xi32>
    %7 = arith.cmpi eq, %1, %6 : vector<256x256xi32>
    %8 = arith.ori %4, %7 : vector<256x256xi1>
    %9 = vector.extract_strided_slice %0 {offsets = [0, 2], sizes = [256, 1], strides = [1, 1]} : vector<256x9xi32> to vector<256x1xi32>
    %10 = vector.broadcast %9 : vector<256x1xi32> to vector<256x256xi32>
    %11 = arith.cmpi eq, %1, %10 : vector<256x256xi32>
    %12 = arith.ori %8, %11 : vector<256x256xi1>
    %13 = vector.extract_strided_slice %0 {offsets = [0, 3], sizes = [256, 1], strides = [1, 1]} : vector<256x9xi32> to vector<256x1xi32>
    %14 = vector.broadcast %13 : vector<256x1xi32> to vector<256x256xi32>
    %15 = arith.cmpi eq, %1, %14 : vector<256x256xi32>
    %16 = arith.ori %12, %15 : vector<256x256xi1>
    %17 = vector.extract_strided_slice %0 {offsets = [0, 4], sizes = [256, 1], strides = [1, 1]} : vector<256x9xi32> to vector<256x1xi32>
    %18 = vector.broadcast %17 : vector<256x1xi32> to vector<256x256xi32>
    %19 = arith.cmpi eq, %1, %18 : vector<256x256xi32>
    %20 = arith.ori %16, %19 : vector<256x256xi1>
    %21 = vector.extract_strided_slice %0 {offsets = [0, 5], sizes = [256, 1], strides = [1, 1]} : vector<256x9xi32> to vector<256x1xi32>
    %22 = vector.broadcast %21 : vector<256x1xi32> to vector<256x256xi32>
    %23 = arith.cmpi eq, %1, %22 : vector<256x256xi32>
    %24 = arith.ori %20, %23 : vector<256x256xi1>
    %25 = vector.extract_strided_slice %0 {offsets = [0, 6], sizes = [256, 1], strides = [1, 1]} : vector<256x9xi32> to vector<256x1xi32>
    %26 = vector.broadcast %25 : vector<256x1xi32> to vector<256x256xi32>
    %27 = arith.cmpi eq, %1, %26 : vector<256x256xi32>
    %28 = arith.ori %24, %27 : vector<256x256xi1>
    %29 = vector.extract_strided_slice %0 {offsets = [0, 7], sizes = [256, 1], strides = [1, 1]} : vector<256x9xi32> to vector<256x1xi32>
    %30 = vector.broadcast %29 : vector<256x1xi32> to vector<256x256xi32>
    %31 = arith.cmpi eq, %1, %30 : vector<256x256xi32>
    %32 = arith.ori %28, %31 : vector<256x256xi1>
    %33 = vector.extract_strided_slice %0 {offsets = [0, 8], sizes = [256, 1], strides = [1, 1]} : vector<256x9xi32> to vector<256x1xi32>
    %34 = vector.broadcast %33 : vector<256x1xi32> to vector<256x256xi32>
    %35 = arith.cmpi eq, %1, %34 : vector<256x256xi32>
    %36 = arith.ori %32, %35 : vector<256x256xi1>
    %37 = arith.extui %36 : vector<256x256xi1> to vector<256x256xi32>
    %38 = arith.sitofp %37 : vector<256x256xi32> to vector<256x256xf32>
    %c0_1 = arith.constant 0 : index
    %c0_2 = arith.constant 0 : index
    %39 = vector.load %arg6[%c0_1, %c0_2] : memref<8x128xf32, #tpu.memory_space<vmem>>, vector<8x128xf32>
    %40 = vector.extract_strided_slice %39 {offsets = [0, 0], sizes = [1, 32], strides = [1, 1]} : vector<8x128xf32> to vector<1x32xf32>
    %41 = vector.extract_strided_slice %39 {offsets = [1, 0], sizes = [1, 32], strides = [1, 1]} : vector<8x128xf32> to vector<1x32xf32>
    %42 = vector.extract_strided_slice %39 {offsets = [2, 0], sizes = [1, 32], strides = [1, 1]} : vector<8x128xf32> to vector<1x32xf32>
    %43 = vector.extract_strided_slice %39 {offsets = [3, 0], sizes = [1, 32], strides = [1, 1]} : vector<8x128xf32> to vector<1x32xf32>
    %44 = vector.extract_strided_slice %39 {offsets = [4, 0], sizes = [1, 32], strides = [1, 1]} : vector<8x128xf32> to vector<1x32xf32>
    %45 = vector.extract_strided_slice %39 {offsets = [5, 0], sizes = [1, 32], strides = [1, 1]} : vector<8x128xf32> to vector<1x32xf32>
    %c0_3 = arith.constant 0 : index
    %c0_4 = arith.constant 0 : index
    %46 = vector.load %arg3[%c0_3, %c0_4] : memref<256x32xf32, #tpu.memory_space<vmem>>, vector<256x32xf32>
    %cst = arith.constant dense<0.000000e+00> : vector<256x32xf32>
    %47 = tpu.matmul %38, %46, %cst {dimension_numbers = #tpu.dot_dimension_numbers<[1], [0], [0], [1], [0, 0, 1, 1], [], []>} : vector<256x256xf32>, vector<256x32xf32>, vector<256x32xf32> -> vector<256x32xf32>
    %48 = vector.broadcast %40 : vector<1x32xf32> to vector<256x32xf32>
    %49 = arith.addf %47, %48 : vector<256x32xf32>
    %cst_5 = arith.constant 0.000000e+00 : f32
    %50 = vector.broadcast %cst_5 : f32 to vector<256x32xf32>
    %51 = arith.maximumf %49, %50 : vector<256x32xf32>
    %c0_6 = arith.constant 0 : index
    %c0_7 = arith.constant 0 : index
    %52 = vector.load %arg4[%c0_6, %c0_7] : memref<32x32xf32, #tpu.memory_space<vmem>>, vector<32x32xf32>
    %cst_8 = arith.constant dense<0.000000e+00> : vector<256x32xf32>
    %53 = tpu.matmul %51, %52, %cst_8 {dimension_numbers = #tpu.dot_dimension_numbers<[1], [0], [0], [1], [0, 0, 1, 1], [], []>} : vector<256x32xf32>, vector<32x32xf32>, vector<256x32xf32> -> vector<256x32xf32>
    %54 = vector.broadcast %41 : vector<1x32xf32> to vector<256x32xf32>
    %55 = arith.addf %53, %54 : vector<256x32xf32>
    %cst_9 = arith.constant 0.000000e+00 : f32
    %56 = vector.broadcast %cst_9 : f32 to vector<256x32xf32>
    %57 = arith.maximumf %55, %56 : vector<256x32xf32>
    %c0_10 = arith.constant 0 : index
    %c0_11 = arith.constant 0 : index
    %58 = vector.load %arg5[%c0_10, %c0_11] : memref<32x32xf32, #tpu.memory_space<vmem>>, vector<32x32xf32>
    %cst_12 = arith.constant dense<0.000000e+00> : vector<256x32xf32>
    %59 = tpu.matmul %57, %58, %cst_12 {dimension_numbers = #tpu.dot_dimension_numbers<[1], [0], [0], [1], [0, 0, 1, 1], [], []>} : vector<256x32xf32>, vector<32x32xf32>, vector<256x32xf32> -> vector<256x32xf32>
    %60 = vector.broadcast %42 : vector<1x32xf32> to vector<256x32xf32>
    %61 = arith.addf %59, %60 : vector<256x32xf32>
    %cst_13 = arith.constant dense<0.000000e+00> : vector<256xf32>
    %62 = vector.multi_reduction <add>, %61, %cst_13 [1] : vector<256x32xf32> to vector<256xf32>
    %63 = vector.shape_cast %62 : vector<256xf32> to vector<256x1xf32>
    %cst_14 = arith.constant 3.200000e+01 : f32
    %64 = vector.broadcast %cst_14 : f32 to vector<256x1xf32>
    %65 = arith.divf %63, %64 : vector<256x1xf32>
    %66 = vector.broadcast %65 : vector<256x1xf32> to vector<256x32xf32>
    %67 = arith.subf %61, %66 : vector<256x32xf32>
    %68 = arith.mulf %67, %67 : vector<256x32xf32>
    %cst_15 = arith.constant dense<0.000000e+00> : vector<256xf32>
    %69 = vector.multi_reduction <add>, %68, %cst_15 [1] : vector<256x32xf32> to vector<256xf32>
    %70 = vector.shape_cast %69 : vector<256xf32> to vector<256x1xf32>
    %cst_16 = arith.constant 3.200000e+01 : f32
    %71 = vector.broadcast %cst_16 : f32 to vector<256x1xf32>
    %72 = arith.divf %70, %71 : vector<256x1xf32>
    %73 = vector.broadcast %65 : vector<256x1xf32> to vector<256x32xf32>
    %74 = arith.subf %61, %73 : vector<256x32xf32>
    %cst_17 = arith.constant 9.99999974E-6 : f32
    %75 = vector.broadcast %cst_17 : f32 to vector<256x1xf32>
    %76 = arith.addf %72, %75 : vector<256x1xf32>
    %77 = math.rsqrt %76 : vector<256x1xf32>
    %78 = vector.broadcast %77 : vector<256x1xf32> to vector<256x32xf32>
    %79 = arith.mulf %74, %78 : vector<256x32xf32>
    %80 = vector.broadcast %43 : vector<1x32xf32> to vector<256x32xf32>
    %81 = arith.mulf %79, %80 : vector<256x32xf32>
    %82 = vector.broadcast %44 : vector<1x32xf32> to vector<256x32xf32>
    %83 = arith.addf %81, %82 : vector<256x32xf32>
    %c0_18 = arith.constant 0 : index
    %c0_19 = arith.constant 0 : index
    %84 = vector.load %arg2[%c0_18, %c0_19] : memref<256x1xf32, #tpu.memory_space<vmem>>, vector<256x1xf32>
    %cst_20 = arith.constant 2.500000e-01 : f32
    %85 = vector.broadcast %cst_20 : f32 to vector<256x1xf32>
    %86 = arith.cmpf olt, %84, %85 : vector<256x1xf32>
    %87 = vector.shape_cast %86 : vector<256x1xi1> to vector<256x1xi1>
    %88 = vector.broadcast %87 : vector<256x1xi1> to vector<256x32xi1>
    %89 = vector.shape_cast %45 : vector<1x32xf32> to vector<1x32xf32>
    %90 = vector.broadcast %89 : vector<1x32xf32> to vector<256x32xf32>
    %91 = arith.select %88, %90, %83 : vector<256x32xi1>, vector<256x32xf32>
    %c0_21 = arith.constant 0 : index
    %c0_22 = arith.constant 0 : index
    %92 = vector.load %arg7[%c0_21, %c0_22] : memref<256x32xf32, #tpu.memory_space<vmem>>, vector<256x32xf32>
    tpu.vector_store %arg7[%c0_21, %c0_22], %91 {strides = array<i32>} : memref<256x32xf32, #tpu.memory_space<vmem>>, vector<256x32xf32>,
    %93 = arith.extui %86 : vector<256x1xi1> to vector<256x1xi32>
    %c0_23 = arith.constant 0 : index
    %c0_24 = arith.constant 0 : index
    %94 = vector.load %arg8[%c0_23, %c0_24] : memref<256x1xi32, #tpu.memory_space<vmem>>, vector<256x1xi32>
    tpu.vector_store %arg8[%c0_23, %c0_24], %93 {strides = array<i32>} : memref<256x1xi32, #tpu.memory_space<vmem>>, vector<256x1xi32>,
    return
  }
  func.func @transform_0(%arg0: i32) -> (i32, i32) {
    %c0_i32 = arith.constant 0 : i32
    %c0_i32_0 = arith.constant 0 : i32
    return %arg0, %c0_i32 : i32, i32
  }
  func.func @transform_1(%arg0: i32) -> (i32, i32) {
    %c0_i32 = arith.constant 0 : i32
    %c0_i32_0 = arith.constant 0 : i32
    return %arg0, %c0_i32 : i32, i32
  }
  func.func @transform_2(%arg0: i32) -> (i32, i32) {
    %c0_i32 = arith.constant 0 : i32
    %c0_i32_0 = arith.constant 0 : i32
    %c0_i32_1 = arith.constant 0 : i32
    return %c0_i32, %c0_i32_0 : i32, i32
  }
  func.func @transform_3(%arg0: i32) -> (i32, i32) {
    %c0_i32 = arith.constant 0 : i32
    %c0_i32_0 = arith.constant 0 : i32
    %c0_i32_1 = arith.constant 0 : i32
    return %c0_i32, %c0_i32_0 : i32, i32
  }
  func.func @transform_4(%arg0: i32) -> (i32, i32) {
    %c0_i32 = arith.constant 0 : i32
    %c0_i32_0 = arith.constant 0 : i32
    %c0_i32_1 = arith.constant 0 : i32
    return %c0_i32, %c0_i32_0 : i32, i32
  }
  func.func @transform_5(%arg0: i32) -> (i32, i32) {
    %c0_i32 = arith.constant 0 : i32
    %c0_i32_0 = arith.constant 0 : i32
    %c0_i32_1 = arith.constant 0 : i32
    return %c0_i32, %c0_i32_0 : i32, i32
  }
  func.func @transform_6(%arg0: i32) -> (i32, i32) {
    %c0_i32 = arith.constant 0 : i32
    %c0_i32_0 = arith.constant 0 : i32
    return %arg0, %c0_i32 : i32, i32
  }
  func.func @transform_7(%arg0: i32) -> (i32, i32) {
    %c0_i32 = arith.constant 0 : i32
    %c0_i32_0 = arith.constant 0 : i32
    return %arg0, %c0_i32 : i32, i32
  }
}

</mosaic_0001>

<bundles_post_ra>
// kernel: tpu_custom_call.1
= control target key start
LH: loop header
LB: loop body
LE: loop exit
PB: predicated region body
PF: predicated region fallthrough
CT: control target
= control target key end

     0   :  { %s4773_s24 = smov 0   ;;  %s11917_s0 = inlined_call_operand.vmem [shape: s32[1024,9], index: 0, kind: input, shape index: {}]   ;;  %s11918_s1 = inlined_call_operand.vmem [shape: f32[1024,1], index: 1, kind: input, shape index: {}]   ;;  %s11919_s2 = inlined_call_operand.vmem [shape: f32[256,32], index: 2, kind: input, shape index: {}]   ;;  %s11920_s3 = inlined_call_operand.vmem [shape: f32[32,32], index: 3, kind: input, shape index: {}]   ;;  %s11921_s4 = inlined_call_operand.vmem [shape: f32[32,32], index: 4, kind: input, shape index: {}]   ;;  %s11922_s5 = inlined_call_operand.vmem [shape: f32[8,128], index: 5, kind: input, shape index: {}]   ;;  %s11923_s6 = inlined_call_operand.vmem [shape: f32[1024,32], index: 6, kind: output, shape index: {0}]   ;;  %s11924_s7 = inlined_call_operand.vmem [shape: s32[1024,1], index: 7, kind: output, shape index: {1}]  }
   0x1 LB: > { %s4387_s25 = sadd.s32 4294967295, %s4720_s24   ;;  %p4391_p0 = scmp.ge.s32.totalorder %s4720_s24, 1  ;;  %s4720_s24 = sphi %s4773_s24, %s18_s24  }
   0x2   : > { %p252_p1 = scmp.lt.s32.totalorder %s4720_s24, 5 }
   0x4   : > { %p253_p2 = pnand %p4391_p0, %p252_p1 }
   0x6   : > { %256 = sbr.rel (%p253_p2) target bundleno = 1978 (0x7ba), region = 44 }
   0xb   : > { %s4392_s26 = sshll.u32 %s4387_s25, 5  ;;  %v11925_v0 = vmov 0   ;;  %v4723_v33 = vmov 1   ;;  %v4724_v58 = vmov 2  }
   0xc   : > { %4551 = vset.pattern.permute.xlu2 %v11925_v0  ;;  %4550 = vset.pattern.permute.xlu1 %v11925_v0  ;;  %p295_p3 = scmp.lt.s32.totalorder %s4392_s26, 127 }
   0xd   : > { %4549 = vset.pattern.permute.xlu0 %v11925_v0 }
   0xe   : > { %s13845_s26 = smov (!%p295_p3, %s4392_s26), 127 }
   0xf   : > { %s4784_s27 = sshll.u32 %s13845_s26, 3 }
  0x10   : > { %s4790_s30 = scalar_lea.vmem %s11917_s0, %s4784_s27  ;;  %s10766_s13 = scalar_lea.vmem %s11918_s1, %s4784_s27 }
  0x11   : > { %v4793_v1 = vld [vmem:[%s4790_s30 + $0x20] sm:$0xff]  ;;  %v4796_v2 = vld [vmem:[%s4790_s30 + $0x10] sm:$0xff]  ;;  %v4805_v4 = vld [vmem:[%s4790_s30 + $0x28] sm:$0xff]  ;;  %s10783_s16 = scalar_lea.vmem %s11924_s7, %s4784_s27  ;;  %s11136_s21 = scalar_lea.vmem %s11923_s6, %s4784_s27 }
  0x12   : > { %v4799_v3 = vld [vmem:[%s4790_s30] sm:$0xff]  ;;  %366 = vperm.xlu2 %4551, %v4793_v1   ;;  %360 = vperm.xlu1 %4550, %v4796_v2   ;;  %v4808_v5 = vld [vmem:[%s4790_s30 + $0x18] sm:$0xff]  ;;  %v4811_v6 = vld [vmem:[%s4790_s30 + $0x8] sm:$0xff] }
  0x13   : > { %354 = vperm.xlu0 %4549, %v4799_v3   ;;  %v4817_v7 = vld [vmem:[%s4790_s30 + $0x40] sm:$0xff]  ;;  %v4820_v8 = vld [vmem:[%s4790_s30 + $0x38] sm:$0xff]  ;;  %v4823_v9 = vld [vmem:[%s4790_s30 + $0x30] sm:$0xff] }
  0x14   : > { %v4829_v10 = vld [vmem:[%s4790_s30 + $0x58] sm:$0xff]  ;;  %v4832_v11 = vld [vmem:[%s4790_s30 + $0x50] sm:$0xff]  ;;  %v4835_v12 = vld [vmem:[%s4790_s30 + $0x48] sm:$0xff] }
  0x15   : > { %v4841_v13 = vld [vmem:[%s4790_s30 + $0x70] sm:$0xff]  ;;  %v4844_v14 = vld [vmem:[%s4790_s30 + $0x68] sm:$0xff]  ;;  %v4847_v15 = vld [vmem:[%s4790_s30 + $0x60] sm:$0xff] }
  0x16   : > { %v4853_v16 = vld [vmem:[%s4790_s30 + $0x88] sm:$0xff]  ;;  %v4856_v17 = vld [vmem:[%s4790_s30 + $0x80] sm:$0xff]  ;;  %v4859_v18 = vld [vmem:[%s4790_s30 + $0x78] sm:$0xff] }
  0x17   : > { %v4865_v19 = vld [vmem:[%s4790_s30 + $0xa0] sm:$0xff]  ;;  %v4868_v20 = vld [vmem:[%s4790_s30 + $0x98] sm:$0xff]  ;;  %v4871_v21 = vld [vmem:[%s4790_s30 + $0x90] sm:$0xff] }
  0x18   : > { %v4877_v22 = vld [vmem:[%s4790_s30 + $0xb8] sm:$0xff]  ;;  %v4880_v23 = vld [vmem:[%s4790_s30 + $0xb0] sm:$0xff]  ;;  %v4883_v24 = vld [vmem:[%s4790_s30 + $0xa8] sm:$0xff] }
  0x19   : > { %v4889_v25 = vld [vmem:[%s4790_s30 + $0xd0] sm:$0xff]  ;;  %v4892_v26 = vld [vmem:[%s4790_s30 + $0xc8] sm:$0xff]  ;;  %v4895_v27 = vld [vmem:[%s4790_s30 + $0xc0] sm:$0xff] }
  0x1a   : > { %369 = vperm.xlu2 %4551, %v4805_v4   ;;  %363 = vperm.xlu1 %4550, %v4808_v5   ;;  %v4901_v28 = vld [vmem:[%s4790_s30 + $0xe8] sm:$0xff]  ;;  %v4904_v29 = vld [vmem:[%s4790_s30 + $0xe0] sm:$0xff]  ;;  %v4907_v30 = vld [vmem:[%s4790_s30 + $0xd8] sm:$0xff] }
  0x1b   : > { %357 = vperm.xlu0 %4549, %v4811_v6   ;;  %v4913_v31 = vld [vmem:[%s4790_s30 + $0xf8] sm:$0xff]  ;;  %v4916_v32 = vld [vmem:[%s4790_s30 + $0xf0] sm:$0xff] }
  0x22   : > { %378 = vperm.xlu2 %4551, %v4817_v7   ;;  %375 = vperm.xlu1 %4550, %v4820_v8  }
  0x23   : > { %372 = vperm.xlu0 %4549, %v4823_v9  }
  0x2a   : > { %387 = vperm.xlu2 %4551, %v4829_v10   ;;  %384 = vperm.xlu1 %4550, %v4832_v11  }
  0x2b   : > { %381 = vperm.xlu0 %4549, %v4835_v12  }
  0x32   : > { %396 = vperm.xlu2 %4551, %v4841_v13   ;;  %393 = vperm.xlu1 %4550, %v4844_v14  }
  0x33   : > { %390 = vperm.xlu0 %4549, %v4847_v15  }
  0x3a   : > { %405 = vperm.xlu2 %4551, %v4853_v16   ;;  %402 = vperm.xlu1 %4550, %v4856_v17  }
  0x3b   : > { %399 = vperm.xlu0 %4549, %v4859_v18  }
  0x42   : > { %414 = vperm.xlu2 %4551, %v4865_v19   ;;  %411 = vperm.xlu1 %4550, %v4868_v20  }
  0x43   : > { %408 = vperm.xlu0 %4549, %v4871_v21  }
  0x4a   : > { %423 = vperm.xlu2 %4551, %v4877_v22   ;;  %420 = vperm.xlu1 %4550, %v4880_v23  }
  0x4b   : > { %417 = vperm.xlu0 %4549, %v4883_v24  }
  0x52   : > { %432 = vperm.xlu2 %4551, %v4889_v25   ;;  %429 = vperm.xlu1 %4550, %v4892_v26  }
  0x53   : > { %426 = vperm.xlu0 %4549, %v4895_v27  }
  0x5a   : > { %441 = vperm.xlu2 %4551, %v4901_v28   ;;  %438 = vperm.xlu1 %4550, %v4904_v29  }
  0x5b   : > { %435 = vperm.xlu0 %4549, %v4907_v30  }
  0x62   : > { %4552 = vset.pattern.permute.xlu2 %v4723_v33  ;;  %447 = vperm.xlu1 %4550, %v4913_v31  }
  0x63   : > { %444 = vperm.xlu0 %4549, %v4916_v32   ;;  %514 = vperm.xlu2 %4552, %v4799_v3  }
  0x6a   : > { %4554 = vset.pattern.permute.xlu1 %v4723_v33 }
  0x6b   : > { %4553 = vset.pattern.permute.xlu0 %v4723_v33  ;;  %520 = vperm.xlu1 %4554, %v4796_v2  }
  0x6c   : > { %523 = vperm.xlu2 %4552, %v4808_v5   ;;  %517 = vperm.xlu0 %4553, %v4811_v6   ;;  %v4924_v34 = vpop.permute.xlu2 %366 }
  0x73   : > { %526 = vperm.xlu1 %4554, %v4793_v1  }
  0x74   : > { %529 = vperm.xlu2 %4552, %v4805_v4   ;;  %532 = vperm.xlu0 %4553, %v4823_v9   ;;  %v4929_v35 = vpop.permute.xlu2 %369 }
  0x7b   : > { %535 = vperm.xlu1 %4554, %v4820_v8  }
  0x7c   : > { %538 = vperm.xlu2 %4552, %v4817_v7   ;;  %541 = vperm.xlu0 %4553, %v4835_v12   ;;  %v4934_v36 = vpop.permute.xlu2 %378 }
  0x7d   : > { %12113 = vst [vmem:[#allocation2_spill] sm:$0xff] %v4934_v36 }
  0x83   : > { %544 = vperm.xlu1 %4554, %v4832_v11  }
  0x84   : > { %547 = vperm.xlu2 %4552, %v4829_v10   ;;  %550 = vperm.xlu0 %4553, %v4847_v15   ;;  %v4939_v37 = vpop.permute.xlu2 %387  ;;  %v4941_v38 = vpop.permute.xlu1 %360 }
  0x85   : > { %12114 = vst [vmem:[#allocation3_spill] sm:$0xff] %v4939_v37  ;;  %v4943_v39 = vpop.permute.xlu0 %354 }
  0x8b   : > { %553 = vperm.xlu1 %4554, %v4844_v14  }
  0x8c   : > { %556 = vperm.xlu2 %4552, %v4841_v13   ;;  %559 = vperm.xlu0 %4553, %v4859_v18   ;;  %v4948_v40 = vpop.permute.xlu2 %396  ;;  %v4950_v41 = vpop.permute.xlu1 %363 }
  0x8d   : > { %12115 = vst [vmem:[#allocation4_spill] sm:$0xff] %v4948_v40  ;;  %v4952_v42 = vpop.permute.xlu0 %357 }
  0x93   : > { %562 = vperm.xlu1 %4554, %v4856_v17  }
  0x94   : > { %565 = vperm.xlu2 %4552, %v4853_v16   ;;  %568 = vperm.xlu0 %4553, %v4871_v21   ;;  %v4957_v43 = vpop.permute.xlu2 %405  ;;  %v4959_v44 = vpop.permute.xlu1 %375 }
  0x95   : > { %12116 = vst [vmem:[#allocation5_spill] sm:$0xff] %v4957_v43  ;;  %v4961_v45 = vpop.permute.xlu0 %372 }
  0x96   : > { %12117 = vst [vmem:[#allocation6_spill] sm:$0xff] %v4959_v44 }
  0x97   : > { %12118 = vst [vmem:[#allocation7_spill] sm:$0xff] %v4961_v45 }
  0x9b   : > { %571 = vperm.xlu1 %4554, %v4868_v20  }
  0x9c   : > { %574 = vperm.xlu2 %4552, %v4865_v19   ;;  %577 = vperm.xlu0 %4553, %v4883_v24   ;;  %v4966_v46 = vpop.permute.xlu2 %414  ;;  %v4968_v47 = vpop.permute.xlu1 %384 }
  0x9d   : > { %12119 = vst [vmem:[#allocation8_spill] sm:$0xff] %v4966_v46  ;;  %v4970_v48 = vpop.permute.xlu0 %381 }
  0x9e   : > { %12120 = vst [vmem:[#allocation9_spill] sm:$0xff] %v4968_v47 }
  0x9f   : > { %12121 = vst [vmem:[#allocation10_spill] sm:$0xff] %v4970_v48 }
  0xa3   : > { %580 = vperm.xlu1 %4554, %v4880_v23  }
  0xa4   : > { %583 = vperm.xlu2 %4552, %v4877_v22   ;;  %586 = vperm.xlu0 %4553, %v4895_v27   ;;  %v4975_v49 = vpop.permute.xlu2 %423  ;;  %v4977_v50 = vpop.permute.xlu1 %393 }
  0xa5   : > { %12122 = vst [vmem:[#allocation11_spill] sm:$0xff] %v4975_v49  ;;  %v4979_v51 = vpop.permute.xlu0 %390 }
  0xa6   : > { %12123 = vst [vmem:[#allocation12_spill] sm:$0xff] %v4977_v50 }
  0xa7   : > { %12124 = vst [vmem:[#allocation13_spill] sm:$0xff] %v4979_v51 }
  0xab   : > { %589 = vperm.xlu1 %4554, %v4892_v26  }
  0xac   : > { %592 = vperm.xlu2 %4552, %v4889_v25   ;;  %595 = vperm.xlu0 %4553, %v4907_v30   ;;  %v4984_v52 = vpop.permute.xlu2 %432  ;;  %v4986_v53 = vpop.permute.xlu1 %402 }
  0xad   : > { %12125 = vst [vmem:[#allocation14_spill] sm:$0xff] %v4984_v52  ;;  %v4988_v54 = vpop.permute.xlu0 %399 }
  0xae   : > { %12126 = vst [vmem:[#allocation15_spill] sm:$0xff] %v4986_v53 }
  0xaf   : > { %12127 = vst [vmem:[#allocation16_spill] sm:$0xff] %v4988_v54 }
  0xb3   : > { %598 = vperm.xlu1 %4554, %v4904_v29  }
  0xb4   : > { %601 = vperm.xlu2 %4552, %v4901_v28   ;;  %604 = vperm.xlu0 %4553, %v4916_v32   ;;  %v4993_v55 = vpop.permute.xlu2 %441  ;;  %v4995_v56 = vpop.permute.xlu1 %411 }
  0xb5   : > { %12128 = vst [vmem:[#allocation17_spill] sm:$0xff] %v4993_v55  ;;  %v4997_v57 = vpop.permute.xlu0 %408 }
  0xb6   : > { %12129 = vst [vmem:[#allocation18_spill] sm:$0xff] %v4995_v56 }
  0xb7   : > { %12130 = vst [vmem:[#allocation19_spill] sm:$0xff] %v4997_v57 }
  0xbb   : > { %607 = vperm.xlu1 %4554, %v4913_v31  }
  0xbc   : > { %4555 = vset.pattern.permute.xlu2 %v4724_v58  ;;  %4556 = vset.pattern.permute.xlu0 %v4724_v58  ;;  %v5000_v59 = vpop.permute.xlu1 %420 }
  0xbd   : > { %12131 = vst [vmem:[#allocation20_spill] sm:$0xff] %v5000_v59  ;;  %738 = vperm.xlu2 %4555, %v4799_v3   ;;  %741 = vperm.xlu0 %4556, %v4811_v6   ;;  %v5004_v60 = vpop.permute.xlu0 %417  ;;  %v5006_v61 = vpop.permute.xlu2 %514 }
  0xbe   : > { %12132 = vst [vmem:[#allocation21_spill] sm:$0xff] %v5004_v60 }
  0xc3   : > { %4557 = vset.pattern.permute.xlu1 %v4724_v58 }
  0xc4   : > { %744 = vperm.xlu1 %4557, %v4796_v2   ;;  %v5009_v62 = vpop.permute.xlu1 %429 }
  0xc5   : > { %12133 = vst [vmem:[#allocation22_spill] sm:$0xff] %v5009_v62  ;;  %747 = vperm.xlu2 %4555, %v4808_v5   ;;  %756 = vperm.xlu0 %4556, %v4823_v9   ;;  %v5013_v63 = vpop.permute.xlu0 %426 }
  0xc6   : > { %12134 = vst [vmem:[#allocation23_spill] sm:$0xff] %v5013_v63  ;;  %v5015_v33 = vpop.permute.xlu2 %523 }
  0xcc   : > { %750 = vperm.xlu1 %4557, %v4793_v1   ;;  %v5018_v0 = vpop.permute.xlu1 %438 }
  0xcd   : > { %12135 = vst [vmem:[#allocation24_spill] sm:$0xff] %v5018_v0  ;;  %753 = vperm.xlu2 %4555, %v4805_v4   ;;  %765 = vperm.xlu0 %4556, %v4835_v12   ;;  %v5022_v58 = vpop.permute.xlu0 %435 }
  0xce   : > { %12136 = vst [vmem:[#allocation25_spill] sm:$0xff] %v5022_v58  ;;  %v5024_v55 = vpop.permute.xlu2 %529 }
  0xd4   : > { %759 = vperm.xlu1 %4557, %v4820_v8   ;;  %v5027_v52 = vpop.permute.xlu1 %447 }
  0xd5   : > { %12137 = vst [vmem:[#allocation26_spill] sm:$0xff] %v5027_v52  ;;  %762 = vperm.xlu2 %4555, %v4817_v7   ;;  %774 = vperm.xlu0 %4556, %v4847_v15   ;;  %v5031_v62 = vpop.permute.xlu0 %444 }
  0xd6   : > { %12138 = vst [vmem:[#allocation27_spill] sm:$0xff] %v5031_v62  ;;  %v5033_v63 = vpop.permute.xlu2 %538 }
  0xd7   : > { %12139 = vst [vmem:[#allocation28_spill] sm:$0xff] %v5033_v63 }
  0xdc   : > { %768 = vperm.xlu1 %4557, %v4832_v11  }
  0xdd   : > { %771 = vperm.xlu2 %4555, %v4829_v10   ;;  %783 = vperm.xlu0 %4556, %v4859_v18   ;;  %v5038_v0 = vpop.permute.xlu1 %520 }
  0xde   : > { %v5040_v58 = vpop.permute.xlu2 %547  ;;  %v5042_v49 = vpop.permute.xlu0 %517 }
  0xdf   : > { %12140 = vst [vmem:[#allocation29_spill] sm:$0xff] %v5040_v58 }
  0xe4   : > { %777 = vperm.xlu1 %4557, %v4844_v14  }
  0xe5   : > { %780 = vperm.xlu2 %4555, %v4841_v13   ;;  %792 = vperm.xlu0 %4556, %v4871_v21   ;;  %v5047_v52 = vpop.permute.xlu1 %526 }
  0xe6   : > { %v5049_v62 = vpop.permute.xlu2 %556  ;;  %v5051_v59 = vpop.permute.xlu0 %532 }
  0xe7   : > { %12141 = vst [vmem:[#allocation30_spill] sm:$0xff] %v5049_v62 }
  0xe8   : > { %12142 = vst [vmem:[#allocation31_spill] sm:$0xff] %v5051_v59 }
  0xec   : > { %786 = vperm.xlu1 %4557, %v4856_v17  }
  0xed   : > { %789 = vperm.xlu2 %4555, %v4853_v16   ;;  %801 = vperm.xlu0 %4556, %v4883_v24   ;;  %v5056_v60 = vpop.permute.xlu1 %535 }
  0xee   : > { %12143 = vst [vmem:[#allocation32_spill] sm:$0xff] %v5056_v60  ;;  %v5058_v56 = vpop.permute.xlu2 %565  ;;  %v5060_v46 = vpop.permute.xlu0 %541 }
  0xef   : > { %12144 = vst [vmem:[#allocation33_spill] sm:$0xff] %v5058_v56 }
  0xf0   : > { %12145 = vst [vmem:[#allocation34_spill] sm:$0xff] %v5060_v46 }
  0xf4   : > { %795 = vperm.xlu1 %4557, %v4868_v20  }
  0xf5   : > { %798 = vperm.xlu2 %4555, %v4865_v19   ;;  %810 = vperm.xlu0 %4556, %v4895_v27   ;;  %v5065_v57 = vpop.permute.xlu1 %544 }
  0xf6   : > { %12146 = vst [vmem:[#allocation35_spill] sm:$0xff] %v5065_v57  ;;  %v5067_v43 = vpop.permute.xlu2 %574  ;;  %v5069_v53 = vpop.permute.xlu0 %550 }
  0xf7   : > { %12147 = vst [vmem:[#allocation36_spill] sm:$0xff] %v5067_v43 }
  0xf8   : > { %12148 = vst [vmem:[#allocation37_spill] sm:$0xff] %v5069_v53 }
  0xfc   : > { %804 = vperm.xlu1 %4557, %v4880_v23  }
  0xfd   : > { %807 = vperm.xlu2 %4555, %v4877_v22   ;;  %819 = vperm.xlu0 %4556, %v4907_v30   ;;  %v5074_v56 = vpop.permute.xlu1 %553 }
  0xfe   : > { %12149 = vst [vmem:[#allocation38_spill] sm:$0xff] %v5074_v56  ;;  %v5076_v54 = vpop.permute.xlu2 %583  ;;  %v5078_v40 = vpop.permute.xlu0 %559  ;;  %v4725_v56 = vmov 3  }
  0xff   : > { %12150 = vst [vmem:[#allocation39_spill] sm:$0xff] %v5076_v54 }
 0x100   : > { %12151 = vst [vmem:[#allocation40_spill] sm:$0xff] %v5078_v40 }
 0x104   : > { %813 = vperm.xlu1 %4557, %v4892_v26  }
 0x105   : > { %816 = vperm.xlu2 %4555, %v4889_v25   ;;  %828 = vperm.xlu0 %4556, %v4916_v32   ;;  %v5083_v43 = vpop.permute.xlu1 %562 }
 0x106   : > { %12152 = vst [vmem:[#allocation41_spill] sm:$0xff] %v5083_v43  ;;  %v5085_v62 = vpop.permute.xlu2 %592  ;;  %v5087_v50 = vpop.permute.xlu0 %568 }
 0x107   : > { %12153 = vst [vmem:[#allocation42_spill] sm:$0xff] %v5085_v62 }
 0x108   : > { %12154 = vst [vmem:[#allocation43_spill] sm:$0xff] %v5087_v50 }
 0x10c   : > { %822 = vperm.xlu1 %4557, %v4904_v29  }
 0x10d   : > { %825 = vperm.xlu2 %4555, %v4901_v28   ;;  %4559 = vset.pattern.permute.xlu0 %v4725_v56  ;;  %v5091_v54 = vpop.permute.xlu1 %571 }
 0x10e   : > { %12155 = vst [vmem:[#allocation44_spill] sm:$0xff] %v5091_v54  ;;  %v5093_v40 = vpop.permute.xlu2 %601  ;;  %965 = vperm.xlu0 %4559, %v4811_v6   ;;  %v5096_v51 = vpop.permute.xlu0 %577 }
 0x10f   : > { %12156 = vst [vmem:[#allocation45_spill] sm:$0xff] %v5093_v40 }
 0x110   : > { %12157 = vst [vmem:[#allocation46_spill] sm:$0xff] %v5096_v51 }
 0x114   : > { %831 = vperm.xlu1 %4557, %v4913_v31  }
 0x115   : > { %4558 = vset.pattern.permute.xlu2 %v4725_v56  ;;  %v5099_v62 = vpop.permute.xlu1 %580 }
 0x116   : > { %12158 = vst [vmem:[#allocation47_spill] sm:$0xff] %v5099_v62  ;;  %962 = vperm.xlu2 %4558, %v4799_v3   ;;  %980 = vperm.xlu0 %4559, %v4823_v9   ;;  %v5103_v50 = vpop.permute.xlu0 %586 }
 0x117   : > { %12159 = vst [vmem:[#allocation48_spill] sm:$0xff] %v5103_v50  ;;  %v5105_v43 = vpop.permute.xlu2 %738 }
 0x11c   : > { %4560 = vset.pattern.permute.xlu1 %v4725_v56 }
 0x11d   : > { %968 = vperm.xlu1 %4560, %v4796_v2   ;;  %v5108_v40 = vpop.permute.xlu1 %589 }
 0x11e   : > { %12160 = vst [vmem:[#allocation49_spill] sm:$0xff] %v5108_v40  ;;  %971 = vperm.xlu2 %4558, %v4808_v5   ;;  %989 = vperm.xlu0 %4559, %v4835_v12   ;;  %v5112_v51 = vpop.permute.xlu0 %595 }
 0x11f   : > { %12161 = vst [vmem:[#allocation50_spill] sm:$0xff] %v5112_v51  ;;  %v5114_v62 = vpop.permute.xlu2 %747 }
 0x125   : > { %974 = vperm.xlu1 %4560, %v4793_v1   ;;  %v5117_v54 = vpop.permute.xlu1 %598 }
 0x126   : > { %12162 = vst [vmem:[#allocation51_spill] sm:$0xff] %v5117_v54  ;;  %977 = vperm.xlu2 %4558, %v4805_v4   ;;  %998 = vperm.xlu0 %4559, %v4847_v15   ;;  %v5121_v56 = vpop.permute.xlu0 %604 }
 0x127   : > { %12163 = vst [vmem:[#allocation52_spill] sm:$0xff] %v5121_v56  ;;  %v5123_v50 = vpop.permute.xlu2 %753 }
 0x12d   : > { %983 = vperm.xlu1 %4560, %v4820_v8   ;;  %v5126_v40 = vpop.permute.xlu1 %607 }
 0x12e   : > { %12164 = vst [vmem:[#allocation53_spill] sm:$0xff] %v5126_v40  ;;  %986 = vperm.xlu2 %4558, %v4817_v7   ;;  %1007 = vperm.xlu0 %4559, %v4859_v18  }
 0x12f   : > { %v5130_v51 = vpop.permute.xlu2 %762  ;;  %v5132_v53 = vpop.permute.xlu0 %741 }
 0x130   : > { %12165 = vst [vmem:[#allocation54_spill] sm:$0xff] %v5130_v51 }
 0x135   : > { %992 = vperm.xlu1 %4560, %v4832_v11  }
 0x136   : > { %995 = vperm.xlu2 %4558, %v4829_v10   ;;  %1016 = vperm.xlu0 %4559, %v4871_v21   ;;  %v5137_v56 = vpop.permute.xlu1 %744 }
 0x137   : > { %v5139_v54 = vpop.permute.xlu2 %771  ;;  %v5141_v37 = vpop.permute.xlu0 %756 }
 0x138   : > { %12166 = vst [vmem:[#allocation55_spill] sm:$0xff] %v5139_v54 }
 0x139   : > { %12167 = vst [vmem:[#allocation56_spill] sm:$0xff] %v5141_v37 }
 0x13d   : > { %1001 = vperm.xlu1 %4560, %v4844_v14  }
 0x13e   : > { %1004 = vperm.xlu2 %4558, %v4841_v13   ;;  %1025 = vperm.xlu0 %4559, %v4883_v24   ;;  %v5146_v40 = vpop.permute.xlu1 %750 }
 0x13f   : > { %v5148_v58 = vpop.permute.xlu2 %780  ;;  %v5150_v47 = vpop.permute.xlu0 %765 }
 0x140   : > { %12168 = vst [vmem:[#allocation57_spill] sm:$0xff] %v5148_v58 }
 0x141   : > { %12169 = vst [vmem:[#allocation58_spill] sm:$0xff] %v5150_v47 }
 0x145   : > { %1010 = vperm.xlu1 %4560, %v4856_v17  }
 0x146   : > { %1013 = vperm.xlu2 %4558, %v4853_v16   ;;  %1034 = vperm.xlu0 %4559, %v4895_v27   ;;  %v5155_v54 = vpop.permute.xlu1 %759 }
 0x147   : > { %12170 = vst [vmem:[#allocation59_spill] sm:$0xff] %v5155_v54  ;;  %v5157_v51 = vpop.permute.xlu2 %789  ;;  %v5159_v57 = vpop.permute.xlu0 %774 }
 0x148   : > { %12171 = vst [vmem:[#allocation60_spill] sm:$0xff] %v5157_v51 }
 0x149   : > { %12172 = vst [vmem:[#allocation61_spill] sm:$0xff] %v5159_v57 }
 0x14d   : > { %1019 = vperm.xlu1 %4560, %v4868_v20  }
 0x14e   : > { %1022 = vperm.xlu2 %4558, %v4865_v19   ;;  %1043 = vperm.xlu0 %4559, %v4907_v30   ;;  %v5164_v58 = vpop.permute.xlu1 %768 }
 0x14f   : > { %12173 = vst [vmem:[#allocation62_spill] sm:$0xff] %v5164_v58  ;;  %v5166_v47 = vpop.permute.xlu2 %798  ;;  %v5168_v46 = vpop.permute.xlu0 %783  ;;  %v4726_v58 = vmov 4  }
 0x150   : > { %12174 = vst [vmem:[#allocation63_spill] sm:$0xff] %v5166_v47 }
 0x151   : > { %12175 = vst [vmem:[#allocation64_spill] sm:$0xff] %v5168_v46 }
 0x155   : > { %1028 = vperm.xlu1 %4560, %v4880_v23  }
 0x156   : > { %1031 = vperm.xlu2 %4558, %v4877_v22   ;;  %1052 = vperm.xlu0 %4559, %v4916_v32   ;;  %v5173_v51 = vpop.permute.xlu1 %777 }
 0x157   : > { %12176 = vst [vmem:[#allocation65_spill] sm:$0xff] %v5173_v51  ;;  %v5175_v57 = vpop.permute.xlu2 %807  ;;  %v5177_v48 = vpop.permute.xlu0 %792 }
 0x158   : > { %12177 = vst [vmem:[#allocation66_spill] sm:$0xff] %v5175_v57 }
 0x159   : > { %12178 = vst [vmem:[#allocation67_spill] sm:$0xff] %v5177_v48 }
 0x15d   : > { %1037 = vperm.xlu1 %4560, %v4892_v26  }
 0x15e   : > { %1040 = vperm.xlu2 %4558, %v4889_v25   ;;  %4562 = vset.pattern.permute.xlu0 %v4726_v58  ;;  %v5181_v47 = vpop.permute.xlu1 %786 }
 0x15f   : > { %12179 = vst [vmem:[#allocation68_spill] sm:$0xff] %v5181_v47  ;;  %v5183_v46 = vpop.permute.xlu2 %816  ;;  %1189 = vperm.xlu0 %4562, %v4811_v6   ;;  %v5186_v36 = vpop.permute.xlu0 %801 }
 0x160   : > { %12180 = vst [vmem:[#allocation69_spill] sm:$0xff] %v5183_v46 }
 0x161   : > { %12181 = vst [vmem:[#allocation70_spill] sm:$0xff] %v5186_v36 }
 0x165   : > { %1046 = vperm.xlu1 %4560, %v4904_v29  }
 0x166   : > { %1049 = vperm.xlu2 %4558, %v4901_v28   ;;  %v5190_v57 = vpop.permute.xlu1 %795 }
 0x167   : > { %12182 = vst [vmem:[#allocation71_spill] sm:$0xff] %v5190_v57  ;;  %v5192_v48 = vpop.permute.xlu2 %825  ;;  %1204 = vperm.xlu0 %4562, %v4823_v9   ;;  %v5195_v51 = vpop.permute.xlu0 %810 }
 0x168   : > { %12183 = vst [vmem:[#allocation72_spill] sm:$0xff] %v5192_v48 }
 0x169   : > { %12184 = vst [vmem:[#allocation73_spill] sm:$0xff] %v5195_v51 }
 0x16d   : > { %1055 = vperm.xlu1 %4560, %v4913_v31  }
 0x16e   : > { %4561 = vset.pattern.permute.xlu2 %v4726_v58  ;;  %v5198_v46 = vpop.permute.xlu1 %804 }
 0x16f   : > { %12185 = vst [vmem:[#allocation74_spill] sm:$0xff] %v5198_v46  ;;  %1186 = vperm.xlu2 %4561, %v4799_v3   ;;  %1213 = vperm.xlu0 %4562, %v4835_v12   ;;  %v5202_v36 = vpop.permute.xlu0 %819 }
 0x170   : > { %12186 = vst [vmem:[#allocation75_spill] sm:$0xff] %v5202_v36  ;;  %v5204_v47 = vpop.permute.xlu2 %962 }
 0x175   : > { %4563 = vset.pattern.permute.xlu1 %v4726_v58 }
 0x176   : > { %1192 = vperm.xlu1 %4563, %v4796_v2   ;;  %v5207_v48 = vpop.permute.xlu1 %813 }
 0x177   : > { %12187 = vst [vmem:[#allocation76_spill] sm:$0xff] %v5207_v48  ;;  %1195 = vperm.xlu2 %4561, %v4808_v5   ;;  %1222 = vperm.xlu0 %4562, %v4847_v15   ;;  %v5211_v51 = vpop.permute.xlu0 %828 }
 0x178   : > { %12188 = vst [vmem:[#allocation77_spill] sm:$0xff] %v5211_v51  ;;  %v5213_v46 = vpop.permute.xlu2 %971 }
 0x17e   : > { %1198 = vperm.xlu1 %4563, %v4793_v1   ;;  %v5216_v57 = vpop.permute.xlu1 %822 }
 0x17f   : > { %12189 = vst [vmem:[#allocation78_spill] sm:$0xff] %v5216_v57  ;;  %1201 = vperm.xlu2 %4561, %v4805_v4   ;;  %1231 = vperm.xlu0 %4562, %v4859_v18  }
 0x180   : > { %v5220_v58 = vpop.permute.xlu2 %977  ;;  %v5222_v36 = vpop.permute.xlu0 %965 }
 0x181   : > { %12190 = vst [vmem:[#allocation79_spill] sm:$0xff] %v5220_v58 }
 0x186   : > { %1207 = vperm.xlu1 %4563, %v4820_v8   ;;  %v5225_v48 = vpop.permute.xlu1 %831 }
 0x187   : > { %12191 = vst [vmem:[#allocation80_spill] sm:$0xff] %v5225_v48  ;;  %1210 = vperm.xlu2 %4561, %v4817_v7   ;;  %1240 = vperm.xlu0 %4562, %v4871_v21  }
 0x188   : > { %v5229_v51 = vpop.permute.xlu2 %986  ;;  %v5231_v63 = vpop.permute.xlu0 %980 }
 0x189   : > { %12192 = vst [vmem:[#allocation81_spill] sm:$0xff] %v5229_v51 }
 0x18a   : > { %12193 = vst [vmem:[#allocation82_spill] sm:$0xff] %v5231_v63 }
 0x18e   : > { %1216 = vperm.xlu1 %4563, %v4832_v11  }
 0x18f   : > { %1219 = vperm.xlu2 %4561, %v4829_v10   ;;  %1249 = vperm.xlu0 %4562, %v4883_v24   ;;  %v5236_v57 = vpop.permute.xlu1 %968 }
 0x190   : > { %v5238_v54 = vpop.permute.xlu2 %995  ;;  %v5240_v44 = vpop.permute.xlu0 %989 }
 0x191   : > { %12194 = vst [vmem:[#allocation83_spill] sm:$0xff] %v5238_v54 }
 0x192   : > { %12195 = vst [vmem:[#allocation84_spill] sm:$0xff] %v5240_v44 }
 0x196   : > { %1225 = vperm.xlu1 %4563, %v4844_v14  }
 0x197   : > { %1228 = vperm.xlu2 %4561, %v4841_v13   ;;  %1258 = vperm.xlu0 %4562, %v4895_v27   ;;  %v5245_v48 = vpop.permute.xlu1 %974 }
 0x198   : > { %12196 = vst [vmem:[#allocation85_spill] sm:$0xff] %v5245_v48  ;;  %v5247_v51 = vpop.permute.xlu2 %1004  ;;  %v5249_v63 = vpop.permute.xlu0 %998 }
 0x199   : > { %12197 = vst [vmem:[#allocation86_spill] sm:$0xff] %v5247_v51 }
 0x19a   : > { %12198 = vst [vmem:[#allocation87_spill] sm:$0xff] %v5249_v63 }
 0x19e   : > { %1234 = vperm.xlu1 %4563, %v4856_v17  }
 0x19f   : > { %1237 = vperm.xlu2 %4561, %v4853_v16   ;;  %1267 = vperm.xlu0 %4562, %v4907_v30   ;;  %v5254_v54 = vpop.permute.xlu1 %983 }
 0x1a0   : > { %12199 = vst [vmem:[#allocation88_spill] sm:$0xff] %v5254_v54  ;;  %v5256_v44 = vpop.permute.xlu2 %1013  ;;  %v5258_v37 = vpop.permute.xlu0 %1007  ;;  %v4727_v54 = vmov 5  }
 0x1a1   : > { %12200 = vst [vmem:[#allocation89_spill] sm:$0xff] %v5256_v44 }
 0x1a2   : > { %12201 = vst [vmem:[#allocation90_spill] sm:$0xff] %v5258_v37 }
 0x1a6   : > { %1243 = vperm.xlu1 %4563, %v4868_v20  }
 0x1a7   : > { %1246 = vperm.xlu2 %4561, %v4865_v19   ;;  %1276 = vperm.xlu0 %4562, %v4916_v32   ;;  %v5263_v51 = vpop.permute.xlu1 %992 }
 0x1a8   : > { %12202 = vst [vmem:[#allocation91_spill] sm:$0xff] %v5263_v51  ;;  %v5265_v63 = vpop.permute.xlu2 %1022  ;;  %v5267_v60 = vpop.permute.xlu0 %1016 }
 0x1a9   : > { %12203 = vst [vmem:[#allocation92_spill] sm:$0xff] %v5265_v63 }
 0x1aa   : > { %12204 = vst [vmem:[#allocation93_spill] sm:$0xff] %v5267_v60 }
 0x1ae   : > { %1252 = vperm.xlu1 %4563, %v4880_v23  }
 0x1af   : > { %1255 = vperm.xlu2 %4561, %v4877_v22   ;;  %4565 = vset.pattern.permute.xlu0 %v4727_v54  ;;  %v5271_v44 = vpop.permute.xlu1 %1001 }
 0x1b0   : > { %12205 = vst [vmem:[#allocation94_spill] sm:$0xff] %v5271_v44  ;;  %v5273_v37 = vpop.permute.xlu2 %1031  ;;  %1413 = vperm.xlu0 %4565, %v4811_v6   ;;  %v5276_v48 = vpop.permute.xlu0 %1025 }
 0x1b1   : > { %12206 = vst [vmem:[#allocation95_spill] sm:$0xff] %v5273_v37 }
 0x1b2   : > { %12207 = vst [vmem:[#allocation96_spill] sm:$0xff] %v5276_v48 }
 0x1b6   : > { %1261 = vperm.xlu1 %4563, %v4892_v26  }
 0x1b7   : > { %1264 = vperm.xlu2 %4561, %v4889_v25   ;;  %v5280_v63 = vpop.permute.xlu1 %1010 }
 0x1b8   : > { %12208 = vst [vmem:[#allocation97_spill] sm:$0xff] %v5280_v63  ;;  %v5282_v60 = vpop.permute.xlu2 %1040  ;;  %1428 = vperm.xlu0 %4565, %v4823_v9   ;;  %v5285_v51 = vpop.permute.xlu0 %1034 }
 0x1b9   : > { %12209 = vst [vmem:[#allocation98_spill] sm:$0xff] %v5282_v60 }
 0x1ba   : > { %12210 = vst [vmem:[#allocation99_spill] sm:$0xff] %v5285_v51 }
 0x1be   : > { %1270 = vperm.xlu1 %4563, %v4904_v29  }
 0x1bf   : > { %1273 = vperm.xlu2 %4561, %v4901_v28   ;;  %v5289_v37 = vpop.permute.xlu1 %1019 }
 0x1c0   : > { %12211 = vst [vmem:[#allocation100_spill] sm:$0xff] %v5289_v37  ;;  %v5291_v44 = vpop.permute.xlu2 %1049  ;;  %1437 = vperm.xlu0 %4565, %v4835_v12   ;;  %v5294_v48 = vpop.permute.xlu0 %1043 }
 0x1c1   : > { %12212 = vst [vmem:[#allocation101_spill] sm:$0xff] %v5291_v44 }
 0x1c2   : > { %12213 = vst [vmem:[#allocation102_spill] sm:$0xff] %v5294_v48 }
 0x1c6   : > { %1279 = vperm.xlu1 %4563, %v4913_v31  }
 0x1c7   : > { %4564 = vset.pattern.permute.xlu2 %v4727_v54  ;;  %v5297_v60 = vpop.permute.xlu1 %1028 }
 0x1c8   : > { %12214 = vst [vmem:[#allocation103_spill] sm:$0xff] %v5297_v60  ;;  %1410 = vperm.xlu2 %4564, %v4799_v3   ;;  %1446 = vperm.xlu0 %4565, %v4847_v15   ;;  %v5301_v51 = vpop.permute.xlu0 %1052 }
 0x1c9   : > { %12215 = vst [vmem:[#allocation104_spill] sm:$0xff] %v5301_v51  ;;  %v5303_v63 = vpop.permute.xlu2 %1186 }
 0x1ce   : > { %4566 = vset.pattern.permute.xlu1 %v4727_v54 }
 0x1cf   : > { %1416 = vperm.xlu1 %4566, %v4796_v2   ;;  %v5306_v44 = vpop.permute.xlu1 %1037 }
 0x1d0   : > { %12216 = vst [vmem:[#allocation105_spill] sm:$0xff] %v5306_v44  ;;  %1419 = vperm.xlu2 %4564, %v4808_v5   ;;  %1455 = vperm.xlu0 %4565, %v4859_v18  }
 0x1d1   : > { %v5310_v48 = vpop.permute.xlu2 %1195  ;;  %v5312_v60 = vpop.permute.xlu0 %1189 }
 0x1d7   : > { %1422 = vperm.xlu1 %4566, %v4793_v1   ;;  %v5315_v37 = vpop.permute.xlu1 %1046 }
 0x1d8   : > { %12217 = vst [vmem:[#allocation106_spill] sm:$0xff] %v5315_v37  ;;  %1425 = vperm.xlu2 %4564, %v4805_v4   ;;  %1464 = vperm.xlu0 %4565, %v4871_v21  }
 0x1d9   : > { %v5319_v54 = vpop.permute.xlu2 %1201  ;;  %v5321_v51 = vpop.permute.xlu0 %1204 }
 0x1da   : > { %12218 = vst [vmem:[#allocation107_spill] sm:$0xff] %v5319_v54 }
 0x1db   : > { %12219 = vst [vmem:[#allocation108_spill] sm:$0xff] %v5321_v51 }
 0x1df   : > { %1431 = vperm.xlu1 %4566, %v4820_v8   ;;  %v5324_v44 = vpop.permute.xlu1 %1055 }
 0x1e0   : > { %12220 = vst [vmem:[#allocation109_spill] sm:$0xff] %v5324_v44  ;;  %1434 = vperm.xlu2 %4564, %v4817_v7   ;;  %1473 = vperm.xlu0 %4565, %v4883_v24  }
 0x1e1   : > { %v5328_v58 = vpop.permute.xlu2 %1210  ;;  %v5330_v45 = vpop.permute.xlu0 %1213 }
 0x1e2   : > { %12221 = vst [vmem:[#allocation110_spill] sm:$0xff] %v5328_v58 }
 0x1e3   : > { %12222 = vst [vmem:[#allocation111_spill] sm:$0xff] %v5330_v45 }
 0x1e7   : > { %1440 = vperm.xlu1 %4566, %v4832_v11  }
 0x1e8   : > { %1443 = vperm.xlu2 %4564, %v4829_v10   ;;  %1482 = vperm.xlu0 %4565, %v4895_v27   ;;  %v5335_v37 = vpop.permute.xlu1 %1192 }
 0x1e9   : > { %v5337_v51 = vpop.permute.xlu2 %1219  ;;  %v5339_v54 = vpop.permute.xlu0 %1222 }
 0x1ea   : > { %12223 = vst [vmem:[#allocation112_spill] sm:$0xff] %v5337_v51 }
 0x1eb   : > { %12224 = vst [vmem:[#allocation113_spill] sm:$0xff] %v5339_v54 }
 0x1ef   : > { %1449 = vperm.xlu1 %4566, %v4844_v14  }
 0x1f0   : > { %1452 = vperm.xlu2 %4564, %v4841_v13   ;;  %1491 = vperm.xlu0 %4565, %v4907_v30   ;;  %v5344_v44 = vpop.permute.xlu1 %1198 }
 0x1f1   : > { %12225 = vst [vmem:[#allocation114_spill] sm:$0xff] %v5344_v44  ;;  %v5346_v45 = vpop.permute.xlu2 %1228  ;;  %v5348_v58 = vpop.permute.xlu0 %1231  ;;  %v12045_v44 = vmov 6  }
 0x1f2   : > { %12226 = vst [vmem:[#allocation115_spill] sm:$0xff] %v5346_v45 }
 0x1f3   : > { %12227 = vst [vmem:[#allocation116_spill] sm:$0xff] %v5348_v58 }
 0x1f7   : > { %1458 = vperm.xlu1 %4566, %v4856_v17  }
 0x1f8   : > { %1461 = vperm.xlu2 %4564, %v4853_v16   ;;  %1500 = vperm.xlu0 %4565, %v4916_v32   ;;  %v5353_v51 = vpop.permute.xlu1 %1207 }
 0x1f9   : > { %12228 = vst [vmem:[#allocation117_spill] sm:$0xff] %v5353_v51  ;;  %v5355_v54 = vpop.permute.xlu2 %1237  ;;  %v5357_v59 = vpop.permute.xlu0 %1240 }
 0x1fa   : > { %12229 = vst [vmem:[#allocation118_spill] sm:$0xff] %v5355_v54 }
 0x1fb   : > { %12230 = vst [vmem:[#allocation119_spill] sm:$0xff] %v5357_v59 }
 0x1ff   : > { %1467 = vperm.xlu1 %4566, %v4868_v20  }
 0x200   : > { %1470 = vperm.xlu2 %4564, %v4865_v19   ;;  %4568 = vset.pattern.permute.xlu0 %v12045_v44  ;;  %v5362_v58 = vpop.permute.xlu1 %1216 }
 0x201   : > { %v5364_v45 = vpop.permute.xlu2 %1246  ;;  %1637 = vperm.xlu0 %4568, %v4811_v6   ;;  %v5367_v32 = vpop.permute.xlu0 %1249 }
 0x202   : > { %12231 = vst [vmem:[#allocation120_spill] sm:$0xff] %v5364_v45 }
 0x203   : > { %12232 = vst [vmem:[#allocation121_spill] sm:$0xff] %v5367_v32 }
 0x207   : > { %1476 = vperm.xlu1 %4566, %v4880_v23  }
 0x208   : > { %1479 = vperm.xlu2 %4564, %v4877_v22   ;;  %v5371_v59 = vpop.permute.xlu1 %1225 }
 0x209   : > { %12233 = vst [vmem:[#allocation122_spill] sm:$0xff] %v5371_v59  ;;  %v5373_v54 = vpop.permute.xlu2 %1255  ;;  %1652 = vperm.xlu0 %4568, %v4823_v9   ;;  %v5376_v51 = vpop.permute.xlu0 %1258 }
 0x20a   : > { %12234 = vst [vmem:[#allocation123_spill] sm:$0xff] %v5373_v54 }
 0x20b   : > { %12235 = vst [vmem:[#allocation124_spill] sm:$0xff] %v5376_v51 }
 0x20f   : > { %1485 = vperm.xlu1 %4566, %v4892_v26  }
 0x210   : > { %1488 = vperm.xlu2 %4564, %v4889_v25   ;;  %v5380_v44 = vpop.permute.xlu1 %1234 }
 0x211   : > { %12236 = vst [vmem:[#allocation125_spill] sm:$0xff] %v5380_v44  ;;  %v5382_v45 = vpop.permute.xlu2 %1264  ;;  %1661 = vperm.xlu0 %4568, %v4835_v12   ;;  %v5385_v32 = vpop.permute.xlu0 %1267  ;;  %v12242_v44 = vmov 6  }
 0x212   : > { %12237 = vst [vmem:[#allocation126_spill] sm:$0xff] %v5382_v45 }
 0x213   : > { %12238 = vst [vmem:[#allocation127_spill] sm:$0xff] %v5385_v32 }
 0x217   : > { %1494 = vperm.xlu1 %4566, %v4904_v29  }
 0x218   : > { %1497 = vperm.xlu2 %4564, %v4901_v28   ;;  %v5389_v54 = vpop.permute.xlu1 %1243 }
 0x219   : > { %12239 = vst [vmem:[#allocation128_spill] sm:$0xff] %v5389_v54  ;;  %v5391_v9 = vpop.permute.xlu2 %1273  ;;  %1670 = vperm.xlu0 %4568, %v4847_v15   ;;  %v5394_v51 = vpop.permute.xlu0 %1276 }
 0x21a   : > { %12240 = vst [vmem:[#allocation129_spill] sm:$0xff] %v5391_v9 }
 0x21b   : > { %12241 = vst [vmem:[#allocation130_spill] sm:$0xff] %v5394_v51 }
 0x21f   : > { %1503 = vperm.xlu1 %4566, %v4913_v31  }
 0x220   : > { %4567 = vset.pattern.permute.xlu2 %v12242_v44  ;;  %v5398_v45 = vpop.permute.xlu1 %1252 }
 0x221   : > { %12243 = vst [vmem:[#allocation131_spill] sm:$0xff] %v5398_v45  ;;  %1634 = vperm.xlu2 %4567, %v4799_v3   ;;  %1679 = vperm.xlu0 %4568, %v4859_v18  }
 0x222   : > { %v5402_v12 = vpop.permute.xlu2 %1410  ;;  %v5404_v28 = vpop.permute.xlu0 %1413 }
 0x227   : > { %4569 = vset.pattern.permute.xlu1 %v12242_v44 }
 0x228   : > { %1640 = vperm.xlu1 %4569, %v4796_v2   ;;  %v5408_v15 = vpop.permute.xlu1 %1261 }
 0x229   : > { %12244 = vst [vmem:[#allocation132_spill] sm:$0xff] %v5408_v15  ;;  %1643 = vperm.xlu2 %4567, %v4808_v5   ;;  %1688 = vperm.xlu0 %4568, %v4871_v21  }
 0x22a   : > { %v5412_v31 = vpop.permute.xlu2 %1419  ;;  %v5414_v51 = vpop.permute.xlu0 %1428 }
 0x230   : > { %1646 = vperm.xlu1 %4569, %v4793_v1   ;;  %v5417_v9 = vpop.permute.xlu1 %1270 }
 0x231   : > { %12245 = vst [vmem:[#allocation133_spill] sm:$0xff] %v5417_v9  ;;  %1649 = vperm.xlu2 %4567, %v4805_v4   ;;  %1697 = vperm.xlu0 %4568, %v4883_v24  }
 0x232   : > { %v5421_v32 = vpop.permute.xlu2 %1425  ;;  %v5423_v45 = vpop.permute.xlu0 %1437 }
 0x238   : > { %1655 = vperm.xlu1 %4569, %v4820_v8   ;;  %v5426_v15 = vpop.permute.xlu1 %1279 }
 0x239   : > { %12246 = vst [vmem:[#allocation134_spill] sm:$0xff] %v5426_v15  ;;  %1658 = vperm.xlu2 %4567, %v4817_v7   ;;  %1706 = vperm.xlu0 %4568, %v4895_v27   ;;  %v12064_v27 = vmov 8  }
 0x23a   : > { %v5430_v54 = vpop.permute.xlu2 %1434  ;;  %v5432_v59 = vpop.permute.xlu0 %1446 }
 0x23b   : > { %12247 = vst [vmem:[#allocation135_spill] sm:$0xff] %v5432_v59 }
 0x240   : > { %1664 = vperm.xlu1 %4569, %v4832_v11  }
 0x241   : > { %1667 = vperm.xlu2 %4567, %v4829_v10   ;;  %1715 = vperm.xlu0 %4568, %v4907_v30   ;;  %v5437_v24 = vpop.permute.xlu1 %1416 }
 0x242   : > { %v5439_v9 = vpop.permute.xlu2 %1443  ;;  %v5441_v8 = vpop.permute.xlu0 %1455 }
 0x243   : > { %12248 = vst [vmem:[#allocation136_spill] sm:$0xff] %v5441_v8 }
 0x248   : > { %1673 = vperm.xlu1 %4569, %v4844_v14  }
 0x249   : > { %1676 = vperm.xlu2 %4567, %v4841_v13   ;;  %4571 = vset.pattern.permute.xlu0 %v12064_v27  ;;  %v5446_v15 = vpop.permute.xlu1 %1422  ;;  %v12068_v13 = vmov 7  }
 0x24a   : > { %v5448_v59 = vpop.permute.xlu2 %1452  ;;  %2082 = vperm.xlu0 %4571, %v4799_v3   ;;  %v5451_v10 = vpop.permute.xlu0 %1464 }
 0x24b   : > { %12249 = vst [vmem:[#allocation137_spill] sm:$0xff] %v5448_v59  ;;  %v12255_v59 = vmov 8  }
 0x24c   : > { %12250 = vst [vmem:[#allocation138_spill] sm:$0xff] %v5451_v10 }
 0x250   : > { %1682 = vperm.xlu1 %4569, %v4856_v17  }
 0x251   : > { %1685 = vperm.xlu2 %4567, %v4853_v16   ;;  %v5455_v30 = vpop.permute.xlu1 %1431 }
 0x252   : > { %v5457_v8 = vpop.permute.xlu2 %1461  ;;  %4574 = vset.pattern.permute.xlu0 %v12068_v13  ;;  %v5460_v27 = vpop.permute.xlu0 %1473 }
 0x253   : > { %12251 = vst [vmem:[#allocation139_spill] sm:$0xff] %v5457_v8  ;;  %1867 = vperm.xlu0 %4574, %v4808_v5   ;;  %v12259_v8 = vmov 7  }
 0x254   : > { %12252 = vst [vmem:[#allocation140_spill] sm:$0xff] %v5460_v27 }
 0x258   : > { %1691 = vperm.xlu1 %4569, %v4868_v20  }
 0x259   : > { %1694 = vperm.xlu2 %4567, %v4865_v19   ;;  %v5465_v10 = vpop.permute.xlu1 %1440 }
 0x25a   : > { %v5467_v17 = vpop.permute.xlu2 %1470  ;;  %v5469_v16 = vpop.permute.xlu0 %1482 }
 0x25b   : > { %12253 = vst [vmem:[#allocation141_spill] sm:$0xff] %v5467_v17  ;;  %4577 = vset.pattern.permute.xlu0 %v12255_v59 }
 0x25c   : > { %12254 = vst [vmem:[#allocation142_spill] sm:$0xff] %v5469_v16  ;;  %2097 = vperm.xlu0 %4577, %v4805_v4  }
 0x260   : > { %1700 = vperm.xlu1 %4569, %v4880_v23  }
 0x261   : > { %1703 = vperm.xlu2 %4567, %v4877_v22   ;;  %v5475_v13 = vpop.permute.xlu1 %1449 }
 0x262   : > { %12256 = vst [vmem:[#allocation143_spill] sm:$0xff] %v5475_v13  ;;  %v5477_v27 = vpop.permute.xlu2 %1479  ;;  %v5479_v20 = vpop.permute.xlu0 %1491  ;;  %v4688_v13 = vld [vmem:[%s4790_s30 + $0x50] sm:$0xff] }
 0x263   : > { %12257 = vst [vmem:[#allocation144_spill] sm:$0xff] %v5477_v27  ;;  %v2461_v27 = vld [vmem:[%s11919_s2 + $0xd8] sm:$0xff] }
 0x264   : > { %12258 = vst [vmem:[#allocation145_spill] sm:$0xff] %v5479_v20  ;;  %4580 = vset.pattern.permute.xlu0 %v12259_v8 }
 0x265   : > { %1882 = vperm.xlu0 %4580, %v4817_v7  }
 0x268   : > { %1709 = vperm.xlu1 %4569, %v4892_v26  }
 0x269   : > { %1712 = vperm.xlu2 %4567, %v4889_v25   ;;  %v5485_v16 = vpop.permute.xlu1 %1458 }
 0x26a   : > { %12260 = vst [vmem:[#allocation146_spill] sm:$0xff] %v5485_v16  ;;  %v5487_v17 = vpop.permute.xlu2 %1488  ;;  %v5489_v23 = vpop.permute.xlu0 %1500  ;;  %v2441_v16 = vld [vmem:[%s11919_s2 + $0x38] sm:$0xff] }
 0x26b   : > { %12261 = vst [vmem:[#allocation147_spill] sm:$0xff] %v5487_v17  ;;  %v4682_v17 = vld [vmem:[%s4790_s30 + $0x20] sm:$0xff] }
 0x26c   : > { %12262 = vst [vmem:[#allocation148_spill] sm:$0xff] %v5489_v23 }
 0x26d   : > { %4583 = vset.pattern.permute.xlu0 %v12255_v59 }
 0x26e   : > { %2112 = vperm.xlu0 %4583, %v4832_v11  }
 0x270   : > { %1718 = vperm.xlu1 %4569, %v4904_v29  }
 0x271   : > { %4570 = vset.pattern.permute.xlu2 %v12259_v8  ;;  %v5495_v20 = vpop.permute.xlu1 %1467 }
 0x272   : > { %12263 = vst [vmem:[#allocation149_spill] sm:$0xff] %v5495_v20  ;;  %1858 = vperm.xlu2 %4570, %v4799_v3   ;;  %v5498_v7 = vpop.permute.xlu2 %1497 }
 0x273   : > { %12264 = vst [vmem:[#allocation150_spill] sm:$0xff] %v5498_v7  ;;  %v5500_v25 = vpop.permute.xlu0 %1637 }
 0x276   : > { %4586 = vset.pattern.permute.xlu0 %v12259_v8 }
 0x277   : > { %1897 = vperm.xlu0 %4586, %v4844_v14  }
 0x278   : > { %4572 = vset.pattern.permute.xlu1 %v12259_v8 }
 0x279   : > { %v5505_v23 = vpop.permute.xlu1 %1476  ;;  %1861 = vperm.xlu1 %4572, %v4811_v6  }
 0x27a   : > { %12265 = vst [vmem:[#allocation151_spill] sm:$0xff] %v5505_v23  ;;  %4573 = vset.pattern.permute.xlu2 %v12255_v59  ;;  %v2460_v23 = vld [vmem:[%s11919_s2 + $0xd0] sm:$0xff] }
 0x27b   : > { %2085 = vperm.xlu2 %4573, %v4811_v6   ;;  %v5510_v11 = vpop.permute.xlu2 %1634  ;;  %v5512_v3 = vpop.permute.xlu0 %1652 }
 0x27f   : > { %4589 = vset.pattern.permute.xlu0 %v12255_v59 }
 0x280   : > { %2127 = vperm.xlu0 %4589, %v4859_v18  }
 0x281   : > { %v5516_v29 = vpop.permute.xlu1 %1485  ;;  %1864 = vperm.xlu1 %4572, %v4796_v2  }
 0x282   : > { %12266 = vst [vmem:[#allocation152_spill] sm:$0xff] %v5516_v29  ;;  %v4683_v29 = vld [vmem:[%s4790_s30 + $0x30] sm:$0xff] }
 0x283   : > { %2088 = vperm.xlu2 %4573, %v4796_v2   ;;  %v5520_v14 = vpop.permute.xlu2 %1643  ;;  %v5522_v7 = vpop.permute.xlu0 %1661  ;;  %v2449_v2 = vld [vmem:[%s11919_s2 + $0x78] sm:$0xff] }
 0x284   : > { %2467 = vmatpush.msra.mxu0 %v2449_v2  ;;  %v2448_v2 = vld [vmem:[%s11919_s2 + $0x70] sm:$0xff] }
 0x286   : > { %2468 = vmatpush.msra.mxu0 %v2448_v2  ;;  %v2446_v2 = vld [vmem:[%s11919_s2 + $0x60] sm:$0xff] }
 0x288   : > { %4592 = vset.pattern.permute.xlu0 %v12259_v8 }
 0x289   : > { %1912 = vperm.xlu0 %4592, %v4871_v21   ;;  %v5526_v6 = vpop.permute.xlu1 %1494  ;;  %4575 = vset.pattern.permute.xlu1 %v12255_v59  ;;  %v2465_v21 = vld [vmem:[%s11919_s2 + $0xf8] sm:$0xff] }
 0x28a   : > { %12267 = vst [vmem:[#allocation153_spill] sm:$0xff] %v5526_v6  ;;  %2091 = vperm.xlu1 %4575, %v4808_v5   ;;  %2580 = vmatpush.msra.mxu1 %v2465_v21  ;;  %v2464_v21 = vld [vmem:[%s11919_s2 + $0xf0] sm:$0xff] }
 0x28b   : > { %4576 = vset.pattern.permute.xlu2 %v12259_v8  ;;  %v5531_v18 = vpop.permute.xlu2 %1649  ;;  %v5540_v6 = vpop.permute.xlu0 %1670 }
 0x28c   : > { %1870 = vperm.xlu2 %4576, %v4793_v1   ;;  %12268 = vst [vmem:[#allocation154_spill] sm:$0xff] %v5540_v6  ;;  %2581 = vmatpush.msra.mxu1 %v2464_v21 }
 0x291   : > { %4595 = vset.pattern.permute.xlu0 %v12255_v59  ;;  %v5543_v5 = vpop.permute.xlu1 %1503 }
 0x292   : > { %12269 = vst [vmem:[#allocation155_spill] sm:$0xff] %v5543_v5  ;;  %2142 = vperm.xlu0 %4595, %v4865_v19   ;;  %2094 = vperm.xlu1 %4575, %v4682_v17   ;;  %v2447_v19 = vld [vmem:[%s11919_s2 + $0x68] sm:$0xff] }
 0x293   : > { %v5547_v1 = vpop.permute.xlu2 %1658  ;;  %v2463_v17 = vld [vmem:[%s11919_s2 + $0xe8] sm:$0xff]  ;;  %2469 = vmatpush.msra.mxu0 %v2447_v19  ;;  %v5569_v21 = vpop.permute.xlu0 %1679  ;;  %v2462_v19 = vld [vmem:[%s11919_s2 + $0xe0] sm:$0xff] }
 0x294   : > { %1873 = vperm.xlu2 %4576, %v4805_v4   ;;  %2582 = vmatpush.msra.mxu1 %v2463_v17  ;;  %12270 = vst [vmem:[#allocation156_spill] sm:$0xff] %v5569_v21  ;;  %v2445_v17 = vld [vmem:[%s11919_s2 + $0x58] sm:$0xff] }
 0x295   : > { %2470 = vmatpush.msra.mxu0 %v2446_v2 }
 0x296   : > { %2583 = vmatpush.msra.mxu1 %v2462_v19  ;;  %v4684_v19 = vld [vmem:[%s4790_s30 + $0x38] sm:$0xff] }
 0x297   : > { %2471 = vmatpush.msra.mxu0 %v2445_v17  ;;  %v2459_v17 = vld [vmem:[%s11919_s2 + $0xc8] sm:$0xff] }
 0x298   : > { %2584 = vmatpush.msra.mxu1 %v2461_v27  ;;  %v2442_v27 = vld [vmem:[%s11919_s2 + $0x40] sm:$0xff] }
 0x29a   : > { %4598 = vset.pattern.permute.xlu0 %v12259_v8  ;;  %v5563_v4 = vpop.permute.xlu1 %1640  ;;  %4578 = vset.pattern.permute.xlu1 %v12259_v8 }
 0x29b   : > { %v5571_v5 = vpop.permute.xlu2 %1667  ;;  %1927 = vperm.xlu0 %4598, %v4877_v22   ;;  %1876 = vperm.xlu1 %4578, %v4683_v29   ;;  %v2444_v22 = vld [vmem:[%s11919_s2 + $0x50] sm:$0xff] }
 0x29c   : > { %4579 = vset.pattern.permute.xlu2 %v12255_v59  ;;  %2472 = vmatpush.msra.mxu0 %v2444_v22  ;;  %v2458_v22 = vld [vmem:[%s11919_s2 + $0xc0] sm:$0xff] }
 0x29d   : > { %2100 = vperm.xlu2 %4579, %v4683_v29   ;;  %2585 = vmatpush.msra.mxu1 %v2460_v23  ;;  %v2443_v29 = vld [vmem:[%s11919_s2 + $0x48] sm:$0xff]  ;;  %v5607_v23 = vpop.permute.xlu0 %1688 }
 0x29e   : > { %12272 = vst [vmem:[#allocation158_spill] sm:$0xff] %v5607_v23  ;;  %2473 = vmatpush.msra.mxu0 %v2443_v29  ;;  %v2440_v29 = vld [vmem:[%s11919_s2 + $0x30] sm:$0xff]  ;;  %v4685_v23 = vld [vmem:[%s4790_s30 + $0x40] sm:$0xff] }
 0x29f   : > { %2586 = vmatpush.msra.mxu1 %v2459_v17 }
 0x2a0   : > { %2474 = vmatpush.msra.mxu0 %v2442_v27  ;;  %v2456_v27 = vld [vmem:[%s11919_s2 + $0xb0] sm:$0xff] }
 0x2a1   : > { %2587 = vmatpush.msra.mxu1 %v2458_v22  ;;  %v2439_v22 = vld [vmem:[%s11919_s2 + $0x28] sm:$0xff] }
 0x2a2   : > { %v5591_v20 = vpop.permute.xlu1 %1646  ;;  %2475 = vmatpush.msra.mxu0 %v2441_v16  ;;  %v4686_v16 = vld [vmem:[%s4790_s30 + $0xe0] sm:$0xff] }
 0x2a3   : > { %v5596_v2 = vpop.permute.xlu2 %1676  ;;  %4601 = vset.pattern.permute.xlu0 %v12255_v59  ;;  %1879 = vperm.xlu1 %4578, %v4684_v19  }
 0x2a4   : > { %12271 = vst [vmem:[#allocation157_spill] sm:$0xff] %v5596_v2  ;;  %2157 = vperm.xlu0 %4601, %v4892_v26   ;;  %v2457_v26 = vld [vmem:[%s11919_s2 + $0xb8] sm:$0xff]  ;;  %2476 = vmatpush.msra.mxu0 %v2440_v29  ;;  %v2455_v29 = vld [vmem:[%s11919_s2 + $0xa8] sm:$0xff] }
 0x2a5   : > { %2103 = vperm.xlu2 %4579, %v4684_v19   ;;  %2588 = vmatpush.msra.mxu1 %v2457_v26  ;;  %v4687_v26 = vld [vmem:[%s4790_s30 + $0x48] sm:$0xff]  ;;  %v5643_v21 = vpop.permute.xlu0 %1697 }
 0x2a6   : > { %12274 = vst [vmem:[#allocation160_spill] sm:$0xff] %v5643_v21  ;;  %2477 = vmatpush.msra.mxu0 %v2439_v22  ;;  %v2453_v21 = vld [vmem:[%s11919_s2 + $0x98] sm:$0xff]  ;;  %v2436_v22 = vld [vmem:[%s11919_s2 + $0x10] sm:$0xff] }
 0x2a7   : > { %2589 = vmatpush.msra.mxu1 %v2456_v27 }
 0x2a9   : > { %2590 = vmatpush.msra.mxu1 %v2455_v29  ;;  %v350_v29 = vlaneseq }
 0x2aa   : > { %v5621_v19 = vpop.permute.xlu1 %1655 }
 0x2ab   : > { %v5623_v17 = vpop.permute.xlu2 %1685  ;;  %4581 = vset.pattern.permute.xlu1 %v12255_v59 }
 0x2ac   : > { %12273 = vst [vmem:[#allocation159_spill] sm:$0xff] %v5623_v17  ;;  %4604 = vset.pattern.permute.xlu0 %v12259_v8  ;;  %2106 = vperm.xlu1 %4581, %v4685_v23   ;;  %v2438_v17 = vld [vmem:[%s11919_s2 + $0x20] sm:$0xff] }
 0x2ad   : > { %4582 = vset.pattern.permute.xlu2 %v12259_v8  ;;  %1942 = vperm.xlu0 %4604, %v4686_v16   ;;  %v2454_v23 = vld [vmem:[%s11919_s2 + $0xa0] sm:$0xff]  ;;  %v2437_v16 = vld [vmem:[%s11919_s2 + $0x18] sm:$0xff] }
 0x2ae   : > { %1885 = vperm.xlu2 %4582, %v4687_v26   ;;  %2478 = vmatpush.msra.mxu0 %v2438_v17  ;;  %v2452_v17 = vld [vmem:[%s11919_s2 + $0x90] sm:$0xff] }
 0x2af   : > { %2591 = vmatpush.msra.mxu1 %v2454_v23  ;;  %v2435_v23 = vld [vmem:[%s11919_s2 + $0x8] sm:$0xff] }
 0x2b0   : > { %2479 = vmatpush.msra.mxu0 %v2437_v16  ;;  %v4689_v16 = vld [vmem:[%s4790_s30 + $0xf0] sm:$0xff] }
 0x2b1   : > { %2592 = vmatpush.msra.mxu1 %v2453_v21  ;;  %v2451_v21 = vld [vmem:[%s11919_s2 + $0x88] sm:$0xff] }
 0x2b2   : > { %v5651_v2 = vpop.permute.xlu1 %1664  ;;  %2480 = vmatpush.msra.mxu0 %v2436_v22 }
 0x2b3   : > { %v5656_v27 = vpop.permute.xlu2 %1694  ;;  %2593 = vmatpush.msra.mxu1 %v2452_v17 }
 0x2b4   : > { %12275 = vst [vmem:[#allocation161_spill] sm:$0xff] %v5656_v27  ;;  %2109 = vperm.xlu1 %4581, %v4687_v26   ;;  %v2434_v26 = vld [vmem:[%s11919_s2] sm:$0xff]  ;;  %v5676_v27 = vpop.permute.xlu0 %1706  ;;  %2481 = vmatpush.msra.mxu0 %v2435_v23  ;;  %v4690_v23 = vld [vmem:[%s4790_s30 + $0x58] sm:$0xff] }
 0x2b5   : > { %4609 = vset.pattern.permute.xlu0 %v12242_v44  ;;  %2594 = vmatpush.msra.mxu1 %v2451_v21 }
 0x2b6   : > { %1888 = vperm.xlu2 %4582, %v4688_v13   ;;  %1724 = vperm.xlu0 %4609, %v4689_v16   ;;  %v2450_v13 = vld [vmem:[%s11919_s2 + $0x80] sm:$0xff]  ;;  %v5681_v16 = vand.u32 127, %v350_v29  ;;  %v4691_v29 = vld [vmem:[%s4790_s30 + $0xf8] sm:$0xff] }
 0x2b7   : > { %2482 = vmatpush.msra.mxu0 %v2434_v26  ;;  %2595 = vmatpush.msra.mxu1 %v2450_v13 }
 0x2b8   : > { %v5689_v17 = vadd.s32 128, %v5681_v16  ;;  %vm609_vm0 = vcmp.eq.s32.totalorder %v5681_v16, %v5006_v61  ;;  %vm449_vm2 = vcmp.eq.s32.totalorder %v5681_v16, %v4943_v39  ;;  %vm833_vm3 = vcmp.eq.s32.totalorder %v5681_v16, %v5105_v43 }
 0x2b9   : > { %vm673_vm5 = vmor %vm449_vm2, %vm609_vm0  ;;  %vm1057_vm8 = vcmp.eq.s32.totalorder %v5681_v16, %v5204_v47  ;;  %vm1281_vm12 = vcmp.eq.s32.totalorder %v5681_v16, %v5303_v63  ;;  %vm1505_vm0 = vcmp.eq.s32.totalorder %v5681_v16, %v5402_v12 }
 0x2ba   : > { %v5683_v22 = vpop.permute.xlu1 %1673  ;;  %vm610_vm1 = vcmp.eq.s32.totalorder %v5689_v17, %v5006_v61  ;;  %vm450_vm4 = vcmp.eq.s32.totalorder %v5689_v17, %v4943_v39  ;;  %vm834_vm6 = vcmp.eq.s32.totalorder %v5689_v17, %v5105_v43  ;;  %vm897_vm9 = vmor %vm673_vm5, %vm833_vm3  ;;  %vm1058_vm10 = vcmp.eq.s32.totalorder %v5689_v17, %v5204_v47  ;;  %v4692_v39 = vld [vmem:[%s4790_s30 + $0x60] sm:$0xff] }
 0x2bb   : > { %v5685_v6 = vpop.permute.xlu2 %1703  ;;  %vm674_vm7 = vmor %vm450_vm4, %vm610_vm1  ;;  %vm1282_vm14 = vcmp.eq.s32.totalorder %v5689_v17, %v5303_v63  ;;  %vm1506_vm2 = vcmp.eq.s32.totalorder %v5689_v17, %v5402_v12  ;;  %v12276_v43 = vmov 0   ;;  %vm1729_vm4 = vcmp.eq.s32.totalorder %v5681_v16, %v5510_v11  ;;  %v4693_v12 = vld [vmem:[%s4790_s30 + $0x68] sm:$0xff] }
 0x2bc   : > { %4584 = vset.pattern.permute.xlu1 %v12259_v8  ;;  %v5711_v61 = vpop.permute.xlu0 %1715  ;;  %vm898_vm11 = vmor %vm674_vm7, %vm834_vm6  ;;  %vm1730_vm5 = vcmp.eq.s32.totalorder %v5689_v17, %v5510_v11  ;;  %v4694_v11 = vld [vmem:[%s4790_s30 + $0x70] sm:$0xff] }
 0x2bd   : > { %1891 = vperm.xlu1 %4584, %v4690_v23   ;;  %vm1121_vm13 = vmor %vm897_vm9, %vm1057_vm8 }
 0x2be   : > { %4585 = vset.pattern.permute.xlu2 %v12255_v59  ;;  %4612 = vset.pattern.permute.xlu0 %v12255_v59  ;;  %vm1122_vm15 = vmor %vm898_vm11, %vm1058_vm10 }
 0x2bf   : > { %2115 = vperm.xlu2 %4585, %v4690_v23   ;;  %2175 = vperm.xlu0 %4612, %v4691_v29   ;;  %vm1345_vm1 = vmor %vm1121_vm13, %vm1281_vm12  ;;  %v4731_v23 = vmov 0.0  }
 0x2c0   : > { %vm1346_vm3 = vmor %vm1122_vm15, %vm1282_vm14 }
 0x2c1   : > { %vm1569_vm6 = vmor %vm1345_vm1, %vm1505_vm0 }
 0x2c2   : > { %v5707_v21 = vpop.permute.xlu1 %1682  ;;  %vm1570_vm7 = vmor %vm1346_vm3, %vm1506_vm2  ;;  %vm615_vm2 = vcmp.eq.s32.totalorder %v5681_v16, %v5015_v33  ;;  %vm616_vm3 = vcmp.eq.s32.totalorder %v5689_v17, %v5015_v33  ;;  %v12279_v33 = vmov 0 }
 0x2c3   : > { %v5713_v26 = vpop.permute.xlu2 %1712  ;;  %vm1793_vm9 = vmor %vm1569_vm6, %vm1729_vm4  ;;  %vm455_vm4 = vcmp.eq.s32.totalorder %v5681_v16, %v4950_v41  ;;  %vm456_vm6 = vcmp.eq.s32.totalorder %v5689_v17, %v4950_v41  ;;  %v12281_v41 = vmov 0 }
 0x2c4   : > { %v2083_v63 = vpop.permute.xlu0 %2082  ;;  %vm1794_vm11 = vmor %vm1570_vm7, %vm1730_vm5  ;;  %vm613_vm5 = vcmp.eq.s32.totalorder %v5681_v16, %v5038_v0 }
 0x2c5   : > { %1894 = vperm.xlu1 %4584, %v4692_v39   ;;  %vm2177_vm8 = vcmp.eq.s32.totalorder %v5681_v16, %v2083_v63  ;;  %vm2178_vm13 = vcmp.eq.s32.totalorder %v5689_v17, %v2083_v63  ;;  %vm5755_vm7 = vmor %vm455_vm4, %vm615_vm2  ;;  %vm457_vm4 = vcmp.eq.s32.totalorder %v5681_v16, %v4924_v34  ;;  %v12315_v63 = vmov 0 }
 0x2c7   : > { %2118 = vperm.xlu2 %4585, %v4692_v39   ;;  %4614 = vset.pattern.permute.xlu0 %v12276_v43 }
 0x2ca   : > { %v5731_v47 = vpop.permute.xlu1 %1691 }
 0x2cc   : > { %v1859_v13 = vpop.permute.xlu2 %1858 }
 0x2cd   : > { %vm1953_vm10 = vcmp.eq.s32.totalorder %v5681_v16, %v1859_v13  ;;  %vm1954_vm12 = vcmp.eq.s32.totalorder %v5689_v17, %v1859_v13  ;;  %4587 = vset.pattern.permute.xlu1 %v12255_v59 }
 0x2ce   : > { %vm2017_vm14 = vmor %vm1793_vm9, %vm1953_vm10  ;;  %2121 = vperm.xlu1 %4587, %v4693_v12   ;;  %vm453_vm9 = vcmp.eq.s32.totalorder %v5681_v16, %v4941_v38  ;;  %v12285_v12 = vmov 0 }
 0x2cf   : > { %4588 = vset.pattern.permute.xlu2 %v12259_v8  ;;  %vm2241_vm15 = vmor %vm2017_vm14, %vm2177_vm8  ;;  %vm614_vm8 = vcmp.eq.s32.totalorder %v5689_v17, %v5038_v0  ;;  %v4695_v0 = vld [vmem:[%s4790_s30 + $0x78] sm:$0xff] }
 0x2d0   : > { %1900 = vperm.xlu2 %4588, %v4694_v11   ;;  %v4400_v29 = vsel %vm2241_vm15, 1.0, %v4731_v23  ;;  %vm2018_vm0 = vmor %vm1794_vm11, %vm1954_vm12  ;;  %vm611_vm11 = vcmp.eq.s32.totalorder %v5681_v16, %v5042_v49  ;;  %vm454_vm12 = vcmp.eq.s32.totalorder %v5689_v17, %v4941_v38  ;;  %vm612_vm15 = vcmp.eq.s32.totalorder %v5689_v17, %v5042_v49 }
 0x2d1   : > { %2483 = vmatmul.f32.vlgmr.msra.gmra.mxu0 %v4400_v29  ;;  %vm2242_vm1 = vmor %vm2018_vm0, %vm2178_vm13  ;;  %vm619_vm13 = vcmp.eq.s32.totalorder %v5681_v16, %v5024_v55  ;;  %vm459_vm0 = vcmp.eq.s32.totalorder %v5681_v16, %v4929_v35  ;;  %v12283_v38 = vmov 0  ;;  %v12290_v29 = vmov 0 }
 0x2d2   : > { %v4401_v39 = vsel %vm2242_vm1, 1.0, %v4731_v23  ;;  %v5743_v13 = vpop.permute.xlu1 %1700  ;;  %vm5763_vm10 = vmor %vm456_vm6, %vm616_vm3  ;;  %vm451_vm1 = vcmp.eq.s32.totalorder %v5681_v16, %v4952_v42  ;;  %vm836_vm3 = vcmp.eq.s32.totalorder %v5689_v17, %v5132_v53  ;;  %v12293_v49 = vmov 0 }
 0x2d3   : > { %2596 = vmatmul.f32.vlgmr.msra.gmra.mxu1 %v4401_v39  ;;  %v12280_v33 = vsel %vm5763_vm10, 4294967295, %v12279_v33  ;;  %vm5773_vm14 = vmor %vm453_vm9, %vm613_vm5  ;;  %vm452_vm5 = vcmp.eq.s32.totalorder %v5689_v17, %v4952_v42  ;;  %v12287_v42 = vmov 0  ;;  %vm12295_vm10 = vcmp.eq.s32.totalorder %v5689_v17, %v5024_v55  ;;  %v4696_v39 = vld [vmem:[%s4790_s30 + $0x80] sm:$0xff] }
 0x2d4   : > { %v12282_v41 = vsel %vm5773_vm14, 4294967295, %v12281_v41  ;;  %vm5784_vm2 = vmor %vm454_vm12, %vm614_vm8  ;;  %vm618_vm8 = vcmp.eq.s32.totalorder %v5689_v17, %v5047_v52  ;;  %vm835_vm12 = vcmp.eq.s32.totalorder %v5681_v16, %v5132_v53  ;;  %vm460_vm14 = vcmp.eq.s32.totalorder %v5689_v17, %v4929_v35 }
 0x2d5   : > { %v12284_v38 = vsel %vm5784_vm2, 4294967295, %v12283_v38  ;;  %vm5799_vm9 = vmor %vm451_vm1, %vm611_vm11  ;;  %vm840_vm1 = vcmp.eq.s32.totalorder %v5689_v17, %v5114_v62  ;;  %vm458_vm2 = vcmp.eq.s32.totalorder %v5689_v17, %v4924_v34  ;;  %v12296_v34 = vmov 0 }
 0x2d6   : > { %2124 = vperm.xlu1 %4587, %v4694_v11   ;;  %v12286_v12 = vsel %vm5799_vm9, 4294967295, %v12285_v12  ;;  %vm5814_vm6 = vmor %vm459_vm0, %vm619_vm13  ;;  %vm12289_vm13 = vcmp.eq.s32.totalorder %v5681_v16, %v5047_v52  ;;  %v12298_v35 = vmov 0  ;;  %v12304_v53 = vmov 0  ;;  %v4697_v52 = vld [vmem:[%s4790_s30 + $0x88] sm:$0xff] }
 0x2d7   : > { %v12288_v42 = vsel %vm5814_vm6, 4294967295, %v12287_v42  ;;  %vm676_vm11 = vmor %vm452_vm5, %vm612_vm15  ;;  %vm12292_vm15 = vcmp.eq.s32.totalorder %v5681_v16, %v5114_v62  ;;  %vm837_vm6 = vcmp.eq.s32.totalorder %v5681_v16, %v5137_v56  ;;  %v12356_v55 = vmov 0  ;;  %v12359_v62 = vld [vmem:[#allocation79_spill] sm:$0xff] }
 0x2d8   : > { %1903 = vperm.xlu2 %4588, %v4695_v0   ;;  %vm5832_vm0 = vmor %vm457_vm4, %vm12289_vm13  ;;  %vm12300_vm13 = vnez %v12286_v12  ;;  %v12336_v12 = vmov 0 }
 0x2d9   : > { %v12291_v29 = vsel %vm5832_vm0, 4294967295, %v12290_v29  ;;  %vm5841_vm5 = vmor %vm5755_vm7, %vm12292_vm15  ;;  %vm838_vm15 = vcmp.eq.s32.totalorder %v5689_v17, %v5137_v56  ;;  %vm12303_vm0 = vnez %v12280_v33  ;;  %v12363_v56 = vld [vmem:[#allocation85_spill] sm:$0xff] }
 0x2da   : > { %v5807_v11 = vpop.permute.xlu1 %1709  ;;  %v12294_v49 = vsel %vm5841_vm5, 4294967295, %v12293_v49  ;;  %vm5850_vm9 = vmor %vm460_vm14, %vm12295_vm10  ;;  %vm1063_vm14 = vcmp.eq.s32.totalorder %v5681_v16, %v5213_v46 }
 0x2db   : > { %v12297_v34 = vsel %vm5850_vm9, 4294967295, %v12296_v34  ;;  %vm5854_vm4 = vmor %vm458_vm2, %vm618_vm8  ;;  %vm12308_vm2 = vnez %v12282_v41  ;;  %v12319_v41 = vmov 0 }
 0x2dc   : > { %v12299_v35 = vsel %vm5854_vm4, 4294967295, %v12298_v35  ;;  %vm5860_vm7 = vmor %vm12300_vm13, %vm835_vm12  ;;  %vm1059_vm12 = vcmp.eq.s32.totalorder %v5681_v16, %v5222_v36  ;;  %vm1064_vm4 = vcmp.eq.s32.totalorder %v5689_v17, %v5213_v46  ;;  %v2086_v46 = vpop.permute.xlu2 %2085 }
 0x2dd   : > { %vm5868_vm5 = vmor %vm12303_vm0, %vm840_vm1  ;;  %vm12311_vm1 = vnez %v12284_v38  ;;  %vm12314_vm0 = vnez %v12294_v49  ;;  %v12333_v38 = vmov 0  ;;  %v12398_v49 = vmov 0 }
 0x2de   : > { %v12305_v53 = vsel %vm5868_vm5, 4294967295, %v12304_v53  ;;  %vm5872_vm10 = vmor %vm676_vm11, %vm836_vm3  ;;  %4590 = vset.pattern.permute.xlu1 %v12259_v8  ;;  %vm1060_vm11 = vcmp.eq.s32.totalorder %v5689_v17, %v5222_v36  ;;  %v12317_v36 = vmov 0  ;;  %vm1062_vm5 = vcmp.eq.s32.totalorder %v5689_v17, %v5236_v57 }
 0x2df   : > { %vm5880_vm8 = vmor %vm12308_vm2, %vm837_vm6  ;;  %1906 = vperm.xlu1 %4590, %v4696_v39   ;;  %vm843_vm6 = vcmp.eq.s32.totalorder %v5681_v16, %v5123_v50  ;;  %vm841_vm2 = vcmp.eq.s32.totalorder %v5681_v16, %v5146_v40 }
 0x2e0   : > { %vm5889_vm3 = vmor %vm12311_vm1, %vm838_vm15  ;;  %4591 = vset.pattern.permute.xlu2 %v12255_v59  ;;  %vm1061_vm15 = vcmp.eq.s32.totalorder %v5681_v16, %v5236_v57  ;;  %v12322_v57 = vmov 0 }
 0x2e1   : > { %vm5901_vm13 = vmor %vm12314_vm0, %vm1063_vm14  ;;  %2130 = vperm.xlu2 %4591, %v4696_v39   ;;  %vm844_vm14 = vcmp.eq.s32.totalorder %v5689_v17, %v5123_v50  ;;  %vm842_vm0 = vcmp.eq.s32.totalorder %v5689_v17, %v5146_v40  ;;  %v12327_v50 = vmov 0  ;;  %v12427_v40 = vld [vmem:[#allocation2_spill] sm:$0xff] }
 0x2e2   : > { %v12316_v63 = vsel %vm5901_vm13, 4294967295, %v12315_v63  ;;  %vm5911_vm1 = vmor %vm5860_vm7, %vm1059_vm12  ;;  %v5917_v33 = vpop.permute.xlu1 %1718  ;;  %vm1283_vm7 = vcmp.eq.s32.totalorder %v5681_v16, %v5312_v60  ;;  %vm12321_vm12 = vnez %v12288_v42  ;;  %v4698_v42 = vld [vmem:[%s4790_s30 + $0x90] sm:$0xff] }
 0x2e3   : > { %v12318_v36 = vsel %vm5911_vm1, 4294967295, %v12317_v36  ;;  %vm5925_vm13 = vmor %vm5872_vm10, %vm1060_vm11  ;;  %vm1284_vm10 = vcmp.eq.s32.totalorder %v5689_v17, %v5312_v60  ;;  %vm12326_vm11 = vnez %v12291_v29  ;;  %v12331_v60 = vld [vmem:[#allocation31_spill] sm:$0xff]  ;;  %v12342_v29 = vmov 0 }
 0x2e4   : > { %v12320_v41 = vsel %vm5925_vm13, 4294967295, %v12319_v41  ;;  %vm5933_vm1 = vmor %vm12321_vm12, %vm843_vm6  ;;  %vm12332_vm12 = vnez %v12297_v34  ;;  %v12347_v34 = vld [vmem:[#allocation7_spill] sm:$0xff]  ;;  %v2089_v0 = vpop.permute.xlu2 %2088 }
 0x2e5   : > { %v12323_v57 = vsel %vm5933_vm1, 4294967295, %v12322_v57  ;;  %vm5941_vm9 = vmor %vm5880_vm8, %vm1061_vm15  ;;  %vm1287_vm8 = vcmp.eq.s32.totalorder %v5681_v16, %v5310_v48  ;;  %vm1285_vm15 = vcmp.eq.s32.totalorder %v5681_v16, %v5335_v37 }
 0x2e6   : > { %vm5949_vm13 = vmor %vm12326_vm11, %vm841_vm2  ;;  %vm1286_vm2 = vcmp.eq.s32.totalorder %v5689_v17, %v5335_v37  ;;  %v12349_v37 = vmov 0 }
 0x2e7   : > { %v12328_v50 = vsel %vm5949_vm13, 4294967295, %v12327_v50  ;;  %vm5955_vm6 = vmor %vm5889_vm3, %vm1062_vm5  ;;  %vm12335_vm5 = vnez %v12299_v35  ;;  %vm12338_vm13 = vnez %v12318_v36  ;;  %v12351_v35 = vmov 0  ;;  %1909 = vperm.xlu1 %4590, %v4697_v52   ;;  %v12369_v36 = vld [vmem:[#allocation32_spill] sm:$0xff] }
 0x2e8   : > { %vm5967_vm11 = vmor %vm12332_vm12, %vm844_vm14  ;;  %vm12341_vm12 = vnez %v12305_v53  ;;  %vm622_vm14 = vcmp.eq.s32.totalorder %v5689_v17, %v12331_v60  ;;  %v12354_v53 = vmov 0 }
 0x2e9   : > { %v12334_v38 = vsel %vm5967_vm11, 4294967295, %v12333_v38  ;;  %vm5973_vm3 = vmor %vm12335_vm5, %vm842_vm0  ;;  %vm12344_vm0 = vnez %v12320_v41  ;;  %2133 = vperm.xlu2 %4591, %v4697_v52  }
 0x2ea   : > { %v12337_v12 = vsel %vm5973_vm3, 4294967295, %v12336_v12  ;;  %vm5979_vm1 = vmor %vm12338_vm13, %vm1283_vm7  ;;  %vm461_vm7 = vcmp.eq.s32.totalorder %v5681_v16, %v12347_v34  ;;  %vm12353_vm13 = vcmp.eq.s32.totalorder %v5681_v16, %v12331_v60 }
 0x2eb   : > { %vm5989_vm11 = vmor %vm12341_vm12, %vm1064_vm4  ;;  %vm12348_vm4 = vnez %v12316_v63  ;;  %v1862_v39 = vpop.permute.xlu1 %1861 }
 0x2ec   : > { %v12343_v29 = vsel %vm5989_vm11, 4294967295, %v12342_v29  ;;  %vm5995_vm5 = vmor %vm12344_vm0, %vm1284_vm10  ;;  %vm1731_vm0 = vcmp.eq.s32.totalorder %v5681_v16, %v5500_v25  ;;  %vm1955_vm3 = vcmp.eq.s32.totalorder %v5681_v16, %v1862_v39  ;;  %v6259_v41 = vpop.permute.xlu2 %1870 }
 0x2ed   : > { %vm6007_vm12 = vmor %vm12348_vm4, %vm1287_vm8 }
 0x2ee   : > { %v12350_v37 = vsel %vm6007_vm12, 4294967295, %v12349_v37  ;;  %vm6013_vm10 = vmor %vm5941_vm9, %vm1285_vm15  ;;  %vm1732_vm9 = vcmp.eq.s32.totalorder %v5689_v17, %v5500_v25  ;;  %vm12358_vm15 = vcmp.eq.s32.totalorder %v5681_v16, %v5404_v28  ;;  %v12476_v25 = vmov 0 }
 0x2ef   : > { %v12352_v35 = vsel %vm6013_vm10, 4294967295, %v12351_v35  ;;  %vm6023_vm11 = vmor %vm461_vm7, %vm12353_vm13  ;;  %vm462_vm13 = vcmp.eq.s32.totalorder %v5689_v17, %v12347_v34  ;;  %vm1067_vm7 = vcmp.eq.s32.totalorder %v5681_v16, %v12359_v62  ;;  %4593 = vset.pattern.permute.xlu1 %v12255_v59  ;;  %v4699_v34 = vld [vmem:[%s4790_s30 + $0x98] sm:$0xff] }
 0x2f0   : > { %v12355_v53 = vsel %vm6023_vm11, 4294967295, %v12354_v53  ;;  %vm6029_vm8 = vmor %vm5955_vm6, %vm1286_vm2  ;;  %vm12360_vm6 = vcmp.eq.s32.totalorder %v5689_v17, %v5404_v28  ;;  %vm1065_vm11 = vcmp.eq.s32.totalorder %v5681_v16, %v12363_v56  ;;  %2136 = vperm.xlu1 %4593, %v4698_v42   ;;  %v12418_v28 = vld [vmem:[#allocation82_spill] sm:$0xff] }
 0x2f1   : > { %v12357_v55 = vsel %vm6029_vm8, 4294967295, %v12356_v55  ;;  %vm1571_vm4 = vmor %vm5979_vm1, %vm12358_vm15  ;;  %vm2179_vm15 = vcmp.eq.s32.totalorder %v5681_v16, %v2086_v46  ;;  %4594 = vset.pattern.permute.xlu2 %v12259_v8  ;;  %v12453_v42 = vld [vmem:[#allocation10_spill] sm:$0xff] }
 0x2f2   : > { %vm1572_vm2 = vmor %vm5995_vm5, %vm12360_vm6  ;;  %1915 = vperm.xlu2 %4594, %v4699_v34  }
 0x2f3   : > { %vm6049_vm8 = vmor %vm462_vm13, %vm622_vm14  ;;  %vm12366_vm13 = vnez %v12323_v57  ;;  %v12373_v57 = vld [vmem:[#allocation56_spill] sm:$0xff]  ;;  %v1865_v52 = vpop.permute.xlu1 %1864 }
 0x2f4   : > { %vm1795_vm1 = vmor %vm1571_vm4, %vm1731_vm0  ;;  %vm1288_vm0 = vcmp.eq.s32.totalorder %v5689_v17, %v5310_v48  ;;  %v12389_v48 = vmov 0 }
 0x2f5   : > { %vm6061_vm5 = vmor %vm1572_vm2, %vm1732_vm9  ;;  %vm12370_vm2 = vnez %v12328_v50  ;;  %vm12375_vm9 = vnez %v12334_v38  ;;  %v12380_v50 = vmov 0  ;;  %v12383_v38 = vld [vmem:[#allocation6_spill] sm:$0xff] }
 0x2f6   : > { %vm6068_vm6 = vmor %vm12366_vm13, %vm1067_vm7  ;;  %vm1509_vm13 = vcmp.eq.s32.totalorder %v5681_v16, %v5437_v24 }
 0x2f7   : > { %vm2019_vm4 = vmor %vm1795_vm1, %vm1955_vm3  ;;  %vm12374_vm1 = vcmp.eq.s32.totalorder %v5689_v17, %v12359_v62  ;;  %v12414_v62 = vld [vmem:[#allocation59_spill] sm:$0xff] }
 0x2f8   : > { %vm6079_vm12 = vmor %vm12370_vm2, %vm1065_vm11  ;;  %vm12378_vm11 = vcmp.eq.s32.totalorder %v5689_v17, %v12363_v56  ;;  %vm12379_vm2 = vnez %v12337_v12  ;;  %v12385_v12 = vmov 0  ;;  %2139 = vperm.xlu1 %4593, %v4699_v34   ;;  %v12458_v34 = vld [vmem:[#allocation88_spill] sm:$0xff] }
 0x2f9   : > { %vm2243_vm14 = vmor %vm2019_vm4, %vm2179_vm15  ;;  %vm12382_vm4 = vcmp.eq.s32.totalorder %v5689_v17, %v1862_v39  ;;  %v12417_v39 = vld [vmem:[#allocation28_spill] sm:$0xff] }
 0x2fa   : > { %vm6094_vm10 = vmor %vm12375_vm9, %vm12374_vm1  ;;  %v4402_v60 = vsel %vm2243_vm14, 1.0, %v4731_v23  ;;  %vm463_vm1 = vcmp.eq.s32.totalorder %v5681_v16, %v12383_v38  ;;  %vm12397_vm14 = vnez %v12355_v53  ;;  %v12410_v53 = vld [vmem:[#allocation114_spill] sm:$0xff] }
 0x2fb   : > { %vm6103_vm7 = vmor %vm12379_vm2, %vm12378_vm11  ;;  %vm12384_vm2 = vnez %v12343_v29  ;;  %2486 = vmatmul.f32.gmra.mxu0 %v4402_v60  ;;  %vm12388_vm11 = vcmp.eq.s32.totalorder %v5681_v16, %v12369_v36  ;;  %v12394_v29 = vmov 0  ;;  %v12437_v60 = vmov 0 }
 0x2fc   : > { %v12381_v50 = vsel %vm6103_vm7, 4294967295, %v12380_v50  ;;  %vm2020_vm9 = vmor %vm6061_vm5, %vm12382_vm4  ;;  %vm12387_vm5 = vcmp.eq.s32.totalorder %v5689_v17, %v2086_v46 }
 0x2fd   : > { %vm6123_vm15 = vmor %vm12384_vm2, %vm1288_vm0  ;;  %vm464_vm2 = vcmp.eq.s32.totalorder %v5689_v17, %v12383_v38  ;;  %v12441_v38 = vmov 0 }
 0x2fe   : > { %v12386_v12 = vsel %vm6123_vm15, 4294967295, %v12385_v12  ;;  %vm2244_vm4 = vmor %vm2020_vm9, %vm12387_vm5  ;;  %vm12391_vm9 = vnez %v12352_v35  ;;  %vm12393_vm5 = vnez %v12350_v37  ;;  %v12403_v37 = vmov 0  ;;  %v12405_v35 = vld [vmem:[#allocation107_spill] sm:$0xff] }
 0x2ff   : > { %vm6135_vm3 = vmor %vm463_vm1, %vm12388_vm11  ;;  %v4403_v46 = vsel %vm2244_vm4, 1.0, %v4731_v23  ;;  %vm12392_vm11 = vcmp.eq.s32.totalorder %v5681_v16, %v5412_v31  ;;  %vm12396_vm4 = vcmp.eq.s32.totalorder %v5681_v16, %v12373_v57  ;;  %vm12407_vm15 = vcmp.eq.s32.totalorder %v5689_v17, %v12373_v57 }
 0x300   : > { %v12390_v48 = vsel %vm6135_vm3, 4294967295, %v12389_v48  ;;  %vm1573_vm1 = vmor %vm12391_vm9, %vm1509_vm13  ;;  %2599 = vmatmul.f32.gmra.mxu1 %v4403_v46  ;;  %vm12400_vm13 = vcmp.eq.s32.totalorder %v5689_v17, %v5437_v24  ;;  %vm12401_vm9 = vnez %v12357_v55  ;;  %v12408_v24 = vmov 0  ;;  %v12454_v46 = vld [vmem:[#allocation34_spill] sm:$0xff]  ;;  %4596 = vset.pattern.permute.xlu1 %v12259_v8 }
 0x301   : > { %vm6156_vm0 = vmor %vm12393_vm5, %vm12392_vm11  ;;  %vm12402_vm5 = vcmp.eq.s32.totalorder %v5689_v17, %v12369_v36  ;;  %v12491_v36 = vmov 0 }
 0x302   : > { %v12395_v29 = vsel %vm6156_vm0, 4294967295, %v12394_v29  ;;  %vm6167_vm3 = vmor %vm12397_vm14, %vm12396_vm4  ;;  %vm1291_vm14 = vcmp.eq.s32.totalorder %v5681_v16, %v12405_v35  ;;  %vm12406_vm4 = vcmp.eq.s32.totalorder %v5681_v16, %v5563_v4 }
 0x303   : > { %v12399_v49 = vsel %vm6167_vm3, 4294967295, %v12398_v49  ;;  %vm1574_vm11 = vmor %vm12401_vm9, %vm12400_vm13  ;;  %vm1957_vm9 = vcmp.eq.s32.totalorder %v5681_v16, %v1865_v52 }
 0x304   : > { %vm6180_vm0 = vmor %vm464_vm2, %vm12402_vm5  ;;  %vm1289_vm2 = vcmp.eq.s32.totalorder %v5681_v16, %v12410_v53  ;;  %vm12411_vm5 = vcmp.eq.s32.totalorder %v5689_v17, %v5563_v4  ;;  %v1868_v4 = vpop.permute.xlu0 %1867 }
 0x305   : > { %v12404_v37 = vsel %vm6180_vm0, 4294967295, %v12403_v37  ;;  %vm1797_vm3 = vmor %vm1573_vm1, %vm12406_vm4  ;;  %vm1958_vm1 = vcmp.eq.s32.totalorder %v5689_v17, %v1865_v52  ;;  %vm847_vm4 = vcmp.eq.s32.totalorder %v5681_v16, %v12414_v62  ;;  %v12461_v52 = vld [vmem:[#allocation54_spill] sm:$0xff] }
 0x306   : > { %vm6194_vm13 = vmor %vm6049_vm8, %vm12407_vm15 }
 0x307   : > { %v12409_v24 = vsel %vm6194_vm13, 4294967295, %v12408_v24  ;;  %vm1798_vm0 = vmor %vm1574_vm11, %vm12411_vm5  ;;  %vm2181_vm13 = vcmp.eq.s32.totalorder %v5681_v16, %v2089_v0  ;;  %vm1512_vm11 = vcmp.eq.s32.totalorder %v5689_v17, %v5412_v31  ;;  %v4700_v31 = vld [vmem:[%s4790_s30 + $0xa0] sm:$0xff] }
 0x308   : > { %vm2021_vm15 = vmor %vm1797_vm3, %vm1957_vm9  ;;  %1918 = vperm.xlu2 %4594, %v4700_v31  }
 0x309   : > { %vm6212_vm7 = vmor %vm6068_vm6, %vm1291_vm14  ;;  %vm1735_vm6 = vcmp.eq.s32.totalorder %v5681_v16, %v5520_v14  ;;  %vm2182_vm14 = vcmp.eq.s32.totalorder %v5689_v17, %v2089_v0  ;;  %v12433_v0 = vmov 0 }
 0x30a   : > { %vm2245_vm5 = vmor %vm2021_vm15, %vm2181_vm13 }
 0x30b   : > { %vm6222_vm8 = vmor %vm6079_vm12, %vm1289_vm2  ;;  %v4404_v56 = vsel %vm2245_vm5, 1.0, %v4731_v23  ;;  %vm12419_vm12 = vcmp.eq.s32.totalorder %v5689_v17, %v12405_v35  ;;  %v12460_v35 = vld [vmem:[#allocation35_spill] sm:$0xff] }
 0x30c   : > { %vm2022_vm3 = vmor %vm1798_vm0, %vm1958_vm1  ;;  %vm12422_vm0 = vcmp.eq.s32.totalorder %v5689_v17, %v12410_v53  ;;  %vm12423_vm1 = vnez %v12381_v50  ;;  %2489 = vmatmul.f32.gmra.mxu0 %v4404_v56  ;;  %v12429_v50 = vmov 0  ;;  %v1874_v56 = vpop.permute.xlu2 %1873  ;;  %v2098_v31 = vpop.permute.xlu0 %2097  ;;  %v12775_v53 = vld [vmem:[#allocation122_spill] sm:$0xff] }
 0x30d   : > { %vm6239_vm2 = vmor %vm6094_vm10, %vm12419_vm12  ;;  %vm12435_vm12 = vcmp.eq.s32.totalorder %v5681_v16, %v12418_v28 }
 0x30e   : > { %vm6248_vm15 = vmor %vm12423_vm1, %vm12422_vm0  ;;  %vm12426_vm0 = vnez %v12386_v12  ;;  %v12445_v12 = vmov 0 }
 0x30f   : > { %vm2246_vm9 = vmor %vm2022_vm3, %vm2182_vm14  ;;  %vm465_vm3 = vcmp.eq.s32.totalorder %v5681_v16, %v12427_v40  ;;  %vm12428_vm14 = vnez %v12390_v48  ;;  %v12450_v48 = vmov 0 }
 0x310   : > { %v4405_v57 = vsel %vm2246_vm9, 1.0, %v4731_v23  ;;  %vm1576_vm1 = vmor %vm12426_vm0, %vm1512_vm11  ;;  %vm12431_vm11 = vnez %v12395_v29  ;;  %vm12436_vm9 = vnez %v12399_v49  ;;  %4597 = vset.pattern.permute.xlu2 %v12255_v59  ;;  %v12518_v49 = vmov 0 }
 0x311   : > { %vm6274_vm13 = vmor %vm12428_vm14, %vm847_vm4  ;;  %2602 = vmatmul.f32.gmra.mxu1 %v4405_v57  ;;  %vm466_vm4 = vcmp.eq.s32.totalorder %v5689_v17, %v12427_v40  ;;  %vm12432_vm14 = vcmp.eq.s32.totalorder %v5681_v16, %v12417_v39  ;;  %v12495_v57 = vmov 0  ;;  %v12565_v40 = vmov 0 }
 0x312   : > { %v12430_v50 = vsel %vm6274_vm13, 4294967295, %v12429_v50  ;;  %vm1799_vm0 = vmor %vm12431_vm11, %vm1735_vm6  ;;  %vm12439_vm6 = vcmp.eq.s32.totalorder %v5689_v17, %v5520_v14  ;;  %vm12440_vm13 = vcmp.eq.s32.totalorder %v5689_v17, %v12417_v39  ;;  %v2092_v14 = vpop.permute.xlu1 %2091  ;;  %v12478_v39 = vmov 0 }
 0x313   : > { %vm6292_vm10 = vmor %vm465_vm3, %vm12432_vm14  ;;  %vm12443_vm14 = vcmp.eq.s32.totalorder %v5689_v17, %v12414_v62  ;;  %v12472_v62 = vmov 0 }
 0x314   : > { %v12434_v0 = vsel %vm6292_vm10, 4294967295, %v12433_v0  ;;  %vm6301_vm5 = vmor %vm12436_vm9, %vm12435_vm12  ;;  %vm12444_vm10 = vnez %v12404_v37  ;;  %vm12452_vm9 = vcmp.eq.s32.totalorder %v5689_v17, %v1868_v4 }
 0x315   : > { %v12438_v60 = vsel %vm6301_vm5, 4294967295, %v12437_v60  ;;  %vm1800_vm11 = vmor %vm1576_vm1, %vm12439_vm6  ;;  %vm12447_vm1 = vcmp.eq.s32.totalorder %v5681_v16, %v1868_v4  ;;  %vm2184_vm5 = vcmp.eq.s32.totalorder %v5689_v17, %v2092_v14  ;;  %v12471_v4 = vld [vmem:[#allocation9_spill] sm:$0xff] }
 0x316   : > { %vm6311_vm3 = vmor %vm466_vm4, %vm12440_vm13  ;;  %vm12448_vm13 = vcmp.eq.s32.totalorder %v5689_v17, %v12418_v28  ;;  %vm12449_vm4 = vnez %v12409_v24  ;;  %v12462_v24 = vld [vmem:[#allocation108_spill] sm:$0xff]  ;;  %v12482_v28 = vmov 0 }
 0x317   : > { %v12442_v38 = vsel %vm6311_vm3, 4294967295, %v12441_v38  ;;  %vm6320_vm12 = vmor %vm12444_vm10, %vm12443_vm14  ;;  %vm2183_vm14 = vcmp.eq.s32.totalorder %v5681_v16, %v2092_v14  ;;  %vm468_vm10 = vcmp.eq.s32.totalorder %v5689_v17, %v12453_v42  ;;  %v12508_v14 = vld [vmem:[#allocation81_spill] sm:$0xff] }
 0x318   : > { %v12446_v12 = vsel %vm6320_vm12, 4294967295, %v12445_v12  ;;  %vm2023_vm6 = vmor %vm1799_vm0, %vm12447_vm1  ;;  %vm12455_vm0 = vcmp.eq.s32.totalorder %v5681_v16, %v5421_v32 }
 0x319   : > { %vm6333_vm3 = vmor %vm12449_vm4, %vm12448_vm13  ;;  %vm1514_vm13 = vcmp.eq.s32.totalorder %v5689_v17, %v5446_v15 }
 0x31a   : > { %v12451_v48 = vsel %vm6333_vm3, 4294967295, %v12450_v48  ;;  %vm2024_vm12 = vmor %vm1800_vm11, %vm12452_vm9  ;;  %vm627_vm3 = vcmp.eq.s32.totalorder %v5681_v16, %v12454_v46  ;;  %vm1737_vm11 = vcmp.eq.s32.totalorder %v5681_v16, %v5591_v20  ;;  %v2095_v63 = vpop.permute.xlu1 %2094 }
 0x31b   : > { %vm2247_vm4 = vmor %vm2023_vm6, %vm2183_vm14  ;;  %vm628_vm6 = vcmp.eq.s32.totalorder %v5689_v17, %v12454_v46  ;;  %v12511_v46 = vmov 0 }
 0x31c   : > { %v4406_v29 = vsel %vm2247_vm4, 1.0, %v4731_v23  ;;  %vm2248_vm9 = vmor %vm2024_vm12, %vm2184_vm5  ;;  %vm1738_vm4 = vcmp.eq.s32.totalorder %v5689_v17, %v5591_v20  ;;  %vm12459_vm5 = vcmp.eq.s32.totalorder %v5681_v16, %v5446_v15  ;;  %vm629_vm12 = vcmp.eq.s32.totalorder %v5681_v16, %v12460_v35  ;;  %v4705_v15 = vld [vmem:[%s4790_s30 + $0xc8] sm:$0xff] }
 0x31d   : > { %vm6361_vm1 = vmor %vm6212_vm7, %vm12455_vm0  ;;  %2492 = vmatmul.f32.gmra.mxu0 %v4406_v29  ;;  %v4407_v37 = vsel %vm2248_vm9, 1.0, %v4731_v23  ;;  %vm12468_vm9 = vcmp.eq.s32.totalorder %v5681_v16, %v12453_v42  ;;  %v12486_v20 = vmov 0  ;;  %v12515_v29 = vmov 0  ;;  %v12667_v42 = vld [vmem:[#allocation65_spill] sm:$0xff] }
 0x31e   : > { %vm1577_vm7 = vmor %vm6222_vm8, %vm12459_vm5  ;;  %vm12465_vm5 = vcmp.eq.s32.totalorder %v5689_v17, %v5421_v32  ;;  %2605 = vmatmul.f32.gmra.mxu1 %v4407_v37  ;;  %v4701_v32 = vld [vmem:[%s4790_s30 + $0xa8] sm:$0xff]  ;;  %v12525_v37 = vmov 0 }
 0x31f   : > { %vm6391_vm8 = vmor %vm6248_vm15, %vm1514_vm13  ;;  %1921 = vperm.xlu1 %4596, %v4701_v32   ;;  %vm12474_vm13 = vcmp.eq.s32.totalorder %v5681_v16, %v12458_v34  ;;  %vm12484_vm15 = vcmp.eq.s32.totalorder %v5681_v16, %v12462_v24  ;;  %2145 = vperm.xlu2 %4597, %v4701_v32   ;;  %v12542_v32 = vld [vmem:[#allocation3_spill] sm:$0xff] }
 0x320   : > { %vm6400_vm14 = vmor %vm6239_vm2, %vm12465_vm5 }
 0x321   : > { %vm6410_vm0 = vmor %vm12468_vm9, %vm627_vm3  ;;  %vm469_vm3 = vcmp.eq.s32.totalorder %v5681_v16, %v12471_v4 }
 0x322   : > { %vm1801_vm2 = vmor %vm1577_vm7, %vm1737_vm11  ;;  %vm12475_vm11 = vnez %v12430_v50  ;;  %v12502_v50 = vld [vmem:[#allocation58_spill] sm:$0xff] }
 0x323   : > { %vm6432_vm9 = vmor %vm468_vm10, %vm628_vm6 }
 0x324   : > { %v12473_v62 = vsel %vm6432_vm9, 4294967295, %v12472_v62  ;;  %vm6441_vm7 = vmor %vm12475_vm11, %vm12474_vm13  ;;  %vm12480_vm13 = vcmp.eq.s32.totalorder %v5681_v16, %v12461_v52  ;;  %vm12481_vm11 = vnez %v12434_v0  ;;  %vm851_vm9 = vcmp.eq.s32.totalorder %v5681_v16, %v12502_v50 }
 0x325   : > { %v12477_v25 = vsel %vm6441_vm7, 4294967295, %v12476_v25  ;;  %vm1802_vm10 = vmor %vm6391_vm8, %vm1738_vm4  ;;  %vm12485_vm4 = vnez %v12438_v60  ;;  %vm12499_vm7 = vnez %v12451_v48  ;;  %v12504_v60 = vld [vmem:[#allocation117_spill] sm:$0xff]  ;;  %v4702_v48 = vld [vmem:[%s4790_s30 + $0xb0] sm:$0xff] }
 0x326   : > { %vm6456_vm6 = vmor %vm469_vm3, %vm629_vm12  ;;  %vm12488_vm12 = vcmp.eq.s32.totalorder %v5681_v16, %v6259_v41 }
 0x327   : > { %v12479_v39 = vsel %vm6456_vm6, 4294967295, %v12478_v39  ;;  %vm6465_vm5 = vmor %vm12481_vm11, %vm12480_vm13  ;;  %vm12489_vm13 = vcmp.eq.s32.totalorder %v5689_v17, %v12461_v52  ;;  %vm12490_vm11 = vnez %v12442_v38  ;;  %vm12498_vm6 = vcmp.eq.s32.totalorder %v5689_v17, %v12462_v24  ;;  %1924 = vperm.xlu1 %4596, %v4702_v48   ;;  %2148 = vperm.xlu2 %4597, %v4702_v48   ;;  %v12529_v52 = vld [vmem:[#allocation29_spill] sm:$0xff] }
 0x328   : > { %v12483_v28 = vsel %vm6465_vm5, 4294967295, %v12482_v28  ;;  %vm6474_vm8 = vmor %vm12485_vm4, %vm12484_vm15  ;;  %vm12493_vm15 = vcmp.eq.s32.totalorder %v5689_v17, %v12458_v34  ;;  %vm12494_vm4 = vnez %v12446_v12  ;;  %v12507_v12 = vld [vmem:[#allocation62_spill] sm:$0xff]  ;;  %v12521_v34 = vmov 0 }
 0x329   : > { %v12487_v20 = vsel %vm6474_vm8, 4294967295, %v12486_v20  ;;  %vm2025_vm3 = vmor %vm1801_vm2, %vm12488_vm12  ;;  %vm2185_vm12 = vcmp.eq.s32.totalorder %v5681_v16, %v2095_v63  ;;  %vm1963_vm2 = vcmp.eq.s32.totalorder %v5681_v16, %v1874_v56  ;;  %v12532_v24 = vmov 0 }
 0x32a   : > { %vm6486_vm5 = vmor %vm12490_vm11, %vm12489_vm13  ;;  %vm12497_vm13 = vcmp.eq.s32.totalorder %v5689_v17, %v6259_v41  ;;  %v12575_v38 = vmov 0 }
 0x32b   : > { %v12492_v36 = vsel %vm6486_vm5, 4294967295, %v12491_v36  ;;  %vm6495_vm8 = vmor %vm12494_vm4, %vm12493_vm15  ;;  %vm2186_vm5 = vcmp.eq.s32.totalorder %v5689_v17, %v2095_v63  ;;  %v12555_v63 = vmov 0 }
 0x32c   : > { %v12496_v57 = vsel %vm6495_vm8, 4294967295, %v12495_v57  ;;  %vm2026_vm11 = vmor %vm1802_vm10, %vm12497_vm13  ;;  %vm1740_vm8 = vcmp.eq.s32.totalorder %v5689_v17, %v5531_v18  ;;  %vm630_vm13 = vcmp.eq.s32.totalorder %v5689_v17, %v12460_v35  ;;  %v1877_v35 = vpop.permute.xlu1 %1876 }
 0x32d   : > { %vm6511_vm15 = vmor %vm12499_vm7, %vm12498_vm6  ;;  %vm12503_vm7 = vcmp.eq.s32.totalorder %v5681_v16, %v5531_v18  ;;  %v2101_v18 = vpop.permute.xlu2 %2100 }
 0x32e   : > { %vm2249_vm4 = vmor %vm2025_vm3, %vm2185_vm12  ;;  %vm1964_vm3 = vcmp.eq.s32.totalorder %v5689_v17, %v1874_v56 }
 0x32f   : > { %v4408_v41 = vsel %vm2249_vm4, 1.0, %v4731_v23  ;;  %vm2250_vm10 = vmor %vm2026_vm11, %vm2186_vm5  ;;  %vm470_vm5 = vcmp.eq.s32.totalorder %v5689_v17, %v12471_v4  ;;  %vm1295_vm11 = vcmp.eq.s32.totalorder %v5681_v16, %v12504_v60  ;;  %vm2187_vm4 = vcmp.eq.s32.totalorder %v5681_v16, %v2098_v31  ;;  %4599 = vset.pattern.permute.xlu1 %v12255_v59  ;;  %4600 = vset.pattern.permute.xlu2 %v12259_v8  ;;  %v12616_v4 = vld [vmem:[#allocation61_spill] sm:$0xff] }
 0x330   : > { %2495 = vmatmul.f32.gmra.mxu0 %v4408_v41  ;;  %v4409_v0 = vsel %vm2250_vm10, 1.0, %v4731_v23  ;;  %vm1803_vm6 = vmor %vm6361_vm1, %vm12503_vm7  ;;  %vm853_vm1 = vcmp.eq.s32.totalorder %v5681_v16, %v12507_v12 }
 0x331   : > { %vm6539_vm10 = vmor %vm1803_vm6, %vm1963_vm2  ;;  %2608 = vmatmul.f32.gmra.mxu1 %v4409_v0  ;;  %v12569_v0 = vld [vmem:[#allocation37_spill] sm:$0xff] }
 0x332   : > { %vm1804_vm2 = vmor %vm6400_vm14, %vm1740_vm8  ;;  %vm12517_vm14 = vnez %v12477_v25  ;;  %vm631_vm8 = vcmp.eq.s32.totalorder %v5681_v16, %v12529_v52 }
 0x333   : > { %vm6558_vm6 = vmor %vm470_vm5, %vm630_vm13  ;;  %vm12513_vm5 = vcmp.eq.s32.totalorder %v5689_v17, %v12502_v50  ;;  %v4704_v50 = vld [vmem:[%s4790_s30 + $0xc0] sm:$0xff] }
 0x334   : > { %vm6567_vm12 = vmor %vm6410_vm0, %vm851_vm9  ;;  %vm12514_vm0 = vnez %v12473_v62  ;;  %1930 = vperm.xlu2 %4600, %v4704_v50  }
 0x335   : > { %v12512_v46 = vsel %vm6567_vm12, 4294967295, %v12511_v46  ;;  %vm2028_vm13 = vmor %vm1804_vm2, %vm1964_vm3  ;;  %vm1965_vm12 = vcmp.eq.s32.totalorder %v5681_v16, %v1877_v35  ;;  %v2104_v41 = vpop.permute.xlu2 %2103 }
 0x336   : > { %vm6583_vm9 = vmor %vm12514_vm0, %vm12513_vm5  ;;  %vm12520_vm5 = vnez %v12479_v39  ;;  %v12551_v39 = vld [vmem:[#allocation91_spill] sm:$0xff] }
 0x337   : > { %v12516_v29 = vsel %vm6583_vm9, 4294967295, %v12515_v29  ;;  %vm6592_vm7 = vmor %vm12517_vm14, %vm1295_vm11  ;;  %vm12523_vm11 = vcmp.eq.s32.totalorder %v5681_v16, %v12508_v14  ;;  %vm12524_vm14 = vnez %v12483_v28  ;;  %v12552_v28 = vld [vmem:[#allocation110_spill] sm:$0xff] }
 0x338   : > { %v12519_v49 = vsel %vm6592_vm7, 4294967295, %v12518_v49  ;;  %vm2251_vm2 = vmor %vm6539_vm10, %vm2187_vm4  ;;  %vm1741_vm4 = vcmp.eq.s32.totalorder %v5681_v16, %v5512_v3  ;;  %vm12527_vm10 = vcmp.eq.s32.totalorder %v5681_v16, %v5414_v51  ;;  %vm12535_vm7 = vnez %v12496_v57 }
 0x339   : > { %vm6607_vm0 = vmor %vm12520_vm5, %vm853_vm1  ;;  %vm12528_vm1 = vnez %v12487_v20  ;;  %v4410_v55 = vsel %vm2251_vm2, 1.0, %v4731_v23  ;;  %v4703_v20 = vld [vmem:[%s4790_s30 + $0xb8] sm:$0xff]  ;;  %v12639_v57 = vmov 0 }
 0x33a   : > { %v12522_v34 = vsel %vm6607_vm0, 4294967295, %v12521_v34  ;;  %vm6616_vm3 = vmor %vm12524_vm14, %vm12523_vm11  ;;  %vm12530_vm0 = vcmp.eq.s32.totalorder %v5689_v17, %v12508_v14  ;;  %vm12531_vm11 = vnez %v12492_v36  ;;  %2498 = vmatmul.f32.gmra.mxu0 %v4410_v55  ;;  %2151 = vperm.xlu1 %4599, %v4703_v20   ;;  %v12558_v36 = vmov 0  ;;  %v1883_v55 = vpop.permute.xlu0 %1882  ;;  %v12713_v20 = vld [vmem:[#allocation113_spill] sm:$0xff] }
 0x33b   : > { %v12526_v37 = vsel %vm6616_vm3, 4294967295, %v12525_v37  ;;  %vm1581_vm5 = vmor %vm12528_vm1, %vm12527_vm10  ;;  %vm12534_vm3 = vcmp.eq.s32.totalorder %v5689_v17, %v12504_v60  ;;  %vm12538_vm10 = vcmp.eq.s32.totalorder %v5689_v17, %v2098_v31  ;;  %v1880_v31 = vpop.permute.xlu1 %1879  ;;  %v12571_v60 = vmov 0 }
 0x33c   : > { %vm6634_vm14 = vmor %vm12531_vm11, %vm12530_vm0  ;;  %vm12539_vm11 = vcmp.eq.s32.totalorder %v5689_v17, %v5414_v51  ;;  %v12545_v51 = vld [vmem:[#allocation84_spill] sm:$0xff]  ;;  %v12581_v14 = vmov 0  ;;  %1933 = vperm.xlu2 %4600, %v4705_v15   ;;  %v12780_v15 = vmov 0 }
 0x33d   : > { %v12533_v24 = vsel %vm6634_vm14, 4294967295, %v12532_v24  ;;  %vm6643_vm9 = vmor %vm12535_vm7, %vm12534_vm3  ;;  %vm471_vm7 = vcmp.eq.s32.totalorder %v5681_v16, %v12542_v32 }
 0x33e   : > { %vm2252_vm1 = vmor %vm2028_vm13, %vm12538_vm10  ;;  %vm632_vm13 = vcmp.eq.s32.totalorder %v5689_v17, %v12529_v52  ;;  %vm1966_vm10 = vcmp.eq.s32.totalorder %v5689_v17, %v1877_v35  ;;  %v12677_v35 = vmov 0  ;;  %v12770_v52 = vld [vmem:[#allocation135_spill] sm:$0xff] }
 0x33f   : > { %vm6658_vm14 = vmor %vm6511_vm15, %vm12539_vm11  ;;  %vm854_vm15 = vcmp.eq.s32.totalorder %v5689_v17, %v12507_v12  ;;  %vm1075_vm11 = vcmp.eq.s32.totalorder %v5681_v16, %v12545_v51  ;;  %v4411_v62 = vsel %vm2252_vm1, 1.0, %v4731_v23  ;;  %v12578_v12 = vld [vmem:[#allocation55_spill] sm:$0xff] }
 0x340   : > { %vm1805_vm3 = vmor %vm1581_vm5, %vm1741_vm4  ;;  %2611 = vmatmul.f32.gmra.mxu1 %v4411_v62  ;;  %vm1967_vm5 = vcmp.eq.s32.totalorder %v5681_v16, %v1880_v31  ;;  %v6925_v62 = vpop.permute.xlu2 %1885 }
 0x341   : > { %vm6667_vm2 = vmor %vm471_vm7, %vm631_vm8  ;;  %vm472_vm8 = vcmp.eq.s32.totalorder %v5689_v17, %v12542_v32  ;;  %vm1077_vm7 = vcmp.eq.s32.totalorder %v5681_v16, %v12551_v39  ;;  %v2728_v32 = vld [vmem:[%s11920_s3 + $0x18] sm:$0xff] }
 0x342   : > { %vm6676_vm0 = vmor %vm1805_vm3, %vm1965_vm12  ;;  %vm12548_vm12 = vcmp.eq.s32.totalorder %v5689_v17, %v5512_v3  ;;  %2154 = vperm.xlu1 %4599, %v4704_v50   ;;  %2839 = vmatpush.msra.mxu2 %v2728_v32  ;;  %v12828_v50 = vmov 0  ;;  %v12961_v32 = vmov 0 }
 0x343   : > { %vm1806_vm1 = vmor %vm6658_vm14, %vm12548_vm12  ;;  %v2107_v25 = vpop.permute.xlu1 %2106 }
 0x344   : > { %vm6696_vm3 = vmor %vm472_vm8, %vm632_vm13  ;;  %vm12557_vm8 = vnez %v12512_v46  ;;  %v12586_v46 = vld [vmem:[#allocation13_spill] sm:$0xff]  ;;  %4603 = vset.pattern.permute.xlu2 %v12255_v59 }
 0x345   : > { %vm6707_vm4 = vmor %vm1806_vm1, %vm1966_vm10  ;;  %vm12573_vm1 = vcmp.eq.s32.totalorder %v5681_v16, %v12552_v28 }
 0x346   : > { %vm6717_vm13 = vmor %vm6558_vm6, %vm854_vm15  ;;  %vm12560_vm6 = vcmp.eq.s32.totalorder %v5681_v16, %v2101_v18 }
 0x347   : > { %v12556_v63 = vsel %vm6717_vm13, 4294967295, %v12555_v63  ;;  %vm6726_vm10 = vmor %vm12557_vm8, %vm1075_vm11  ;;  %vm12563_vm11 = vcmp.eq.s32.totalorder %v5689_v17, %v12545_v51  ;;  %vm12564_vm8 = vnez %v12516_v29  ;;  %v12618_v51 = vmov 0  ;;  %v12669_v29 = vld [vmem:[#allocation4_spill] sm:$0xff] }
 0x348   : > { %v12559_v36 = vsel %vm6726_vm10, 4294967295, %v12558_v36  ;;  %vm6739_vm15 = vmor %vm6676_vm0, %vm12560_vm6  ;;  %vm12567_vm0 = vcmp.eq.s32.totalorder %v5681_v16, %v5455_v30  ;;  %vm12568_vm6 = vnez %v12519_v49  ;;  %v12594_v49 = vmov 0 }
 0x349   : > { %vm6748_vm14 = vmor %vm12564_vm8, %vm12563_vm11  ;;  %vm12570_vm11 = vnez %v12522_v34  ;;  %v4412_v48 = vsel %vm6739_vm15, 1.0, %v4731_v23  ;;  %v12596_v34 = vld [vmem:[#allocation111_spill] sm:$0xff] }
 0x34a   : > { %v12566_v40 = vsel %vm6748_vm14, 4294967295, %v12565_v40  ;;  %vm1583_vm12 = vmor %vm12568_vm6, %vm12567_vm0  ;;  %vm12574_vm14 = vnez %v12526_v37  ;;  %vm12577_vm0 = vcmp.eq.s32.totalorder %v5689_v17, %v2101_v18  ;;  %2501 = vmatmul.f32.gmra.mxu0 %v4412_v48  ;;  %4602 = vset.pattern.permute.xlu1 %v12259_v8  ;;  %v12663_v48 = vld [vmem:[#allocation87_spill] sm:$0xff] }
 0x34b   : > { %vm6767_vm8 = vmor %vm12570_vm11, %vm1077_vm7  ;;  %vm12579_vm11 = vcmp.eq.s32.totalorder %v5689_v17, %v12552_v28  ;;  %vm12588_vm7 = vcmp.eq.s32.totalorder %v5681_v16, %v12569_v0  ;;  %v12623_v28 = vld [vmem:[#allocation83_spill] sm:$0xff] }
 0x34c   : > { %v12572_v60 = vsel %vm6767_vm8, 4294967295, %v12571_v60  ;;  %vm6776_vm10 = vmor %vm12574_vm14, %vm12573_vm1  ;;  %vm12580_vm8 = vnez %v12533_v24  ;;  %v12692_v24 = vmov 0 }
 0x34d   : > { %v12576_v38 = vsel %vm6776_vm10, 4294967295, %v12575_v38  ;;  %vm2254_vm6 = vmor %vm6707_vm4, %vm12577_vm0  ;;  %vm12583_vm4 = vcmp.eq.s32.totalorder %v5689_v17, %v5455_v30  ;;  %vm634_vm0 = vcmp.eq.s32.totalorder %v5689_v17, %v12569_v0  ;;  %v12589_v30 = vmov 0  ;;  %v12658_v0 = vld [vmem:[#allocation30_spill] sm:$0xff] }
 0x34e   : > { %vm6792_vm13 = vmor %vm12580_vm8, %vm12579_vm11  ;;  %vm473_vm8 = vcmp.eq.s32.totalorder %v5681_v16, %v12586_v46  ;;  %vm12587_vm11 = vcmp.eq.s32.totalorder %v5681_v16, %v5621_v19  ;;  %v4413_v18 = vsel %vm2254_vm6, 1.0, %v4731_v23  ;;  %vm12597_vm6 = vcmp.eq.s32.totalorder %v5689_v17, %v5621_v19 }
 0x34f   : > { %v12582_v14 = vsel %vm6792_vm13, 4294967295, %v12581_v14  ;;  %vm6806_vm1 = vmor %vm6643_vm9, %vm12583_vm4  ;;  %vm856_vm4 = vcmp.eq.s32.totalorder %v5689_v17, %v12578_v12  ;;  %2614 = vmatmul.f32.gmra.mxu1 %v4413_v18  ;;  %v12684_v19 = vmov 0 }
 0x350   : > { %vm1807_vm15 = vmor %vm1583_vm12, %vm12587_vm11  ;;  %vm474_vm12 = vcmp.eq.s32.totalorder %v5689_v17, %v12586_v46  ;;  %vm12593_vm11 = vcmp.eq.s32.totalorder %v5681_v16, %v12578_v12  ;;  %v12668_v46 = vld [vmem:[#allocation112_spill] sm:$0xff]  ;;  %v4708_v12 = vld [vmem:[%s4790_s30 + $0xe0] sm:$0xff] }
 0x351   : > { %vm6821_vm9 = vmor %vm473_vm8, %vm12588_vm7  ;;  %vm1078_vm8 = vcmp.eq.s32.totalorder %v5689_v17, %v12551_v39  ;;  %v12622_v39 = vld [vmem:[#allocation38_spill] sm:$0xff] }
 0x352   : > { %v12590_v30 = vsel %vm6821_vm9, 4294967295, %v12589_v30  ;;  %vm6828_vm13 = vmor %vm1807_vm15, %vm1967_vm5  ;;  %vm1299_vm5 = vcmp.eq.s32.totalorder %v5681_v16, %v12596_v34 }
 0x353   : > { %vm6839_vm7 = vmor %vm6667_vm2, %vm12593_vm11  ;;  %vm1300_vm2 = vcmp.eq.s32.totalorder %v5689_v17, %v12596_v34  ;;  %vm2191_vm11 = vcmp.eq.s32.totalorder %v5681_v16, %v2104_v41  ;;  %v12671_v34 = vmov 0 }
 0x354   : > { %v12595_v49 = vsel %vm6839_vm7, 4294967295, %v12594_v49  ;;  %vm1808_vm15 = vmor %vm6806_vm1, %vm12597_vm6  ;;  %vm12600_vm7 = vcmp.eq.s32.totalorder %v5689_v17, %v1880_v31  ;;  %vm1301_vm1 = vcmp.eq.s32.totalorder %v5681_v16, %v5362_v58  ;;  %v13014_v31 = vld [vmem:[#allocation47_spill] sm:$0xff] }
 0x355   : > { %vm6852_vm14 = vmor %vm474_vm12, %vm634_vm0 }
 0x356   : > { %vm6861_vm9 = vmor %vm1808_vm15, %vm12600_vm7  ;;  %vm12607_vm7 = vnez %v12556_v63  ;;  %vm12624_vm15 = vcmp.eq.s32.totalorder %v5689_v17, %v5430_v54  ;;  %v12633_v63 = vmov 0 }
 0x357   : > { %vm6867_vm10 = vmor %vm6696_vm3, %vm856_vm4  ;;  %vm12610_vm3 = vnez %v12559_v36  ;;  %v12716_v36 = vld [vmem:[#allocation94_spill] sm:$0xff] }
 0x358   : > { %vm6877_vm12 = vmor %vm6828_vm13, %vm2191_vm11  ;;  %vm12613_vm11 = vnez %v12566_v40  ;;  %vm12617_vm13 = vnez %v12572_v60  ;;  %v12643_v40 = vmov 0  ;;  %v2110_v60 = vpop.permute.xlu1 %2109 }
 0x359   : > { %vm6883_vm6 = vmor %vm12607_vm7, %vm1078_vm8  ;;  %vm2192_vm8 = vcmp.eq.s32.totalorder %v5689_v17, %v2104_v41  ;;  %v4414_v56 = vsel %vm6877_vm12, 1.0, %v4731_v23  ;;  %vm12625_vm12 = vnez %v12582_v14  ;;  %v12662_v14 = vld [vmem:[#allocation40_spill] sm:$0xff] }
 0x35a   : > { %vm6889_vm4 = vmor %vm12610_vm3, %vm1299_vm5  ;;  %2504 = vmatmul.f32.gmra.mxu0 %v4414_v56  ;;  %v12710_v56 = vld [vmem:[#allocation57_spill] sm:$0xff]  ;;  %v12826_v41 = vld [vmem:[#allocation116_spill] sm:$0xff] }
 0x35b   : > { %vm6904_vm5 = vmor %vm12613_vm11, %vm1300_vm2  ;;  %vm12629_vm2 = vcmp.eq.s32.totalorder %v5681_v16, %v5547_v1 }
 0x35c   : > { %vm2256_vm3 = vmor %vm6861_vm9, %vm2192_vm8  ;;  %vm12620_vm9 = vcmp.eq.s32.totalorder %v5681_v16, %v5430_v54  ;;  %vm12621_vm8 = vnez %v12576_v38  ;;  %v12630_v54 = vld [vmem:[#allocation12_spill] sm:$0xff] }
 0x35d   : > { %vm6919_vm0 = vmor %vm12617_vm13, %vm1301_vm1  ;;  %v4415_v3 = vsel %vm2256_vm3, 1.0, %v4731_v23 }
 0x35e   : > { %v12619_v51 = vsel %vm6919_vm0, 4294967295, %v12618_v51  ;;  %vm1585_vm11 = vmor %vm12621_vm8, %vm12620_vm9  ;;  %vm12626_vm0 = vcmp.eq.s32.totalorder %v5681_v16, %v5423_v45  ;;  %2617 = vmatmul.f32.gmra.mxu1 %v4415_v3  ;;  %vm12638_vm8 = vcmp.eq.s32.totalorder %v5681_v16, %v12622_v39 }
 0x35f   : > { %vm1586_vm7 = vmor %vm12625_vm12, %vm12624_vm15  ;;  %vm475_vm12 = vcmp.eq.s32.totalorder %v5681_v16, %v12630_v54 }
 0x360   : > { %vm6950_vm9 = vmor %vm6889_vm4, %vm12626_vm0  ;;  %vm12631_vm0 = vcmp.eq.s32.totalorder %v5681_v16, %v12616_v4  ;;  %vm12632_vm4 = vnez %v12590_v30  ;;  %v1889_v30 = vpop.permute.xlu2 %1888 }
 0x361   : > { %vm1809_vm13 = vmor %vm1585_vm11, %vm12629_vm2  ;;  %vm12635_vm11 = vcmp.eq.s32.totalorder %v5689_v17, %v5547_v1  ;;  %vm12642_vm2 = vnez %v12595_v49  ;;  %v12670_v49 = vld [vmem:[#allocation16_spill] sm:$0xff] }
 0x362   : > { %vm6968_vm1 = vmor %vm12632_vm4, %vm12631_vm0  ;;  %vm12641_vm4 = vcmp.eq.s32.totalorder %v5681_v16, %v12623_v28  ;;  %v2727_v1 = vld [vmem:[%s11920_s3 + $0x10] sm:$0xff] }
 0x363   : > { %v12634_v63 = vsel %vm6968_vm1, 4294967295, %v12633_v63  ;;  %vm6978_vm15 = vmor %vm1586_vm7, %vm12635_vm11  ;;  %vm1302_vm7 = vcmp.eq.s32.totalorder %v5689_v17, %v5362_v58  ;;  %vm12645_vm11 = vcmp.eq.s32.totalorder %v5681_v16, %v1883_v55  ;;  %v4706_v58 = vld [vmem:[%s4790_s30 + $0xd0] sm:$0xff]  ;;  %2840 = vmatpush.msra.mxu2 %v2727_v1  ;;  %v12823_v1 = vmov 0 }
 0x364   : > { %vm6985_vm0 = vmor %vm475_vm12, %vm12638_vm8  ;;  %vm2194_vm12 = vcmp.eq.s32.totalorder %v5689_v17, %v2107_v25  ;;  %1936 = vperm.xlu1 %4602, %v4706_v58   ;;  %2160 = vperm.xlu2 %4603, %v4706_v58   ;;  %v2726_v58 = vld [vmem:[%s11920_s3 + $0x8] sm:$0xff] }
 0x365   : > { %v12640_v57 = vsel %vm6985_vm0, 4294967295, %v12639_v57  ;;  %vm6994_vm3 = vmor %vm12642_vm2, %vm12641_vm4  ;;  %vm12646_vm0 = vcmp.eq.s32.totalorder %v5689_v17, %v12616_v4  ;;  %vm12649_vm4 = vcmp.eq.s32.totalorder %v5681_v16, %v2107_v25  ;;  %2841 = vmatpush.msra.mxu2 %v2726_v58  ;;  %v12796_v25 = vld [vmem:[#allocation154_spill] sm:$0xff]  ;;  %v12825_v58 = vld [vmem:[#allocation115_spill] sm:$0xff] }
 0x366   : > { %v12644_v40 = vsel %vm6994_vm3, 4294967295, %v12643_v40  ;;  %vm2033_vm8 = vmor %vm1809_vm13, %vm12645_vm11  ;;  %vm12650_vm13 = vcmp.eq.s32.totalorder %v5689_v17, %v12623_v28  ;;  %v7230_v28 = vpop.permute.xlu1 %1891  ;;  %v12881_v4 = vld [vmem:[#allocation8_spill] sm:$0xff] }
 0x367   : > { %vm7009_vm1 = vmor %vm6852_vm14, %vm12646_vm0  ;;  %vm1525_vm14 = vcmp.eq.s32.totalorder %v5681_v16, %v5465_v10  ;;  %vm12653_vm0 = vcmp.eq.s32.totalorder %v5689_v17, %v1883_v55  ;;  %v4707_v55 = vld [vmem:[%s4790_s30 + $0xd8] sm:$0xff] }
 0x368   : > { %vm2257_vm3 = vmor %vm2033_vm8, %vm12649_vm4  ;;  %vm476_vm8 = vcmp.eq.s32.totalorder %v5689_v17, %v12630_v54  ;;  %v7243_v3 = vpop.permute.xlu2 %2115 }
 0x369   : > { %vm7023_vm11 = vmor %vm6867_vm10, %vm12650_vm13  ;;  %vm1747_vm10 = vcmp.eq.s32.totalorder %v5681_v16, %v5522_v7  ;;  %v4416_v38 = vsel %vm2257_vm3, 1.0, %v4731_v23  ;;  %vm477_vm3 = vcmp.eq.s32.totalorder %v5681_v16, %v12669_v29 }
 0x36a   : > { %vm2034_vm2 = vmor %vm6978_vm15, %vm12653_vm0  ;;  %vm636_vm0 = vcmp.eq.s32.totalorder %v5689_v17, %v12622_v39  ;;  %2507 = vmatmul.f32.gmra.mxu0 %v4416_v38  ;;  %vm12676_vm15 = vcmp.eq.s32.totalorder %v5681_v16, %v12658_v0  ;;  %v2113_v39 = vpop.permute.xlu0 %2112  ;;  %v12745_v38 = vmov 0 }
 0x36b   : > { %vm7038_vm4 = vmor %vm6883_vm6, %vm1302_vm7  ;;  %vm12659_vm7 = vcmp.eq.s32.totalorder %v5689_v17, %v5423_v45  ;;  %v12665_v45 = vmov 0  ;;  %vm12679_vm6 = vcmp.eq.s32.totalorder %v5681_v16, %v12662_v14 }
 0x36c   : > { %vm7044_vm13 = vmor %vm2034_vm2, %vm2194_vm12  ;;  %vm479_vm2 = vcmp.eq.s32.totalorder %v5681_v16, %v12670_v49  ;;  %1939 = vperm.xlu1 %4602, %v4707_v55   ;;  %2163 = vperm.xlu2 %4603, %v4707_v55  }
 0x36d   : > { %vm7060_vm12 = vmor %vm6904_vm5, %vm12659_vm7  ;;  %vm12664_vm5 = vnez %v12619_v51  ;;  %v4417_v18 = vsel %vm7044_vm13, 1.0, %v4731_v23  ;;  %v12791_v51 = vmov 0 }
 0x36e   : > { %vm7077_vm7 = vmor %vm12664_vm5, %vm1525_vm14  ;;  %2620 = vmatmul.f32.gmra.mxu1 %v4417_v18 }
 0x36f   : > { %v12666_v45 = vsel %vm7077_vm7, 4294967295, %v12665_v45  ;;  %vm1811_vm14 = vmor %vm6950_vm9, %vm1747_vm10  ;;  %vm12673_vm10 = vcmp.eq.s32.totalorder %v5689_v17, %v5522_v7  ;;  %v12680_v7 = vmov 0 }
 0x370   : > { %vm7104_vm13 = vmor %vm476_vm8, %vm636_vm0  ;;  %vm478_vm0 = vcmp.eq.s32.totalorder %v5689_v17, %v12669_v29  ;;  %vm12683_vm8 = vnez %v12634_v63  ;;  %v2119_v55 = vpop.permute.xlu2 %2118  ;;  %v12811_v63 = vld [vmem:[#allocation5_spill] sm:$0xff] }
 0x371   : > { %v12672_v34 = vsel %vm7104_vm13, 4294967295, %v12671_v34  ;;  %vm7115_vm5 = vmor %vm7060_vm12, %vm12673_vm10  ;;  %vm12682_vm10 = vcmp.eq.s32.totalorder %v5681_v16, %v12663_v48 }
 0x372   : > { %vm7126_vm9 = vmor %vm477_vm3, %vm12676_vm15  ;;  %vm1304_vm15 = vcmp.eq.s32.totalorder %v5689_v17, %v12668_v46  ;;  %vm12686_vm3 = vcmp.eq.s32.totalorder %v5681_v16, %v6925_v62 }
 0x373   : > { %v12678_v35 = vsel %vm7126_vm9, 4294967295, %v12677_v35  ;;  %vm7133_vm12 = vmor %vm479_vm2, %vm12679_vm6  ;;  %vm2196_vm6 = vcmp.eq.s32.totalorder %v5689_v17, %v2110_v60  ;;  %vm12687_vm2 = vcmp.eq.s32.totalorder %v5689_v17, %v12658_v0  ;;  %v12833_v0 = vld [vmem:[#allocation143_spill] sm:$0xff] }
 0x374   : > { %v12681_v7 = vsel %vm7133_vm12, 4294967295, %v12680_v7  ;;  %vm7142_vm13 = vmor %vm12683_vm8, %vm12682_vm10  ;;  %vm12690_vm8 = vcmp.eq.s32.totalorder %v5681_v16, %v12667_v42  ;;  %vm12691_vm10 = vnez %v12640_v57  ;;  %4605 = vset.pattern.permute.xlu1 %v12255_v59  ;;  %4606 = vset.pattern.permute.xlu2 %v12242_v44 }
 0x375   : > { %v12685_v19 = vsel %vm7142_vm13, 4294967295, %v12684_v19  ;;  %vm2035_vm9 = vmor %vm1811_vm14, %vm12686_vm3  ;;  %vm12694_vm14 = vcmp.eq.s32.totalorder %v5681_v16, %v12668_v46  ;;  %vm12695_vm3 = vnez %v12644_v40  ;;  %v12722_v40 = vmov 0  ;;  %2166 = vperm.xlu1 %4605, %v4708_v12   ;;  %v1898_v12 = vpop.permute.xlu0 %1897 }
 0x376   : > { %vm7155_vm12 = vmor %vm478_vm0, %vm12687_vm2  ;;  %vm12698_vm2 = vcmp.eq.s32.totalorder %v5681_v16, %v2110_v60  ;;  %v12916_v60 = vmov 0 }
 0x377   : > { %vm7164_vm13 = vmor %vm12691_vm10, %vm12690_vm8  ;;  %vm12699_vm10 = vcmp.eq.s32.totalorder %v5689_v17, %v12663_v48  ;;  %v2725_v48 = vld [vmem:[%s11920_s3] sm:$0xff] }
 0x378   : > { %v12693_v24 = vsel %vm7164_vm13, 4294967295, %v12692_v24  ;;  %vm7173_vm7 = vmor %vm12695_vm3, %vm12694_vm14  ;;  %vm1749_vm14 = vcmp.eq.s32.totalorder %v5681_v16, %v5651_v2  ;;  %vm12702_vm3 = vcmp.eq.s32.totalorder %v5689_v17, %v6925_v62  ;;  %2842 = vmatpush.msra.mxu2 %v2725_v48  ;;  %v12923_v48 = vmov 0 }
 0x379   : > { %vm2259_vm8 = vmor %vm2035_vm9, %vm12698_vm2  ;;  %vm1973_vm2 = vcmp.eq.s32.totalorder %v5681_v16, %v1889_v30 }
 0x37a   : > { %vm7187_vm13 = vmor %vm7009_vm1, %vm12699_vm10  ;;  %v4418_v62 = vsel %vm2259_vm8, 1.0, %v4731_v23  ;;  %vm12707_vm10 = vcmp.eq.s32.totalorder %v5689_v17, %v5465_v10  ;;  %v12712_v10 = vld [vmem:[#allocation64_spill] sm:$0xff] }
 0x37b   : > { %vm2036_vm0 = vmor %vm7115_vm5, %vm12702_vm3  ;;  %vm1750_vm5 = vcmp.eq.s32.totalorder %v5689_v17, %v5651_v2  ;;  %2510 = vmatmul.f32.gmra.mxu0 %v4418_v62  ;;  %vm1974_vm3 = vcmp.eq.s32.totalorder %v5689_v17, %v1889_v30  ;;  %v4709_v30 = vld [vmem:[%s4790_s30 + $0xe8] sm:$0xff]  ;;  %v12819_v2 = vmov 0  ;;  %v12886_v62 = vld [vmem:[#allocation36_spill] sm:$0xff] }
 0x37c   : > { %vm7203_vm9 = vmor %vm7023_vm11, %vm1304_vm15  ;;  %1721 = vperm.xlu2 %4606, %v4709_v30  }
 0x37d   : > { %vm7207_vm1 = vmor %vm2036_vm0, %vm2196_vm6  ;;  %vm12720_vm0 = vcmp.eq.s32.totalorder %v5689_v17, %v12667_v42  ;;  %v12752_v42 = vmov 0  ;;  %4607 = vset.pattern.permute.xlu1 %v12259_v8 }
 0x37e   : > { %vm7220_vm11 = vmor %vm7038_vm4, %vm12707_vm10  ;;  %vm12711_vm4 = vnez %v12666_v45  ;;  %vm863_vm10 = vcmp.eq.s32.totalorder %v5681_v16, %v12712_v10  ;;  %v4419_v54 = vsel %vm7207_vm1, 1.0, %v4731_v23  ;;  %v12750_v45 = vld [vmem:[#allocation41_spill] sm:$0xff]  ;;  %1945 = vperm.xlu1 %4607, %v4709_v30  }
 0x37f   : > { %vm1813_vm8 = vmor %vm12711_vm4, %vm1749_vm14  ;;  %vm480_vm14 = vcmp.eq.s32.totalorder %v5689_v17, %v12670_v49  ;;  %2623 = vmatmul.f32.gmra.mxu1 %v4419_v54  ;;  %vm12721_vm4 = vnez %v12672_v34  ;;  %v12760_v49 = vld [vmem:[#allocation15_spill] sm:$0xff]  ;;  %v7410_v34 = vpop.permute.xlu1 %1894 }
 0x380   : > { %vm7250_vm15 = vmor %vm1813_vm8, %vm1973_vm2  ;;  %vm12717_vm2 = vcmp.eq.s32.totalorder %v5689_v17, %v12662_v14  ;;  %v7673_v14 = vpop.permute.xlu2 %1900 }
 0x381   : > { %vm1814_vm1 = vmor %vm7220_vm11, %vm1750_vm5  ;;  %vm12733_vm11 = vcmp.eq.s32.totalorder %v5681_v16, %v12713_v20  ;;  %vm12734_vm5 = vnez %v12685_v19  ;;  %v12769_v19 = vld [vmem:[#allocation90_spill] sm:$0xff] }
 0x382   : > { %vm7270_vm8 = vmor %vm480_vm14, %vm12717_vm2 }
 0x383   : > { %vm7279_vm6 = vmor %vm12721_vm4, %vm12720_vm0  ;;  %vm12726_vm0 = vcmp.eq.s32.totalorder %v5681_v16, %v12710_v56  ;;  %vm12727_vm4 = vnez %v12678_v35 }
 0x384   : > { %v12723_v40 = vsel %vm7279_vm6, 4294967295, %v12722_v40  ;;  %vm7288_vm14 = vmor %vm1814_vm1, %vm1974_vm3  ;;  %vm12730_vm3 = vnez %v12681_v7  ;;  %v12768_v7 = vld [vmem:[#allocation86_spill] sm:$0xff]  ;;  %4608 = vset.pattern.permute.xlu2 %v12255_v59  ;;  %v12814_v59 = vmov 0 }
 0x385   : > { %vm7303_vm2 = vmor %vm12727_vm4, %vm12726_vm0  ;;  %vm12737_vm4 = vcmp.eq.s32.totalorder %v5681_v16, %v2113_v39  ;;  %vm12744_vm0 = vnez %v12693_v24  ;;  %2169 = vperm.xlu2 %4608, %v4709_v30   ;;  %v12849_v30 = vld [vmem:[#allocation60_spill] sm:$0xff]  ;;  %v12865_v24 = vmov 0 }
 0x386   : > { %vm7312_vm1 = vmor %vm12730_vm3, %vm863_vm10  ;;  %vm12743_vm3 = vcmp.eq.s32.totalorder %v5681_v16, %v12716_v36 }
 0x387   : > { %vm7321_vm6 = vmor %vm12734_vm5, %vm12733_vm11  ;;  %vm12740_vm5 = vcmp.eq.s32.totalorder %v5689_v17, %v12710_v56  ;;  %v12797_v56 = vld [vmem:[#allocation33_spill] sm:$0xff] }
 0x388   : > { %vm7332_vm10 = vmor %vm7250_vm15, %vm12737_vm4 }
 0x389   : > { %vm7341_vm11 = vmor %vm7155_vm12, %vm12740_vm5  ;;  %vm12747_vm12 = vcmp.eq.s32.totalorder %v5681_v16, %v5439_v9  ;;  %v4420_v18 = vsel %vm7332_vm10, 1.0, %v4731_v23  ;;  %vm12761_vm10 = vcmp.eq.s32.totalorder %v5681_v16, %v5571_v5 }
 0x38a   : > { %vm7350_vm15 = vmor %vm12744_vm0, %vm12743_vm3  ;;  %vm12751_vm3 = vcmp.eq.s32.totalorder %v5689_v17, %v12713_v20  ;;  %2513 = vmatmul.f32.gmra.mxu0 %v4420_v18  ;;  %v12807_v20 = vld [vmem:[#allocation68_spill] sm:$0xff]  ;;  %v13122_v18 = vld [vmem:[#allocation49_spill] sm:$0xff] }
 0x38b   : > { %v12746_v38 = vsel %vm7350_vm15, 4294967295, %v12745_v38  ;;  %vm7362_vm5 = vmor %vm7173_vm7, %vm12747_vm12  ;;  %vm12754_vm7 = vcmp.eq.s32.totalorder %v5689_v17, %v2113_v39  ;;  %vm12776_vm15 = vcmp.eq.s32.totalorder %v5689_v17, %v7230_v28  ;;  %v12799_v39 = vmov 0 }
 0x38c   : > { %vm7376_vm4 = vmor %vm7187_vm13, %vm12751_vm3  ;;  %vm12757_vm3 = vcmp.eq.s32.totalorder %v5689_v17, %v5439_v9  ;;  %v12763_v9 = vmov 0  ;;  %vm12786_vm13 = vcmp.eq.s32.totalorder %v5681_v16, %v7243_v3 }
 0x38d   : > { %v12753_v42 = vsel %vm7376_vm4, 4294967295, %v12752_v42  ;;  %vm7385_vm12 = vmor %vm7288_vm14, %vm12754_vm7  ;;  %vm481_vm7 = vcmp.eq.s32.totalorder %v5681_v16, %v12760_v49 }
 0x38e   : > { %vm7402_vm14 = vmor %vm7203_vm9, %vm12757_vm3  ;;  %vm12762_vm3 = vcmp.eq.s32.totalorder %v5681_v16, %v12750_v45  ;;  %v4421_v37 = vsel %vm7385_vm12, 1.0, %v4731_v23  ;;  %vm1530_vm12 = vcmp.eq.s32.totalorder %v5689_v17, %v12770_v52 }
 0x38f   : > { %vm1815_vm0 = vmor %vm7362_vm5, %vm12761_vm10  ;;  %vm12765_vm5 = vcmp.eq.s32.totalorder %v5681_v16, %v7230_v28  ;;  %2626 = vmatmul.f32.gmra.mxu1 %v4421_v37  ;;  %v12803_v28 = vmov 0 }
 0x390   : > { %vm7422_vm4 = vmor %vm481_vm7, %vm12762_vm3  ;;  %vm482_vm3 = vcmp.eq.s32.totalorder %v5689_v17, %v12760_v49  ;;  %vm12772_vm7 = vcmp.eq.s32.totalorder %v5689_v17, %v12750_v45  ;;  %v12854_v49 = vld [vmem:[#allocation43_spill] sm:$0xff]  ;;  %v13025_v45 = vld [vmem:[#allocation20_spill] sm:$0xff] }
 0x391   : > { %v12764_v9 = vsel %vm7422_vm4, 4294967295, %v12763_v9  ;;  %vm7436_vm10 = vmor %vm1815_vm0, %vm12765_vm5  ;;  %vm12771_vm0 = vcmp.eq.s32.totalorder %v5689_v17, %v5571_v5  ;;  %v12876_v5 = vld [vmem:[#allocation136_spill] sm:$0xff] }
 0x392   : > { %vm1816_vm5 = vmor %vm7402_vm14, %vm12771_vm0  ;;  %vm2200_vm14 = vcmp.eq.s32.totalorder %v5689_v17, %v7243_v3  ;;  %vm12782_vm0 = vcmp.eq.s32.totalorder %v5689_v17, %v12716_v36  ;;  %v7590_v36 = vpop.permute.xlu1 %2121 }
 0x393   : > { %vm7458_vm9 = vmor %vm482_vm3, %vm12772_vm7  ;;  %vm12779_vm7 = vcmp.eq.s32.totalorder %v5689_v17, %v12712_v10  ;;  %v13074_v10 = vld [vmem:[#allocation96_spill] sm:$0xff] }
 0x394   : > { %vm7469_vm4 = vmor %vm1816_vm5, %vm12776_vm15  ;;  %vm12783_vm15 = vnez %v12723_v40  ;;  %v12901_v40 = vld [vmem:[#allocation125_spill] sm:$0xff] }
 0x395   : > { %vm7480_vm3 = vmor %vm7270_vm8, %vm12779_vm7  ;;  %vm12787_vm7 = vcmp.eq.s32.totalorder %v5681_v16, %v12768_v7 }
 0x396   : > { %v12781_v15 = vsel %vm7480_vm3, 4294967295, %v12780_v15  ;;  %vm7489_vm5 = vmor %vm12783_vm15, %vm12782_vm0  ;;  %vm12790_vm0 = vcmp.eq.s32.totalorder %v5681_v16, %v12769_v19 }
 0x397   : > { %vm2263_vm8 = vmor %vm7436_vm10, %vm12786_vm13  ;;  %vm12793_vm13 = vcmp.eq.s32.totalorder %v5681_v16, %v12770_v52  ;;  %v13050_v52 = vmov 0 }
 0x398   : > { %vm7505_vm3 = vmor %vm7303_vm2, %vm12787_vm7  ;;  %vm12798_vm7 = vcmp.eq.s32.totalorder %v5689_v17, %v12768_v7  ;;  %v4422_v54 = vsel %vm2263_vm8, 1.0, %v4731_v23  ;;  %vm12813_vm8 = vcmp.eq.s32.totalorder %v5681_v16, %v12797_v56  ;;  %v12857_v7 = vld [vmem:[#allocation19_spill] sm:$0xff] }
 0x399   : > { %vm7514_vm15 = vmor %vm7312_vm1, %vm12790_vm0  ;;  %2516 = vmatmul.f32.gmra.mxu0 %v4422_v54  ;;  %v4711_v54 = vld [vmem:[%s4790_s30 + $0xf8] sm:$0xff] }
 0x39a   : > { %v12792_v51 = vsel %vm7514_vm15, 4294967295, %v12791_v51  ;;  %vm7523_vm10 = vmor %vm7321_vm6, %vm12793_vm13  ;;  %vm12801_vm6 = vcmp.eq.s32.totalorder %v5681_v16, %v12775_v53  ;;  %vm12802_vm13 = vnez %v12746_v38  ;;  %v7734_v37 = vpop.permute.xlu1 %2124  ;;  %v12919_v38 = vmov 0 }
 0x39b   : > { %vm7537_vm0 = vmor %vm7341_vm11, %vm12798_vm7  ;;  %vm1977_vm11 = vcmp.eq.s32.totalorder %v5681_v16, %v7410_v34  ;;  %vm865_vm7 = vcmp.eq.s32.totalorder %v5681_v16, %v12807_v20 }
 0x39c   : > { %v12800_v39 = vsel %vm7537_vm0, 4294967295, %v12799_v39  ;;  %vm7546_vm2 = vmor %vm12802_vm13, %vm12801_vm6  ;;  %vm12808_vm0 = vnez %v12753_v42  ;;  %vm12812_vm13 = vcmp.eq.s32.totalorder %v5681_v16, %v12796_v25  ;;  %v4710_v42 = vld [vmem:[%s4790_s30 + $0xf0] sm:$0xff] }
 0x39d   : > { %v12804_v28 = vsel %vm7546_vm2, 4294967295, %v12803_v28  ;;  %vm7552_vm1 = vmor %vm7469_vm4, %vm2200_vm14  ;;  %vm483_vm4 = vcmp.eq.s32.totalorder %v5681_v16, %v12811_v63  ;;  %1948 = vperm.xlu1 %4607, %v4710_v42   ;;  %2172 = vperm.xlu2 %4608, %v4710_v42   ;;  %v12931_v42 = vmov 0 }
 0x39e   : > { %vm7562_vm15 = vmor %vm12808_vm0, %vm1530_vm12  ;;  %v4423_v57 = vsel %vm7552_vm1, 1.0, %v4731_v23  ;;  %vm1088_vm1 = vcmp.eq.s32.totalorder %v5689_v17, %v12769_v19  ;;  %vm12822_vm0 = vcmp.eq.s32.totalorder %v5689_v17, %v12797_v56  ;;  %v12860_v19 = vmov 0  ;;  %v12981_v56 = vld [vmem:[#allocation46_spill] sm:$0xff] }
 0x39f   : > { %vm1817_vm12 = vmor %vm7523_vm10, %vm12812_vm13  ;;  %vm484_vm13 = vcmp.eq.s32.totalorder %v5689_v17, %v12811_v63  ;;  %2629 = vmatmul.f32.gmra.mxu1 %v4423_v57  ;;  %v2597_v57 = vpop.f32.mrf.mxu1 }
 0x3a0   : > { %vm7584_vm6 = vmor %vm483_vm4, %vm12813_vm8  ;;  %vm12818_vm8 = vnez %v12764_v9  ;;  %v2433_v9 = vld [vmem:[%s11922_s5] sm:$0xff] }
 0x3a1   : > { %v12815_v59 = vsel %vm7584_vm6, 4294967295, %v12814_v59  ;;  %vm7598_vm10 = vmor %vm1817_vm12, %vm1977_vm11  ;;  %vm1308_vm11 = vcmp.eq.s32.totalorder %v5689_v17, %v12775_v53  ;;  %vm12821_vm12 = vcmp.eq.s32.totalorder %v5689_v17, %v12796_v25  ;;  %vm12827_vm6 = vcmp.eq.s32.totalorder %v5689_v17, %v7410_v34  ;;  %v12855_v34 = vld [vmem:[#allocation97_spill] sm:$0xff]  ;;  %v12887_v25 = vld [vmem:[#allocation44_spill] sm:$0xff] }
 0x3a2   : > { %vm7610_vm14 = vmor %vm12818_vm8, %vm865_vm7  ;;  %vm1309_vm8 = vcmp.eq.s32.totalorder %v5681_v16, %v12825_v58  ;;  %v12869_v53 = vmov 0 }
 0x3a3   : > { %v12820_v2 = vsel %vm7610_vm14, 4294967295, %v12819_v2  ;;  %vm1818_vm4 = vmor %vm7562_vm15, %vm12821_vm12  ;;  %vm1311_vm14 = vcmp.eq.s32.totalorder %v5681_v16, %v12826_v41  ;;  %vm1310_vm12 = vcmp.eq.s32.totalorder %v5689_v17, %v12825_v58  ;;  %v13001_v58 = vmov 0 }
 0x3a4   : > { %vm7626_vm7 = vmor %vm484_vm13, %vm12822_vm0  ;;  %vm12830_vm0 = vcmp.eq.s32.totalorder %v5689_v17, %v12807_v20  ;;  %v12895_v20 = vmov 0 }
 0x3a5   : > { %v12824_v1 = vsel %vm7626_vm7, 4294967295, %v12823_v1  ;;  %vm7637_vm2 = vmor %vm1818_vm4, %vm12827_vm6  ;;  %vm1531_vm6 = vcmp.eq.s32.totalorder %v5681_v16, %v12833_v0  ;;  %vm12834_vm4 = vcmp.eq.s32.totalorder %v5681_v16, %v2119_v55  ;;  %vm12835_vm7 = vnez %v12781_v15  ;;  %v12877_v15 = vld [vmem:[#allocation137_spill] sm:$0xff]  ;;  %4610 = vset.pattern.permute.xlu1 %v12242_v44  ;;  %v7864_v44 = vpop.permute.xlu2 %1903  ;;  %4611 = vset.pattern.permute.xlu2 %v12259_v8  ;;  %v12904_v8 = vld [vmem:[#allocation18_spill] sm:$0xff] }
 0x3a6   : > { %v12829_v50 = vsel %vm7637_vm2, 4294967295, %v12828_v50  ;;  %vm7647_vm13 = vmor %vm7458_vm9, %vm12830_vm0  ;;  %1727 = vperm.xlu1 %4610, %v4711_v54   ;;  %1951 = vperm.xlu2 %4611, %v4711_v54  }
 0x3a7   : > { %vm2265_vm15 = vmor %vm7598_vm10, %vm12834_vm4  ;;  %vm12846_vm4 = vnez %v12829_v50  ;;  %v7916_v50 = vpop.permute.xlu1 %1906 }
 0x3a8   : > { %vm7661_vm2 = vmor %vm12835_vm7, %vm1088_vm1  ;;  %vm12842_vm1 = vnez %v12792_v51  ;;  %v4424_v29 = vsel %vm2265_vm15, 1.0, %v4731_v23  ;;  %vm12856_vm15 = vcmp.eq.s32.totalorder %v5689_v17, %v12833_v0  ;;  %v12913_v0 = vmov 0 }
 0x3a9   : > { %vm7667_vm9 = vmor %vm7489_vm5, %vm1308_vm11  ;;  %vm1755_vm5 = vcmp.eq.s32.totalorder %v5681_v16, %v5683_v22  ;;  %vm12845_vm11 = vcmp.eq.s32.totalorder %v5689_v17, %v2119_v55  ;;  %2519 = vmatmul.f32.gmra.mxu0 %v4424_v29  ;;  %v12969_v51 = vmov 0  ;;  %v13123_v29 = vld [vmem:[#allocation103_spill] sm:$0xff] }
 0x3aa   : > { %vm7677_vm10 = vmor %vm7505_vm3, %vm1309_vm8  ;;  %vm645_vm3 = vcmp.eq.s32.totalorder %v5681_v16, %v12854_v49 }
 0x3ab   : > { %vm7683_vm7 = vmor %vm12842_vm1, %vm1311_vm14  ;;  %vm12850_vm14 = vnez %v12800_v39  ;;  %v12891_v39 = vld [vmem:[#allocation157_spill] sm:$0xff] }
 0x3ac   : > { %vm7694_vm0 = vmor %vm12846_vm4, %vm12845_vm11  ;;  %vm12853_vm11 = vnez %v12804_v28  ;;  %v2484_v28 = vpop.f32.mrf.mxu0 }
 0x3ad   : > { %vm7705_vm8 = vmor %vm12850_vm14, %vm1310_vm12  ;;  %v4425_v35 = vsel %vm7694_vm0, 1.0, %v4731_v23  ;;  %vm12868_vm0 = vnez %v12820_v2 }
 0x3ae   : > { %vm1595_vm4 = vmor %vm12853_vm11, %vm1531_vm6  ;;  %vm12859_vm6 = vnez %v12815_v59  ;;  %2632 = vmatmul.f32.gmra.mxu1 %v4425_v35  ;;  %v12898_v59 = vld [vmem:[#allocation67_spill] sm:$0xff]  ;;  %4615 = vset.pattern.permute.xlu1 %v12276_v43 }
 0x3af   : > { %vm1596_vm1 = vmor %vm7667_vm9, %vm12856_vm15  ;;  %vm485_vm9 = vcmp.eq.s32.totalorder %v5681_v16, %v12857_v7  ;;  %vm12858_vm15 = vcmp.eq.s32.totalorder %v5681_v16, %v12849_v30  ;;  %v12948_v35 = vld [vmem:[#allocation71_spill] sm:$0xff]  ;;  %4613 = vset.pattern.permute.xlu2 %v12276_v43  ;;  %v8074_v55 = vpop.permute.xlu1 %1909 }
 0x3b0   : > { %vm1819_vm14 = vmor %vm1595_vm4, %vm1755_vm5  ;;  %vm12862_vm5 = vcmp.eq.s32.totalorder %v5689_v17, %v5683_v22  ;;  %v7783_v22 = vperm.slane %v2433_v9, 0  ;;  %v12946_v9 = vld [vmem:[#allocation63_spill] sm:$0xff] }
 0x3b1   : > { %vm7749_vm12 = vmor %vm12859_vm6, %vm12858_vm15  ;;  %vm12867_vm15 = vcmp.eq.s32.totalorder %v5681_v16, %v12855_v34 }
 0x3b2   : > { %v12861_v19 = vsel %vm7749_vm12, 4294967295, %v12860_v19  ;;  %vm7759_vm4 = vmor %vm1596_vm1, %vm12862_vm5  ;;  %vm12873_vm12 = vnez %v12824_v1  ;;  %vm12878_vm1 = vcmp.eq.s32.totalorder %v5681_v16, %v7590_v36  ;;  %vm646_vm5 = vcmp.eq.s32.totalorder %v5689_v17, %v12854_v49  ;;  %v8031_v49 = vpop.permute.xlu2 %2130 }
 0x3b3   : > { %vm7766_vm6 = vmor %vm485_vm9, %vm645_vm3  ;;  %vm12871_vm3 = vcmp.eq.s32.totalorder %v5681_v16, %v1898_v12  ;;  %v2485_v3 = vadd.f32 %v2484_v28, %v7783_v22 }
 0x3b4   : > { %v12866_v24 = vsel %vm7766_vm6, 4294967295, %v12865_v24  ;;  %vm7775_vm11 = vmor %vm12868_vm0, %vm12867_vm15  ;;  %vm12872_vm6 = vcmp.eq.s32.totalorder %v5689_v17, %v12849_v30  ;;  %vm1535_vm15 = vcmp.eq.s32.totalorder %v5681_v16, %v12876_v5  ;;  %v12937_v30 = vld [vmem:[#allocation156_spill] sm:$0xff] }
 0x3b5   : > { %v12870_v53 = vsel %vm7775_vm11, 4294967295, %v12869_v53  ;;  %vm2043_vm9 = vmor %vm1819_vm14, %vm12871_vm3  ;;  %v2598_v2 = vadd.f32 %v2597_v57, %v2485_v3  ;;  %v12993_v57 = vld [vmem:[#allocation139_spill] sm:$0xff] }
 0x3b6   : > { %vm7792_vm0 = vmor %vm12873_vm12, %vm12872_vm6  ;;  %vm12882_vm6 = vcmp.eq.s32.totalorder %v5689_v17, %v12855_v34 }
 0x3b7   : > { %vm7803_vm11 = vmor %vm2043_vm9, %vm12878_vm1  ;;  %vm12885_vm9 = vcmp.eq.s32.totalorder %v5689_v17, %v1898_v12  ;;  %v2693_v12 = vmax.f32 %v2598_v2, 0.0  ;;  %v12996_v2 = vld [vmem:[#allocation119_spill] sm:$0xff] }
 0x3b8   : > { %vm7816_vm3 = vmor %vm7647_vm13, %vm12882_vm6  ;;  %vm12888_vm6 = vcmp.eq.s32.totalorder %v5689_v17, %v12826_v41  ;;  %v4426_v63 = vsel %vm7803_vm11, 1.0, %v4731_v23  ;;  %vm12900_vm11 = vcmp.eq.s32.totalorder %v5689_v17, %v12877_v15  ;;  %v12906_v41 = vmov 0 }
 0x3b9   : > { %vm2044_vm14 = vmor %vm7759_vm4, %vm12885_vm9  ;;  %vm1757_vm4 = vcmp.eq.s32.totalorder %v5681_v16, %v12891_v39  ;;  %vm12892_vm9 = vcmp.eq.s32.totalorder %v5689_v17, %v7590_v36  ;;  %v12899_v36 = vld [vmem:[#allocation89_spill] sm:$0xff]  ;;  %2522 = vmatmul.f32.gmra.mxu0 %v4426_v63  ;;  %vm12912_vm13 = vcmp.eq.s32.totalorder %v5681_v16, %v12881_v4  ;;  %v13081_v63 = vmov 0 }
 0x3ba   : > { %vm7837_vm1 = vmor %vm7661_vm2, %vm12888_vm6  ;;  %v8191_v3 = vpop.permute.xlu2 %2133 }
 0x3bb   : > { %vm7847_vm12 = vmor %vm2044_vm14, %vm12892_vm9  ;;  %vm12897_vm14 = vcmp.eq.s32.totalorder %v5681_v16, %v12877_v15  ;;  %vm1091_vm9 = vcmp.eq.s32.totalorder %v5681_v16, %v12899_v36  ;;  %v12958_v15 = vmov 0 }
 0x3bc   : > { %vm7858_vm2 = vmor %vm7683_vm7, %vm1535_vm15  ;;  %v4427_v1 = vsel %vm7847_vm12, 1.0, %v4731_v23  ;;  %vm12911_vm12 = vcmp.eq.s32.totalorder %v5681_v16, %v12886_v62 }
 0x3bd   : > { %v12896_v20 = vsel %vm7858_vm2, 4294967295, %v12895_v20  ;;  %vm1597_vm7 = vmor %vm7677_vm10, %vm12897_vm14  ;;  %2635 = vmatmul.f32.gmra.mxu1 %v4427_v1  ;;  %vm12929_vm2 = vcmp.eq.s32.totalorder %v5681_v16, %v12901_v40  ;;  %v12998_v1 = vmov 0 }
 0x3be   : > { %vm1598_vm6 = vmor %vm7705_vm8, %vm12900_vm11  ;;  %vm487_vm8 = vcmp.eq.s32.totalorder %v5681_v16, %v12904_v8  ;;  %vm12905_vm11 = vcmp.eq.s32.totalorder %v5689_v17, %v12857_v7  ;;  %v12949_v7 = vld [vmem:[#allocation118_spill] sm:$0xff] }
 0x3bf   : > { %vm7898_vm15 = vmor %vm1597_vm7, %vm1757_vm4  ;;  %vm12908_vm7 = vcmp.eq.s32.totalorder %v5689_v17, %v12891_v39 }
 0x3c0   : > { %vm7910_vm14 = vmor %vm12905_vm11, %vm646_vm5  ;;  %vm488_vm11 = vcmp.eq.s32.totalorder %v5689_v17, %v12904_v8  ;;  %vm12918_vm5 = vnez %v12861_v19  ;;  %v13005_v8 = vmov 0 }
 0x3c1   : > { %v12907_v41 = vsel %vm7910_vm14, 4294967295, %v12906_v41  ;;  %vm7921_vm10 = vmor %vm1598_vm6, %vm12908_vm7  ;;  %vm12915_vm6 = vcmp.eq.s32.totalorder %v5681_v16, %v12887_v25 }
 0x3c2   : > { %vm7935_vm4 = vmor %vm12912_vm13, %vm12911_vm12  ;;  %vm1314_vm13 = vcmp.eq.s32.totalorder %v5689_v17, %v12901_v40  ;;  %vm2206_vm12 = vcmp.eq.s32.totalorder %v5689_v17, %v7734_v37  ;;  %v12994_v40 = vmov 0 }
 0x3c3   : > { %v12914_v0 = vsel %vm7935_vm4, 4294967295, %v12913_v0  ;;  %vm7942_vm7 = vmor %vm487_vm8, %vm12915_vm6  ;;  %vm12921_vm8 = vcmp.eq.s32.totalorder %v5681_v16, %v7673_v14 }
 0x3c4   : > { %v12917_v60 = vsel %vm7942_vm7, 4294967295, %v12916_v60  ;;  %vm7951_vm14 = vmor %vm12918_vm5, %vm1091_vm9  ;;  %vm12922_vm7 = vcmp.eq.s32.totalorder %v5689_v17, %v12887_v25  ;;  %vm12925_vm5 = vcmp.eq.s32.totalorder %v5681_v16, %v12898_v59  ;;  %v12977_v25 = vmov 0 }
 0x3c5   : > { %v12920_v38 = vsel %vm7951_vm14, 4294967295, %v12919_v38  ;;  %vm2045_vm6 = vmor %vm7898_vm15, %vm12921_vm8  ;;  %vm12926_vm14 = vnez %v12866_v24  ;;  %vm12930_vm15 = vnez %v12870_v53  ;;  %v12952_v24 = vld [vmem:[#allocation93_spill] sm:$0xff]  ;;  %v12953_v53 = vld [vmem:[#allocation146_spill] sm:$0xff] }
 0x3c6   : > { %vm7967_vm9 = vmor %vm488_vm11, %vm12922_vm7  ;;  %vm1536_vm11 = vcmp.eq.s32.totalorder %v5689_v17, %v12876_v5  ;;  %vm12933_vm7 = vcmp.eq.s32.totalorder %v5681_v16, %v7734_v37  ;;  %v2128_v37 = vpop.permute.xlu0 %2127  ;;  %v12955_v5 = vmov 0 }
 0x3c7   : > { %v12924_v48 = vsel %vm7967_vm9, 4294967295, %v12923_v48  ;;  %vm7976_vm4 = vmor %vm12926_vm14, %vm12925_vm5  ;;  %vm12934_vm14 = vcmp.eq.s32.totalorder %v5689_v17, %v12899_v36  ;;  %v12992_v36 = vld [vmem:[#allocation100_spill] sm:$0xff] }
 0x3c8   : > { %vm7985_vm8 = vmor %vm12930_vm15, %vm12929_vm2  ;;  %vm1759_vm2 = vcmp.eq.s32.totalorder %v5681_v16, %v12937_v30  ;;  %vm12938_vm15 = vcmask 261120  }
 0x3c9   : > { %v12932_v42 = vsel %vm7985_vm8, 4294967295, %v12931_v42  ;;  %vm2269_vm9 = vmor %vm2045_vm6, %vm12933_vm7  ;;  %4464 = vmatmul.msk.f32.vlgmr.msra.gmra.mxu2 %vm12938_vm15, %v2693_v12  ;;  %vm12939_vm8 = vcmp.eq.s32.totalorder %v5689_v17, %v7673_v14  ;;  %v13037_v14 = vld [vmem:[#allocation120_spill] sm:$0xff] }
 0x3ca   : > { %vm7999_vm5 = vmor %vm7792_vm0, %vm12934_vm14  ;;  %vm1983_vm0 = vcmp.eq.s32.totalorder %v5681_v16, %v7864_v44  ;;  %v4428_v34 = vsel %vm2269_vm9, 1.0, %v4731_v23 }
 0x3cb   : > { %vm2046_vm6 = vmor %vm7921_vm10, %vm12939_vm8  ;;  %vm1760_vm10 = vcmp.eq.s32.totalorder %v5689_v17, %v12937_v30  ;;  %2525 = vmatmul.f32.gmra.mxu0 %v4428_v34  ;;  %v8370_v34 = vpop.permute.xlu2 %1915 }
 0x3cc   : > { %vm8013_vm7 = vmor %vm7816_vm3, %vm1314_vm13  ;;  %vm873_vm13 = vcmp.eq.s32.totalorder %v5681_v16, %v12946_v9 }
 0x3cd   : > { %vm8019_vm14 = vmor %vm2046_vm6, %vm2206_vm12  ;;  %vm12947_vm12 = vnez %v12896_v20  ;;  %v12986_v20 = vld [vmem:[#allocation21_spill] sm:$0xff] }
 0x3ce   : > { %vm8025_vm15 = vmor %vm7837_vm1, %vm1536_vm11  ;;  %vm870_vm1 = vcmp.eq.s32.totalorder %v5689_v17, %v12898_v59  ;;  %vm1984_vm11 = vcmp.eq.s32.totalorder %v5689_v17, %v7864_v44  ;;  %v4429_v19 = vsel %vm8019_vm14, 1.0, %v4731_v23  ;;  %vm12957_vm14 = vnez %v12907_v41  ;;  %v12991_v59 = vld [vmem:[#allocation92_spill] sm:$0xff] }
 0x3cf   : > { %vm1823_vm8 = vmor %vm12947_vm12, %vm1759_vm2  ;;  %vm490_vm12 = vcmp.eq.s32.totalorder %v5689_v17, %v12881_v4  ;;  %2638 = vmatmul.f32.gmra.mxu1 %v4429_v19  ;;  %v12965_v4 = vmov 0  ;;  %v12987_v44 = vmov 0  ;;  %v13009_v41 = vmov 0 }
 0x3d0   : > { %vm8056_vm2 = vmor %vm1823_vm8, %vm1983_vm0  ;;  %vm12954_vm8 = vcmp.eq.s32.totalorder %v5689_v17, %v12886_v62  ;;  %v12974_v62 = vmov 0 }
 0x3d1   : > { %vm1824_vm0 = vmor %vm8025_vm15, %vm1760_vm10  ;;  %vm1316_vm15 = vcmp.eq.s32.totalorder %v5689_v17, %v12949_v7  ;;  %vm2208_vm10 = vcmp.eq.s32.totalorder %v5689_v17, %v2128_v37 }
 0x3d2   : > { %vm8079_vm9 = vmor %vm490_vm12, %vm12954_vm8  ;;  %vm12960_vm8 = vnez %v12914_v0 }
 0x3d3   : > { %v12956_v5 = vsel %vm8079_vm9, 4294967295, %v12955_v5  ;;  %vm8088_vm3 = vmor %vm12957_vm14, %vm870_vm1  ;;  %vm12963_vm1 = vcmp.eq.s32.totalorder %v5681_v16, %v12948_v35  ;;  %vm12964_vm14 = vnez %v12917_v60  ;;  %v13109_v60 = vld [vmem:[#allocation23_spill] sm:$0xff] }
 0x3d4   : > { %v12959_v15 = vsel %vm8088_vm3, 4294967295, %v12958_v15  ;;  %vm2048_vm12 = vmor %vm1824_vm0, %vm1984_vm11  ;;  %vm12967_vm11 = vcmp.eq.s32.totalorder %v5681_v16, %v12949_v7  ;;  %vm12968_vm0 = vnez %v12920_v38  ;;  %v13022_v38 = vld [vmem:[#allocation70_spill] sm:$0xff] }
 0x3d5   : > { %vm8103_vm6 = vmor %vm12960_vm8, %vm873_vm13  ;;  %vm1538_vm13 = vcmp.eq.s32.totalorder %v5689_v17, %v12953_v53  ;;  %vm12971_vm8 = vcmp.eq.s32.totalorder %v5681_v16, %v2128_v37 }
 0x3d6   : > { %v12962_v32 = vsel %vm8103_vm6, 4294967295, %v12961_v32  ;;  %vm8112_vm3 = vmor %vm12964_vm14, %vm12963_vm1  ;;  %vm12972_vm14 = vcmp.eq.s32.totalorder %v5689_v17, %v12948_v35  ;;  %v13045_v35 = vld [vmem:[#allocation138_spill] sm:$0xff] }
 0x3d7   : > { %v12966_v4 = vsel %vm8112_vm3, 4294967295, %v12965_v4  ;;  %vm8121_vm9 = vmor %vm12968_vm0, %vm12967_vm11  ;;  %vm12973_vm3 = vnez %v12924_v48  ;;  %vm12976_vm11 = vcmp.eq.s32.totalorder %v5681_v16, %v12952_v24 }
 0x3d8   : > { %v12970_v51 = vsel %vm8121_vm9, 4294967295, %v12969_v51  ;;  %vm2271_vm1 = vmor %vm8056_vm2, %vm12971_vm8  ;;  %vm1761_vm2 = vcmp.eq.s32.totalorder %v5681_v16, %v5707_v21  ;;  %vm12979_vm8 = vcmp.eq.s32.totalorder %v5681_v16, %v12953_v53  ;;  %v1913_v53 = vpop.permute.xlu0 %1912 }
 0x3d9   : > { %vm8136_vm6 = vmor %vm12973_vm3, %vm12972_vm14  ;;  %vm12980_vm3 = vnez %v12932_v42  ;;  %v4430_v28 = vsel %vm2271_vm1, 1.0, %v4731_v23  ;;  %vm1317_vm1 = vcmp.eq.s32.totalorder %v5681_v16, %v12996_v2  ;;  %v13116_v42 = vld [vmem:[#allocation48_spill] sm:$0xff] }
 0x3da   : > { %v12975_v62 = vsel %vm8136_vm6, 4294967295, %v12974_v62  ;;  %vm8145_vm0 = vmor %vm7976_vm4, %vm12976_vm11  ;;  %vm651_vm6 = vcmp.eq.s32.totalorder %v5681_v16, %v12981_v56  ;;  %vm1985_vm4 = vcmp.eq.s32.totalorder %v5681_v16, %v7916_v50  ;;  %2528 = vmatmul.f32.gmra.mxu0 %v4430_v28  ;;  %v13073_v28 = vld [vmem:[#allocation39_spill] sm:$0xff] }
 0x3db   : > { %v12978_v25 = vsel %vm8145_vm0, 4294967295, %v12977_v25  ;;  %vm1601_vm14 = vmor %vm12980_vm3, %vm12979_vm8  ;;  %vm1762_vm0 = vcmp.eq.s32.totalorder %v5689_v17, %v5707_v21  ;;  %v8227_v21 = vpop.permute.xlu1 %2136 }
 0x3dc   : > { %vm8160_vm9 = vmor %vm7999_vm5, %vm1316_vm15  ;;  %vm491_vm5 = vcmp.eq.s32.totalorder %v5681_v16, %v12986_v20  ;;  %vm652_vm15 = vcmp.eq.s32.totalorder %v5689_v17, %v12981_v56  ;;  %v2600_v56 = vpop.f32.mrf.mxu1 }
 0x3dd   : > { %vm2272_vm11 = vmor %vm2048_vm12, %vm2208_vm10  ;;  %vm1986_vm10 = vcmp.eq.s32.totalorder %v5689_v17, %v7916_v50  ;;  %v13011_v50 = vld [vmem:[#allocation159_spill] sm:$0xff] }
 0x3de   : > { %vm8171_vm8 = vmor %vm8013_vm7, %vm1538_vm13  ;;  %vm874_vm7 = vcmp.eq.s32.totalorder %v5689_v17, %v12946_v9  ;;  %vm1094_vm13 = vcmp.eq.s32.totalorder %v5689_v17, %v12952_v24  ;;  %v4431_v54 = vsel %vm2272_vm11, 1.0, %v4731_v23  ;;  %v13126_v9 = vld [vmem:[#allocation121_spill] sm:$0xff]  ;;  %v13135_v24 = vld [vmem:[#allocation22_spill] sm:$0xff] }
 0x3df   : > { %vm1825_vm12 = vmor %vm1601_vm14, %vm1761_vm2  ;;  %vm492_vm2 = vcmp.eq.s32.totalorder %v5689_v17, %v12986_v20  ;;  %vm1097_vm14 = vcmp.eq.s32.totalorder %v5681_v16, %v12991_v59  ;;  %2641 = vmatmul.f32.gmra.mxu1 %v4431_v54  ;;  %v13079_v54 = vld [vmem:[#allocation11_spill] sm:$0xff] }
 0x3e0   : > { %vm8181_vm3 = vmor %vm491_vm5, %vm651_vm6 }
 0x3e1   : > { %v12988_v44 = vsel %vm8181_vm3, 4294967295, %v12987_v44  ;;  %vm8197_vm6 = vmor %vm1825_vm12, %vm1985_vm4  ;;  %vm1096_vm12 = vcmp.eq.s32.totalorder %v5689_v17, %v12992_v36 }
 0x3e2   : > { %vm1826_vm4 = vmor %vm8171_vm8, %vm1762_vm0  ;;  %vm12997_vm8 = vnez %v12956_v5  ;;  %v13058_v5 = vmov 0 }
 0x3e3   : > { %vm8217_vm11 = vmor %vm492_vm2, %vm652_vm15  ;;  %vm13000_vm2 = vnez %v12959_v15  ;;  %v8392_v7 = vpop.permute.xlu1 %2139 }
 0x3e4   : > { %v12995_v40 = vsel %vm8217_vm11, 4294967295, %v12994_v40  ;;  %vm2050_vm0 = vmor %vm1826_vm4, %vm1986_vm10  ;;  %vm1540_vm10 = vcmp.eq.s32.totalorder %v5689_v17, %v12993_v57  ;;  %vm13003_vm4 = vcmp.eq.s32.totalorder %v5681_v16, %v8031_v49  ;;  %vm13015_vm11 = vnez %v12975_v62  ;;  %v13068_v62 = vld [vmem:[#allocation74_spill] sm:$0xff] }
 0x3e5   : > { %vm8237_vm15 = vmor %vm12997_vm8, %vm874_vm7  ;;  %vm13004_vm8 = vnez %v12962_v32  ;;  %v13064_v32 = vld [vmem:[#allocation158_spill] sm:$0xff] }
 0x3e6   : > { %v12999_v1 = vsel %vm8237_vm15, 4294967295, %v12998_v1  ;;  %vm8246_vm5 = vmor %vm13000_vm2, %vm1094_vm13  ;;  %vm13007_vm13 = vcmp.eq.s32.totalorder %v5681_v16, %v12992_v36  ;;  %vm13008_vm2 = vnez %v12966_v4 }
 0x3e7   : > { %v13002_v58 = vsel %vm8246_vm5, 4294967295, %v13001_v58  ;;  %vm2273_vm7 = vmor %vm8197_vm6, %vm13003_vm4  ;;  %vm13012_vm4 = vcmp.eq.s32.totalorder %v5681_v16, %v12993_v57  ;;  %vm1987_vm6 = vcmp.eq.s32.totalorder %v5681_v16, %v8074_v55  ;;  %v13087_v57 = vmov 0 }
 0x3e8   : > { %vm8262_vm15 = vmor %vm13004_vm8, %vm1097_vm14  ;;  %vm13013_vm14 = vnez %v12970_v51  ;;  %v4432_v12 = vsel %vm2273_vm7, 1.0, %v4731_v23  ;;  %v13163_v51 = vld [vmem:[#allocation161_spill] sm:$0xff] }
 0x3e9   : > { %v13006_v8 = vsel %vm8262_vm15, 4294967295, %v13005_v8  ;;  %vm8271_vm5 = vmor %vm13008_vm2, %vm13007_vm13  ;;  %vm653_vm15 = vcmp.eq.s32.totalorder %v5681_v16, %v13014_v31  ;;  %vm13018_vm13 = vnez %v12978_v25  ;;  %2531 = vmatmul.f32.gmra.mxu0 %v4432_v12 }
 0x3ea   : > { %v13010_v41 = vsel %vm8271_vm5, 4294967295, %v13009_v41  ;;  %vm1603_vm8 = vmor %vm13013_vm14, %vm13012_vm4  ;;  %vm13021_vm4 = vcmp.eq.s32.totalorder %v5689_v17, %v8031_v49  ;;  %vm875_vm5 = vcmp.eq.s32.totalorder %v5681_v16, %v13022_v38  ;;  %v13038_v49 = vld [vmem:[#allocation128_spill] sm:$0xff] }
 0x3eb   : > { %vm8286_vm3 = vmor %vm13015_vm11, %vm1096_vm12  ;;  %vm493_vm12 = vcmp.eq.s32.totalorder %v5681_v16, %v13025_v45  ;;  %v8607_v12 = vpop.permute.xlu1 %1921 }
 0x3ec   : > { %vm8292_vm2 = vmor %vm13018_vm13, %vm1317_vm1 }
 0x3ed   : > { %vm2274_vm14 = vmor %vm2050_vm0, %vm13021_vm4  ;;  %vm654_vm0 = vcmp.eq.s32.totalorder %v5689_v17, %v13014_v31  ;;  %vm13026_vm4 = vcmp.eq.s32.totalorder %v5681_v16, %v13011_v50  ;;  %v8586_v31 = vpop.permute.xlu2 %1918 }
 0x3ee   : > { %vm8308_vm1 = vmor %vm8160_vm9, %vm1540_vm10  ;;  %vm876_vm9 = vcmp.eq.s32.totalorder %v5689_v17, %v13022_v38  ;;  %vm2211_vm10 = vcmp.eq.s32.totalorder %v5681_v16, %v8191_v3  ;;  %v4433_v46 = vsel %vm2274_vm14, 1.0, %v4731_v23  ;;  %vm13053_vm14 = vnez %v13002_v58  ;;  %v13099_v58 = vld [vmem:[#allocation141_spill] sm:$0xff] }
 0x3ef   : > { %vm1827_vm7 = vmor %vm1603_vm8, %vm13026_vm4  ;;  %vm13031_vm8 = vnez %v12988_v44  ;;  %2644 = vmatmul.f32.gmra.mxu1 %v4433_v46  ;;  %vm13034_vm4 = vcmp.eq.s32.totalorder %v5689_v17, %v13011_v50  ;;  %v13111_v38 = vmov 0  ;;  %v2603_v46 = vpop.f32.mrf.mxu1  ;;  %v2143_v44 = vpop.permute.xlu0 %2142  ;;  %v13289_v50 = vmov 0 }
 0x3f0   : > { %vm8321_vm11 = vmor %vm493_vm12, %vm653_vm15  ;;  %vm494_vm15 = vcmp.eq.s32.totalorder %v5689_v17, %v13025_v45  ;;  %v13216_v45 = vld [vmem:[#allocation160_spill] sm:$0xff] }
 0x3f1   : > { %vm8333_vm13 = vmor %vm1827_vm7, %vm1987_vm6  ;;  %vm13052_vm6 = vcmp.eq.s32.totalorder %v5689_v17, %v12996_v2  ;;  %v13182_v2 = vld [vmem:[#allocation140_spill] sm:$0xff] }
 0x3f2   : > { %vm8344_vm12 = vmor %vm13031_vm8, %vm875_vm5 }
 0x3f3   : > { %vm1828_vm7 = vmor %vm8308_vm1, %vm13034_vm4  ;;  %vm13039_vm1 = vcmp.eq.s32.totalorder %v5689_v17, %v8074_v55  ;;  %v2487_v55 = vpop.f32.mrf.mxu0 }
 0x3f4   : > { %vm8360_vm5 = vmor %vm494_vm15, %vm654_vm0  ;;  %vm13042_vm0 = vnez %v12995_v40  ;;  %v2488_v4 = vadd.f32 %v2487_v55, %v7783_v22  ;;  %v13181_v40 = vld [vmem:[#allocation95_spill] sm:$0xff] }
 0x3f5   : > { %vm8375_vm4 = vmor %vm1828_vm7, %vm13039_vm1  ;;  %vm13049_vm1 = vnez %v12999_v1  ;;  %v13238_v55 = vld [vmem:[#allocation151_spill] sm:$0xff] }
 0x3f6   : > { %vm8384_vm15 = vmor %vm13042_vm0, %vm876_vm9  ;;  %vm13048_vm9 = vcmp.eq.s32.totalorder %v5689_v17, %v12991_v59  ;;  %v2601_v20 = vadd.f32 %v2600_v56, %v2488_v4  ;;  %v13243_v4 = vld [vmem:[#allocation105_spill] sm:$0xff] }
 0x3f7   : > { %vm8399_vm7 = vmor %vm8333_vm13, %vm2211_vm10  ;;  %vm13056_vm10 = vcmp.eq.s32.totalorder %v5681_v16, %v13037_v14 }
 0x3f8   : > { %vm8408_vm0 = vmor %vm13049_vm1, %vm13048_vm9  ;;  %vm13057_vm9 = vnez %v13006_v8  ;;  %v4434_v39 = vsel %vm8399_vm7, 1.0, %v4731_v23  ;;  %vm13080_vm7 = vcmp.eq.s32.totalorder %v5681_v16, %v13068_v62  ;;  %v2694_v36 = vmax.f32 %v2601_v20, 0.0  ;;  %v13100_v8 = vld [vmem:[#allocation149_spill] sm:$0xff] }
 0x3f9   : > { %v13051_v52 = vsel %vm8408_vm0, 4294967295, %v13050_v52  ;;  %vm8417_vm8 = vmor %vm13053_vm14, %vm13052_vm6  ;;  %vm13060_vm14 = vcmp.eq.s32.totalorder %v5681_v16, %v13038_v49  ;;  %vm13061_vm6 = vnez %v13010_v41  ;;  %2534 = vmatmul.f32.gmra.mxu0 %v4434_v39  ;;  %v13174_v20 = vld [vmem:[#allocation73_spill] sm:$0xff]  ;;  %v13379_v41 = vld [vmem:[#allocation102_spill] sm:$0xff] }
 0x3fa   : > { %vm8428_vm1 = vmor %vm13057_vm9, %vm13056_vm10  ;;  %vm13065_vm10 = vcmp.eq.s32.totalorder %v5689_v17, %v8191_v3 }
 0x3fb   : > { %v13059_v5 = vsel %vm8428_vm1, 4294967295, %v13058_v5  ;;  %vm8437_vm0 = vmor %vm13061_vm6, %vm13060_vm14  ;;  %vm13069_vm6 = vcmp.eq.s32.totalorder %v5689_v17, %v13038_v49  ;;  %vm13072_vm1 = vcmp.eq.s32.totalorder %v5681_v16, %v13045_v35  ;;  %vm13075_vm14 = vcmp.eq.s32.totalorder %v5689_v17, %v13045_v35  ;;  %v2490_v0 = vpop.f32.mrf.mxu0  ;;  %v13125_v49 = vld [vmem:[#allocation66_spill] sm:$0xff] }
 0x3fc   : > { %vm8449_vm9 = vmor %vm8375_vm4, %vm13065_vm10  ;;  %v2491_v48 = vadd.f32 %v2490_v0, %v7783_v22  ;;  %v13130_v35 = vmov 0 }
 0x3fd   : > { %vm8460_vm13 = vmor %vm8286_vm3, %vm13069_vm6  ;;  %vm13076_vm3 = vcmp.eq.s32.totalorder %v5681_v16, %v13064_v32  ;;  %v4435_v3 = vsel %vm8449_vm9, 1.0, %v4731_v23  ;;  %vm1322_vm9 = vcmp.eq.s32.totalorder %v5689_v17, %v13037_v14 }
 0x3fe   : > { %vm1605_vm4 = vmor %vm8292_vm2, %vm13072_vm1  ;;  %2647 = vmatmul.f32.gmra.mxu1 %v4435_v3  ;;  %v2604_v14 = vadd.f32 %v2603_v46, %v2491_v48  ;;  %v8811_v3 = vpop.permute.xlu1 %1924  ;;  %v13217_v46 = vld [vmem:[#allocation42_spill] sm:$0xff]  ;;  %v13303_v48 = vld [vmem:[#allocation132_spill] sm:$0xff] }
 0x3ff   : > { %vm1606_vm2 = vmor %vm8417_vm8, %vm13075_vm14  ;;  %vm495_vm14 = vcmp.eq.s32.totalorder %v5681_v16, %v13079_v54 }
 0x400   : > { %vm8491_vm6 = vmor %vm1605_vm4, %vm13076_vm3  ;;  %vm13083_vm3 = vcmp.eq.s32.totalorder %v5689_v17, %v13064_v32  ;;  %v2695_v19 = vmax.f32 %v2604_v14, 0.0  ;;  %v13241_v32 = vmov 0 }
 0x401   : > { %vm8507_vm10 = vmor %vm8321_vm11, %vm13080_vm7  ;;  %vm496_vm11 = vcmp.eq.s32.totalorder %v5689_v17, %v13079_v54  ;;  %vm13086_vm7 = vcmp.eq.s32.totalorder %v5681_v16, %v13073_v28 }
 0x402   : > { %v13082_v63 = vsel %vm8507_vm10, 4294967295, %v13081_v63  ;;  %vm8516_vm8 = vmor %vm1606_vm2, %vm13083_vm3  ;;  %vm13089_vm2 = vcmp.eq.s32.totalorder %v5681_v16, %v13074_v10 }
 0x403   : > { %vm8526_vm1 = vmor %vm495_vm14, %vm13086_vm7  ;;  %vm13092_vm14 = vcmp.eq.s32.totalorder %v5681_v16, %v1913_v53  ;;  %v2493_v25 = vpop.f32.mrf.mxu0 }
 0x404   : > { %v13088_v57 = vsel %vm8526_vm1, 4294967295, %v13087_v57  ;;  %vm8535_vm3 = vmor %vm8344_vm12, %vm13089_vm2  ;;  %vm13093_vm1 = vcmp.eq.s32.totalorder %v5689_v17, %v13073_v28  ;;  %vm13096_vm12 = vcmp.eq.s32.totalorder %v5689_v17, %v13068_v62  ;;  %v8765_v62 = vpop.permute.xlu2 %2145  ;;  %v2494_v39 = vadd.f32 %v2493_v25, %v7783_v22  ;;  %v2606_v28 = vpop.f32.mrf.mxu1 }
 0x405   : > { %vm2053_vm7 = vmor %vm8491_vm6, %vm13092_vm14  ;;  %vm13101_vm14 = vcmask 261120   ;;  %vm13127_vm6 = vcmp.eq.s32.totalorder %v5681_v16, %v5731_v47  ;;  %v13340_v25 = vmov 0 }
 0x406   : > { %vm8550_vm10 = vmor %vm496_vm11, %vm13093_vm1  ;;  %4465 = vmatmul.msk.f32.gmra.mxu2 %vm13101_vm14, %v2694_v36  ;;  %vm13102_vm1 = vcmp.eq.s32.totalorder %v5681_v16, %v8227_v21  ;;  %v2607_v54 = vadd.f32 %v2606_v28, %v2494_v39  ;;  %v13542_v39 = vld [vmem:[#allocation150_spill] sm:$0xff] }
 0x407   : > { %vm8559_vm2 = vmor %vm8360_vm5, %vm13096_vm12  ;;  %vm13105_vm5 = vcmp.eq.s32.totalorder %v5689_v17, %v13074_v10 }
 0x408   : > { %vm8571_vm11 = vmor %vm2053_vm7, %vm13102_vm1  ;;  %vm13108_vm7 = vcmp.eq.s32.totalorder %v5689_v17, %v1913_v53  ;;  %vm13118_vm1 = vcmp.eq.s32.totalorder %v5681_v16, %v13099_v58  ;;  %v13138_v53 = vmov 0  ;;  %v2696_v1 = vmax.f32 %v2607_v54, 0.0 }
 0x409   : > { %vm8580_vm12 = vmor %vm8384_vm15, %vm13105_vm5  ;;  %vm13110_vm5 = vnez %v13051_v52  ;;  %v4436_v30 = vsel %vm8571_vm11, 1.0, %v4731_v23  ;;  %v13232_v52 = vmov 0 }
 0x40a   : > { %vm2054_vm14 = vmor %vm8516_vm8, %vm13108_vm7  ;;  %vm13113_vm8 = vcmp.eq.s32.totalorder %v5689_v17, %v8227_v21  ;;  %v13120_v21 = vmov 0  ;;  %2537 = vmatmul.f32.gmra.mxu0 %v4436_v30 }
 0x40b   : > { %vm8601_vm4 = vmor %vm13110_vm5, %vm1322_vm9  ;;  %vm13119_vm9 = vnez %v13059_v5  ;;  %v13150_v5 = vmov 0 }
 0x40c   : > { %v13112_v38 = vsel %vm8601_vm4, 4294967295, %v13111_v38  ;;  %vm8613_vm7 = vmor %vm2054_vm14, %vm13113_vm8  ;;  %vm13117_vm14 = vcmp.eq.s32.totalorder %v5681_v16, %v13100_v8 }
 0x40d   : > { %vm1607_vm8 = vmor %vm8437_vm0, %vm13117_vm14  ;;  %vm13124_vm0 = vcmp.eq.s32.totalorder %v5689_v17, %v13100_v8  ;;  %v4437_v37 = vsel %vm8613_vm7, 1.0, %v4731_v23  ;;  %vm13137_vm7 = vcmp.eq.s32.totalorder %v5689_v17, %v13109_v60  ;;  %vm13140_vm14 = vcmp.eq.s32.totalorder %v5681_v16, %v13123_v29 }
 0x40e   : > { %vm8636_vm5 = vmor %vm13119_vm9, %vm13118_vm1  ;;  %2650 = vmatmul.f32.gmra.mxu1 %v4437_v37  ;;  %v13190_v8 = vmov 0 }
 0x40f   : > { %v13121_v21 = vsel %vm8636_vm5, 4294967295, %v13120_v21  ;;  %vm1608_vm1 = vmor %vm8460_vm13, %vm13124_vm0  ;;  %vm13128_vm13 = vcmp.eq.s32.totalorder %v5681_v16, %v13116_v42  ;;  %vm13129_vm0 = vcmp.eq.s32.totalorder %v5681_v16, %v13109_v60  ;;  %vm13152_vm5 = vcmp.eq.s32.totalorder %v5681_v16, %v13126_v9  ;;  %v13384_v60 = vld [vmem:[#allocation126_spill] sm:$0xff] }
 0x410   : > { %vm1831_vm11 = vmor %vm1607_vm8, %vm13127_vm6  ;;  %vm13132_vm6 = vcmp.eq.s32.totalorder %v5689_v17, %v5731_v47  ;;  %v13330_v47 = vld [vmem:[#allocation98_spill] sm:$0xff] }
 0x411   : > { %vm8669_vm9 = vmor %vm13129_vm0, %vm13128_vm13  ;;  %vm499_vm13 = vcmp.eq.s32.totalorder %v5681_v16, %v13135_v24  ;;  %vm13136_vm0 = vcmp.eq.s32.totalorder %v5689_v17, %v13116_v42  ;;  %v2496_v42 = vpop.f32.mrf.mxu0 }
 0x412   : > { %v13131_v35 = vsel %vm8669_vm9, 4294967295, %v13130_v35  ;;  %vm8682_vm8 = vmor %vm1608_vm1, %vm13132_vm6  ;;  %vm13141_vm1 = vnez %v13082_v63  ;;  %v13177_v63 = vld [vmem:[#allocation131_spill] sm:$0xff] }
 0x413   : > { %vm8694_vm15 = vmor %vm13137_vm7, %vm13136_vm0  ;;  %vm13144_vm7 = vcmp.eq.s32.totalorder %v5681_v16, %v8370_v34 }
 0x414   : > { %v13139_v53 = vsel %vm8694_vm15, 4294967295, %v13138_v53  ;;  %vm8703_vm6 = vmor %vm13141_vm1, %vm13140_vm14  ;;  %vm13145_vm15 = vcmp.eq.s32.totalorder %v5681_v16, %v13122_v18  ;;  %vm13148_vm14 = vcmp.eq.s32.totalorder %v5681_v16, %v13125_v49  ;;  %vm13149_vm1 = vnez %v13088_v57  ;;  %v13180_v57 = vld [vmem:[#allocation76_spill] sm:$0xff] }
 0x415   : > { %vm2055_vm0 = vmor %vm1831_vm11, %vm13144_vm7  ;;  %vm13156_vm7 = vcmp.eq.s32.totalorder %v5681_v16, %v8392_v7 }
 0x416   : > { %vm8717_vm4 = vmor %vm499_vm13, %vm13145_vm15  ;;  %vm1546_vm15 = vcmp.eq.s32.totalorder %v5689_v17, %v13099_v58  ;;  %vm13155_vm13 = vcmask 261120   ;;  %v13186_v58 = vmov 0 }
 0x417   : > { %vm8726_vm9 = vmor %vm13149_vm1, %vm13148_vm14  ;;  %4466 = vmatmul.msk.f32.gmra.mxu2 %vm13155_vm13, %v2695_v19  ;;  %vm13157_vm1 = vcmp.eq.s32.totalorder %v5689_v17, %v13125_v49  ;;  %v8972_v49 = vpop.permute.xlu2 %2148 }
 0x418   : > { %v13151_v5 = vsel %vm8726_vm9, 4294967295, %v13150_v5  ;;  %vm8735_vm11 = vmor %vm8535_vm3, %vm13152_vm5  ;;  %vm13160_vm3 = vcmp.eq.s32.totalorder %v5689_v17, %v13123_v29 }
 0x419   : > { %vm2279_vm14 = vmor %vm2055_vm0, %vm13156_vm7  ;;  %vm13165_vm7 = vcmp.eq.s32.totalorder %v5689_v17, %v13126_v9  ;;  %v2609_v9 = vpop.f32.mrf.mxu1 }
 0x41a   : > { %vm8750_vm9 = vmor %vm8550_vm10, %vm13157_vm1  ;;  %vm13164_vm10 = vcmp.eq.s32.totalorder %v5689_v17, %v8370_v34  ;;  %vm1993_vm1 = vcmp.eq.s32.totalorder %v5681_v16, %v8586_v31  ;;  %v4438_v10 = vsel %vm2279_vm14, 1.0, %v4731_v23  ;;  %vm13176_vm14 = vnez %v13121_v21  ;;  %v2499_v34 = vpop.f32.mrf.mxu0  ;;  %v13316_v21 = vld [vmem:[#allocation142_spill] sm:$0xff] }
 0x41b   : > { %vm8759_vm5 = vmor %vm8559_vm2, %vm13160_vm3  ;;  %vm13168_vm3 = vcmp.eq.s32.totalorder %v5689_v17, %v8392_v7  ;;  %2540 = vmatmul.f32.gmra.mxu0 %v4438_v10  ;;  %v13264_v10 = vld [vmem:[#allocation50_spill] sm:$0xff] }
 0x41c   : > { %vm2056_vm13 = vmor %vm8682_vm8, %vm13164_vm10  ;;  %vm13171_vm10 = vnez %v13112_v38  ;;  %v13387_v38 = vmov 0 }
 0x41d   : > { %vm8777_vm2 = vmor %vm8580_vm12, %vm13165_vm7  ;;  %vm13188_vm12 = vcmp.eq.s32.totalorder %v5681_v16, %v13174_v20 }
 0x41e   : > { %vm8787_vm0 = vmor %vm2056_vm13, %vm13168_vm3 }
 0x41f   : > { %vm8801_vm7 = vmor %vm13171_vm10, %vm1546_vm15  ;;  %vm13175_vm15 = vcmp.eq.s32.totalorder %v5681_v16, %v13163_v51  ;;  %v4439_v59 = vsel %vm8787_vm0, 1.0, %v4731_v23  ;;  %vm13183_vm0 = vcmp.eq.s32.totalorder %v5689_v17, %v13163_v51  ;;  %v13244_v51 = vld [vmem:[#allocation123_spill] sm:$0xff] }
 0x420   : > { %vm1833_vm10 = vmor %vm13176_vm14, %vm13175_vm15  ;;  %2653 = vmatmul.f32.gmra.mxu1 %v4439_v59  ;;  %vm13185_vm15 = vcmp.eq.s32.totalorder %v5689_v17, %v13135_v24  ;;  %vm13189_vm14 = vnez %v13131_v35  ;;  %v13229_v35 = vld [vmem:[#allocation14_spill] sm:$0xff]  ;;  %v13234_v24 = vld [vmem:[#allocation99_spill] sm:$0xff] }
 0x421   : > { %vm8829_vm8 = vmor %vm1833_vm10, %vm1993_vm1  ;;  %vm13184_vm10 = vcmp.eq.s32.totalorder %v5689_v17, %v13122_v18  ;;  %v2497_v18 = vadd.f32 %v2496_v42, %v7783_v22 }
 0x422   : > { %vm1834_vm1 = vmor %vm8801_vm7, %vm13183_vm0  ;;  %vm13199_vm0 = vcmp.eq.s32.totalorder %v5681_v16, %v13177_v63  ;;  %vm13203_vm7 = vcmp.eq.s32.totalorder %v5681_v16, %v2143_v44  ;;  %v2502_v29 = vpop.f32.mrf.mxu0 }
 0x423   : > { %vm8850_vm3 = vmor %vm13185_vm15, %vm13184_vm10  ;;  %vm13192_vm10 = vcmp.eq.s32.totalorder %v5689_v17, %v8586_v31  ;;  %v13200_v31 = vmov 0  ;;  %v2610_v19 = vadd.f32 %v2609_v9, %v2497_v18  ;;  %v1928_v18 = vpop.permute.xlu0 %1927  ;;  %v2503_v9 = vadd.f32 %v2502_v29, %v7783_v22 }
 0x424   : > { %v13187_v58 = vsel %vm8850_vm3, 4294967295, %v13186_v58  ;;  %vm8859_vm13 = vmor %vm13189_vm14, %vm13188_vm12  ;;  %vm13195_vm12 = vcmp.eq.s32.totalorder %v5689_v17, %v13174_v20  ;;  %vm13196_vm14 = vnez %v13139_v53  ;;  %v13588_v29 = vmov 0 }
 0x425   : > { %v13191_v8 = vsel %vm8859_vm13, 4294967295, %v13190_v8  ;;  %vm8871_vm3 = vmor %vm1834_vm1, %vm13192_vm10  ;;  %vm1548_vm1 = vcmp.eq.s32.totalorder %v5689_v17, %v13182_v2  ;;  %vm13202_vm10 = vcmask 261120   ;;  %v2697_v15 = vmax.f32 %v2610_v19, 0.0  ;;  %v13324_v19 = vld [vmem:[#allocation75_spill] sm:$0xff] }
 0x426   : > { %vm8880_vm13 = vmor %vm13196_vm14, %vm13195_vm12  ;;  %4467 = vmatmul.msk.f32.gmra.mxu2 %vm13202_vm10, %v2696_v1  ;;  %vm13206_vm14 = vcmp.eq.s32.totalorder %v5681_v16, %v13180_v57  ;;  %vm13210_vm10 = vnez %v13151_v5  ;;  %v9022_v5 = vpop.permute.xlu1 %2151  ;;  %v13283_v1 = vmov 0 }
 0x427   : > { %vm8889_vm15 = vmor %vm8703_vm6, %vm13199_vm0  ;;  %vm13209_vm0 = vcmp.eq.s32.totalorder %v5681_v16, %v13181_v40 }
 0x428   : > { %v13201_v31 = vsel %vm8889_vm15, 4294967295, %v13200_v31  ;;  %vm8900_vm12 = vmor %vm8829_vm8, %vm13203_vm7  ;;  %vm13213_vm8 = vcmp.eq.s32.totalorder %v5681_v16, %v13182_v2 }
 0x429   : > { %vm8909_vm6 = vmor %vm8717_vm4, %vm13206_vm14  ;;  %vm13224_vm4 = vcmp.eq.s32.totalorder %v5689_v17, %v2143_v44  ;;  %v4440_v37 = vsel %vm8900_vm12, 1.0, %v4731_v23  ;;  %vm13231_vm12 = vcmp.eq.s32.totalorder %v5681_v16, %v13217_v46  ;;  %vm13251_vm14 = vcmp.eq.s32.totalorder %v5681_v16, %v13234_v24 }
 0x42a   : > { %vm8918_vm15 = vmor %vm13210_vm10, %vm13209_vm0  ;;  %vm13218_vm0 = vcmp.eq.s32.totalorder %v5689_v17, %v13181_v40  ;;  %2543 = vmatmul.f32.gmra.mxu0 %v4440_v37  ;;  %v2500_v44 = vadd.f32 %v2499_v34, %v7783_v22  ;;  %v13281_v40 = vld [vmem:[#allocation25_spill] sm:$0xff]  ;;  %v13349_v34 = vmov 0  ;;  %v2505_v54 = vpop.f32.mrf.mxu0 }
 0x42b   : > { %vm8927_vm7 = vmor %vm8735_vm11, %vm13213_vm8  ;;  %vm13221_vm11 = vcmp.eq.s32.totalorder %v5689_v17, %v13177_v63  ;;  %v13274_v63 = vld [vmem:[#allocation69_spill] sm:$0xff] }
 0x42c   : > { %vm8940_vm10 = vmor %vm8750_vm9, %vm13218_vm0 }
 0x42d   : > { %vm8949_vm8 = vmor %vm8759_vm5, %vm13221_vm11  ;;  %vm1996_vm11 = vcmp.eq.s32.totalorder %v5689_v17, %v8607_v12 }
 0x42e   : > { %vm8960_vm9 = vmor %vm8871_vm3, %vm13224_vm4  ;;  %vm501_vm3 = vcmp.eq.s32.totalorder %v5681_v16, %v13229_v35  ;;  %vm13239_vm4 = vcmp.eq.s32.totalorder %v5689_v17, %v13216_v45 }
 0x42f   : > { %vm8966_vm0 = vmor %vm8777_vm2, %vm1548_vm1  ;;  %vm13230_vm2 = vcmp.eq.s32.totalorder %v5681_v16, %v13216_v45  ;;  %v4441_v53 = vsel %vm8960_vm9, 1.0, %v4731_v23  ;;  %v13304_v45 = vld [vmem:[#allocation144_spill] sm:$0xff] }
 0x430   : > { %vm1835_vm1 = vmor %vm8927_vm7, %vm13230_vm2  ;;  %vm13235_vm2 = vcmp.eq.s32.totalorder %v5681_v16, %v8607_v12  ;;  %2656 = vmatmul.f32.gmra.mxu1 %v4441_v53  ;;  %v13253_v12 = vmov 0  ;;  %v13329_v53 = vld [vmem:[#allocation51_spill] sm:$0xff] }
 0x431   : > { %vm8991_vm5 = vmor %vm501_vm3, %vm13231_vm12  ;;  %vm502_vm12 = vcmp.eq.s32.totalorder %v5689_v17, %v13229_v35  ;;  %v13323_v35 = vld [vmem:[#allocation45_spill] sm:$0xff] }
 0x432   : > { %v13233_v52 = vsel %vm8991_vm5, 4294967295, %v13232_v52  ;;  %vm9007_vm3 = vmor %vm1835_vm1, %vm13235_vm2  ;;  %vm13240_vm1 = vcmp.eq.s32.totalorder %v5689_v17, %v13217_v46  ;;  %vm13255_vm5 = vcmask 261120   ;;  %v13498_v46 = vld [vmem:[#allocation129_spill] sm:$0xff] }
 0x433   : > { %vm1836_vm9 = vmor %vm8966_vm0, %vm13239_vm4  ;;  %vm13252_vm0 = vnez %v13191_v8  ;;  %4468 = vmatmul.msk.f32.gmra.mxu2 %vm13255_vm5, %v2697_v15  ;;  %vm13260_vm5 = vcmp.eq.s32.totalorder %v5681_v16, %v13238_v55 }
 0x434   : > { %vm9027_vm2 = vmor %vm502_vm12, %vm13240_vm1  ;;  %vm13247_vm12 = vcmp.eq.s32.totalorder %v5689_v17, %v13180_v57  ;;  %vm13248_vm1 = vnez %v13187_v58  ;;  %v9169_v58 = vpop.permute.xlu2 %1930  ;;  %v13474_v57 = vmov 0 }
 0x435   : > { %v13242_v32 = vsel %vm9027_vm2, 4294967295, %v13241_v32  ;;  %vm9040_vm4 = vmor %vm1836_vm9, %vm1996_vm11  ;;  %vm1773_vm9 = vcmp.eq.s32.totalorder %v5681_v16, %v5743_v13  ;;  %vm13261_vm11 = vnez %v13201_v31  ;;  %v13291_v31 = vld [vmem:[#allocation124_spill] sm:$0xff] }
 0x436   : > { %vm9049_vm2 = vmor %vm13248_vm1, %vm13247_vm12  ;;  %vm13256_vm12 = vcmp.eq.s32.totalorder %v5681_v16, %v8765_v62 }
 0x437   : > { %vm9058_vm7 = vmor %vm13252_vm0, %vm13251_vm14  ;;  %vm13257_vm14 = vcmp.eq.s32.totalorder %v5689_v17, %v13234_v24 }
 0x438   : > { %v13254_v12 = vsel %vm9058_vm7, 4294967295, %v13253_v12  ;;  %vm2283_vm1 = vmor %vm9007_vm3, %vm13256_vm12 }
 0x439   : > { %vm9077_vm0 = vmor %vm8880_vm13, %vm13257_vm14  ;;  %vm13265_vm13 = vcmp.eq.s32.totalorder %v5681_v16, %v13243_v4  ;;  %vm13268_vm14 = vcmp.eq.s32.totalorder %v5681_v16, %v13244_v51  ;;  %v4442_v36 = vsel %vm2283_vm1, 1.0, %v4731_v23  ;;  %vm13282_vm1 = vcmp.eq.s32.totalorder %v5681_v16, %v13264_v10 }
 0x43a   : > { %vm9088_vm7 = vmor %vm13261_vm11, %vm13260_vm5  ;;  %2546 = vmatmul.f32.gmra.mxu0 %v4442_v36  ;;  %v2506_v36 = vadd.f32 %v2505_v54, %v7783_v22  ;;  %v13557_v54 = vmov 0 }
 0x43b   : > { %vm9099_vm12 = vmor %vm8909_vm6, %vm13265_vm13  ;;  %vm13271_vm6 = vcmp.eq.s32.totalorder %v5689_v17, %v8765_v62  ;;  %v2612_v62 = vpop.f32.mrf.mxu1 }
 0x43c   : > { %vm9108_vm11 = vmor %vm8918_vm15, %vm13268_vm14  ;;  %vm885_vm15 = vcmp.eq.s32.totalorder %v5681_v16, %v13274_v63  ;;  %vm13275_vm14 = vcmp.eq.s32.totalorder %v5689_v17, %v13244_v51  ;;  %v2613_v2 = vadd.f32 %v2612_v62, %v2500_v44  ;;  %v13337_v51 = vld [vmem:[#allocation24_spill] sm:$0xff]  ;;  %v9387_v28 = vpop.permute.xlu2 %1933 }
 0x43d   : > { %vm9120_vm13 = vmor %vm9040_vm4, %vm13271_vm6  ;;  %vm13278_vm4 = vcmp.eq.s32.totalorder %v5689_v17, %v13238_v55  ;;  %v13332_v55 = vmov 0  ;;  %v13366_v44 = vld [vmem:[#allocation152_spill] sm:$0xff] }
 0x43e   : > { %vm9131_vm5 = vmor %vm8940_vm10, %vm13275_vm14  ;;  %vm503_vm10 = vcmp.eq.s32.totalorder %v5681_v16, %v13281_v40  ;;  %v4443_v8 = vsel %vm9120_vm13, 1.0, %v4731_v23  ;;  %v2698_v0 = vmax.f32 %v2613_v2, 0.0 }
 0x43f   : > { %vm9143_vm6 = vmor %vm8949_vm8, %vm13278_vm4  ;;  %2659 = vmatmul.f32.gmra.mxu1 %v4443_v8  ;;  %v13378_v8 = vld [vmem:[#allocation72_spill] sm:$0xff] }
 0x440   : > { %vm1837_vm8 = vmor %vm9088_vm7, %vm1773_vm9  ;;  %vm13285_vm7 = vcmp.eq.s32.totalorder %v5681_v16, %v8811_v3 }
 0x441   : > { %vm9161_vm4 = vmor %vm503_vm10, %vm13282_vm1  ;;  %vm504_vm10 = vcmp.eq.s32.totalorder %v5689_v17, %v13281_v40  ;;  %vm13288_vm1 = vnez %v13233_v52  ;;  %v13375_v40 = vld [vmem:[#allocation52_spill] sm:$0xff] }
 0x442   : > { %v13284_v1 = vsel %vm9161_vm4, 4294967295, %v13283_v1  ;;  %vm9177_vm9 = vmor %vm1837_vm8, %vm13285_vm7  ;;  %vm13292_vm7 = vcmp.eq.s32.totalorder %v5689_v17, %v5743_v13  ;;  %vm13313_vm8 = vnez %v13254_v12 }
 0x443   : > { %vm9188_vm3 = vmor %vm13288_vm1, %vm885_vm15  ;;  %vm13293_vm15 = vcmp.eq.s32.totalorder %v5689_v17, %v13264_v10  ;;  %v13549_v10 = vmov 0 }
 0x444   : > { %v13290_v50 = vsel %vm9188_vm3, 4294967295, %v13289_v50  ;;  %vm1838_vm14 = vmor %vm9143_vm6, %vm13292_vm7  ;;  %vm13296_vm3 = vcmp.eq.s32.totalorder %v5689_v17, %v8811_v3  ;;  %vm13299_vm6 = vcmp.eq.s32.totalorder %v5689_v17, %v13274_v63  ;;  %v9232_v3 = vpop.permute.xlu1 %2154  ;;  %v13368_v63 = vld [vmem:[#allocation27_spill] sm:$0xff]  ;;  %v9557_v30 = vpop.permute.xlu2 %2160 }
 0x445   : > { %vm9204_vm1 = vmor %vm504_vm10, %vm13293_vm15  ;;  %vm13300_vm10 = vnez %v13242_v32  ;;  %v13335_v32 = vld [vmem:[#allocation17_spill] sm:$0xff] }
 0x446   : > { %vm9215_vm4 = vmor %vm1838_vm14, %vm13296_vm3  ;;  %vm13305_vm3 = vcmask 261120   ;;  %vm13306_vm14 = vcmp.eq.s32.totalorder %v5681_v16, %v8972_v49 }
 0x447   : > { %vm9224_vm7 = vmor %vm13300_vm10, %vm13299_vm6  ;;  %4469 = vmatmul.msk.f32.gmra.mxu2 %vm13305_vm3, %v2698_v0  ;;  %vm13309_vm6 = vcmp.eq.s32.totalorder %v5689_v17, %v13243_v4  ;;  %vm13312_vm3 = vcmp.eq.s32.totalorder %v5681_v16, %v13291_v31  ;;  %v13383_v0 = vld [vmem:[#allocation78_spill] sm:$0xff] }
 0x448   : > { %vm9240_vm13 = vmor %vm9177_vm9, %vm13306_vm14 }
 0x449   : > { %vm9249_vm10 = vmor %vm9049_vm2, %vm13309_vm6  ;;  %vm13317_vm2 = vcmp.eq.s32.totalorder %v5689_v17, %v13291_v31  ;;  %v4444_v24 = vsel %vm9240_vm13, 1.0, %v4731_v23 }
 0x44a   : > { %vm9258_vm15 = vmor %vm13313_vm8, %vm13312_vm3  ;;  %vm13320_vm3 = vcmp.eq.s32.totalorder %v5689_v17, %v8972_v49  ;;  %vm13325_vm8 = vcmp.eq.s32.totalorder %v5681_v16, %v13303_v48  ;;  %v2615_v49 = vpop.f32.mrf.mxu1  ;;  %2549 = vmatmul.f32.gmra.mxu0 %v4444_v24  ;;  %v2158_v24 = vpop.permute.xlu0 %2157 }
 0x44b   : > { %vm9271_vm6 = vmor %vm9077_vm0, %vm13317_vm2  ;;  %v2616_v15 = vadd.f32 %v2615_v49, %v2503_v9  ;;  %v2508_v9 = vpop.f32.mrf.mxu0 }
 0x44c   : > { %vm9283_vm14 = vmor %vm9215_vm4, %vm13320_vm3  ;;  %vm13328_vm3 = vcmp.eq.s32.totalorder %v5681_v16, %v13304_v45  ;;  %vm13331_vm4 = vcmp.eq.s32.totalorder %v5681_v16, %v13316_v21  ;;  %v9444_v62 = vpop.permute.xlu1 %1936 }
 0x44d   : > { %vm9296_vm9 = vmor %vm9099_vm12, %vm13325_vm8  ;;  %vm507_vm8 = vcmp.eq.s32.totalorder %v5681_v16, %v13335_v32  ;;  %v4445_v4 = vsel %vm9283_vm14, 1.0, %v4731_v23  ;;  %v2699_v56 = vmax.f32 %v2616_v15, 0.0  ;;  %v13432_v15 = vld [vmem:[#allocation127_spill] sm:$0xff] }
 0x44e   : > { %vm1615_vm0 = vmor %vm9108_vm11, %vm13328_vm3  ;;  %vm13334_vm11 = vcmp.eq.s32.totalorder %v5689_v17, %v13304_v45  ;;  %2662 = vmatmul.f32.gmra.mxu1 %v4445_v4 }
 0x44f   : > { %vm9319_vm2 = vmor %vm9258_vm15, %vm13331_vm4  ;;  %vm13336_vm4 = vcmp.eq.s32.totalorder %v5681_v16, %v5685_v6  ;;  %vm13348_vm15 = vcmp.eq.s32.totalorder %v5681_v16, %v13329_v53 }
 0x450   : > { %v13333_v55 = vsel %vm9319_vm2, 4294967295, %v13332_v55  ;;  %vm1616_vm3 = vmor %vm9131_vm5, %vm13334_vm11  ;;  %vm505_vm5 = vcmp.eq.s32.totalorder %v5681_v16, %v13337_v51  ;;  %vm13338_vm11 = vcmp.eq.s32.totalorder %v5681_v16, %v13324_v19  ;;  %vm13339_vm2 = vnez %v13284_v1 }
 0x451   : > { %vm1839_vm13 = vmor %vm1615_vm0, %vm13336_vm4  ;;  %vm13342_vm0 = vcmp.eq.s32.totalorder %v5689_v17, %v5685_v6  ;;  %v13353_v6 = vmov 0 }
 0x452   : > { %vm9348_vm12 = vmor %vm13339_vm2, %vm13338_vm11  ;;  %vm13345_vm2 = vcmp.eq.s32.totalorder %v5681_v16, %v13323_v35  ;;  %v1943_v7 = vpop.permute.xlu0 %1942 }
 0x453   : > { %v13341_v25 = vsel %vm9348_vm12, 4294967295, %v13340_v25  ;;  %vm9358_vm4 = vmor %vm1616_vm3, %vm13342_vm0  ;;  %vm13351_vm3 = vcmp.eq.s32.totalorder %v5681_v16, %v13330_v47  ;;  %vm13352_vm0 = vnez %v13290_v50  ;;  %v2511_v59 = vpop.f32.mrf.mxu0 }
 0x454   : > { %vm9365_vm11 = vmor %vm507_vm8, %vm13345_vm2  ;;  %vm13359_vm8 = vcmask 261120  }
 0x455   : > { %vm9372_vm14 = vmor %vm505_vm5, %vm13348_vm15  ;;  %vm13355_vm5 = vcmp.eq.s32.totalorder %v5681_v16, %v1928_v18  ;;  %4470 = vmatmul.msk.f32.gmra.mxu2 %vm13359_vm8, %v2699_v56  ;;  %vm13360_vm15 = vcmp.eq.s32.totalorder %v5681_v16, %v9022_v5  ;;  %vm1777_vm8 = vcmp.eq.s32.totalorder %v5681_v16, %v5676_v27  ;;  %v13437_v56 = vld [vmem:[#allocation147_spill] sm:$0xff] }
 0x456   : > { %v13350_v34 = vsel %vm9372_vm14, 4294967295, %v13349_v34  ;;  %vm9381_vm12 = vmor %vm13352_vm0, %vm13351_vm3  ;;  %vm13356_vm14 = vcmp.eq.s32.totalorder %v5689_v17, %v13324_v19  ;;  %vm1554_vm0 = vcmp.eq.s32.totalorder %v5689_v17, %v13316_v21  ;;  %v13404_v21 = vmov 0 }
 0x457   : > { %v13354_v6 = vsel %vm9381_vm12, 4294967295, %v13353_v6  ;;  %vm2063_vm2 = vmor %vm1839_vm13, %vm13355_vm5 }
 0x458   : > { %vm9398_vm3 = vmor %vm9204_vm1, %vm13356_vm14  ;;  %vm13363_vm1 = vcmp.eq.s32.totalorder %v5689_v17, %v13330_v47 }
 0x459   : > { %vm9408_vm12 = vmor %vm2063_vm2, %vm13360_vm15  ;;  %vm13367_vm15 = vcmp.eq.s32.totalorder %v5689_v17, %v1928_v18  ;;  %vm13385_vm2 = vnez %v13333_v55  ;;  %v13408_v18 = vmov 0 }
 0x45a   : > { %vm9419_vm14 = vmor %vm9224_vm7, %vm13363_vm1  ;;  %vm13369_vm7 = vcmp.eq.s32.totalorder %v5689_v17, %v13303_v48  ;;  %v4446_v1 = vsel %vm9408_vm12, 1.0, %v4731_v23  ;;  %v13390_v48 = vmov 0 }
 0x45b   : > { %vm2064_vm5 = vmor %vm9358_vm4, %vm13367_vm15  ;;  %vm13372_vm4 = vcmp.eq.s32.totalorder %v5689_v17, %v9022_v5  ;;  %v2618_v5 = vpop.f32.mrf.mxu1  ;;  %2552 = vmatmul.f32.gmra.mxu0 %v4446_v1 }
 0x45c   : > { %vm9438_vm1 = vmor %vm9249_vm10, %vm13369_vm7  ;;  %vm666_vm10 = vcmp.eq.s32.totalorder %v5689_v17, %v13329_v53  ;;  %vm669_vm7 = vcmp.eq.s32.totalorder %v5681_v16, %v13375_v40  ;;  %v2619_v31 = vadd.f32 %v2618_v5, %v2506_v36  ;;  %v9653_v53 = vpop.permute.xlu1 %1939  ;;  %v13472_v36 = vld [vmem:[#allocation26_spill] sm:$0xff] }
 0x45d   : > { %vm9450_vm15 = vmor %vm2064_vm5, %vm13372_vm4  ;;  %vm508_vm5 = vcmp.eq.s32.totalorder %v5689_v17, %v13335_v32  ;;  %vm13386_vm4 = vcmp.eq.s32.totalorder %v5689_v17, %v13337_v51  ;;  %v13435_v51 = vld [vmem:[#allocation101_spill] sm:$0xff]  ;;  %v13533_v32 = vld [vmem:[#allocation130_spill] sm:$0xff] }
 0x45e   : > { %vm9463_vm13 = vmor %vm9271_vm6, %vm1554_vm0  ;;  %vm13380_vm6 = vcmp.eq.s32.totalorder %v5681_v16, %v13366_v44  ;;  %v4447_v13 = vsel %vm9450_vm15, 1.0, %v4731_v23  ;;  %v2700_v42 = vmax.f32 %v2619_v31, 0.0  ;;  %vm13398_vm15 = vcmp.eq.s32.totalorder %v5681_v16, %v13379_v41  ;;  %v13486_v31 = vld [vmem:[#allocation104_spill] sm:$0xff] }
 0x45f   : > { %vm9481_vm0 = vmor %vm9296_vm9, %vm13380_vm6  ;;  %vm13392_vm6 = vcmp.eq.s32.totalorder %v5689_v17, %v5676_v27  ;;  %2665 = vmatmul.f32.gmra.mxu1 %v4447_v13  ;;  %v13400_v27 = vmov 0  ;;  %v13491_v13 = vmov 0 }
 0x460   : > { %vm1841_vm9 = vmor %vm13385_vm2, %vm1777_vm8  ;;  %vm13389_vm8 = vcmp.eq.s32.totalorder %v5681_v16, %v13368_v63 }
 0x461   : > { %vm9509_vm12 = vmor %vm13386_vm4, %vm666_vm10  ;;  %vm13407_vm4 = vnez %v13350_v34 }
 0x462   : > { %v13388_v38 = vsel %vm9509_vm12, 4294967295, %v13387_v38  ;;  %vm9519_vm2 = vmor %vm13389_vm8, %vm669_vm7  ;;  %vm13395_vm7 = vcmp.eq.s32.totalorder %v5689_v17, %v13323_v35  ;;  %vm13402_vm12 = vcmp.eq.s32.totalorder %v5681_v16, %v9169_v58 }
 0x463   : > { %v13391_v48 = vsel %vm9519_vm2, 4294967295, %v13390_v48  ;;  %vm9530_vm10 = vmor %vm9463_vm13, %vm13392_vm6  ;;  %vm13399_vm13 = vnez %v13341_v25  ;;  %v2621_v52 = vpop.f32.mrf.mxu1  ;;  %v13436_v25 = vld [vmem:[#allocation106_spill] sm:$0xff] }
 0x464   : > { %vm9539_vm8 = vmor %vm508_vm5, %vm13395_vm7  ;;  %vm13403_vm7 = vcmp.eq.s32.totalorder %v5681_v16, %v13378_v8  ;;  %vm13411_vm5 = vnez %v13354_v6  ;;  %v13449_v6 = vld [vmem:[#allocation53_spill] sm:$0xff] }
 0x465   : > { %vm9548_vm6 = vmor %vm13399_vm13, %vm13398_vm15  ;;  %vm13406_vm13 = vcmp.eq.s32.totalorder %v5681_v16, %v13383_v0 }
 0x466   : > { %v13401_v27 = vsel %vm9548_vm6, 4294967295, %v13400_v27  ;;  %vm2065_vm2 = vmor %vm1841_vm9, %vm13402_vm12  ;;  %vm13410_vm9 = vcmp.eq.s32.totalorder %v5681_v16, %v13384_v60 }
 0x467   : > { %vm9566_vm15 = vmor %vm9365_vm11, %vm13403_vm7  ;;  %vm1556_vm11 = vcmp.eq.s32.totalorder %v5689_v17, %v13366_v44  ;;  %vm13414_vm7 = vcmask 261120   ;;  %v13467_v44 = vmov 0 }
 0x468   : > { %v13405_v21 = vsel %vm9566_vm15, 4294967295, %v13404_v21  ;;  %vm9575_vm12 = vmor %vm13407_vm4, %vm13406_vm13  ;;  %4471 = vmatmul.msk.f32.gmra.mxu2 %vm13414_vm7, %v2700_v42  ;;  %vm13415_vm4 = vcmp.eq.s32.totalorder %v5681_v16, %v9232_v3  ;;  %v13496_v42 = vmov 0 }
 0x469   : > { %v13409_v18 = vsel %vm9575_vm12, 4294967295, %v13408_v18  ;;  %vm9584_vm6 = vmor %vm13411_vm5, %vm13410_vm9  ;;  %vm13416_vm12 = vcmp.eq.s32.totalorder %v5689_v17, %v13379_v41  ;;  %vm1779_vm5 = vcmp.eq.s32.totalorder %v5681_v16, %v5807_v11  ;;  %vm13419_vm9 = vcmp.eq.s32.totalorder %v5689_v17, %v9169_v58 }
 0x46a   : > { %vm2289_vm13 = vmor %vm2065_vm2, %vm13415_vm4  ;;  %vm13420_vm4 = vcmp.eq.s32.totalorder %v5689_v17, %v13384_v60  ;;  %v2509_v58 = vadd.f32 %v2508_v9, %v7783_v22  ;;  %vm510_vm2 = vcmp.eq.s32.totalorder %v5689_v17, %v13368_v63  ;;  %v9776_v63 = vpop.permute.xlu2 %2163  ;;  %v2514_v9 = vpop.f32.mrf.mxu0 }
 0x46b   : > { %vm9599_vm15 = vmor %vm9398_vm3, %vm13416_vm12  ;;  %vm2003_vm12 = vcmp.eq.s32.totalorder %v5681_v16, %v9387_v28  ;;  %v4448_v49 = vsel %vm2289_vm13, 1.0, %v4731_v23  ;;  %vm13429_vm13 = vcmp.eq.s32.totalorder %v5689_v17, %v13375_v40  ;;  %v2512_v40 = vadd.f32 %v2511_v59, %v7783_v22 }
 0x46c   : > { %vm2066_vm7 = vmor %vm9530_vm10, %vm13419_vm9  ;;  %vm13423_vm10 = vcmp.eq.s32.totalorder %v5689_v17, %v9232_v3  ;;  %v13428_v3 = vld [vmem:[#allocation77_spill] sm:$0xff]  ;;  %v2622_v47 = vadd.f32 %v2621_v52, %v2509_v58  ;;  %2555 = vmatmul.f32.gmra.mxu0 %v4448_v49  ;;  %v2515_v35 = vadd.f32 %v2514_v9, %v7783_v22  ;;  %v13596_v52 = vld [vmem:[#allocation155_spill] sm:$0xff] }
 0x46d   : > { %vm9617_vm3 = vmor %vm9419_vm14, %vm13420_vm4  ;;  %vm1780_vm4 = vcmp.eq.s32.totalorder %v5689_v17, %v5807_v11  ;;  %v13444_v11 = vmov 0 }
 0x46e   : > { %vm9627_vm9 = vmor %vm2066_vm7, %vm13423_vm10  ;;  %v2701_v12 = vmax.f32 %v2622_v47, 0.0  ;;  %vm13466_vm10 = vnez %v13409_v18  ;;  %v13510_v18 = vld [vmem:[#allocation80_spill] sm:$0xff] }
 0x46f   : > { %vm9635_vm14 = vmor %vm9438_vm1, %vm1556_vm11  ;;  %v4449_v4 = vsel %vm9627_vm9, 1.0, %v4731_v23  ;;  %vm13438_vm9 = vcmp.eq.s32.totalorder %v5681_v16, %v13428_v3 }
 0x470   : > { %vm1843_vm1 = vmor %vm9481_vm0, %vm1779_vm5  ;;  %2668 = vmatmul.f32.gmra.mxu1 %v4449_v4  ;;  %vm13442_vm5 = vcmp.eq.s32.totalorder %v5689_v17, %v13383_v0  ;;  %v13574_v0 = vmov 0 }
 0x471   : > { %vm9658_vm7 = vmor %vm510_vm2, %vm13429_vm13  ;;  %vm13443_vm13 = vnez %v13388_v38  ;;  %v13493_v38 = vld [vmem:[#allocation145_spill] sm:$0xff] }
 0x472   : > { %vm9670_vm11 = vmor %vm1843_vm1, %vm2003_vm12  ;;  %vm13439_vm1 = vnez %v13391_v48  ;;  %v9868_v48 = vpop.permute.xlu1 %2166  ;;  %v9970_v49 = vpop.permute.xlu2 %1721 }
 0x473   : > { %vm1844_vm12 = vmor %vm9635_vm14, %vm1780_vm4  ;;  %vm13453_vm4 = vcmp.eq.s32.totalorder %v5681_v16, %v13432_v15  ;;  %vm13457_vm14 = vcmask 261120   ;;  %v2517_v20 = vpop.f32.mrf.mxu0 }
 0x474   : > { %vm9693_vm2 = vmor %vm13439_vm1, %vm13438_vm9  ;;  %vm13446_vm9 = vcmp.eq.s32.totalorder %v5689_v17, %v9387_v28  ;;  %v13455_v28 = vmov 0  ;;  %4472 = vmatmul.msk.f32.gmra.mxu2 %vm13457_vm14, %v2701_v12  ;;  %vm13465_vm14 = vcmp.eq.s32.totalorder %v5681_v16, %v13436_v25  ;;  %v2518_v59 = vadd.f32 %v2517_v20, %v7783_v22 }
 0x475   : > { %vm9702_vm0 = vmor %vm13443_vm13, %vm13442_vm5  ;;  %vm13450_vm5 = vcmp.eq.s32.totalorder %v5689_v17, %v13378_v8  ;;  %v2624_v8 = vpop.f32.mrf.mxu1 }
 0x476   : > { %v13445_v11 = vsel %vm9702_vm0, 4294967295, %v13444_v11  ;;  %vm9712_vm1 = vmor %vm1844_vm12, %vm13446_vm9  ;;  %vm13454_vm12 = vnez %v13401_v27  ;;  %vm13458_vm0 = vcmp.eq.s32.totalorder %v5681_v16, %v2158_v24  ;;  %v2625_v50 = vadd.f32 %v2624_v8, %v2512_v40  ;;  %v13499_v27 = vld [vmem:[#allocation133_spill] sm:$0xff] }
 0x477   : > { %vm9723_vm13 = vmor %vm9539_vm8, %vm13450_vm5  ;;  %vm13461_vm5 = vcmp.eq.s32.totalorder %v5681_v16, %v13435_v51  ;;  %v13568_v8 = vmov 0 }
 0x478   : > { %vm9732_vm9 = vmor %vm13454_vm12, %vm13453_vm4  ;;  %vm13462_vm4 = vnez %v13405_v21  ;;  %v2702_v45 = vmax.f32 %v2625_v50, 0.0  ;;  %v13502_v21 = vmov 0 }
 0x479   : > { %v13456_v28 = vsel %vm9732_vm9, 4294967295, %v13455_v28  ;;  %vm9743_vm8 = vmor %vm9670_vm11, %vm13458_vm0  ;;  %vm13469_vm11 = vcmp.eq.s32.totalorder %v5681_v16, %v13437_v56 }
 0x47a   : > { %vm9752_vm12 = vmor %vm13462_vm4, %vm13461_vm5  ;;  %vm13473_vm4 = vcmp.eq.s32.totalorder %v5689_v17, %v13432_v15  ;;  %v4450_v41 = vsel %vm9743_vm8, 1.0, %v4731_v23  ;;  %v10127_v40 = vpop.permute.xlu2 %2169 }
 0x47b   : > { %vm9761_vm9 = vmor %vm13466_vm10, %vm13465_vm14  ;;  %vm511_vm10 = vcmp.eq.s32.totalorder %v5681_v16, %v13472_v36  ;;  %2558 = vmatmul.f32.gmra.mxu0 %v4450_v41 }
 0x47c   : > { %v13468_v44 = vsel %vm9761_vm9, 4294967295, %v13467_v44  ;;  %vm9770_vm0 = vmor %vm9584_vm6, %vm13469_vm11  ;;  %vm13476_vm11 = vcmp.eq.s32.totalorder %v5689_v17, %v2158_v24  ;;  %vm13479_vm9 = vcmp.eq.s32.totalorder %v5681_v16, %v13449_v6  ;;  %vm13482_vm6 = vcmp.eq.s32.totalorder %v5689_v17, %v13437_v56  ;;  %v2974_v56 = vld [vmem:[%s11921_s4 + $0x10] sm:$0xff] }
 0x47d   : > { %vm9785_vm14 = vmor %vm9599_vm15, %vm13473_vm4 }
 0x47e   : > { %v13475_v57 = vsel %vm9785_vm14, 4294967295, %v13474_v57  ;;  %vm9796_vm5 = vmor %vm9712_vm1, %vm13476_vm11  ;;  %vm1117_vm11 = vcmp.eq.s32.totalorder %v5681_v16, %v13486_v31  ;;  %vm13487_vm1 = vcmp.eq.s32.totalorder %v5681_v16, %v9444_v62 }
 0x47f   : > { %vm9803_vm15 = vmor %vm511_vm10, %vm13479_vm9  ;;  %vm13485_vm10 = vcmp.eq.s32.totalorder %v5681_v16, %v5713_v26  ;;  %v4451_v60 = vsel %vm9796_vm5, 1.0, %v4731_v23  ;;  %vm13494_vm5 = vcmp.eq.s32.totalorder %v5689_v17, %v5713_v26 }
 0x480   : > { %vm9814_vm14 = vmor %vm9617_vm3, %vm13482_vm6  ;;  %vm2006_vm6 = vcmp.eq.s32.totalorder %v5689_v17, %v9444_v62  ;;  %2671 = vmatmul.f32.gmra.mxu1 %v4451_v60  ;;  %v13506_v62 = vmov 0  ;;  %v2520_v60 = vpop.f32.mrf.mxu0 }
 0x481   : > { %vm1845_vm3 = vmor %vm9770_vm0, %vm13485_vm10  ;;  %vm512_vm0 = vcmp.eq.s32.totalorder %v5689_v17, %v13472_v36  ;;  %vm13490_vm10 = vcmp.eq.s32.totalorder %v5689_v17, %v13428_v3  ;;  %v2627_v3 = vpop.f32.mrf.mxu1 }
 0x482   : > { %vm9841_vm4 = vmor %vm1845_vm3, %vm13487_vm1  ;;  %vm1339_vm3 = vcmp.eq.s32.totalorder %v5681_v16, %v13498_v46  ;;  %vm1337_vm1 = vcmp.eq.s32.totalorder %v5681_v16, %v13499_v27  ;;  %v2628_v47 = vadd.f32 %v2627_v3, %v2515_v35 }
 0x483   : > { %vm9855_vm9 = vmor %vm9658_vm7, %vm13490_vm10  ;;  %vm13495_vm7 = vcmp.eq.s32.totalorder %v5689_v17, %v13449_v6  ;;  %v2973_v6 = vld [vmem:[%s11921_s4 + $0x8] sm:$0xff] }
 0x484   : > { %v13492_v13 = vsel %vm9855_vm9, 4294967295, %v13491_v13  ;;  %vm1846_vm8 = vmor %vm9814_vm14, %vm13494_vm5  ;;  %vm13505_vm14 = vnez %v13445_v11  ;;  %v2703_v4 = vmax.f32 %v2628_v47, 0.0  ;;  %v10050_v11 = vpop.permute.xlu1 %1945 }
 0x485   : > { %vm9873_vm10 = vmor %vm512_vm0, %vm13495_vm7  ;;  %vm13504_vm7 = vcmp.eq.s32.totalorder %v5689_v17, %v13436_v25 }
 0x486   : > { %v13497_v42 = vsel %vm9873_vm10, 4294967295, %v13496_v42  ;;  %vm9886_vm5 = vmor %vm1846_vm8, %vm2006_vm6  ;;  %vm1560_vm6 = vcmp.eq.s32.totalorder %v5689_v17, %v13493_v38  ;;  %vm13508_vm8 = vcmask 261120  }
 0x487   : > { %vm9895_vm0 = vmor %vm9693_vm2, %vm1117_vm11  ;;  %4473 = vmatmul.msk.f32.gmra.mxu2 %vm13508_vm8, %v2702_v45  ;;  %vm13509_vm2 = vcmp.eq.s32.totalorder %v5681_v16, %v9557_v30  ;;  %vm13514_vm8 = vcmp.eq.s32.totalorder %v5681_v16, %v13493_v38  ;;  %v13582_v45 = vld [vmem:[#allocation134_spill] sm:$0xff] }
 0x488   : > { %v13503_v21 = vsel %vm9895_vm0, 4294967295, %v13502_v21  ;;  %vm9904_vm10 = vmor %vm13505_vm14, %vm13504_vm7  ;;  %vm895_vm0 = vcmp.eq.s32.totalorder %v5681_v16, %v13510_v18  ;;  %vm13511_vm14 = vcmp.eq.s32.totalorder %v5689_v17, %v13435_v51  ;;  %v2975_v51 = vld [vmem:[%s11921_s4 + $0x18] sm:$0xff]  ;;  %v2523_v9 = vpop.f32.mrf.mxu0 }
 0x489   : > { %v13507_v62 = vsel %vm9904_vm10, 4294967295, %v13506_v62  ;;  %vm2293_vm11 = vmor %vm9841_vm4, %vm13509_vm2  ;;  %vm13515_vm10 = vnez %v13456_v28  ;;  %vm1783_vm4 = vcmp.eq.s32.totalorder %v5681_v16, %v5711_v61  ;;  %3085 = vmatpush.msra.mxu3 %v2975_v51  ;;  %v2630_v2 = vpop.f32.mrf.mxu1  ;;  %v2524_v58 = vadd.f32 %v2523_v9, %v7783_v22 }
 0x48a   : > { %vm9923_vm7 = vmor %vm9723_vm13, %vm13511_vm14  ;;  %vm13520_vm13 = vnez %v13468_v44  ;;  %v13555_v44 = vld [vmem:[#allocation109_spill] sm:$0xff]  ;;  %v2631_v1 = vadd.f32 %v2630_v2, %v2518_v59 }
 0x48b   : > { %vm9932_vm9 = vmor %vm13515_vm10, %vm13514_vm8  ;;  %vm2007_vm10 = vcmp.eq.s32.totalorder %v5681_v16, %v9653_v53  ;;  %vm13523_vm8 = vcmp.eq.s32.totalorder %v5689_v17, %v9557_v30  ;;  %v4452_v30 = vsel %vm2293_vm11, 1.0, %v4731_v23  ;;  %vm896_vm11 = vcmp.eq.s32.totalorder %v5689_v17, %v13510_v18  ;;  %3086 = vmatpush.msra.mxu3 %v2974_v56 }
 0x48c   : > { %vm9940_vm2 = vmor %vm9752_vm12, %vm1339_vm3  ;;  %vm13526_vm3 = vnez %v13475_v57  ;;  %2561 = vmatmul.f32.gmra.mxu0 %v4452_v30  ;;  %v2972_v57 = vld [vmem:[%s11921_s4] sm:$0xff]  ;;  %v2704_v50 = vmax.f32 %v2631_v1, 0.0  ;;  %v1949_v38 = vpop.permute.xlu1 %1948 }
 0x48d   : > { %vm9946_vm14 = vmor %vm13520_vm13, %vm1337_vm1  ;;  %vm1784_vm13 = vcmp.eq.s32.totalorder %v5689_v17, %v5711_v61  ;;  %3087 = vmatpush.msra.mxu3 %v2973_v6 }
 0x48e   : > { %vm9958_vm12 = vmor %vm9886_vm5, %vm13523_vm8 }
 0x48f   : > { %vm9964_vm1 = vmor %vm13526_vm3, %vm1560_vm6  ;;  %vm1118_vm6 = vcmp.eq.s32.totalorder %v5689_v17, %v13486_v31  ;;  %vm2008_vm3 = vcmp.eq.s32.totalorder %v5689_v17, %v9653_v53  ;;  %v4453_v15 = vsel %vm9958_vm12, 1.0, %v4731_v23  ;;  %v13543_v53 = vld [vmem:[#allocation153_spill] sm:$0xff]  ;;  %3088 = vmatpush.msra.mxu3 %v2972_v57  ;;  %v13572_v31 = vld [vmem:[#allocation148_spill] sm:$0xff] }
 0x490   : > { %vm9978_vm5 = vmor %vm9803_vm15, %vm895_vm0  ;;  %2674 = vmatmul.f32.gmra.mxu1 %v4453_v15  ;;  %v2526_v55 = vpop.f32.mrf.mxu0  ;;  %v10259_v15 = vld [vmem:[%s11922_s5] sm:$0xff] }
 0x491   : > { %vm1847_vm8 = vmor %vm9932_vm9, %vm1783_vm4  ;;  %vm1341_vm9 = vcmp.eq.s32.totalorder %v5681_v16, %v13533_v32  ;;  %v2527_v25 = vadd.f32 %v2526_v55, %v7783_v22 }
 0x492   : > { %vm9995_vm0 = vmor %vm1847_vm8, %vm2007_vm10  ;;  %vm13534_vm10 = vnez %v13492_v13  ;;  %vm13545_vm8 = vcmp.eq.s32.totalorder %v5681_v16, %v9776_v63  ;;  %v13580_v13 = vmov 0 }
 0x493   : > { %vm1848_vm15 = vmor %vm9964_vm1, %vm1784_vm13  ;;  %vm13544_vm1 = vcmask 261120  }
 0x494   : > { %vm10019_vm12 = vmor %vm13534_vm10, %vm1118_vm6  ;;  %vm13539_vm6 = vnez %v13497_v42  ;;  %4474 = vmatmul.msk.f32.gmra.mxu2 %vm13544_vm1, %v2703_v4  ;;  %vm13551_vm1 = vcmp.eq.s32.totalorder %v5689_v17, %v13499_v27 }
 0x495   : > { %vm10030_vm13 = vmor %vm1848_vm15, %vm2008_vm3  ;;  %vm13563_vm3 = vcmp.eq.s32.totalorder %v5681_v16, %v13542_v39 }
 0x496   : > { %vm10042_vm10 = vmor %vm13539_vm6, %vm896_vm11  ;;  %vm13548_vm11 = vnez %v13503_v21  ;;  %v1725_v21 = vpop.permute.xlu0 %1724 }
 0x497   : > { %vm10058_vm4 = vmor %vm9995_vm0, %vm13545_vm8  ;;  %vm13552_vm0 = vnez %v13507_v62  ;;  %v2173_v62 = vpop.permute.xlu2 %2172 }
 0x498   : > { %vm10070_vm6 = vmor %vm13548_vm11, %vm1341_vm9  ;;  %vm13556_vm11 = vcmp.eq.s32.totalorder %v5689_v17, %v13498_v46  ;;  %v4454_v5 = vsel %vm10058_vm4, 1.0, %v4731_v23  ;;  %vm1342_vm4 = vcmp.eq.s32.totalorder %v5689_v17, %v13533_v32  ;;  %v2633_v46 = vpop.f32.mrf.mxu1  ;;  %v10262_v32 = vperm.slane %v10259_v15, 1 }
 0x499   : > { %v13550_v10 = vsel %vm10070_vm6, 4294967295, %v13549_v10  ;;  %vm10079_vm8 = vmor %vm13552_vm0, %vm13551_vm1  ;;  %vm13559_vm0 = vcmp.eq.s32.totalorder %v5689_v17, %v9776_v63  ;;  %v13564_v63 = vmov 0  ;;  %2564 = vmatmul.f32.gmra.mxu0 %v4454_v5  ;;  %vm13570_vm1 = vcmp.eq.s32.totalorder %v5681_v16, %v5917_v33 }
 0x49a   : > { %vm10092_vm15 = vmor %vm9923_vm7, %vm13556_vm11  ;;  %vm13562_vm7 = vcmp.eq.s32.totalorder %v5681_v16, %v13543_v53 }
 0x49b   : > { %v13558_v54 = vsel %vm10092_vm15, 4294967295, %v13557_v54  ;;  %vm10104_vm9 = vmor %vm10030_vm13, %vm13559_vm0 }
 0x49c   : > { %vm1625_vm11 = vmor %vm9946_vm14, %vm13562_vm7  ;;  %vm13566_vm14 = vcmp.eq.s32.totalorder %v5689_v17, %v13543_v53  ;;  %v4455_v41 = vsel %vm10104_vm9, 1.0, %v4731_v23  ;;  %vm2234_vm9 = vcmp.eq.s32.totalorder %v5689_v17, %v9868_v48 }
 0x49d   : > { %vm10123_vm13 = vmor %vm9940_vm2, %vm13563_vm3  ;;  %vm13567_vm2 = vcmp.eq.s32.totalorder %v5681_v16, %v13555_v44  ;;  %2677 = vmatmul.f32.gmra.mxu1 %v4455_v41 }
 0x49e   : > { %v13565_v63 = vsel %vm10123_vm13, 4294967295, %v13564_v63  ;;  %vm1626_vm0 = vmor %vm10079_vm8, %vm13566_vm14  ;;  %vm2233_vm14 = vcmp.eq.s32.totalorder %v5681_v16, %v9868_v48  ;;  %v2521_v48 = vadd.f32 %v2520_v60, %v7783_v22  ;;  %v2176_v51 = vpop.permute.xlu0 %2175 }
 0x49f   : > { %vm10143_vm3 = vmor %vm9978_vm5, %vm13567_vm2  ;;  %vm1120_vm5 = vcmp.eq.s32.totalorder %v5689_v17, %v13555_v44  ;;  %vm13571_vm2 = vcmp.eq.s32.totalorder %v5689_v17, %v5917_v33  ;;  %v13577_v33 = vmov 0  ;;  %v1952_v47 = vpop.permute.xlu2 %1951 }
 0x4a0   : > { %v13569_v8 = vsel %vm10143_vm3, 4294967295, %v13568_v8  ;;  %vm1849_vm8 = vmor %vm1625_vm11, %vm13570_vm1  ;;  %vm2010_vm3 = vcmp.eq.s32.totalorder %v5689_v17, %v1943_v7  ;;  %vm1565_vm1 = vcmp.eq.s32.totalorder %v5681_v16, %v13572_v31  ;;  %vm13573_vm11 = vcmp.eq.s32.totalorder %v5681_v16, %v1943_v7  ;;  %v2636_v35 = vpop.f32.mrf.mxu1 }
 0x4a1   : > { %vm1850_vm7 = vmor %vm1626_vm0, %vm13571_vm2  ;;  %vm1564_vm0 = vcmp.eq.s32.totalorder %v5689_v17, %v13542_v39  ;;  %vm13576_vm2 = vcmask 261120   ;;  %v2634_v26 = vadd.f32 %v2633_v46, %v2521_v48  ;;  %v2637_v3 = vadd.f32 %v2636_v35, %v2524_v58  ;;  %v2844_v39 = vpop.f32.mrf.mxu2 }
 0x4a2   : > { %vm2073_vm13 = vmor %vm1849_vm8, %vm13573_vm11  ;;  %4475 = vmatmul.msk.f32.gmra.mxu2 %vm13576_vm2, %v2704_v50  ;;  %v2845_v53 = vadd.f32 %v2844_v39, %v10262_v32 }
 0x4a3   : > { %vm10171_vm15 = vmor %vm10019_vm12, %vm1342_vm4  ;;  %vm1787_vm4 = vcmp.eq.s32.totalorder %v5681_v16, %v9970_v49  ;;  %vm13579_vm12 = vnez %v13550_v10  ;;  %v2705_v14 = vmax.f32 %v2634_v26, 0.0  ;;  %v2706_v24 = vmax.f32 %v2637_v3, 0.0  ;;  %v2529_v10 = vpop.f32.mrf.mxu0 }
 0x4a4   : > { %v13575_v0 = vsel %vm10171_vm15, 4294967295, %v13574_v0  ;;  %vm2297_vm6 = vmor %vm2073_vm13, %vm2233_vm14  ;;  %vm2011_vm13 = vcmp.eq.s32.totalorder %v5681_v16, %v10050_v11  ;;  %v2940_v6 = vmax.f32 %v2845_v53, 0.0 }
 0x4a5   : > { %vm10180_vm8 = vmor %vm10042_vm10, %vm1120_vm5  ;;  %vm1788_vm5 = vcmp.eq.s32.totalorder %v5689_v17, %v9970_v49  ;;  %v4456_v27 = vsel %vm2297_vm6, 1.0, %v4731_v23  ;;  %vm1566_vm6 = vcmp.eq.s32.totalorder %v5689_v17, %v13572_v31  ;;  %v1728_v49 = vpop.permute.xlu1 %1727 }
 0x4a6   : > { %v13578_v33 = vsel %vm10180_vm8, 4294967295, %v13577_v33  ;;  %vm2074_vm11 = vmor %vm1850_vm7, %vm2010_vm3  ;;  %vm1343_vm7 = vcmp.eq.s32.totalorder %v5681_v16, %v13582_v45  ;;  %vm13583_vm3 = vnez %v13558_v54  ;;  %2567 = vmatmul.f32.gmra.mxu0 %v4456_v27  ;;  %vm1790_vm8 = vcmp.eq.s32.totalorder %v5689_v17, %v1725_v21 }
 0x4a7   : > { %vm10188_vm15 = vmor %vm13579_vm12, %vm1565_vm1  ;;  %vm13586_vm1 = vnez %v13565_v63  ;;  %vm13587_vm12 = vnez %v13569_v8 }
 0x4a8   : > { %v13581_v13 = vsel %vm10188_vm15, 4294967295, %v13580_v13  ;;  %vm2298_vm10 = vmor %vm2074_vm11, %vm2234_vm9  ;;  %vm2012_vm9 = vcmp.eq.s32.totalorder %v5689_v17, %v10050_v11  ;;  %v2639_v61 = vpop.f32.mrf.mxu1 }
 0x4a9   : > { %vm10199_vm14 = vmor %vm13583_vm3, %vm1564_vm0  ;;  %vm2235_vm0 = vcmp.eq.s32.totalorder %v5681_v16, %v10127_v40  ;;  %v4457_v18 = vsel %vm2298_vm10, 1.0, %v4731_v23  ;;  %vm2236_vm10 = vcmp.eq.s32.totalorder %v5689_v17, %v10127_v40  ;;  %v2640_v12 = vadd.f32 %v2639_v61, %v2527_v25  ;;  %v2847_v31 = vpop.f32.mrf.mxu2 }
 0x4aa   : > { %vm1851_vm2 = vmor %vm13586_vm1, %vm1787_vm4  ;;  %2680 = vmatmul.f32.gmra.mxu1 %v4457_v18 }
 0x4ab   : > { %vm2075_vm11 = vmor %vm1851_vm2, %vm2011_vm13  ;;  %vm1344_vm13 = vcmp.eq.s32.totalorder %v5689_v17, %v13582_v45  ;;  %vm13590_vm2 = vcmask 261120   ;;  %v2707_v34 = vmax.f32 %v2640_v12, 0.0 }
 0x4ac   : > { %vm10215_vm3 = vmor %vm13587_vm12, %vm1343_vm7  ;;  %vm1789_vm7 = vcmp.eq.s32.totalorder %v5681_v16, %v1725_v21  ;;  %4476 = vmatmul.msk.f32.gmra.mxu2 %vm13590_vm2, %v2705_v14  ;;  %vm13595_vm2 = vnez %v13581_v13 }
 0x4ad   : > { %v13589_v29 = vsel %vm10215_vm3, 4294967295, %v13588_v29  ;;  %vm1852_vm4 = vmor %vm10199_vm14, %vm1788_vm5  ;;  %vm13591_vm3 = vnez %v13575_v0  ;;  %vm13592_vm14 = vnez %v13578_v33  ;;  %v2848_v33 = vadd.f32 %v2847_v31, %v10262_v32 }
 0x4ae   : > { %vm2076_vm1 = vmor %vm1852_vm4, %vm2012_vm9  ;;  %vm2013_vm9 = vcmp.eq.s32.totalorder %v5681_v16, %v1949_v38 }
 0x4af   : > { %vm2299_vm12 = vmor %vm2075_vm11, %vm2235_vm0  ;;  %vm2014_vm0 = vcmp.eq.s32.totalorder %v5689_v17, %v1949_v38  ;;  %v2941_v13 = vmax.f32 %v2848_v33, 0.0 }
 0x4b0   : > { %vm1630_vm15 = vmor %vm13591_vm3, %vm1566_vm6  ;;  %v4458_v19 = vsel %vm2299_vm12, 1.0, %v4731_v23  ;;  %vm1567_vm3 = vcmp.eq.s32.totalorder %v5681_v16, %v13596_v52  ;;  %v2642_v28 = vpop.f32.mrf.mxu1 }
 0x4b1   : > { %vm10234_vm5 = vmor %vm13592_vm14, %vm1344_vm13  ;;  %2570 = vmatmul.f32.gmra.mxu0 %v4458_v19  ;;  %vm2237_vm14 = vcmp.eq.s32.totalorder %v5681_v16, %v2173_v62  ;;  %v2850_v42 = vpop.f32.mrf.mxu2 }
 0x4b2   : > { %vm2300_vm4 = vmor %vm2076_vm1, %vm2236_vm10  ;;  %vm2238_vm10 = vcmp.eq.s32.totalorder %v5689_v17, %v2173_v62  ;;  %v2851_v27 = vadd.f32 %v2850_v42, %v10262_v32 }
 0x4b3   : > { %vm1853_vm11 = vmor %vm13595_vm2, %vm1789_vm7  ;;  %v4459_v30 = vsel %vm2300_vm4, 1.0, %v4731_v23  ;;  %vm13597_vm7 = vnez %v13589_v29  ;;  %vm1791_vm2 = vcmp.eq.s32.totalorder %v5681_v16, %v1728_v49 }
 0x4b4   : > { %vm1854_vm6 = vmor %vm1630_vm15, %vm1790_vm8  ;;  %2683 = vmatmul.f32.gmra.mxu1 %v4459_v30  ;;  %vm1568_vm15 = vcmp.eq.s32.totalorder %v5689_v17, %v13596_v52  ;;  %vm13598_vm8 = vcmask 261120   ;;  %v2942_v21 = vmax.f32 %v2851_v27, 0.0 }
 0x4b5   : > { %vm2077_vm13 = vmor %vm1853_vm11, %vm2013_vm9  ;;  %4477 = vmatmul.msk.f32.gmra.mxu2 %vm13598_vm8, %v2706_v24  ;;  %vm1792_vm11 = vcmp.eq.s32.totalorder %v5689_v17, %v1728_v49 }
 0x4b6   : > { %vm2078_vm1 = vmor %vm1854_vm6, %vm2014_vm0 }
 0x4b7   : > { %vm1631_vm12 = vmor %vm13597_vm7, %vm1567_vm3  ;;  %vm2015_vm3 = vcmp.eq.s32.totalorder %v5681_v16, %v1952_v47  ;;  %vm2240_vm7 = vcmp.eq.s32.totalorder %v5689_v17, %v2176_v51 }
 0x4b8   : > { %vm2301_vm9 = vmor %vm2077_vm13, %vm2237_vm14  ;;  %vm2016_vm14 = vcmp.eq.s32.totalorder %v5689_v17, %v1952_v47  ;;  %v2532_v17 = vpop.f32.mrf.mxu0  ;;  %v2645_v36 = vpop.f32.mrf.mxu1 }
 0x4b9   : > { %vm10264_vm4 = vmor %vm2078_vm1, %vm2238_vm10  ;;  %v4460_v56 = vsel %vm2301_vm9, 1.0, %v4731_v23  ;;  %vm2239_vm10 = vcmp.eq.s32.totalorder %v5681_v16, %v2176_v51  ;;  %v2530_v16 = vadd.f32 %v2529_v10, %v7783_v22  ;;  %v2533_v59 = vadd.f32 %v2532_v17, %v7783_v22  ;;  %v2853_v14 = vpop.f32.mrf.mxu2 }
 0x4ba   : > { %vm1855_vm0 = vmor %vm1631_vm12, %vm1791_vm2  ;;  %2573 = vmatmul.f32.gmra.mxu0 %v4460_v56  ;;  %v4461_v11 = vsel %vm10264_vm4, 1.0, %v4731_v23  ;;  %v2854_v37 = vadd.f32 %v2853_v14, %v10262_v32 }
 0x4bb   : > { %vm1632_vm6 = vmor %vm10234_vm5, %vm1568_vm15  ;;  %v2643_v20 = vadd.f32 %v2642_v28, %v2530_v16  ;;  %v2646_v57 = vadd.f32 %v2645_v36, %v2533_v59 }
 0x4bc   : > { %vm1856_vm13 = vmor %vm1632_vm6, %vm1792_vm11  ;;  %2686 = vmatmul.f32.gmra.mxu1 %v4461_v11  ;;  %v2943_v35 = vmax.f32 %v2854_v37, 0.0 }
 0x4bd   : > { %vm2079_vm1 = vmor %vm1855_vm0, %vm2015_vm3  ;;  %v2708_v54 = vmax.f32 %v2643_v20, 0.0  ;;  %v2709_v63 = vmax.f32 %v2646_v57, 0.0 }
 0x4be   : > { %vm2080_vm5 = vmor %vm1856_vm13, %vm2016_vm14 }
 0x4bf   : > { %vm13601_vm12 = vmmov %vm13598_vm8 }
 0x4c0   : > { %4478 = vmatmul.msk.f32.gmra.mxu2 %vm13601_vm12, %v2707_v34  ;;  %vm2303_vm2 = vmor %vm2079_vm1, %vm2239_vm10  ;;  %v2535_v40 = vpop.f32.mrf.mxu0  ;;  %v2648_v5 = vpop.f32.mrf.mxu1 }
 0x4c1   : > { %vm13602_vm15 = vmmov %vm13598_vm8  ;;  %v4462_v7 = vsel %vm2303_vm2, 1.0, %v4731_v23  ;;  %v2536_v2 = vadd.f32 %v2535_v40, %v7783_v22  ;;  %v2856_v3 = vpop.f32.mrf.mxu2 }
 0x4c2   : > { %4496 = vmatmul.msk.f32.vlgmr.msra.gmra.mxu3 %vm13602_vm15, %v2940_v6  ;;  %vm2304_vm8 = vmor %vm2080_vm5, %vm2240_vm7  ;;  %2576 = vmatmul.f32.gmra.mxu0 %v4462_v7  ;;  %v2857_v24 = vadd.f32 %v2856_v3, %v10262_v32 }
 0x4c3   : > { %v4463_v44 = vsel %vm2304_vm8, 1.0, %v4731_v23  ;;  %vm13603_vm9 = vmmov %vm13601_vm12  ;;  %v2649_v1 = vadd.f32 %v2648_v5, %v2536_v2 }
 0x4c4   : > { %2689 = vmatmul.f32.gmra.mxu1 %v4463_v44  ;;  %vm13604_vm11 = vmmov %vm13603_vm9  ;;  %v2944_v55 = vmax.f32 %v2857_v24, 0.0 }
 0x4c5   : > { %v2710_v8 = vmax.f32 %v2649_v1, 0.0  ;;  %vm13605_vm4 = vmmov %vm13603_vm9 }
 0x4c6   : > { %vm13606_vm0 = vmmov %vm13605_vm4 }
 0x4c7   : > { %vm13607_vm3 = vmmov %vm13606_vm0 }
 0x4c8   : > { %4479 = vmatmul.msk.f32.gmra.mxu2 %vm13603_vm9, %v2708_v54  ;;  %v2538_v23 = vpop.f32.mrf.mxu0  ;;  %v2651_v50 = vpop.f32.mrf.mxu1  ;;  %vm13608_vm6 = vmmov %vm13606_vm0 }
 0x4c9   : > { %v2539_v41 = vadd.f32 %v2538_v23, %v7783_v22  ;;  %vm13609_vm13 = vmmov %vm13606_vm0 }
 0x4ca   : > { %4497 = vmatmul.msk.f32.gmra.mxu3 %vm13607_vm3, %v2941_v13  ;;  %vm13610_vm14 = vmmov %vm13606_vm0  ;;  %v2859_v61 = vpop.f32.mrf.mxu2 }
 0x4cb   : > { %v2652_v0 = vadd.f32 %v2651_v50, %v2539_v41  ;;  %vm13611_vm1 = vmmov %vm13606_vm0  ;;  %v2860_v12 = vadd.f32 %v2859_v61, %v10262_v32 }
 0x4cc   : > { %vm13612_vm10 = vmmov %vm13606_vm0 }
 0x4cd   : > { %v2711_v60 = vmax.f32 %v2652_v0, 0.0  ;;  %vm13613_vm5 = vmmov %vm13606_vm0  ;;  %v2945_v53 = vmax.f32 %v2860_v12, 0.0 }
 0x4ce   : > { %vm13614_vm7 = vmmov %vm13606_vm0 }
 0x4cf   : > { %vm13615_vm12 = vmmov %vm13606_vm0 }
 0x4d0   : > { %4480 = vmatmul.msk.f32.gmra.mxu2 %vm13604_vm11, %v2709_v63  ;;  %v2541_v38 = vpop.f32.mrf.mxu0  ;;  %v2654_v45 = vpop.f32.mrf.mxu1  ;;  %vm13616_vm2 = vmmov %vm13606_vm0 }
 0x4d1   : > { %v2542_v48 = vadd.f32 %v2541_v38, %v7783_v22  ;;  %vm13617_vm15 = vmmov %vm13606_vm0 }
 0x4d2   : > { %4498 = vmatmul.msk.f32.gmra.mxu3 %vm13609_vm13, %v2942_v21  ;;  %vm13618_vm8 = vmmov %vm13606_vm0 }
 0x4d3   : > { %v2655_v46 = vadd.f32 %v2654_v45, %v2542_v48  ;;  %vm13619_vm9 = vmmov %vm13606_vm0 }
 0x4d4   : > { %vm13620_vm11 = vmmov %vm13606_vm0 }
 0x4d5   : > { %v2712_v26 = vmax.f32 %v2655_v46, 0.0  ;;  %vm13622_vm3 = vmmov %vm13606_vm0 }
 0x4d6   : > { %vm13624_vm13 = vmmov %vm13606_vm0 }
 0x4d8   : > { %4481 = vmatmul.msk.f32.gmra.mxu2 %vm13605_vm4, %v2710_v8  ;;  %v2544_v62 = vpop.f32.mrf.mxu0  ;;  %v2657_v29 = vpop.f32.mrf.mxu1  ;;  %vm13621_vm4 = vmmov %vm13606_vm0 }
 0x4d9   : > { %v2545_v18 = vadd.f32 %v2544_v62, %v7783_v22  ;;  %v2862_v10 = vpop.f32.mrf.mxu2 }
 0x4da   : > { %4499 = vmatmul.msk.f32.gmra.mxu3 %vm13611_vm1, %v2943_v35  ;;  %v2863_v28 = vadd.f32 %v2862_v10, %v10262_v32  ;;  %vm13626_vm1 = vmmov %vm13606_vm0 }
 0x4db   : > { %v2658_v9 = vadd.f32 %v2657_v29, %v2545_v18 }
 0x4dc   : > { %v2946_v20 = vmax.f32 %v2863_v28, 0.0  ;;  %v10343_v28 = vperm.slane %v10259_v15, 2 }
 0x4dd   : > { %v2713_v58 = vmax.f32 %v2658_v9, 0.0 }
 0x4e0   : > { %4482 = vmatmul.msk.f32.gmra.mxu2 %vm13606_vm0, %v2711_v60  ;;  %v2547_v19 = vpop.f32.mrf.mxu0  ;;  %v2660_v49 = vpop.f32.mrf.mxu1 }
 0x4e1   : > { %v2548_v52 = vadd.f32 %v2547_v19, %v7783_v22 }
 0x4e2   : > { %4500 = vmatmul.msk.f32.gmra.mxu3 %vm13613_vm5, %v2944_v55  ;;  %vm13628_vm5 = vmmov %vm13606_vm0 }
 0x4e3   : > { %v2661_v30 = vadd.f32 %v2660_v49, %v2548_v52 }
 0x4e5   : > { %v2714_v47 = vmax.f32 %v2661_v30, 0.0 }
 0x4e8   : > { %4483 = vmatmul.msk.f32.gmra.mxu2 %vm13608_vm6, %v2712_v26  ;;  %v2550_v4 = vpop.f32.mrf.mxu0  ;;  %v2663_v25 = vpop.f32.mrf.mxu1  ;;  %vm13623_vm6 = vmmov %vm13606_vm0 }
 0x4e9   : > { %v2551_v51 = vadd.f32 %v2550_v4, %v7783_v22 }
 0x4ea   : > { %4501 = vmatmul.msk.f32.gmra.mxu3 %vm13615_vm12, %v2945_v53  ;;  %vm13630_vm12 = vmmov %vm13606_vm0 }
 0x4eb   : > { %v2664_v56 = vadd.f32 %v2663_v25, %v2551_v51  ;;  %v2865_v59 = vpop.f32.mrf.mxu2 }
 0x4ec   : > { %v2866_v57 = vadd.f32 %v2865_v59, %v10262_v32 }
 0x4ed   : > { %v2715_v39 = vmax.f32 %v2664_v56, 0.0 }
 0x4ee   : > { %v2947_v40 = vmax.f32 %v2866_v57, 0.0 }
 0x4f0   : > { %4484 = vmatmul.msk.f32.gmra.mxu2 %vm13610_vm14, %v2713_v58  ;;  %v2553_v11 = vpop.f32.mrf.mxu0  ;;  %v2666_v6 = vpop.f32.mrf.mxu1  ;;  %vm13625_vm14 = vmmov %vm13606_vm0 }
 0x4f1   : > { %v2554_v34 = vadd.f32 %v2553_v11, %v7783_v22 }
 0x4f2   : > { %4502 = vmatmul.msk.f32.gmra.mxu3 %vm13617_vm15, %v2946_v20  ;;  %vm13632_vm15 = vmmov %vm13606_vm0 }
 0x4f3   : > { %v2667_v16 = vadd.f32 %v2666_v6, %v2554_v34 }
 0x4f5   : > { %v2716_v7 = vmax.f32 %v2667_v16, 0.0 }
 0x4f7   : > { %v2868_v8 = vpop.f32.mrf.mxu2 }
 0x4f8   : > { %4485 = vmatmul.msk.f32.gmra.mxu2 %vm13612_vm10, %v2714_v47  ;;  %v2556_v44 = vpop.f32.mrf.mxu0  ;;  %v2669_v17 = vpop.f32.mrf.mxu1  ;;  %v2869_v41 = vadd.f32 %v2868_v8, %v10262_v32  ;;  %vm13627_vm10 = vmmov %vm13606_vm0 }
 0x4f9   : > { %v2557_v54 = vadd.f32 %v2556_v44, %v7783_v22 }
 0x4fa   : > { %4503 = vmatmul.msk.f32.gmra.mxu3 %vm13619_vm9, %v2947_v40  ;;  %v2948_v31 = vmax.f32 %v2869_v41, 0.0  ;;  %vm13634_vm9 = vmmov %vm13606_vm0 }
 0x4fb   : > { %v2670_v36 = vadd.f32 %v2669_v17, %v2557_v54 }
 0x4fd   : > { %v2717_v63 = vmax.f32 %v2670_v36, 0.0 }
 0x500   : > { %4486 = vmatmul.msk.f32.gmra.mxu2 %vm13614_vm7, %v2715_v39  ;;  %v2559_v2 = vpop.f32.mrf.mxu0  ;;  %v2672_v1 = vpop.f32.mrf.mxu1  ;;  %vm13629_vm7 = vmmov %vm13606_vm0 }
 0x501   : > { %v2560_v5 = vadd.f32 %v2559_v2, %v7783_v22 }
 0x502   : > { %4504 = vmatmul.msk.f32.gmra.mxu3 %vm13621_vm4, %v2948_v31  ;;  %vm13636_vm4 = vmmov %vm13606_vm0 }
 0x503   : > { %v2673_v23 = vadd.f32 %v2672_v1, %v2560_v5 }
 0x505   : > { %v2718_v50 = vmax.f32 %v2673_v23, 0.0 }
 0x508   : > { %4487 = vmatmul.msk.f32.gmra.mxu2 %vm13616_vm2, %v2716_v7  ;;  %vm13631_vm2 = vmmov %vm13606_vm0 }
 0x509   : > { %v2562_v0 = vpop.f32.mrf.mxu0 }
 0x50a   : > { %v2563_v33 = vadd.f32 %v2562_v0, %v7783_v22  ;;  %v2871_v13 = vpop.f32.mrf.mxu2 }
 0x50b   : > { %v2872_v48 = vadd.f32 %v2871_v13, %v10262_v32 }
 0x50d   : > { %v2675_v60 = vpop.f32.mrf.mxu1  ;;  %v2949_v42 = vmax.f32 %v2872_v48, 0.0 }
 0x50e   : > { %v2676_v38 = vadd.f32 %v2675_v60, %v2563_v33 }
 0x50f   : > { %4505 = vmatmul.msk.f32.gmra.mxu3 %vm13622_vm3, %v2949_v42  ;;  %vm13637_vm3 = vmmov %vm13606_vm0 }
 0x510   : > { %4488 = vmatmul.msk.f32.gmra.mxu2 %vm13618_vm8, %v2717_v63  ;;  %v2719_v45 = vmax.f32 %v2676_v38, 0.0  ;;  %vm13633_vm8 = vmmov %vm13606_vm0 }
 0x516   : > { %v2565_v46 = vpop.f32.mrf.mxu0 }
 0x517   : > { %v2566_v27 = vadd.f32 %v2565_v46, %v7783_v22  ;;  %v2874_v21 = vpop.f32.mrf.mxu2 }
 0x518   : > { %4489 = vmatmul.msk.f32.gmra.mxu2 %vm13620_vm11, %v2718_v50  ;;  %v2875_v18 = vadd.f32 %v2874_v21, %v10262_v32  ;;  %vm13635_vm11 = vmmov %vm13606_vm0 }
 0x51a   : > { %v2678_v26 = vpop.f32.mrf.mxu1  ;;  %v2950_v14 = vmax.f32 %v2875_v18, 0.0 }
 0x51b   : > { %v2679_v62 = vadd.f32 %v2678_v26, %v2566_v27 }
 0x51c   : > { %4506 = vmatmul.msk.f32.gmra.mxu3 %vm13624_vm13, %v2950_v14  ;;  %vm13639_vm13 = vmmov %vm13606_vm0 }
 0x51d   : > { %v2720_v29 = vmax.f32 %v2679_v62, 0.0 }
 0x520   : > { %4490 = vmatmul.msk.f32.gmra.mxu2 %vm13606_vm0, %v2719_v45 }
 0x523   : > { %v2568_v9 = vpop.f32.mrf.mxu0 }
 0x524   : > { %v2569_v37 = vadd.f32 %v2568_v9, %v7783_v22 }
 0x525   : > { %v2877_v35 = vpop.f32.mrf.mxu2 }
 0x526   : > { %v2878_v52 = vadd.f32 %v2877_v35, %v10262_v32 }
 0x527   : > { %v2681_v58 = vpop.f32.mrf.mxu1 }
 0x528   : > { %4491 = vmatmul.msk.f32.gmra.mxu2 %vm13623_vm6, %v2720_v29  ;;  %v2682_v19 = vadd.f32 %v2681_v58, %v2569_v37  ;;  %v2951_v3 = vmax.f32 %v2878_v52, 0.0  ;;  %vm13638_vm6 = vmmov %vm13606_vm0 }
 0x52a   : > { %v2721_v49 = vmax.f32 %v2682_v19, 0.0  ;;  %4507 = vmatmul.msk.f32.gmra.mxu3 %vm13626_vm1, %v2951_v3  ;;  %vm13641_vm1 = vmmov %vm13606_vm0 }
 0x52e   : > { %v2571_v30 = vpop.f32.mrf.mxu0 }
 0x52f   : > { %v2572_v24 = vadd.f32 %v2571_v30, %v7783_v22  ;;  %v2880_v55 = vpop.f32.mrf.mxu2 }
 0x530   : > { %4492 = vmatmul.msk.f32.gmra.mxu2 %vm13625_vm14, %v2721_v49  ;;  %v2881_v51 = vadd.f32 %v2880_v55, %v10262_v32  ;;  %vm13640_vm14 = vmmov %vm13606_vm0 }
 0x531   : > { %v2684_v47 = vpop.f32.mrf.mxu1 }
 0x532   : > { %v2685_v4 = vadd.f32 %v2684_v47, %v2572_v24  ;;  %v2952_v61 = vmax.f32 %v2881_v51, 0.0 }
 0x534   : > { %v2722_v25 = vmax.f32 %v2685_v4, 0.0  ;;  %4508 = vmatmul.msk.f32.gmra.mxu3 %vm13628_vm5, %v2952_v61  ;;  %vm13643_vm5 = vmmov %vm13606_vm0 }
 0x537   : > { %v2574_v56 = vpop.f32.mrf.mxu0 }
 0x538   : > { %4493 = vmatmul.msk.f32.gmra.mxu2 %vm13627_vm10, %v2722_v25  ;;  %v2575_v12 = vadd.f32 %v2574_v56, %v7783_v22  ;;  %v2883_v53 = vpop.f32.mrf.mxu2  ;;  %vm13642_vm10 = vmmov %vm13606_vm0 }
 0x539   : > { %v2687_v39 = vpop.f32.mrf.mxu1  ;;  %v2884_v34 = vadd.f32 %v2883_v53, %v10262_v32 }
 0x53a   : > { %v2688_v11 = vadd.f32 %v2687_v39, %v2575_v12 }
 0x53b   : > { %v2953_v10 = vmax.f32 %v2884_v34, 0.0 }
 0x53c   : > { %v2723_v6 = vmax.f32 %v2688_v11, 0.0 }
 0x53d   : > { %4509 = vmatmul.msk.f32.gmra.mxu3 %vm13630_vm12, %v2953_v10  ;;  %vm13645_vm12 = vmmov %vm13606_vm0 }
 0x53f   : > { %v2577_v16 = vpop.f32.mrf.mxu0 }
 0x540   : > { %4494 = vmatmul.msk.f32.gmra.mxu2 %vm13629_vm7, %v2723_v6  ;;  %v2578_v7 = vadd.f32 %v2577_v16, %v7783_v22  ;;  %vm13644_vm7 = vmmov %vm13606_vm0 }
 0x541   : > { %v2690_v20 = vpop.f32.mrf.mxu1 }
 0x542   : > { %v2691_v54 = vadd.f32 %v2690_v20, %v2578_v7 }
 0x543   : > { %v2886_v44 = vpop.f32.mrf.mxu2 }
 0x544   : > { %v2887_v17 = vadd.f32 %v2886_v44, %v10262_v32  ;;  %v2724_v57 = vmax.f32 %v2691_v54, 0.0 }
 0x545   : > { %v3090_v59 = vpop.f32.mrf.mxu3 }
 0x546   : > { %v10348_v36 = vadd.f32 %v3090_v59, %v10343_v28  ;;  %v2954_v63 = vmax.f32 %v2887_v17, 0.0 }
 0x548   : > { %v3186_v40 = vsel %vm13631_vm2, %v10348_v36, 0.0  ;;  %4495 = vmatmul.msk.f32.gmra.mxu2 %vm13632_vm15, %v2724_v57  ;;  %4510 = vmatmul.msk.f32.gmra.mxu3 %vm13633_vm8, %v2954_v63  ;;  %vm13646_vm2 = vmmov %vm13606_vm0 }
 0x549   : > { %3187 = vadd.xlane.f32.xlu1 %v3186_v40  ;;  %vm13647_vm15 = vmmov %vm13606_vm0 }
 0x54a   : > { %vm13648_vm8 = vmmov %vm13606_vm0 }
 0x54b   : > { %v2889_v22 = vpop.f32.mrf.mxu2 }
 0x54c   : > { %v2890_v15 = vadd.f32 %v2889_v22, %v10262_v32 }
 0x54d   : > { %v3093_v0 = vpop.f32.mrf.mxu3 }
 0x54e   : > { %v2955_v2 = vmax.f32 %v2890_v15, 0.0  ;;  %v10362_v60 = vadd.f32 %v3093_v0, %v10343_v28 }
 0x550   : > { %4511 = vmatmul.msk.f32.gmra.mxu3 %vm13634_vm9, %v2955_v2  ;;  %v3189_v38 = vsel %vm13606_vm0, %v10362_v60, 0.0  ;;  %vm13649_vm9 = vmmov %vm13606_vm0 }
 0x551   : > { %3190 = vadd.xlane.f32.xlu2 %v3189_v38 }
 0x553   : > { %v2892_v5 = vpop.f32.mrf.mxu2 }
 0x554   : > { %v2893_v1 = vadd.f32 %v2892_v5, %v10262_v32 }
 0x555   : > { %v3096_v45 = vpop.f32.mrf.mxu3 }
 0x556   : > { %v2956_v8 = vmax.f32 %v2893_v1, 0.0  ;;  %v10369_v46 = vadd.f32 %v3096_v45, %v10343_v28 }
 0x558   : > { %4512 = vmatmul.msk.f32.gmra.mxu3 %vm13635_vm11, %v2956_v8  ;;  %v3192_v26 = vsel %vm13638_vm6, %v10369_v46, 0.0  ;;  %vm13650_vm11 = vmmov %vm13606_vm0 }
 0x559   : > { %3193 = vadd.xlane.f32.xlu0 %v3192_v26  ;;  %vm13653_vm6 = vmmov %vm13606_vm0 }
 0x55b   : > { %v2895_v23 = vpop.f32.mrf.mxu2 }
 0x55c   : > { %v2896_v41 = vadd.f32 %v2895_v23, %v10262_v32 }
 0x55d   : > { %v3099_v62 = vpop.f32.mrf.mxu3 }
 0x55e   : > { %v2957_v50 = vmax.f32 %v2896_v41, 0.0  ;;  %v10376_v29 = vadd.f32 %v3099_v62, %v10343_v28 }
 0x560   : > { %4513 = vmatmul.msk.f32.gmra.mxu3 %vm13636_vm4, %v2957_v50  ;;  %v3195_v9 = vsel %vm13640_vm14, %v10376_v29, 0.0  ;;  %vm13651_vm4 = vmmov %vm13606_vm0 }
 0x561   : > { %3196 = vadd.xlane.f32.xlu2 %v3195_v9  ;;  %vm13655_vm14 = vmmov %vm13606_vm0 }
 0x563   : > { %v2898_v31 = vpop.f32.mrf.mxu2 }
 0x564   : > { %v2899_v33 = vadd.f32 %v2898_v31, %v10262_v32 }
 0x565   : > { %v3102_v58 = vpop.f32.mrf.mxu3 }
 0x566   : > { %v2958_v13 = vmax.f32 %v2899_v33, 0.0  ;;  %v10383_v19 = vadd.f32 %v3102_v58, %v10343_v28 }
 0x568   : > { %4514 = vmatmul.msk.f32.gmra.mxu3 %vm13637_vm3, %v2958_v13  ;;  %v3198_v49 = vsel %vm13642_vm10, %v10383_v19, 0.0  ;;  %vm13652_vm3 = vmmov %vm13606_vm0 }
 0x569   : > { %3199 = vadd.xlane.f32.xlu1 %v3198_v49  ;;  %vm13657_vm10 = vmmov %vm13606_vm0 }
 0x56b   : > { %v2901_v48 = vpop.f32.mrf.mxu2 }
 0x56c   : > { %v2902_v42 = vadd.f32 %v2901_v48, %v10262_v32 }
 0x56d   : > { %v3105_v30 = vpop.f32.mrf.mxu3 }
 0x56e   : > { %v2959_v27 = vmax.f32 %v2902_v42, 0.0  ;;  %v10390_v47 = vadd.f32 %v3105_v30, %v10343_v28 }
 0x570   : > { %4515 = vmatmul.msk.f32.gmra.mxu3 %vm13639_vm13, %v2959_v27  ;;  %v3201_v4 = vsel %vm13644_vm7, %v10390_v47, 0.0  ;;  %vm13654_vm13 = vmmov %vm13606_vm0 }
 0x571   : > { %3202 = vadd.xlane.f32.xlu2 %v3201_v4  ;;  %vm13659_vm7 = vmmov %vm13606_vm0 }
 0x573   : > { %v2904_v21 = vpop.f32.mrf.mxu2 }
 0x574   : > { %v2905_v18 = vadd.f32 %v2904_v21, %v10262_v32 }
 0x575   : > { %v3108_v25 = vpop.f32.mrf.mxu3 }
 0x576   : > { %v2960_v14 = vmax.f32 %v2905_v18, 0.0  ;;  %v10397_v56 = vadd.f32 %v3108_v25, %v10343_v28 }
 0x578   : > { %4516 = vmatmul.msk.f32.gmra.mxu3 %vm13641_vm1, %v2960_v14  ;;  %v3204_v39 = vsel %vm13646_vm2, %v10397_v56, 0.0  ;;  %vm13656_vm1 = vmmov %vm13606_vm0 }
 0x579   : > { %3205 = vadd.xlane.f32.xlu1 %v3204_v39  ;;  %vm13661_vm2 = vmmov %vm13606_vm0 }
 0x57b   : > { %v2907_v37 = vpop.f32.mrf.mxu2 }
 0x57c   : > { %v2908_v35 = vadd.f32 %v2907_v37, %v10262_v32 }
 0x57d   : > { %v3111_v11 = vpop.f32.mrf.mxu3 }
 0x57e   : > { %v2961_v52 = vmax.f32 %v2908_v35, 0.0  ;;  %v10404_v6 = vadd.f32 %v3111_v11, %v10343_v28 }
 0x580   : > { %4517 = vmatmul.msk.f32.gmra.mxu3 %vm13643_vm5, %v2961_v52  ;;  %v3207_v16 = vsel %vm13648_vm8, %v10404_v6, 0.0  ;;  %vm13658_vm5 = vmmov %vm13606_vm0 }
 0x581   : > { %3208 = vadd.xlane.f32.xlu2 %v3207_v16  ;;  %vm13663_vm8 = vmmov %vm13606_vm0 }
 0x583   : > { %v2910_v3 = vpop.f32.mrf.mxu2 }
 0x584   : > { %v2911_v24 = vadd.f32 %v2910_v3, %v10262_v32 }
 0x585   : > { %v3114_v20 = vpop.f32.mrf.mxu3 }
 0x586   : > { %v2962_v55 = vmax.f32 %v2911_v24, 0.0  ;;  %v10411_v54 = vadd.f32 %v3114_v20, %v10343_v28 }
 0x588   : > { %4518 = vmatmul.msk.f32.gmra.mxu3 %vm13645_vm12, %v2962_v55  ;;  %v3210_v59 = vsel %vm13650_vm11, %v10411_v54, 0.0  ;;  %vm13660_vm12 = vmmov %vm13606_vm0 }
 0x589   : > { %3211 = vadd.xlane.f32.xlu0 %v3210_v59  ;;  %vm13665_vm11 = vmmov %vm13606_vm0 }
 0x58b   : > { %v2913_v51 = vpop.f32.mrf.mxu2 }
 0x58c   : > { %v2914_v61 = vadd.f32 %v2913_v51, %v10262_v32 }
 0x58e   : > { %v2963_v12 = vmax.f32 %v2914_v61, 0.0 }
 0x590   : > { %4519 = vmatmul.msk.f32.gmra.mxu3 %vm13647_vm15, %v2963_v12  ;;  %vm13662_vm15 = vmmov %vm13606_vm0 }
 0x592   : > { %v3117_v63 = vpop.f32.mrf.mxu3 }
 0x593   : > { %v2916_v53 = vpop.f32.mrf.mxu2  ;;  %v10418_v22 = vadd.f32 %v3117_v63, %v10343_v28 }
 0x594   : > { %v2917_v34 = vadd.f32 %v2916_v53, %v10262_v32 }
 0x595   : > { %v3213_v2 = vsel %vm13606_vm0, %v10418_v22, 0.0 }
 0x596   : > { %v2964_v10 = vmax.f32 %v2917_v34, 0.0  ;;  %3214 = vadd.xlane.f32.xlu1 %v3213_v2 }
 0x598   : > { %4520 = vmatmul.msk.f32.gmra.mxu3 %vm13649_vm9, %v2964_v10  ;;  %vm13664_vm9 = vmmov %vm13606_vm0 }
 0x59b   : > { %v2919_v7 = vpop.f32.mrf.mxu2 }
 0x59c   : > { %v2920_v44 = vadd.f32 %v2919_v7, %v10262_v32 }
 0x59e   : > { %v2965_v17 = vmax.f32 %v2920_v44, 0.0 }
 0x59f   : > { %v3120_v1 = vpop.f32.mrf.mxu3 }
 0x5a0   : > { %4521 = vmatmul.msk.f32.gmra.mxu3 %vm13651_vm4, %v2965_v17  ;;  %v10425_v23 = vadd.f32 %v3120_v1, %v10343_v28  ;;  %vm13666_vm4 = vmmov %vm13606_vm0 }
 0x5a2   : > { %v3216_v50 = vsel %vm13653_vm6, %v10425_v23, 0.0  ;;  %vm13668_vm6 = vmmov %vm13606_vm0 }
 0x5a3   : > { %v2922_v57 = vpop.f32.mrf.mxu2  ;;  %3217 = vadd.xlane.f32.xlu2 %v3216_v50 }
 0x5a4   : > { %v2923_v40 = vadd.f32 %v2922_v57, %v10262_v32 }
 0x5a6   : > { %v2966_v15 = vmax.f32 %v2923_v40, 0.0 }
 0x5a8   : > { %4522 = vmatmul.msk.f32.gmra.mxu3 %vm13652_vm3, %v2966_v15  ;;  %vm13667_vm3 = vmmov %vm13606_vm0 }
 0x5ab   : > { %v2925_v5 = vpop.f32.mrf.mxu2 }
 0x5ac   : > { %v2926_v8 = vadd.f32 %v2925_v5, %v10262_v32 }
 0x5ad   : > { %v3123_v0 = vpop.f32.mrf.mxu3 }
 0x5ae   : > { %v2967_v41 = vmax.f32 %v2926_v8, 0.0  ;;  %v10432_v13 = vadd.f32 %v3123_v0, %v10343_v28 }
 0x5b0   : > { %4523 = vmatmul.msk.f32.gmra.mxu3 %vm13654_vm13, %v2967_v41  ;;  %v3219_v48 = vsel %vm13655_vm14, %v10432_v13, 0.0  ;;  %vm13669_vm13 = vmmov %vm13606_vm0 }
 0x5b1   : > { %3220 = vadd.xlane.f32.xlu0 %v3219_v48  ;;  %vm13670_vm14 = vmmov %vm13606_vm0 }
 0x5b3   : > { %v2928_v31 = vpop.f32.mrf.mxu2 }
 0x5b4   : > { %v2929_v33 = vadd.f32 %v2928_v31, %v10262_v32 }
 0x5b6   : > { %v2968_v38 = vmax.f32 %v2929_v33, 0.0 }
 0x5b7   : > { %v3126_v27 = vpop.f32.mrf.mxu3 }
 0x5b8   : > { %4524 = vmatmul.msk.f32.gmra.mxu3 %vm13656_vm1, %v2968_v38  ;;  %v10439_v26 = vadd.f32 %v3126_v27, %v10343_v28  ;;  %vm13671_vm1 = vmmov %vm13606_vm0 }
 0x5ba   : > { %v3222_v62 = vsel %vm13657_vm10, %v10439_v26, 0.0  ;;  %vm13672_vm10 = vmmov %vm13606_vm0 }
 0x5bb   : > { %v2931_v45 = vpop.f32.mrf.mxu2  ;;  %3223 = vadd.xlane.f32.xlu1 %v3222_v62 }
 0x5bc   : > { %v2932_v42 = vadd.f32 %v2931_v45, %v10262_v32  ;;  %v4732_v45 = vmov 32.0  }
 0x5bd   : > { %4616 = vrcp.f32 %v4732_v45 }
 0x5be   : > { %v2969_v21 = vmax.f32 %v2932_v42, 0.0 }
 0x5c0   : > { %4525 = vmatmul.msk.f32.gmra.mxu3 %vm13658_vm5, %v2969_v21  ;;  %v3129_v9 = vpop.f32.mrf.mxu3  ;;  %vm13673_vm5 = vmmov %vm13606_vm0 }
 0x5c1   : > { %v10446_v37 = vadd.f32 %v3129_v9, %v10343_v28 }
 0x5c3   : > { %v2934_v18 = vpop.f32.mrf.mxu2  ;;  %v3225_v35 = vsel %vm13659_vm7, %v10446_v37, 0.0  ;;  %v4617_v21 = vpop.eup %4616  ;;  %vm13674_vm7 = vmmov %vm13606_vm0 }
 0x5c4   : > { %v2935_v14 = vadd.f32 %v2934_v18, %v10262_v32  ;;  %3226 = vadd.xlane.f32.xlu2 %v3225_v35 }
 0x5c6   : > { %v2970_v58 = vmax.f32 %v2935_v14, 0.0  ;;  %v3283_v14 = vmul.f32 32.0, %v4617_v21 }
 0x5c8   : > { %4526 = vmatmul.msk.f32.gmra.mxu3 %vm13660_vm12, %v2970_v58  ;;  %v3284_v9 = vsub.f32 1.0, %v3283_v14  ;;  %vm3287_vm12 = vweird.f32 %v4617_v21 }
 0x5cb   : > { %v2937_v52 = vpop.f32.mrf.mxu2  ;;  %v3132_v3 = vpop.f32.mrf.mxu3 }
 0x5cc   : > { %v2938_v49 = vadd.f32 %v2937_v52, %v10262_v32  ;;  %v10453_v30 = vadd.f32 %v3132_v3, %v10343_v28  ;;  %v3194_v45 = vpop.xlane.xlu0 %3193 }
 0x5ce   : > { %v2971_v24 = vmax.f32 %v2938_v49, 0.0  ;;  %v3228_v55 = vsel %vm13661_vm2, %v10453_v30, 0.0  ;;  %v3285_v49 = vmul.f32 %v4617_v21, %v3284_v9  ;;  %vm13675_vm2 = vmmov %vm13606_vm0 }
 0x5cf   : > { %3229 = vadd.xlane.f32.xlu0 %v3228_v55 }
 0x5d0   : > { %4527 = vmatmul.msk.f32.gmra.mxu3 %vm13662_vm15, %v2971_v24  ;;  %v3286_v3 = vadd.f32 %v4617_v21, %v3285_v49  ;;  %vm13676_vm15 = vmmov %vm13606_vm0 }
 0x5d3   : > { %v3135_v4 = vpop.f32.mrf.mxu3 }
 0x5d4   : > { %v10459_v51 = vadd.f32 %v3135_v4, %v10343_v28 }
 0x5d6   : > { %v3231_v25 = vsel %vm13663_vm8, %v10459_v51, 0.0  ;;  %vm13677_vm8 = vmmov %vm13606_vm0 }
 0x5d7   : > { %3232 = vadd.xlane.f32.xlu1 %v3231_v25  ;;  %v10528_v25 = vsel %vm3287_vm12, %v4617_v21, %v3286_v3  ;;  %vm13693_vm12 = vmmov %vm13606_vm0 }
 0x5d8   : > { %v3291_v21 = vmul.f32 %v10528_v25, %v3194_v45 }
 0x5db   : > { %v3138_v32 = vpop.f32.mrf.mxu3 }
 0x5dc   : > { %v10464_v61 = vadd.f32 %v3138_v32, %v10343_v28  ;;  %v3188_v32 = vpop.xlane.xlu1 %3187 }
 0x5de   : > { %v3234_v12 = vsel %vm13664_vm9, %v10464_v61, 0.0  ;;  %vm13678_vm9 = vmmov %vm13606_vm0 }
 0x5df   : > { %3235 = vadd.xlane.f32.xlu2 %v3234_v12  ;;  %v3191_v12 = vpop.xlane.xlu2 %3190 }
 0x5e3   : > { %v3141_v39 = vpop.f32.mrf.mxu3 }
 0x5e4   : > { %v10469_v53 = vadd.f32 %v3141_v39, %v10343_v28  ;;  %v3289_v39 = vmul.f32 %v10528_v25, %v3188_v32 }
 0x5e6   : > { %v3237_v11 = vsel %vm13665_vm11, %v10469_v53, 0.0  ;;  %vm13679_vm11 = vmmov %vm13606_vm0 }
 0x5e7   : > { %3238 = vadd.xlane.f32.xlu0 %v3237_v11 }
 0x5eb   : > { %v3144_v34 = vpop.f32.mrf.mxu3 }
 0x5ec   : > { %v10474_v10 = vadd.f32 %v3144_v34, %v10343_v28 }
 0x5ee   : > { %v3240_v16 = vsel %vm13666_vm4, %v10474_v10, 0.0  ;;  %vm13681_vm4 = vmmov %vm13606_vm0 }
 0x5ef   : > { %3241 = vadd.xlane.f32.xlu1 %v3240_v16  ;;  %v10535_v16 = vsub.f32 %v10348_v36, %v3289_v39 }
 0x5f3   : > { %v3147_v7 = vpop.f32.mrf.mxu3 }
 0x5f4   : > { %v10479_v20 = vadd.f32 %v3147_v7, %v10343_v28 }
 0x5f6   : > { %v3243_v44 = vsel %vm13606_vm0, %v10479_v20, 0.0 }
 0x5f7   : > { %3244 = vadd.xlane.f32.xlu2 %v3243_v44  ;;  %v3197_v44 = vpop.xlane.xlu2 %3196 }
 0x5fb   : > { %v3150_v17 = vpop.f32.mrf.mxu3 }
 0x5fc   : > { %v10484_v59 = vadd.f32 %v3150_v17, %v10343_v28  ;;  %v3200_v17 = vpop.xlane.xlu1 %3199 }
 0x5fe   : > { %v3246_v57 = vsel %vm13667_vm3, %v10484_v59, 0.0  ;;  %vm13683_vm3 = vmmov %vm13606_vm0 }
 0x5ff   : > { %3247 = vadd.xlane.f32.xlu0 %v3246_v57  ;;  %v3290_v57 = vmul.f32 %v10528_v25, %v3191_v12 }
 0x601   : > { %v10547_v36 = vsub.f32 %v10362_v60, %v3290_v57 }
 0x603   : > { %v3153_v63 = vpop.f32.mrf.mxu3 }
 0x604   : > { %v10489_v40 = vadd.f32 %v3153_v63, %v10343_v28  ;;  %v3292_v63 = vmul.f32 %v10528_v25, %v3197_v44 }
 0x606   : > { %v3249_v15 = vsel %vm13668_vm6, %v10489_v40, 0.0  ;;  %vm13684_vm6 = vmmov %vm13606_vm0 }
 0x607   : > { %3250 = vadd.xlane.f32.xlu1 %v3249_v15  ;;  %v3353_v15 = vmul.f32 %v10535_v16, %v10535_v16 }
 0x60b   : > { %v3156_v2 = vpop.f32.mrf.mxu3 }
 0x60c   : > { %v10494_v5 = vadd.f32 %v3156_v2, %v10343_v28 }
 0x60e   : > { %v3252_v1 = vsel %vm13669_vm13, %v10494_v5, 0.0  ;;  %vm13685_vm13 = vmmov %vm13606_vm0 }
 0x60f   : > { %3253 = vadd.xlane.f32.xlu2 %v3252_v1 }
 0x613   : > { %v3159_v8 = vpop.f32.mrf.mxu3 }
 0x614   : > { %v10499_v41 = vadd.f32 %v3159_v8, %v10343_v28  ;;  %v10550_v8 = vsub.f32 %v10376_v29, %v3292_v63 }
 0x616   : > { %v3255_v50 = vsel %vm13670_vm14, %v10499_v41, 0.0  ;;  %v3356_v29 = vmul.f32 %v10550_v8, %v10550_v8  ;;  %vm13687_vm14 = vmmov %vm13606_vm0 }
 0x617   : > { %3256 = vadd.xlane.f32.xlu0 %v3255_v50  ;;  %v3385_v50 = vsel %vm13677_vm8, %v3353_v15, 0.0  ;;  %vm13698_vm8 = vmmov %vm13606_vm0 }
 0x618   : > { %v3394_v49 = vsel %vm13681_vm4, %v3356_v29, 0.0  ;;  %vm13704_vm4 = vmmov %vm13606_vm0 }
 0x61b   : > { %v3162_v31 = vpop.f32.mrf.mxu3 }
 0x61c   : > { %v10504_v0 = vadd.f32 %v3162_v31, %v10343_v28 }
 0x61e   : > { %v3258_v33 = vsel %vm13671_vm1, %v10504_v0, 0.0  ;;  %vm13688_vm1 = vmmov %vm13606_vm0 }
 0x61f   : > { %3259 = vadd.xlane.f32.xlu1 %v3258_v33  ;;  %v3203_v33 = vpop.xlane.xlu2 %3202 }
 0x620   : > { %v3294_v39 = vmul.f32 %v10528_v25, %v3203_v33 }
 0x622   : > { %v10596_v57 = vsub.f32 %v10390_v47, %v3294_v39 }
 0x623   : > { %v3165_v38 = vpop.f32.mrf.mxu3 }
 0x624   : > { %v10509_v48 = vadd.f32 %v3165_v38, %v10343_v28  ;;  %v3206_v38 = vpop.xlane.xlu1 %3205 }
 0x625   : > { %v3295_v60 = vmul.f32 %v10528_v25, %v3206_v38  ;;  %v3358_v38 = vmul.f32 %v10596_v57, %v10596_v57 }
 0x626   : > { %v3261_v42 = vsel %vm13672_vm10, %v10509_v48, 0.0  ;;  %vm13689_vm10 = vmmov %vm13606_vm0 }
 0x627   : > { %3262 = vadd.xlane.f32.xlu2 %v3261_v42  ;;  %v3354_v42 = vmul.f32 %v10547_v36, %v10547_v36 }
 0x629   : > { %v3388_v9 = vsel %vm13679_vm11, %v3354_v42, 0.0  ;;  %vm13702_vm11 = vmmov %vm13606_vm0 }
 0x62b   : > { %v3168_v27 = vpop.f32.mrf.mxu3 }
 0x62c   : > { %v10514_v62 = vadd.f32 %v3168_v27, %v10343_v28  ;;  %v3293_v27 = vmul.f32 %v10528_v25, %v3200_v17  ;;  %v3215_v32 = vpop.xlane.xlu1 %3214 }
 0x62e   : > { %v3264_v18 = vsel %vm13673_vm5, %v10514_v62, 0.0  ;;  %vm13691_vm5 = vmmov %vm13606_vm0 }
 0x62f   : > { %3265 = vadd.xlane.f32.xlu0 %v3264_v18 }
 0x633   : > { %v3171_v58 = vpop.f32.mrf.mxu3 }
 0x634   : > { %v10519_v35 = vadd.f32 %v3171_v58, %v10343_v28  ;;  %v10567_v58 = vsub.f32 %v10383_v19, %v3293_v27  ;;  %v3298_v19 = vmul.f32 %v10528_v25, %v3215_v32  ;;  %v3224_v15 = vpop.xlane.xlu1 %3223 }
 0x636   : > { %v3267_v52 = vsel %vm13674_vm7, %v10519_v35, 0.0  ;;  %v3357_v12 = vmul.f32 %v10567_v58, %v10567_v58  ;;  %vm13692_vm7 = vmmov %vm13606_vm0 }
 0x637   : > { %3268 = vadd.xlane.f32.xlu1 %v3267_v52  ;;  %v10570_v52 = vsub.f32 %v10397_v56, %v3295_v60 }
 0x638   : > { %v3397_v17 = vsel %vm13684_vm6, %v3357_v12, 0.0  ;;  %vm13708_vm6 = vmmov %vm13606_vm0 }
 0x639   : > { %13680 = vst [vmem:[#allocation31_spill] sm:$0xff] %v10570_v52  ;;  %v3359_v56 = vmul.f32 %v10570_v52, %v10570_v52 }
 0x63b   : > { %v3174_v24 = vpop.f32.mrf.mxu3  ;;  %v3403_v44 = vsel %vm13683_vm3, %v3359_v56, 0.0  ;;  %vm13706_vm3 = vmmov %vm13606_vm0 }
 0x63c   : > { %v10524_v55 = vadd.f32 %v3174_v24, %v10343_v28  ;;  %v10576_v24 = vsub.f32 %v10369_v46, %v3291_v21 }
 0x63e   : > { %v3270_v4 = vsel %vm13675_vm2, %v10524_v55, 0.0  ;;  %v3355_v46 = vmul.f32 %v10576_v24, %v10576_v24  ;;  %vm13696_vm2 = vmmov %vm13606_vm0 }
 0x63f   : > { %3271 = vadd.xlane.f32.xlu2 %v3270_v4  ;;  %v3209_v4 = vpop.xlane.xlu2 %3208 }
 0x643   : > { %v3177_v11 = vpop.f32.mrf.mxu3 }
 0x644   : > { %v10532_v34 = vadd.f32 %v3177_v11, %v10343_v28 }
 0x646   : > { %v3273_v7 = vsel %vm13676_vm15, %v10532_v34, 0.0  ;;  %vm13697_vm15 = vmmov %vm13606_vm0 }
 0x647   : > { %3274 = vadd.xlane.f32.xlu0 %v3273_v7  ;;  %v10591_v7 = vsub.f32 %v10418_v22, %v3298_v19  ;;  %v3218_v63 = vpop.xlane.xlu2 %3217  ;;  %v3301_v22 = vmul.f32 %v10528_v25, %v3224_v15 }
 0x649   : > { %13682 = vst [vmem:[#allocation7_spill] sm:$0xff] %v10591_v7  ;;  %v10612_v42 = vsub.f32 %v10439_v26, %v3301_v22 }
 0x64b   : > { %v3180_v2 = vpop.f32.mrf.mxu3  ;;  %13686 = vst [vmem:[#allocation79_spill] sm:$0xff] %v10612_v42 }
 0x64c   : > { %v10544_v1 = vadd.f32 %v3180_v2, %v10343_v28  ;;  %v3391_v2 = vsel %vm13685_vm13, %v3355_v46, 0.0  ;;  %vm13709_vm13 = vmmov %vm13606_vm0 }
 0x64e   : > { %v3276_v31 = vsel %vm13678_vm9, %v10544_v1, 0.0  ;;  %vm13701_vm9 = vmmov %vm13606_vm0 }
 0x64f   : > { %3386 = vadd.xlane.f32.xlu0 %v3385_v50  ;;  %3277 = vadd.xlane.f32.xlu1 %v3276_v31  ;;  %v3212_v50 = vpop.xlane.xlu0 %3211  ;;  %v3362_v31 = vmul.f32 %v10591_v7, %v10591_v7  ;;  %v3227_v21 = vpop.xlane.xlu2 %3226 }
 0x650   : > { %v3297_v47 = vmul.f32 %v10528_v25, %v3212_v50 }
 0x651   : > { %v3412_v27 = vsel %vm13687_vm14, %v3362_v31, 0.0  ;;  %vm13711_vm14 = vmmov %vm13606_vm0 }
 0x652   : > { %v10617_v29 = vsub.f32 %v10411_v54, %v3297_v47 }
 0x653   : > { %v3183_v18 = vpop.f32.mrf.mxu3 }
 0x654   : > { %v10563_v14 = vadd.f32 %v3183_v18, %v10343_v28  ;;  %v3296_v28 = vmul.f32 %v10528_v25, %v3209_v4  ;;  %v3233_v18 = vpop.xlane.xlu1 %3232  ;;  %v3361_v32 = vmul.f32 %v10617_v29, %v10617_v29 }
 0x655   : > { %v3304_v26 = vmul.f32 %v10528_v25, %v3233_v18 }
 0x656   : > { %v3279_v3 = vsel %vm13606_vm0, %v10563_v14, 0.0  ;;  %v10588_v11 = vsub.f32 %v10404_v6, %v3296_v28  ;;  %v3299_v6 = vmul.f32 %v10528_v25, %v3218_v63 }
 0x657   : > { %3395 = vadd.xlane.f32.xlu0 %v3394_v49  ;;  %3389 = vadd.xlane.f32.xlu1 %v3388_v9  ;;  %v3400_v9 = vsel %vm13689_vm10, %v3358_v38, 0.0  ;;  %v3221_v49 = vpop.xlane.xlu0 %3220  ;;  %v10633_v19 = vsub.f32 %v10459_v51, %v3304_v26  ;;  %v3236_v46 = vpop.xlane.xlu2 %3235  ;;  %vm13714_vm10 = vmmov %vm13606_vm0 }
 0x658   : > { %3280 = vadd.xlane.f32.xlu2 %v3279_v3  ;;  %v3360_v33 = vmul.f32 %v10588_v11, %v10588_v11  ;;  %v10609_v45 = vsub.f32 %v10425_v23, %v3299_v6  ;;  %v3302_v23 = vmul.f32 %v10528_v25, %v3227_v21  ;;  %v3365_v3 = vmul.f32 %v10612_v42, %v10612_v42 }
 0x659   : > { %v3300_v54 = vmul.f32 %v10528_v25, %v3221_v49  ;;  %13690 = vst [vmem:[#allocation85_spill] sm:$0xff] %v10633_v19  ;;  %v3368_v15 = vmul.f32 %v10633_v19, %v10633_v19 }
 0x65a   : > { %v3406_v60 = vsel %vm13688_vm1, %v3360_v33, 0.0  ;;  %v3363_v4 = vmul.f32 %v10609_v45, %v10609_v45  ;;  %v10630_v28 = vsub.f32 %v10446_v37, %v3302_v23  ;;  %v3421_v56 = vsel %vm13691_vm5, %v3365_v3, 0.0  ;;  %vm13713_vm1 = vmmov %vm13606_vm0 }
 0x65b   : > { %v10638_v39 = vsub.f32 %v10432_v13, %v3300_v54  ;;  %v3305_v37 = vmul.f32 %v10528_v25, %v3236_v46  ;;  %v3430_v31 = vsel %vm13696_vm2, %v3368_v15, 0.0  ;;  %vm13716_vm5 = vmmov %vm13606_vm0 }
 0x65c   : > { %v3415_v12 = vsel %vm13692_vm7, %v3363_v4, 0.0  ;;  %vm13718_vm7 = vmmov %vm13606_vm0 }
 0x65d   : > { %v3364_v50 = vmul.f32 %v10638_v39, %v10638_v39  ;;  %v10651_v6 = vsub.f32 %v10464_v61, %v3305_v37  ;;  %vm13722_vm2 = vmmov %vm13606_vm0 }
 0x65f   : > { %3404 = vadd.xlane.f32.xlu0 %v3403_v44  ;;  %3398 = vadd.xlane.f32.xlu1 %v3397_v17  ;;  %v3409_v17 = vsel %vm13693_vm12, %v3361_v32, 0.0  ;;  %v3230_v63 = vpop.xlane.xlu0 %3229  ;;  %13694 = vst [vmem:[#allocation32_spill] sm:$0xff] %v10651_v6  ;;  %v3369_v18 = vmul.f32 %v10651_v6, %v10651_v6  ;;  %vm13720_vm12 = vmmov %vm13606_vm0 }
 0x660   : > { %3392 = vadd.xlane.f32.xlu2 %v3391_v2  ;;  %v3366_v2 = vmul.f32 %v10630_v28, %v10630_v28  ;;  %v3303_v13 = vmul.f32 %v10528_v25, %v3230_v63 }
 0x661   : > { %v3433_v4 = vsel %vm13702_vm11, %v3369_v18, 0.0  ;;  %vm13728_vm11 = vmmov %vm13606_vm0 }
 0x662   : > { %v3242_v44 = vpop.xlane.xlu1 %3241  ;;  %v3424_v33 = vsel %vm13697_vm15, %v3366_v2, 0.0  ;;  %v10659_v47 = vsub.f32 %v10453_v30, %v3303_v13  ;;  %vm13724_vm15 = vmmov %vm13606_vm0 }
 0x663   : > { %v3307_v51 = vmul.f32 %v10528_v25, %v3242_v44 }
 0x664   : > { %v3367_v49 = vmul.f32 %v10659_v47, %v10659_v47 }
 0x665   : > { %v10654_v22 = vsub.f32 %v10474_v10, %v3307_v51 }
 0x666   : > { %v3427_v32 = vsel %vm13704_vm4, %v3367_v49, 0.0 }
 0x667   : > { %3413 = vadd.xlane.f32.xlu0 %v3412_v27  ;;  %3407 = vadd.xlane.f32.xlu1 %v3406_v60  ;;  %13695 = vst [vmem:[#allocation56_spill] sm:$0xff] %v10654_v22  ;;  %v3418_v27 = vsel %vm13698_vm8, %v3364_v50, 0.0  ;;  %v3239_v60 = vpop.xlane.xlu0 %3238  ;;  %v3371_v10 = vmul.f32 %v10654_v22, %v10654_v22  ;;  %vm13726_vm8 = vmmov %vm13606_vm0 }
 0x668   : > { %3401 = vadd.xlane.f32.xlu2 %v3400_v9  ;;  %v3306_v9 = vmul.f32 %v10528_v25, %v3239_v60 }
 0x669   : > { %v3439_v3 = vsel %vm13701_vm9, %v3371_v10, 0.0 }
 0x66a   : > { %v3245_v38 = vpop.xlane.xlu2 %3244  ;;  %v10680_v54 = vsub.f32 %v10469_v53, %v3306_v9 }
 0x66b   : > { %v3308_v61 = vmul.f32 %v10528_v25, %v3245_v38 }
 0x66c   : > { %13703 = vst [vmem:[#allocation114_spill] sm:$0xff] %v10680_v54  ;;  %v3370_v53 = vmul.f32 %v10680_v54, %v10680_v54 }
 0x66d   : > { %v10672_v23 = vsub.f32 %v10479_v20, %v3308_v61 }
 0x66e   : > { %v3436_v15 = vsel %vm13708_vm6, %v3370_v53, 0.0 }
 0x66f   : > { %3422 = vadd.xlane.f32.xlu0 %v3421_v56  ;;  %3416 = vadd.xlane.f32.xlu1 %v3415_v12  ;;  %13699 = vst [vmem:[#allocation6_spill] sm:$0xff] %v10672_v23 }
 0x670   : > { %3410 = vadd.xlane.f32.xlu2 %v3409_v17 }
 0x672   : > { %v3248_v56 = vpop.xlane.xlu0 %3247 }
 0x673   : > { %v3309_v46 = vmul.f32 %v10528_v25, %v3248_v56 }
 0x675   : > { %v10697_v51 = vsub.f32 %v10484_v59, %v3309_v46 }
 0x677   : > { %3431 = vadd.xlane.f32.xlu0 %v3430_v31  ;;  %3425 = vadd.xlane.f32.xlu1 %v3424_v33  ;;  %13707 = vst [vmem:[#allocation28_spill] sm:$0xff] %v10697_v51 }
 0x678   : > { %3419 = vadd.xlane.f32.xlu2 %v3418_v27 }
 0x67a   : > { %v3251_v21 = vpop.xlane.xlu1 %3250 }
 0x67b   : > { %v3310_v30 = vmul.f32 %v10528_v25, %v3251_v21 }
 0x67d   : > { %v10675_v26 = vsub.f32 %v10489_v40, %v3310_v30  ;;  %v3372_v40 = vmul.f32 %v10672_v23, %v10672_v23 }
 0x67f   : > { %13700 = vst [vmem:[#allocation107_spill] sm:$0xff] %v10675_v26  ;;  %3440 = vadd.xlane.f32.xlu0 %v3439_v3  ;;  %3434 = vadd.xlane.f32.xlu1 %v3433_v4  ;;  %v3374_v20 = vmul.f32 %v10675_v26, %v10675_v26  ;;  %v3442_v37 = vsel %vm13706_vm3, %v3372_v40, 0.0  ;;  %vm4252_vm3 = vcmask 7168  }
 0x680   : > { %3428 = vadd.xlane.f32.xlu2 %v3427_v32 }
 0x681   : > { %v3448_v63 = vsel %vm13606_vm0, %v3374_v20, 0.0 }
 0x682   : > { %v3254_v12 = vpop.xlane.xlu2 %3253 }
 0x683   : > { %v3311_v44 = vmul.f32 %v10528_v25, %v3254_v12 }
 0x685   : > { %v10692_v17 = vsub.f32 %v10494_v5, %v3311_v44  ;;  %v3373_v5 = vmul.f32 %v10697_v51, %v10697_v51 }
 0x687   : > { %13705 = vst [vmem:[#allocation59_spill] sm:$0xff] %v10692_v17  ;;  %3449 = vadd.xlane.f32.xlu0 %v3448_v63  ;;  %3443 = vadd.xlane.f32.xlu1 %v3442_v37  ;;  %v3375_v13 = vmul.f32 %v10692_v17, %v10692_v17  ;;  %v3445_v59 = vsel %vm13711_vm14, %v3373_v5, 0.0 }
 0x688   : > { %3437 = vadd.xlane.f32.xlu2 %v3436_v15 }
 0x689   : > { %v3451_v31 = vsel %vm13709_vm13, %v3375_v13, 0.0 }
 0x68a   : > { %v3257_v2 = vpop.xlane.xlu0 %3256 }
 0x68b   : > { %v3312_v50 = vmul.f32 %v10528_v25, %v3257_v2 }
 0x68d   : > { %v10707_v33 = vsub.f32 %v10499_v41, %v3312_v50 }
 0x68f   : > { %13710 = vst [vmem:[#allocation82_spill] sm:$0xff] %v10707_v33  ;;  %3452 = vadd.xlane.f32.xlu1 %v3451_v31  ;;  %v3376_v60 = vmul.f32 %v10707_v33, %v10707_v33 }
 0x690   : > { %3446 = vadd.xlane.f32.xlu2 %v3445_v59 }
 0x691   : > { %v3454_v21 = vsel %vm13713_vm1, %v3376_v60, 0.0 }
 0x692   : > { %v3260_v38 = vpop.xlane.xlu1 %3259 }
 0x693   : > { %v3313_v27 = vmul.f32 %v10528_v25, %v3260_v38 }
 0x695   : > { %v10714_v61 = vsub.f32 %v10504_v0, %v3313_v27 }
 0x697   : > { %13712 = vst [vmem:[#allocation2_spill] sm:$0xff] %v10714_v61  ;;  %v3377_v10 = vmul.f32 %v10714_v61, %v10714_v61  ;;  %v3987_v61 = vld [vmem:[%s10766_s13 + $0xc0] sm:$0xff] }
 0x698   : > { %3455 = vadd.xlane.f32.xlu2 %v3454_v21  ;;  %v3963_v21 = vld [vmem:[%s10766_s13] sm:$0xff] }
 0x699   : > { %v3457_v41 = vsel %vm13714_vm10, %v3377_v10, 0.0  ;;  %v3964_v10 = vld [vmem:[%s10766_s13 + $0x8] sm:$0xff]  ;;  %vm3995_vm9 = vcmp.lt.f32.partialorder %v3963_v21, 0.25 }
 0x69a   : > { %v3263_v18 = vpop.xlane.xlu2 %3262  ;;  %3458 = vadd.xlane.f32.xlu0 %v3457_v41  ;;  %vm3996_vm4 = vcmp.lt.f32.partialorder %v3964_v10, 0.25 }
 0x69b   : > { %v3314_v9 = vmul.f32 %v10528_v25, %v3263_v18  ;;  %v3966_v18 = vld [vmem:[%s10766_s13 + $0x18] sm:$0xff] }
 0x69c   : > { %vm3998_vm0 = vcmp.lt.f32.partialorder %v3966_v18, 0.25  ;;  %v3969_v18 = vld [vmem:[%s10766_s13 + $0x30] sm:$0xff] }
 0x69d   : > { %v10722_v30 = vsub.f32 %v10509_v48, %v3314_v9  ;;  %v3971_v9 = vld [vmem:[%s10766_s13 + $0x40] sm:$0xff] }
 0x69e   : > { %vm4003_vm6 = vcmp.lt.f32.partialorder %v3971_v9, 0.25  ;;  %v3980_v9 = vld [vmem:[%s10766_s13 + $0x88] sm:$0xff] }
 0x69f   : > { %13715 = vst [vmem:[#allocation10_spill] sm:$0xff] %v10722_v30  ;;  %v3378_v49 = vmul.f32 %v10722_v30, %v10722_v30 }
 0x6a1   : > { %v3460_v0 = vsel %vm13716_vm5, %v3378_v49, 0.0 }
 0x6a2   : > { %3461 = vadd.xlane.f32.xlu1 %v3460_v0  ;;  %v3266_v3 = vpop.xlane.xlu0 %3265  ;;  %v3968_v0 = vld [vmem:[%s10766_s13 + $0x28] sm:$0xff] }
 0x6a3   : > { %v3315_v4 = vmul.f32 %v10528_v25, %v3266_v3  ;;  %v4028_v3 = vsel %vm3996_vm4, 1, %v12276_v43  ;;  %vm4000_vm13 = vcmp.lt.f32.partialorder %v3968_v0, 0.25 }
 0x6a4   : > { %4254 = vst.msk [vmem:[%s10783_s16 + $0x8] sm:$0xff] %vm4252_vm3, %v4028_v3 }
 0x6a5   : > { %v10729_v32 = vsub.f32 %v10514_v62, %v3315_v4  ;;  %v4030_v4 = vsel %vm3998_vm0, 1, %v12276_v43 }
 0x6a6   : > { %4256 = vst.msk [vmem:[%s10783_s16 + $0x18] sm:$0xff] %vm4252_vm3, %v4030_v4 }
 0x6a7   : > { %13717 = vst [vmem:[#allocation34_spill] sm:$0xff] %v10729_v32  ;;  %v3379_v56 = vmul.f32 %v10729_v32, %v10729_v32 }
 0x6a9   : > { %v3463_v12 = vsel %vm13718_vm7, %v3379_v56, 0.0  ;;  %v4035_v56 = vsel %vm4003_vm6, 1, %v12276_v43 }
 0x6aa   : > { %v3269_v20 = vpop.xlane.xlu1 %3268  ;;  %3464 = vadd.xlane.f32.xlu2 %v3463_v12  ;;  %v3965_v12 = vld [vmem:[%s10766_s13 + $0x10] sm:$0xff]  ;;  %4261 = vst.msk [vmem:[%s10783_s16 + $0x40] sm:$0xff] %vm4252_vm3, %v4035_v56 }
 0x6ab   : > { %v3316_v48 = vmul.f32 %v10528_v25, %v3269_v20  ;;  %v3974_v20 = vld [vmem:[%s10766_s13 + $0x58] sm:$0xff]  ;;  %vm3997_vm14 = vcmp.lt.f32.partialorder %v3965_v12, 0.25 }
 0x6ac   : > { %vm4006_vm1 = vcmp.lt.f32.partialorder %v3974_v20, 0.25  ;;  %v3972_v20 = vld [vmem:[%s10766_s13 + $0x48] sm:$0xff] }
 0x6ad   : > { %v10736_v40 = vsub.f32 %v10519_v35, %v3316_v48  ;;  %v4032_v48 = vsel %vm4000_vm13, 1, %v12276_v43 }
 0x6ae   : > { %4258 = vst.msk [vmem:[%s10783_s16 + $0x28] sm:$0xff] %vm4252_vm3, %v4032_v48 }
 0x6af   : > { %13719 = vst [vmem:[#allocation88_spill] sm:$0xff] %v10736_v40  ;;  %v3380_v46 = vmul.f32 %v10736_v40, %v10736_v40 }
 0x6b1   : > { %v3466_v44 = vsel %vm13720_vm12, %v3380_v46, 0.0  ;;  %v4029_v46 = vsel %vm3997_vm14, 1, %v12276_v43 }
 0x6b2   : > { %3467 = vadd.xlane.f32.xlu0 %v3466_v44  ;;  %v3272_v62 = vpop.xlane.xlu2 %3271  ;;  %4255 = vst.msk [vmem:[%s10783_s16 + $0x10] sm:$0xff] %vm4252_vm3, %v4029_v46  ;;  %v4038_v44 = vsel %vm4006_vm1, 1, %v12276_v43 }
 0x6b3   : > { %v3317_v53 = vmul.f32 %v10528_v25, %v3272_v62  ;;  %4264 = vst.msk [vmem:[%s10783_s16 + $0x58] sm:$0xff] %vm4252_vm3, %v4038_v44 }
 0x6b5   : > { %v10743_v63 = vsub.f32 %v10524_v55, %v3317_v53  ;;  %v3970_v53 = vld [vmem:[%s10766_s13 + $0x38] sm:$0xff] }
 0x6b6   : > { %vm4002_vm10 = vcmp.lt.f32.partialorder %v3970_v53, 0.25  ;;  %v3983_v53 = vld [vmem:[%s10766_s13 + $0xa0] sm:$0xff] }
 0x6b7   : > { %13721 = vst [vmem:[#allocation35_spill] sm:$0xff] %v10743_v63  ;;  %v3381_v37 = vmul.f32 %v10743_v63, %v10743_v63 }
 0x6b9   : > { %v3469_v15 = vsel %vm13722_vm2, %v3381_v37, 0.0  ;;  %v4034_v37 = vsel %vm4002_vm10, 1, %v12276_v43  ;;  %vm4001_vm2 = vcmp.lt.f32.partialorder %v3969_v18, 0.25  ;;  %v3986_v18 = vld [vmem:[%s10766_s13 + $0xb8] sm:$0xff] }
 0x6ba   : > { %3470 = vadd.xlane.f32.xlu1 %v3469_v15  ;;  %v3275_v35 = vpop.xlane.xlu0 %3274  ;;  %4260 = vst.msk [vmem:[%s10783_s16 + $0x38] sm:$0xff] %vm4252_vm3, %v4034_v37  ;;  %v4033_v0 = vsel %vm4001_vm2, 1, %v12276_v43  ;;  %vm4018_vm6 = vcmp.lt.f32.partialorder %v3986_v18, 0.25 }
 0x6bb   : > { %v3318_v2 = vmul.f32 %v10528_v25, %v3275_v35  ;;  %v3967_v35 = vld [vmem:[%s10766_s13 + $0x20] sm:$0xff]  ;;  %4259 = vst.msk [vmem:[%s10783_s16 + $0x30] sm:$0xff] %vm4252_vm3, %v4033_v0 }
 0x6bc   : > { %vm3999_vm5 = vcmp.lt.f32.partialorder %v3967_v35, 0.25  ;;  %v3979_v35 = vld [vmem:[%s10766_s13 + $0x80] sm:$0xff] }
 0x6bd   : > { %v10750_v13 = vsub.f32 %v10532_v34, %v3318_v2  ;;  %vm4011_vm4 = vcmp.lt.f32.partialorder %v3979_v35, 0.25 }
 0x6bf   : > { %13723 = vst [vmem:[#allocation54_spill] sm:$0xff] %v10750_v13  ;;  %v3382_v50 = vmul.f32 %v10750_v13, %v10750_v13 }
 0x6c1   : > { %v3472_v5 = vsel %vm13724_vm15, %v3382_v50, 0.0  ;;  %v3977_v50 = vld [vmem:[%s10766_s13 + $0x70] sm:$0xff]  ;;  %vm4012_vm15 = vcmp.lt.f32.partialorder %v3980_v9, 0.25  ;;  %v4043_v9 = vsel %vm4011_vm4, 1, %v12276_v43 }
 0x6c2   : > { %v3278_v55 = vpop.xlane.xlu1 %3277  ;;  %3473 = vadd.xlane.f32.xlu2 %v3472_v5  ;;  %v3387_v2 = vpop.xlane.xlu0 %3386  ;;  %v4031_v5 = vsel %vm3999_vm5, 1, %v12276_v43  ;;  %vm4009_vm7 = vcmp.lt.f32.partialorder %v3977_v50, 0.25  ;;  %4269 = vst.msk [vmem:[%s10783_s16 + $0x80] sm:$0xff] %vm4252_vm3, %v4043_v9 }
 0x6c3   : > { %v3319_v31 = vmul.f32 %v10528_v25, %v3278_v55  ;;  %4257 = vst.msk [vmem:[%s10783_s16 + $0x20] sm:$0xff] %vm4252_vm3, %v4031_v5  ;;  %v4041_v55 = vsel %vm4009_vm7, 1, %v12276_v43 }
 0x6c4   : > { %4267 = vst.msk [vmem:[%s10783_s16 + $0x70] sm:$0xff] %vm4252_vm3, %v4041_v55 }
 0x6c5   : > { %v10757_v59 = vsub.f32 %v10544_v1, %v3319_v31 }
 0x6c7   : > { %13725 = vst [vmem:[#allocation108_spill] sm:$0xff] %v10757_v59  ;;  %v3383_v38 = vmul.f32 %v10757_v59, %v10757_v59 }
 0x6c9   : > { %v3475_v27 = vsel %vm13726_vm8, %v3383_v38, 0.0 }
 0x6ca   : > { %3476 = vadd.xlane.f32.xlu0 %v3475_v27  ;;  %v3396_v38 = vpop.xlane.xlu0 %3395  ;;  %v3390_v27 = vpop.xlane.xlu1 %3389 }
 0x6cb   : > { %v3281_v34 = vpop.xlane.xlu2 %3280 }
 0x6cc   : > { %v3320_v60 = vmul.f32 %v10528_v25, %v3281_v34  ;;  %v3973_v34 = vld [vmem:[%s10766_s13 + $0x50] sm:$0xff] }
 0x6cd   : > { %vm4005_vm12 = vcmp.lt.f32.partialorder %v3973_v34, 0.25  ;;  %v3482_v34 = vmul.f32 %v3390_v27, %v10528_v25 }
 0x6ce   : > { %v10770_v1 = vsub.f32 %v10563_v14, %v3320_v60  ;;  %v4027_v14 = vsel %vm3995_vm9, 1, %v12276_v43  ;;  %vm4004_vm9 = vcmp.lt.f32.partialorder %v3972_v20, 0.25 }
 0x6cf   : > { %4253 = vst.msk [vmem:[%s10783_s16] sm:$0xff] %vm4252_vm3, %v4027_v14  ;;  %v4036_v50 = vsel %vm4004_vm9, 1, %v12276_v43  ;;  %v10889_v27 = vadd.f32 1e-05, %v3482_v34  ;;  %v3981_v34 = vld [vmem:[%s10766_s13 + $0x90] sm:$0xff] }
 0x6d0   : > { %13727 = vst [vmem:[#allocation9_spill] sm:$0xff] %v10770_v1  ;;  %v3384_v41 = vmul.f32 %v10770_v1, %v10770_v1  ;;  %vm4013_vm5 = vcmp.lt.f32.partialorder %v3981_v34, 0.25 }
 0x6d1   : > { %4262 = vst.msk [vmem:[%s10783_s16 + $0x48] sm:$0xff] %vm4252_vm3, %v4036_v50 }
 0x6d2   : > { %v3478_v49 = vsel %vm13728_vm11, %v3384_v41, 0.0  ;;  %v10830_v21 = vpop.xlane.xlu0 %3404  ;;  %v10832_v10 = vpop.xlane.xlu1 %3398  ;;  %v4037_v41 = vsel %vm4005_vm12, 1, %v12276_v43  ;;  %vm4015_vm11 = vcmp.lt.f32.partialorder %v3983_v53, 0.25 }
 0x6d3   : > { %3479 = vadd.xlane.f32.xlu1 %v3478_v49  ;;  %v10809_v62 = vpop.xlane.xlu2 %3392  ;;  %4263 = vst.msk [vmem:[%s10783_s16 + $0x50] sm:$0xff] %vm4252_vm3, %v4037_v41 }
 0x6da   : > { %4060 = vperm.xlu2 %4613, %v4027_v14   ;;  %v10841_v14 = vpop.xlane.xlu0 %3413  ;;  %v10849_v12 = vpop.xlane.xlu1 %3407 }
 0x6db   : > { %v10813_v15 = vpop.xlane.xlu2 %3401  ;;  %v3490_v54 = vmul.f32 %v10841_v14, %v10528_v25 }
 0x6dd   : > { %v11080_v52 = vadd.f32 1e-05, %v3490_v54 }
 0x6de   : > { %4063 = vperm.xlu0 %4614, %v4028_v3   ;;  %v4044_v3 = vsel %vm4012_vm15, 1, %v12276_v43 }
 0x6df   : > { %4270 = vst.msk [vmem:[%s10783_s16 + $0x88] sm:$0xff] %vm4252_vm3, %v4044_v3 }
 0x6e2   : > { %4069 = vperm.xlu2 %4613, %v4030_v4   ;;  %v3481_v4 = vmul.f32 %v3387_v2, %v10528_v25  ;;  %v3975_v2 = vld [vmem:[%s10766_s13 + $0x60] sm:$0xff] }
 0x6e3   : > { %v10825_v31 = vpop.xlane.xlu2 %3410  ;;  %vm4007_vm0 = vcmp.lt.f32.partialorder %v3975_v2, 0.25 }
 0x6e6   : > { %4084 = vperm.xlu0 %4614, %v4035_v56   ;;  %v3976_v56 = vld [vmem:[%s10766_s13 + $0x68] sm:$0xff] }
 0x6e7   : > { %vm4008_vm8 = vcmp.lt.f32.partialorder %v3976_v56, 0.25  ;;  %v3978_v56 = vld [vmem:[%s10766_s13 + $0x78] sm:$0xff] }
 0x6e8   : > { %vm4010_vm14 = vcmp.lt.f32.partialorder %v3978_v56, 0.25  ;;  %v3485_v56 = vmul.f32 %v10832_v10, %v10528_v25  ;;  %v3984_v10 = vld [vmem:[%s10766_s13 + $0xa8] sm:$0xff] }
 0x6e9   : > { %v4042_v18 = vsel %vm4010_vm14, 1, %v12276_v43  ;;  %vm4016_vm2 = vcmp.lt.f32.partialorder %v3984_v10, 0.25 }
 0x6ea   : > { %4075 = vperm.xlu2 %4613, %v4032_v48   ;;  %v10854_v48 = vadd.f32 1e-05, %v3481_v4  ;;  %4268 = vst.msk [vmem:[%s10783_s16 + $0x78] sm:$0xff] %vm4252_vm3, %v4042_v18  ;;  %v10945_v26 = vadd.f32 1e-05, %v3485_v56  ;;  %v4048_v32 = vsel %vm4016_vm2, 1, %v12276_v43 }
 0x6eb   : > { %v10828_v60 = vpop.xlane.xlu2 %3419  ;;  %4274 = vst.msk [vmem:[%s10783_s16 + $0xa8] sm:$0xff] %vm4252_vm3, %v4048_v32 }
 0x6ec   : > { %4066 = vperm.xlu1 %4615, %v4029_v46   ;;  %4618 = vrsqrt.f32 %v10854_v48  ;;  %vm3591_vm2 = vweird.f32 %v10945_v26 }
 0x6ee   : > { %4093 = vperm.xlu0 %4614, %v4038_v44   ;;  %v4040_v44 = vsel %vm4008_vm8, 1, %v12276_v43  ;;  %vm4019_vm8 = vcmp.lt.f32.partialorder %v3987_v61, 0.25 }
 0x6ef   : > { %4266 = vst.msk [vmem:[%s10783_s16 + $0x68] sm:$0xff] %vm4252_vm3, %v4040_v44 }
 0x6f2   : > { %4081 = vperm.xlu2 %4613, %v4034_v37   ;;  %v10860_v37 = vpop.xlane.xlu0 %3422 }
 0x6f3   : > { %v10839_v49 = vpop.xlane.xlu2 %3428 }
 0x6f4   : > { %4072 = vperm.xlu1 %4615, %v4031_v5   ;;  %v3484_v5 = vmul.f32 %v3396_v38, %v10528_v25  ;;  %v4039_v38 = vsel %vm4007_vm0, 1, %v12276_v43 }
 0x6f5   : > { %4265 = vst.msk [vmem:[%s10783_s16 + $0x60] sm:$0xff] %vm4252_vm3, %v4039_v38 }
 0x6f6   : > { %4102 = vperm.xlu0 %4614, %v4041_v55   ;;  %v4047_v55 = vsel %vm4015_vm11, 1, %v12276_v43  ;;  %v10885_v4 = vadd.f32 1e-05, %v3484_v5  ;;  %v3985_v5 = vld [vmem:[%s10766_s13 + $0xb0] sm:$0xff] }
 0x6f7   : > { %4273 = vst.msk [vmem:[%s10783_s16 + $0xa0] sm:$0xff] %vm4252_vm3, %v4047_v55  ;;  %vm4017_vm10 = vcmp.lt.f32.partialorder %v3985_v5, 0.25 }
 0x6f8   : > { %4620 = vrsqrt.f32 %v10885_v4  ;;  %v4049_v5 = vsel %vm4017_vm10, 1, %v12276_v43  ;;  %vm3561_vm10 = vweird.f32 %v10889_v27 }
 0x6f9   : > { %4622 = vrsqrt.f32 %v10889_v27  ;;  %4275 = vst.msk [vmem:[%s10783_s16 + $0xb0] sm:$0xff] %vm4252_vm3, %v4049_v5 }
 0x6fa   : > { %4090 = vperm.xlu2 %4613, %v4037_v41   ;;  %v10873_v41 = vpop.xlane.xlu1 %3416  ;;  %v10897_v35 = vpop.xlane.xlu0 %3431 }
 0x6fb   : > { %v10856_v46 = vpop.xlane.xlu2 %3437 }
 0x6fc   : > { %4078 = vperm.xlu1 %4615, %v4033_v0   ;;  %v3982_v0 = vld [vmem:[%s10766_s13 + $0x98] sm:$0xff] }
 0x6fd   : > { %vm4014_vm13 = vcmp.lt.f32.partialorder %v3982_v0, 0.25  ;;  %v3988_v0 = vld [vmem:[%s10766_s13 + $0xc8] sm:$0xff] }
 0x6fe   : > { %4111 = vperm.xlu0 %4614, %v4044_v3   ;;  %v10883_v3 = vpop.eup %4618  ;;  %v4046_v2 = vsel %vm4014_vm13, 1, %v12276_v43  ;;  %vm4020_vm12 = vcmp.lt.f32.partialorder %v3988_v0, 0.25 }
 0x6ff   : > { %v3546_v53 = vmul.f32 %v10883_v3, %v10854_v48  ;;  %4272 = vst.msk [vmem:[%s10783_s16 + $0x98] sm:$0xff] %vm4252_vm3, %v4046_v2  ;;  %v10931_v34 = vpop.eup %4620  ;;  %v4052_v56 = vsel %vm4020_vm12, 1, %v12276_v43  ;;  %vm3552_vm4 = vweird.f32 %v10883_v3 }
 0x700   : > { %4278 = vst.msk [vmem:[%s10783_s16 + $0xc8] sm:$0xff] %vm4252_vm3, %v4052_v56 }
 0x702   : > { %4099 = vperm.xlu2 %4613, %v4040_v44   ;;  %v4050_v44 = vsel %vm4018_vm6, 1, %v12276_v43  ;;  %v10957_v22 = vpop.xlane.xlu0 %3440  ;;  %vm3551_vm6 = vweird.f32 %v10854_v48 }
 0x703   : > { %v10892_v20 = vpop.xlane.xlu2 %3446  ;;  %4276 = vst.msk [vmem:[%s10783_s16 + $0xb8] sm:$0xff] %vm4252_vm3, %v4050_v44  ;;  %vm3553_vm13 = vmor %vm3551_vm6, %vm3552_vm4  ;;  %vm13738_vm4 = vcmask 261120  }
 0x704   : > { %4087 = vperm.xlu1 %4615, %v4036_v50   ;;  %v3989_v50 = vld [vmem:[%s10766_s13 + $0xd0] sm:$0xff] }
 0x705   : > { %vm4021_vm1 = vcmp.lt.f32.partialorder %v3989_v50, 0.25 }
 0x706   : > { %4120 = vperm.xlu0 %4614, %v4047_v55   ;;  %v3486_v55 = vmul.f32 %v10813_v15, %v10528_v25  ;;  %v3992_v15 = vld [vmem:[%s10766_s13 + $0xe8] sm:$0xff]  ;;  %v4053_v50 = vsel %vm4021_vm1, 1, %v12276_v43  ;;  %vm3582_vm1 = vweird.f32 %v10931_v34 }
 0x707   : > { %4279 = vst.msk [vmem:[%s10783_s16 + $0xd0] sm:$0xff] %vm4252_vm3, %v4053_v50  ;;  %vm4024_vm7 = vcmp.lt.f32.partialorder %v3992_v15, 0.25 }
 0x708   : > { %v10923_v59 = vadd.f32 1e-05, %v3486_v55  ;;  %v10937_v55 = vpop.eup %4622 }
 0x709   : > { %v3556_v1 = vmul.f32 %v10937_v55, %v10889_v27  ;;  %vm3562_vm14 = vweird.f32 %v10937_v55 }
 0x70a   : > { %4108 = vperm.xlu2 %4613, %v4043_v9   ;;  %v3547_v9 = vmul.f32 %v10883_v3, %v3546_v53  ;;  %v3488_v53 = vmul.f32 %v10849_v12, %v10528_v25  ;;  %v3487_v12 = vmul.f32 %v10830_v21, %v10528_v25  ;;  %4624 = vrsqrt.f32 %v10923_v59  ;;  %vm11112_vm12 = vmor %vm3561_vm10, %vm3562_vm14 }
 0x70b   : > { %v10950_v15 = vpop.xlane.xlu2 %3455  ;;  %v3576_v21 = vmul.f32 %v10931_v34, %v10885_v4  ;;  %4626 = vrsqrt.f32 %v10945_v26  ;;  %v3557_v33 = vmul.f32 %v10937_v55, %v3556_v1 }
 0x70c   : > { %4096 = vperm.xlu1 %4615, %v4039_v38   ;;  %v10915_v38 = vpop.xlane.xlu1 %3425  ;;  %v3548_v40 = vmul.f32 0.5, %v3547_v9  ;;  %v4056_v9 = vsel %vm4024_vm7, 1, %v12276_v43 }
 0x70d   : > { %4282 = vst.msk [vmem:[%s10783_s16 + $0xe8] sm:$0xff] %vm4252_vm3, %v4056_v9  ;;  %v3577_v61 = vmul.f32 %v10931_v34, %v3576_v21  ;;  %v3558_v30 = vmul.f32 0.5, %v3557_v33 }
 0x70e   : > { %4129 = vperm.xlu0 %4614, %v4050_v44   ;;  %v3483_v44 = vmul.f32 %v10809_v62, %v10528_v25  ;;  %v4045_v62 = vsel %vm4013_vm5, 1, %v12276_v43  ;;  %v3549_v10 = vsub.f32 1.5, %v3548_v40  ;;  %v3993_v40 = vld [vmem:[%s10766_s13 + $0xf0] sm:$0xff] }
 0x70f   : > { %4271 = vst.msk [vmem:[%s10783_s16 + $0x90] sm:$0xff] %vm4252_vm3, %v4045_v62  ;;  %vm4025_vm0 = vcmp.lt.f32.partialorder %v3993_v40, 0.25  ;;  %v3559_v17 = vsub.f32 1.5, %v3558_v30 }
 0x710   : > { %v10947_v13 = vadd.f32 1e-05, %v3483_v44  ;;  %v3994_v44 = vld [vmem:[%s10766_s13 + $0xf8] sm:$0xff]  ;;  %v10994_v19 = vpop.eup %4624  ;;  %v11024_v42 = vsel %vm4025_vm0, 1, %v12276_v43 }
 0x711   : > { %vm4026_vm9 = vcmp.lt.f32.partialorder %v3994_v44, 0.25  ;;  %4283 = vst.msk [vmem:[%s10783_s16 + $0xf0] sm:$0xff] %vm4252_vm3, %v11024_v42 }
 0x712   : > { %4117 = vperm.xlu2 %4613, %v4046_v2   ;;  %v3991_v2 = vld [vmem:[%s10766_s13 + $0xe0] sm:$0xff]  ;;  %4628 = vrsqrt.f32 %v10947_v13  ;;  %v10999_v21 = vsel %vm4026_vm9, 1, %v12276_v43 }
 0x713   : > { %vm4023_vm15 = vcmp.lt.f32.partialorder %v3991_v2, 0.25  ;;  %v10982_v2 = vsel %vm4019_vm8, 1, %v12276_v43  ;;  %4284 = vst.msk [vmem:[%s10783_s16 + $0xf8] sm:$0xff] %vm4252_vm3, %v10999_v21  ;;  %vm3602_vm8 = vweird.f32 %v10994_v19 }
 0x714   : > { %4105 = vperm.xlu1 %4615, %v4042_v18   ;;  %v10955_v18 = vadd.f32 1e-05, %v3488_v53  ;;  %v3990_v53 = vld [vmem:[%s10766_s13 + $0xd8] sm:$0xff]  ;;  %v10975_v0 = vsel %vm4023_vm15, 1, %v12276_v43  ;;  %v10988_v63 = vpop.xlane.xlu1 %3434  ;;  %4277 = vst.msk [vmem:[%s10783_s16 + $0xc0] sm:$0xff] %vm4252_vm3, %v10982_v2  ;;  %vm3571_vm15 = vweird.f32 %v10947_v13 }
 0x715   : > { %4281 = vst.msk [vmem:[%s10783_s16 + $0xe0] sm:$0xff] %vm4252_vm3, %v10975_v0  ;;  %vm4022_vm11 = vcmp.lt.f32.partialorder %v3990_v53, 0.25  ;;  %v3550_v53 = vmul.f32 %v10883_v3, %v3549_v10  ;;  %v3492_v10 = vmul.f32 %v10828_v60, %v10528_v25 }
 0x716   : > { %4138 = vperm.xlu0 %4614, %v4053_v50   ;;  %v3489_v50 = vmul.f32 %v10825_v31, %v10528_v25  ;;  %v10986_v31 = vadd.f32 1e-05, %v3487_v12  ;;  %4630 = vrsqrt.f32 %v10955_v18  ;;  %v11012_v1 = vsel %vm4022_vm11, 1, %v12276_v43 }
 0x717   : > { %4280 = vst.msk [vmem:[%s10783_s16 + $0xd8] sm:$0xff] %vm4252_vm3, %v11012_v1  ;;  %v3554_v33 = vsel %vm3553_vm13, %v10883_v3, %v3550_v53  ;;  %v11055_v3 = vadd.f32 1e-05, %v3492_v10  ;;  %vm3581_vm3 = vweird.f32 %v10885_v4  ;;  %v11075_v10 = vmul.f32 %v10937_v55, %v3559_v17 }
 0x718   : > { %v11001_v12 = vadd.f32 1e-05, %v3489_v50  ;;  %v3578_v50 = vmul.f32 0.5, %v3577_v61  ;;  %4632 = vrsqrt.f32 %v10986_v31  ;;  %v11032_v61 = vpop.xlane.xlu0 %3449  ;;  %v3865_v30 = vmul.f32 %v3554_v33, %v10535_v16  ;;  %vm11092_vm5 = vmor %vm3581_vm3, %vm3582_vm1 }
 0x719   : > { %13730 = vst [vmem:[#allocation117_spill] sm:$0xff] %v11032_v61  ;;  %v3494_v4 = vmul.f32 %v10915_v38, %v10528_v25  ;;  %v3564_v38 = vsel %vm11112_vm12, %v10937_v55, %v11075_v10  ;;  %vm3601_vm11 = vweird.f32 %v10923_v59  ;;  %vm3621_vm1 = vweird.f32 %v10955_v18 }
 0x71a   : > { %4126 = vperm.xlu2 %4613, %v4049_v5   ;;  %v3491_v5 = vmul.f32 %v10873_v41, %v10528_v25  ;;  %v11021_v41 = vpop.eup %4626  ;;  %4634 = vrsqrt.f32 %v11001_v12  ;;  %v3579_v48 = vsub.f32 1.5, %v3578_v50  ;;  %vm11162_vm6 = vmor %vm3601_vm11, %vm3602_vm8 }
 0x71b   : > { %v11026_v51 = vpop.eup %4628  ;;  %v3586_v60 = vmul.f32 %v11021_v41, %v10945_v26  ;;  %vm3592_vm7 = vweird.f32 %v11021_v41 }
 0x71c   : > { %4114 = vperm.xlu1 %4615, %v4045_v62   ;;  %v3596_v62 = vmul.f32 %v10994_v19, %v10923_v59  ;;  %v11041_v43 = vadd.f32 1e-05, %v3491_v5  ;;  %v3566_v61 = vmul.f32 %v11026_v51, %v10947_v13  ;;  %v11057_v53 = vpop.xlane.xlu1 %3443  ;;  %vm3572_vm0 = vweird.f32 %v11026_v51  ;;  %vm11191_vm3 = vmor %vm3591_vm2, %vm3592_vm7 }
 0x71d   : > { %v11009_v44 = vpop.xlane.xlu2 %3464  ;;  %v3587_v33 = vmul.f32 %v11021_v41, %v3586_v60  ;;  %vm11204_vm14 = vmor %vm3571_vm15, %vm3572_vm0  ;;  %vm3611_vm15 = vweird.f32 %v10986_v31 }
 0x71e   : > { %13729 = vst [vmem:[#allocation58_spill] sm:$0xff] %v11009_v44  ;;  %4147 = vperm.xlu0 %4614, %v4056_v9   ;;  %v11037_v9 = vpop.eup %4630  ;;  %v3597_v40 = vmul.f32 %v10994_v19, %v3596_v62  ;;  %4636 = vrsqrt.f32 %v11041_v43  ;;  %vm13747_vm2 = vmmov %vm13738_vm4  ;;  %vm3651_vm8 = vweird.f32 %v11041_v43 }
 0x71f   : > { %v11049_v23 = vpop.eup %4632  ;;  %v3616_v5 = vmul.f32 %v11037_v9, %v10955_v18  ;;  %4638 = vrsqrt.f32 %v11055_v3  ;;  %vm3622_vm13 = vweird.f32 %v11037_v9 }
 0x720   : > { %v11069_v62 = vpop.eup %4634  ;;  %v3598_v16 = vmul.f32 0.5, %v3597_v40  ;;  %v3606_v7 = vmul.f32 %v11049_v23, %v10986_v31  ;;  %v11087_v40 = vpop.xlane.xlu0 %3458  ;;  %4640 = vrsqrt.f32 %v11080_v52  ;;  %vm11222_vm7 = vmor %vm3621_vm1, %vm3622_vm13 }
 0x721   : > { %v3617_v6 = vmul.f32 %v11037_v9, %v3616_v5  ;;  %13732 = vst [vmem:[#allocation81_spill] sm:$0xff] %v11087_v40  ;;  %v3626_v54 = vmul.f32 %v11069_v62, %v11001_v12  ;;  %vm3632_vm12 = vweird.f32 %v11069_v62  ;;  %vm13750_vm13 = vmmov %vm13747_vm2 }
 0x722   : > { %4135 = vperm.xlu2 %4613, %v4052_v56   ;;  %v4713_v56 = vld [vmem:[%s11922_s5] sm:$0xff]  ;;  %v3599_v27 = vsub.f32 1.5, %v3598_v16 }
 0x723   : > { %v11067_v50 = vperm.slane %v4713_v56, 3  ;;  %v3618_v16 = vmul.f32 0.5, %v3617_v6 }
 0x724   : > { %4123 = vperm.xlu1 %4615, %v4048_v32   ;;  %v3580_v32 = vmul.f32 %v10931_v34, %v3579_v48  ;;  %v3495_v48 = vmul.f32 %v10839_v49, %v10528_v25  ;;  %v11108_v5 = vpop.eup %4636  ;;  %v11146_v10 = vpop.xlane.xlu1 %3452 }
 0x725   : > { %v3898_v60 = vmul.f32 %v11067_v50, %v3865_v30  ;;  %v3588_v30 = vmul.f32 0.5, %v3587_v33  ;;  %v3619_v44 = vsub.f32 1.5, %v3618_v16 }
 0x726   : > { %v3584_v49 = vsel %vm11092_vm5, %v10931_v34, %v3580_v32  ;;  %v3607_v34 = vmul.f32 %v11049_v23, %v3606_v7  ;;  %v11118_v32 = vperm.slane %v4713_v56, 5  ;;  %v11125_v17 = vadd.f32 1e-05, %v3495_v48 }
 0x727   : > { %v3868_v33 = vmul.f32 %v3584_v49, %v10550_v8  ;;  %v3627_v7 = vmul.f32 %v11069_v62, %v3626_v54  ;;  %v3646_v8 = vmul.f32 %v11108_v5, %v11041_v43  ;;  %v3589_v48 = vsub.f32 1.5, %v3588_v30 }
 0x728   : > { %v3608_v40 = vmul.f32 0.5, %v3607_v34  ;;  %v3497_v54 = vmul.f32 %v10988_v63, %v10528_v25  ;;  %4642 = vrsqrt.f32 %v11125_v17  ;;  %vm3612_vm5 = vweird.f32 %v11049_v23 }
 0x729   : > { %v3628_v30 = vmul.f32 0.5, %v3627_v7  ;;  %v3901_v34 = vmul.f32 %v11067_v50, %v3868_v33  ;;  %v3647_v16 = vmul.f32 %v11108_v5, %v3646_v8  ;;  %v3866_v7 = vmul.f32 %v3564_v38, %v10547_v36  ;;  %vm11313_vm1 = vmor %vm3611_vm15, %vm3612_vm5 }
 0x72a   : > { %4144 = vperm.xlu2 %4613, %v10975_v0   ;;  %vm13755_vm5 = vmmov %vm13747_vm2 }
 0x72b   : > { %v3629_v38 = vsub.f32 1.5, %v3628_v30 }
 0x72c   : > { %4132 = vperm.xlu1 %4615, %v10982_v2   ;;  %v3600_v2 = vmul.f32 %v10994_v19, %v3599_v27  ;;  %v11153_v27 = vpop.xlane.xlu0 %3467 }
 0x72d   : > { %13737 = vst [vmem:[#allocation29_spill] sm:$0xff] %v11153_v27  ;;  %v11179_v27 = vadd.f32 1e-05, %v3497_v54 }
 0x732   : > { %4153 = vperm.xlu2 %4613, %v10999_v21  }
 0x734   : > { %4141 = vperm.xlu1 %4615, %v11012_v1   ;;  %v3648_v1 = vmul.f32 0.5, %v3647_v16 }
 0x735   : > { %v11062_v14 = vpop.xlane.xlu2 %3473 }
 0x736   : > { %13731 = vst [vmem:[#allocation62_spill] sm:$0xff] %v11062_v14  ;;  %v3567_v14 = vmul.f32 %v11026_v51, %v3566_v61  ;;  %v11098_v61 = vperm.slane %v4713_v56, 4  ;;  %v11144_v56 = vadd.f32 1e-05, %v3494_v4 }
 0x738   : > { %v3568_v0 = vmul.f32 0.5, %v3567_v14  ;;  %v3931_v6 = vadd.f32 %v11098_v61, %v3898_v60  ;;  %v11139_v14 = vpop.eup %4638  ;;  %4644 = vrsqrt.f32 %v11144_v56  ;;  %v3934_v8 = vadd.f32 %v11098_v61, %v3901_v34 }
 0x739   : > { %v11157_v4 = vpop.eup %4640  ;;  %v3656_v59 = vmul.f32 %v11139_v14, %v11055_v3  ;;  %4646 = vrsqrt.f32 %v11179_v27 }
 0x73a   : > { %v3569_v49 = vsub.f32 1.5, %v3568_v0  ;;  %v3604_v0 = vsel %vm11162_vm6, %v10994_v19, %v3600_v2  ;;  %v3620_v19 = vmul.f32 %v11037_v9, %v3619_v44  ;;  %vm3662_vm6 = vweird.f32 %v11139_v14 }
 0x73b   : > { %v3870_v21 = vmul.f32 %v3604_v0, %v10596_v57  ;;  %v3657_v44 = vmul.f32 %v11139_v14, %v3656_v59  ;;  %v3630_v0 = vmul.f32 %v11069_v62, %v3629_v38  ;;  %vm3642_vm15 = vweird.f32 %v11157_v4 }
 0x73c   : > { %v3570_v33 = vmul.f32 %v11026_v51, %v3569_v49  ;;  %v3624_v30 = vsel %vm11222_vm7, %v11037_v9, %v3620_v19  ;;  %4150 = vperm.xlu1 %4615, %v11024_v42  }
 0x73d   : > { %v4061_v55 = vpop.permute.xlu2 %4060  ;;  %v11238_v34 = vpop.xlane.xlu0 %3476  ;;  %v3658_v16 = vmul.f32 0.5, %v3657_v44 }
 0x73e   : > { %vm4155_vm9 = vcmp.eq.s32.totalorder %v4061_v55, 1  ;;  %v3493_v55 = vmul.f32 %v10860_v37, %v10528_v25  ;;  %v3636_v37 = vmul.f32 %v11157_v4, %v11080_v52 }
 0x73f   : > { %v4188_v60 = vsel %vm4155_vm9, %v11118_v32, %v3931_v6  ;;  %v3590_v6 = vmul.f32 %v11021_v41, %v3589_v48  ;;  %v11198_v48 = vpop.eup %4642  ;;  %vm3631_vm9 = vweird.f32 %v11001_v12 }
 0x740   : > { %4220 = vst.msk [vmem:[%s11136_s21] sm:$0xff] %vm13738_vm4, %v4188_v60  ;;  %v3609_v60 = vsub.f32 1.5, %v3608_v40  ;;  %v11209_v57 = vadd.f32 1e-05, %v3493_v55  ;;  %v11211_v40 = vpop.xlane.xlu1 %3461  ;;  %v11228_v63 = vpop.eup %4644  ;;  %v3637_v59 = vmul.f32 %v11157_v4, %v3636_v37  ;;  %v3903_v55 = vmul.f32 %v11067_v50, %v3870_v21  ;;  %vm11263_vm11 = vmor %vm3631_vm9, %vm3632_vm12 }
 0x741   : > { %v3594_v54 = vsel %vm11191_vm3, %v11021_v41, %v3590_v6  ;;  %v3574_v41 = vsel %vm11204_vm14, %v11026_v51, %v3570_v33  ;;  %v3686_v51 = vmul.f32 %v11198_v48, %v11125_v17  ;;  %v3649_v6 = vsub.f32 1.5, %v3648_v1  ;;  %v11271_v12 = vpop.eup %4646 }
 0x742   : > { %v11217_v49 = vmul.f32 %v11049_v23, %v3609_v60  ;;  %v11248_v9 = vmul.f32 %v3594_v54, %v10567_v58  ;;  %4648 = vrsqrt.f32 %v11209_v57  ;;  %v3500_v60 = vmul.f32 %v11057_v53, %v10528_v25 }
 0x743   : > { %v11254_v33 = vmul.f32 %v3574_v41, %v10576_v24  ;;  %v3676_v19 = vmul.f32 %v11228_v63, %v11144_v56  ;;  %v3872_v37 = vmul.f32 %v3624_v30, %v10588_v11  ;;  %v3638_v58 = vmul.f32 0.5, %v3637_v59 }
 0x744   : > { %v3498_v24 = vmul.f32 %v10856_v46, %v10528_v25  ;;  %v3899_v53 = vmul.f32 %v11067_v50, %v3866_v7  ;;  %v3634_v11 = vsel %vm11263_vm11, %v11069_v62, %v3630_v0  ;;  %v3659_v21 = vsub.f32 1.5, %v3658_v16 }
 0x745   : > { %v4070_v2 = vpop.permute.xlu2 %4069  ;;  %v3687_v38 = vmul.f32 %v11198_v48, %v3686_v51  ;;  %v3936_v44 = vadd.f32 %v11098_v61, %v3903_v55  ;;  %vm3652_vm4 = vweird.f32 %v11108_v5  ;;  %v11280_v42 = vadd.f32 1e-05, %v3500_v60 }
 0x746   : > { %vm4158_vm10 = vcmp.eq.s32.totalorder %v4070_v2, 1  ;;  %v3677_v7 = vmul.f32 %v11228_v63, %v3676_v19  ;;  %v3496_v62 = vmul.f32 %v10897_v35, %v10528_v25  ;;  %v3873_v54 = vmul.f32 %v3634_v11, %v10617_v29  ;;  %vm11303_vm3 = vmor %vm3651_vm8, %vm3652_vm4 }
 0x747   : > { %v4191_v18 = vsel %vm4158_vm10, %v11118_v32, %v3934_v8  ;;  %v3650_v8 = vmul.f32 %v11108_v5, %v3649_v6  ;;  %v3706_v13 = vmul.f32 %v11271_v12, %v11179_v27  ;;  %v3932_v41 = vadd.f32 %v11098_v61, %v3899_v53  ;;  %vm13758_vm8 = vmmov %vm13755_vm5 }
 0x748   : > { %4223 = vst.msk [vmem:[%s11136_s21 + $0x18] sm:$0xff] %vm13747_vm2, %v4191_v18  ;;  %v11282_v46 = vpop.xlane.xlu1 %3470  ;;  %v11289_v1 = vpop.eup %4648  ;;  %v11294_v18 = vadd.f32 1e-05, %v3498_v24  ;;  %v3660_v29 = vmul.f32 %v11139_v14, %v3659_v21  ;;  %v3688_v59 = vmul.f32 0.5, %v3687_v38  ;;  %v3905_v0 = vmul.f32 %v11067_v50, %v3872_v37 }
 0x749   : > { %v3654_v43 = vsel %vm11303_vm3, %v11108_v5, %v3650_v8  ;;  %4650 = vrsqrt.f32 %v11280_v42  ;;  %v3503_v51 = vmul.f32 %v11146_v10, %v10528_v25  ;;  %v3614_v31 = vsel %vm11313_vm1, %v11049_v23, %v11217_v49 }
 0x74a   : > { %v3639_v6 = vsub.f32 1.5, %v3638_v58  ;;  %v3666_v60 = vmul.f32 %v11289_v1, %v11209_v57  ;;  %vm3661_vm10 = vweird.f32 %v11055_v3  ;;  %v3678_v5 = vmul.f32 0.5, %v3677_v7 }
 0x74b   : > { %vm11335_vm7 = vmor %vm3661_vm10, %vm3662_vm6  ;;  %v3707_v19 = vmul.f32 %v11271_v12, %v3706_v13  ;;  %4652 = vrsqrt.f32 %v11294_v18  ;;  %v3906_v37 = vmul.f32 %v11067_v50, %v3873_v54  ;;  %v3875_v58 = vmul.f32 %v3654_v43, %v10609_v45 }
 0x74c   : > { %v3664_v3 = vsel %vm11335_vm7, %v11139_v14, %v3660_v29  ;;  %v3689_v36 = vsub.f32 1.5, %v3688_v59  ;;  %v3938_v24 = vadd.f32 %v11098_v61, %v3905_v0  ;;  %v11347_v11 = vadd.f32 1e-05, %v3496_v62  ;;  %vm13759_vm6 = vmmov %vm13755_vm5 }
 0x74d   : > { %v4076_v2 = vpop.permute.xlu2 %4075  ;;  %v11349_v21 = vadd.f32 1e-05, %v3503_v51  ;;  %v3501_v38 = vmul.f32 %v10892_v20, %v10528_v25  ;;  %v11356_v45 = vmul.f32 %v11157_v4, %v3639_v6  ;;  %v3667_v14 = vmul.f32 %v11289_v1, %v3666_v60  ;;  %vm13764_vm7 = vmmov %vm13759_vm6 }
 0x74e   : > { %vm4160_vm0 = vcmp.eq.s32.totalorder %v4076_v2, 1  ;;  %vm3681_vm2 = vweird.f32 %v11144_v56  ;;  %v3679_v7 = vsub.f32 1.5, %v3678_v5  ;;  %v3876_v62 = vmul.f32 %v3664_v3, %v10638_v39 }
 0x74f   : > { %v4193_v26 = vsel %vm4160_vm0, %v11118_v32, %v3936_v44  ;;  %v11361_v8 = vpop.eup %4650  ;;  %v3708_v20 = vmul.f32 0.5, %v3707_v19  ;;  %v3690_v13 = vmul.f32 %v11198_v48, %v3689_v36  ;;  %vm3692_vm9 = vweird.f32 %v11198_v48 }
 0x750   : > { %4225 = vst.msk [vmem:[%s11136_s21 + $0x28] sm:$0xff] %vm13750_vm13, %v4193_v26  ;;  %v4064_v30 = vpop.permute.xlu0 %4063  ;;  %v11353_v44 = vpop.xlane.xlu1 %3479  ;;  %v3939_v26 = vadd.f32 %v11098_v61, %v3906_v37  ;;  %vm3641_vm4 = vweird.f32 %v11080_v52  ;;  %4654 = vrsqrt.f32 %v11349_v21  ;;  %v11375_v39 = vadd.f32 1e-05, %v3501_v38 }
 0x751   : > { %vm4156_vm14 = vcmp.eq.s32.totalorder %v4064_v30, 1  ;;  %v11371_v30 = vpop.eup %4652  ;;  %v3900_v29 = vmul.f32 %v11067_v50, %v11254_v33  ;;  %4656 = vrsqrt.f32 %v11347_v11  ;;  %vm3691_vm0 = vweird.f32 %v11125_v17 }
 0x752   : > { %v4189_v55 = vsel %vm4156_vm14, %v11118_v32, %v3932_v41  ;;  %v3908_v41 = vmul.f32 %v11067_v50, %v3875_v58  ;;  %v3736_v59 = vmul.f32 %v11361_v8, %v11280_v42  ;;  %v3506_v0 = vmul.f32 %v11211_v40, %v10528_v25  ;;  %vm11394_vm3 = vmor %vm3691_vm0, %vm3692_vm9 }
 0x753   : > { %4221 = vst.msk [vmem:[%s11136_s21 + $0x8] sm:$0xff] %vm13755_vm5, %v4189_v55  ;;  %v11388_v43 = vmul.f32 0.5, %v3667_v14  ;;  %v3680_v51 = vmul.f32 %v11228_v63, %v3679_v7  ;;  %vm3682_vm13 = vweird.f32 %v11228_v63  ;;  %v3909_v17 = vmul.f32 %v11067_v50, %v3876_v62  ;;  %vm11449_vm9 = vmor %vm3641_vm4, %vm3642_vm15 }
 0x754   : > { %v3709_v55 = vsub.f32 1.5, %v3708_v20  ;;  %v3694_v40 = vsel %vm11394_vm3, %v11198_v48, %v3690_v13  ;;  %v3716_v6 = vmul.f32 %v11371_v30, %v11294_v18  ;;  %v3941_v60 = vadd.f32 %v11098_v61, %v3908_v41  ;;  %vm11419_vm5 = vmor %vm3681_vm2, %vm3682_vm13 }
 0x755   : > { %v4082_v53 = vpop.permute.xlu2 %4081  ;;  %4658 = vrsqrt.f32 %v11375_v39  ;;  %v3504_v10 = vmul.f32 %v10950_v15, %v10528_v25  ;;  %v3933_v37 = vadd.f32 %v11098_v61, %v3900_v29  ;;  %v3737_v58 = vmul.f32 %v11361_v8, %v3736_v59  ;;  %vm13765_vm2 = vmmov %vm13759_vm6 }
 0x756   : > { %vm4162_vm12 = vcmp.eq.s32.totalorder %v4082_v53, 1  ;;  %v11410_v48 = vadd.f32 1e-05, %v3506_v0  ;;  %v11413_v36 = vpop.eup %4654  ;;  %v3499_v53 = vmul.f32 %v10957_v22, %v10528_v25  ;;  %v3942_v14 = vadd.f32 %v11098_v61, %v3909_v17  ;;  %vm13768_vm0 = vmmov %vm13765_vm2 }
 0x757   : > { %v4195_v2 = vsel %vm4162_vm12, %v11118_v32, %v3938_v24  ;;  %v3879_v24 = vmul.f32 %v3694_v40, %v10659_v47  ;;  %v11430_v7 = vpop.eup %4656  ;;  %v3684_v56 = vsel %vm11419_vm5, %v11228_v63, %v3680_v51  ;;  %v3710_v62 = vmul.f32 %v11271_v12, %v3709_v55  ;;  %vm13772_vm3 = vmmov %vm13768_vm0  ;;  %v13785_v63 = vld [vmem:[#allocation6_spill] sm:$0xff] }
 0x758   : > { %4227 = vst.msk [vmem:[%s11136_s21 + $0x38] sm:$0xff] %vm13758_vm8, %v4195_v2  ;;  %v4085_v54 = vpop.permute.xlu0 %4084  ;;  %vm3712_vm12 = vweird.f32 %v11271_v12  ;;  %v3717_v22 = vmul.f32 %v11371_v30, %v3716_v6  ;;  %v11440_v47 = vadd.f32 1e-05, %v3504_v10  ;;  %v3766_v13 = vmul.f32 %v11413_v36, %v11349_v21  ;;  %vm13774_vm5 = vmmov %vm13768_vm0 }
 0x759   : > { %vm4163_vm11 = vcmp.eq.s32.totalorder %v4085_v54, 1  ;;  %v3738_v54 = vmul.f32 0.5, %v3737_v58  ;;  %4660 = vrsqrt.f32 %v11410_v48  ;;  %v3644_v52 = vsel %vm11449_vm9, %v11157_v4, %v11356_v45 }
 0x75a   : > { %v4196_v35 = vsel %vm4163_vm11, %v11118_v32, %v3939_v26  ;;  %v3902_v26 = vmul.f32 %v11067_v50, %v11248_v9  ;;  %vm3711_vm11 = vweird.f32 %v11179_v27  ;;  %v3878_v9 = vmul.f32 %v3684_v56, %v10630_v28 }
 0x75b   : > { %4228 = vst.msk [vmem:[%s11136_s21 + $0x40] sm:$0xff] %vm13759_vm6, %v4196_v35  ;;  %v11459_v41 = vpop.eup %4658  ;;  %vm11468_vm15 = vmor %vm3711_vm11, %vm3712_vm12  ;;  %v3509_v35 = vmul.f32 %v11282_v46, %v10528_v25  ;;  %v3912_v29 = vmul.f32 %v11067_v50, %v3879_v24  ;;  %v3669_v59 = vsub.f32 1.5, %v11388_v43  ;;  %vm3672_vm4 = vweird.f32 %v11289_v1  ;;  %v13771_v46 = vld [vmem:[#allocation58_spill] sm:$0xff] }
 0x75c   : > { %v3696_v0 = vmul.f32 %v11430_v7, %v11347_v11  ;;  %v3714_v28 = vsel %vm11468_vm15, %v11271_v12, %v3710_v62  ;;  %v11482_v51 = vadd.f32 1e-05, %v3499_v53  ;;  %v3718_v33 = vmul.f32 0.5, %v3717_v22 }
 0x75d   : > { %v4091_v5 = vpop.permute.xlu2 %4090  ;;  %4662 = vrsqrt.f32 %v11440_v47  ;;  %v3507_v17 = vmul.f32 %v13771_v46, %v10528_v25  ;;  %v3935_v55 = vadd.f32 %v11098_v61, %v3902_v26  ;;  %vm3671_vm6 = vweird.f32 %v11209_v57 }
 0x75e   : > { %v4067_v19 = vpop.permute.xlu1 %4066  ;;  %vm4165_vm14 = vcmp.eq.s32.totalorder %v4091_v5, 1  ;;  %v3739_v40 = vsub.f32 1.5, %v3738_v54  ;;  %v3767_v6 = vmul.f32 %v11413_v36, %v3766_v13  ;;  %v3746_v12 = vmul.f32 %v11459_v41, %v11375_v39  ;;  %vm11548_vm15 = vmor %vm3671_vm6, %vm3672_vm4 }
 0x75f   : > { %vm4157_vm10 = vcmp.eq.s32.totalorder %v4067_v19, 1  ;;  %v4198_v3 = vsel %vm4165_vm14, %v11118_v32, %v3941_v60  ;;  %v11492_v60 = vadd.f32 1e-05, %v3509_v35  ;;  %v3911_v10 = vmul.f32 %v11067_v50, %v3878_v9  ;;  %v11497_v58 = vpop.eup %4660 }
 0x760   : > { %v4190_v38 = vsel %vm4157_vm10, %v11118_v32, %v3933_v37  ;;  %4230 = vst.msk [vmem:[%s11136_s21 + $0x50] sm:$0xff] %vm13764_vm7, %v4198_v3  ;;  %v4094_v2 = vpop.permute.xlu0 %4093  ;;  %v3945_v19 = vadd.f32 %v11098_v61, %v3912_v29  ;;  %v11500_v3 = vmul.f32 %v11289_v1, %v3669_v59  ;;  %v3697_v15 = vmul.f32 %v11430_v7, %v3696_v0 }
 0x761   : > { %4222 = vst.msk [vmem:[%s11136_s21 + $0x10] sm:$0xff] %vm13765_vm2, %v4190_v38  ;;  %vm4166_vm8 = vcmp.eq.s32.totalorder %v4094_v2, 1  ;;  %4664 = vrsqrt.f32 %v11482_v51  ;;  %vm3742_vm10 = vweird.f32 %v11361_v8  ;;  %v3719_v24 = vsub.f32 1.5, %v3718_v33 }
 0x762   : > { %v4199_v20 = vsel %vm4166_vm8, %v11118_v32, %v3942_v14  ;;  %v11507_v53 = vadd.f32 1e-05, %v3507_v17  ;;  %v13773_v14 = vld [vmem:[#allocation32_spill] sm:$0xff]  ;;  %v3740_v56 = vmul.f32 %v11361_v8, %v3739_v40  ;;  %v3768_v62 = vmul.f32 0.5, %v3767_v6  ;;  %v13780_v6 = vld [vmem:[#allocation31_spill] sm:$0xff] }
 0x763   : > { %4231 = vst.msk [vmem:[%s11136_s21 + $0x58] sm:$0xff] %vm13768_vm0, %v4199_v20  ;;  %v3881_v2 = vmul.f32 %v3714_v28, %v13773_v14  ;;  %v3747_v22 = vmul.f32 %v11459_v41, %v3746_v12  ;;  %v11515_v20 = vpop.eup %4662  ;;  %v3796_v26 = vmul.f32 %v11497_v58, %v11410_v48  ;;  %4666 = vrsqrt.f32 %v11492_v60  ;;  %v13781_v12 = vld [vmem:[#allocation7_spill] sm:$0xff] }
 0x764   : > { %v3512_v54 = vmul.f32 %v11353_v44, %v10528_v25  ;;  %v3944_v13 = vadd.f32 %v11098_v61, %v3911_v10  ;;  %v3698_v27 = vmul.f32 0.5, %v3697_v15  ;;  %vm3741_vm7 = vweird.f32 %v11280_v42 }
 0x765   : > { %v4100_v9 = vpop.permute.xlu2 %4099  ;;  %vm3721_vm12 = vweird.f32 %v11294_v18  ;;  %vm11527_vm8 = vmor %vm3741_vm7, %vm3742_vm10  ;;  %v3720_v29 = vmul.f32 %v11371_v30, %v3719_v24  ;;  %vm3722_vm11 = vweird.f32 %v11371_v30  ;;  %4668 = vrsqrt.f32 %v11507_v53 }
 0x766   : > { %v4073_v43 = vpop.permute.xlu1 %4072  ;;  %vm4168_vm2 = vcmp.eq.s32.totalorder %v4100_v9, 1  ;;  %v3744_v42 = vsel %vm11527_vm8, %v11361_v8, %v3740_v56  ;;  %v3769_v0 = vsub.f32 1.5, %v3768_v62  ;;  %v3748_v28 = vmul.f32 0.5, %v3747_v22  ;;  %vm11580_vm1 = vmor %vm3721_vm12, %vm3722_vm11  ;;  %v13786_v56 = vld [vmem:[#allocation114_spill] sm:$0xff] }
 0x767   : > { %vm4159_vm13 = vcmp.eq.s32.totalorder %v4073_v43, 1  ;;  %v4201_v44 = vsel %vm4168_vm2, %v11118_v32, %v3944_v13  ;;  %v11535_v59 = vpop.eup %4664  ;;  %v3776_v33 = vmul.f32 %v11515_v20, %v11440_v47  ;;  %v3797_v17 = vmul.f32 %v11497_v58, %v3796_v26  ;;  %vm13789_vm10 = vmmov %vm13768_vm0 }
 0x768   : > { %v4192_v5 = vsel %vm4159_vm13, %v11118_v32, %v3935_v55  ;;  %v4103_v37 = vpop.permute.xlu0 %4102  ;;  %4233 = vst.msk [vmem:[%s11136_s21 + $0x68] sm:$0xff] %vm13768_vm0, %v4201_v44  ;;  %v13779_v55 = vld [vmem:[#allocation62_spill] sm:$0xff]  ;;  %v11555_v43 = vadd.f32 1e-05, %v3512_v54  ;;  %v3914_v40 = vmul.f32 %v11067_v50, %v3881_v2  ;;  %v3871_v57 = vmul.f32 %v3614_v31, %v13780_v6  ;;  %v13784_v31 = vld [vmem:[#allocation117_spill] sm:$0xff]  ;;  %v13793_v6 = vld [vmem:[#allocation59_spill] sm:$0xff] }
 0x769   : > { %4224 = vst.msk [vmem:[%s11136_s21 + $0x20] sm:$0xff] %vm13772_vm3, %v4192_v5  ;;  %vm4169_vm14 = vcmp.eq.s32.totalorder %v4103_v37, 1  ;;  %v3510_v8 = vmul.f32 %v13779_v55, %v10528_v25  ;;  %v11570_v5 = vmul.f32 %v3644_v52, %v13781_v12  ;;  %v3674_v10 = vsel %vm11548_vm15, %v11289_v1, %v11500_v3  ;;  %v11584_v49 = vpop.eup %4666 }
 0x76a   : > { %v4202_v38 = vsel %vm4169_vm14, %v11118_v32, %v3945_v19  ;;  %v3699_v19 = vsub.f32 1.5, %v3698_v27  ;;  %v3726_v4 = vmul.f32 %v11535_v59, %v11482_v51  ;;  %v3724_v16 = vsel %vm11580_vm1, %v11371_v30, %v3720_v29 }
 0x76b   : > { %4234 = vst.msk [vmem:[%s11136_s21 + $0x70] sm:$0xff] %vm13774_vm5, %v4202_v38  ;;  %v3502_v45 = vmul.f32 %v13784_v31, %v10528_v25  ;;  %vm3772_vm9 = vweird.f32 %v11413_v36  ;;  %v3884_v18 = vmul.f32 %v3744_v42, %v13785_v63  ;;  %v3770_v52 = vmul.f32 %v11413_v36, %v3769_v0  ;;  %v11597_v24 = vpop.eup %4668 }
 0x76c   : > { %v3749_v37 = vsub.f32 1.5, %v3748_v28  ;;  %v3777_v15 = vmul.f32 %v11515_v20, %v3776_v33  ;;  %v3798_v38 = vmul.f32 0.5, %v3797_v17  ;;  %v11599_v14 = vadd.f32 1e-05, %v3510_v8 }
 0x76d   : > { %4670 = vrsqrt.f32 %v11555_v43  ;;  %v3947_v30 = vadd.f32 %v11098_v61, %v3914_v40  ;;  %v4109_v2 = vpop.permute.xlu2 %4108  ;;  %v3882_v62 = vmul.f32 %v3724_v16, %v13786_v56  ;;  %vm3771_vm4 = vweird.f32 %v11349_v21 }
 0x76e   : > { %v3826_v22 = vmul.f32 %v11584_v49, %v11492_v60  ;;  %vm4171_vm6 = vcmp.eq.s32.totalorder %v4109_v2, 1  ;;  %vm3702_vm13 = vweird.f32 %v11430_v7  ;;  %v3727_v26 = vmul.f32 %v11535_v59, %v3726_v4  ;;  %vm11613_vm3 = vmor %vm3771_vm4, %vm3772_vm9 }
 0x76f   : > { %v11609_v54 = vadd.f32 1e-05, %v3502_v45  ;;  %vm3752_vm14 = vweird.f32 %v11459_v41  ;;  %v4204_v21 = vsel %vm4171_vm6, %v11118_v32, %v3947_v30  ;;  %v3774_v9 = vsel %vm11613_vm3, %v11413_v36, %v3770_v52  ;;  %v4079_v52 = vpop.permute.xlu1 %4078  ;;  %vm13794_vm9 = vmmov %vm13789_vm10 }
 0x770   : > { %v3750_v27 = vmul.f32 %v11459_v41, %v3749_v37  ;;  %v3778_v35 = vmul.f32 0.5, %v3777_v15  ;;  %v3806_v29 = vmul.f32 %v11597_v24, %v11507_v53  ;;  %4236 = vst.msk [vmem:[%s11136_s21 + $0x80] sm:$0xff] %vm13789_vm10, %v4204_v21  ;;  %v3799_v44 = vsub.f32 1.5, %v3798_v38  ;;  %v4112_v37 = vpop.permute.xlu0 %4111 }
 0x771   : > { %4672 = vrsqrt.f32 %v11599_v14  ;;  %v3904_v42 = vmul.f32 %v11067_v50, %v3871_v57  ;;  %v3917_v0 = vmul.f32 %v11067_v50, %v3884_v18  ;;  %v11631_v28 = vmul.f32 %v11430_v7, %v3699_v19 }
 0x772   : > { %vm3751_vm5 = vweird.f32 %v11375_v39  ;;  %v3827_v36 = vmul.f32 %v11584_v49, %v3826_v22  ;;  %v3915_v33 = vmul.f32 %v11067_v50, %v3882_v62  ;;  %v11638_v55 = vmul.f32 0.5, %v3727_v26  ;;  %v13792_v39 = vld [vmem:[#allocation81_spill] sm:$0xff]  ;;  %v13795_v26 = vld [vmem:[#allocation28_spill] sm:$0xff] }
 0x773   : > { %v11636_v17 = vpop.eup %4670  ;;  %4674 = vrsqrt.f32 %v11609_v54  ;;  %vm11643_vm7 = vmor %vm3751_vm5, %vm3752_vm14  ;;  %vm3782_vm12 = vweird.f32 %v11515_v20  ;;  %v3505_v40 = vmul.f32 %v13792_v39, %v10528_v25  ;;  %v3887_v57 = vmul.f32 %v3774_v9, %v13793_v6 }
 0x774   : > { %v3754_v12 = vsel %vm11643_vm7, %v11459_v41, %v3750_v27  ;;  %v3779_v19 = vsub.f32 1.5, %v3778_v35  ;;  %v3807_v23 = vmul.f32 %v11597_v24, %v3806_v29  ;;  %v3800_v4 = vmul.f32 %v11497_v58, %v3799_v44  ;;  %vm13798_vm14 = vmmov %vm13794_vm9  ;;  %v13802_v29 = vld [vmem:[#allocation79_spill] sm:$0xff] }
 0x775   : > { %vm3802_vm2 = vweird.f32 %v11497_v58  ;;  %v3937_v16 = vadd.f32 %v11098_v61, %v3904_v42  ;;  %v3950_v31 = vadd.f32 %v11098_v61, %v3917_v0  ;;  %v4118_v45 = vpop.permute.xlu2 %4117  ;;  %v3828_v63 = vmul.f32 0.5, %v3827_v36  ;;  %vm13801_vm5 = vmmov %vm13794_vm9 }
 0x776   : > { %v3856_v18 = vmul.f32 %v11636_v17, %v11555_v43  ;;  %v3948_v41 = vadd.f32 %v11098_v61, %v3915_v33  ;;  %vm4174_vm8 = vcmp.eq.s32.totalorder %v4118_v45, 1  ;;  %vm3801_vm11 = vweird.f32 %v11410_v48 }
 0x777   : > { %v11662_v15 = vpop.eup %4672  ;;  %vm4161_vm0 = vcmp.eq.s32.totalorder %v4079_v52, 1  ;;  %vm4172_vm1 = vcmp.eq.s32.totalorder %v4112_v37, 1  ;;  %v4207_v38 = vsel %vm4174_vm8, %v11118_v32, %v3950_v31  ;;  %v3780_v30 = vmul.f32 %v11515_v20, %v3779_v19  ;;  %vm11678_vm3 = vmor %vm3801_vm11, %vm3802_vm2 }
 0x778   : > { %v3808_v2 = vmul.f32 0.5, %v3807_v23  ;;  %v4194_v56 = vsel %vm4161_vm0, %v11118_v32, %v3937_v16  ;;  %v4205_v62 = vsel %vm4172_vm1, %v11118_v32, %v3948_v41  ;;  %4239 = vst.msk [vmem:[%s11136_s21 + $0x98] sm:$0xff] %vm13794_vm9, %v4207_v38  ;;  %vm3701_vm4 = vweird.f32 %v11347_v11  ;;  %v13807_v23 = vld [vmem:[#allocation82_spill] sm:$0xff]  ;;  %vm13808_vm11 = vmmov %vm13801_vm5 }
 0x779   : > { %v11671_v22 = vpop.eup %4674  ;;  %v3885_v48 = vmul.f32 %v3754_v12, %v13795_v26  ;;  %vm3781_vm6 = vweird.f32 %v11440_v47  ;;  %4226 = vst.msk [vmem:[%s11136_s21 + $0x30] sm:$0xff] %vm13798_vm14, %v4194_v56  ;;  %v3920_v21 = vmul.f32 %v11067_v50, %v3887_v57  ;;  %vm11687_vm10 = vmor %vm3701_vm4, %vm3702_vm13  ;;  %v3804_v11 = vsel %vm11678_vm3, %v11497_v58, %v3800_v4  ;;  %v4088_v57 = vpop.permute.xlu1 %4087  ;;  %v13812_v56 = vld [vmem:[#allocation85_spill] sm:$0xff] }
 0x77a   : > { %v3829_v47 = vsub.f32 1.5, %v3828_v63  ;;  %v3836_v27 = vmul.f32 %v11662_v15, %v11599_v14  ;;  %v3857_v35 = vmul.f32 %v11636_v17, %v3856_v18  ;;  %4237 = vst.msk [vmem:[%s11136_s21 + $0x88] sm:$0xff] %vm13801_vm5, %v4205_v62  ;;  %v3877_v44 = vmul.f32 %v3674_v10, %v13802_v29  ;;  %vm11711_vm13 = vmor %vm3781_vm6, %vm3782_vm12  ;;  %v13805_v10 = vld [vmem:[#allocation10_spill] sm:$0xff]  ;;  %v4121_v18 = vpop.permute.xlu0 %4120 }
 0x77b   : > { %v3704_v58 = vsel %vm11687_vm10, %v11430_v7, %v11631_v28  ;;  %v11715_v0 = vadd.f32 1e-05, %v3505_v40  ;;  %v3907_v46 = vmul.f32 %v11067_v50, %v11570_v5  ;;  %v3729_v36 = vsub.f32 1.5, %v11638_v55  ;;  %vm13811_vm9 = vmmov %vm13801_vm5 }
 0x77c   : > { %v3756_v1 = vmul.f32 %v11671_v22, %v11609_v54  ;;  %v3784_v7 = vsel %vm11711_vm13, %v11515_v20, %v3780_v30  ;;  %v3809_v3 = vsub.f32 1.5, %v3808_v2  ;;  %v3890_v28 = vmul.f32 %v3804_v11, %v13805_v10  ;;  %v13806_v20 = vld [vmem:[#allocation29_spill] sm:$0xff]  ;;  %vm13815_vm10 = vmmov %vm13801_vm5 }
 0x77d   : > { %vm3832_vm15 = vweird.f32 %v11584_v49  ;;  %v3918_v33 = vmul.f32 %v11067_v50, %v3885_v48  ;;  %v3953_v8 = vadd.f32 %v11098_v61, %v3920_v21  ;;  %v4127_v5 = vpop.permute.xlu2 %4126  ;;  %v3830_v55 = vmul.f32 %v11584_v49, %v3829_v47  ;;  %v13816_v21 = vld [vmem:[#allocation35_spill] sm:$0xff] }
 0x77e   : > { %v3837_v39 = vmul.f32 %v11662_v15, %v3836_v27  ;;  %v3858_v40 = vmul.f32 0.5, %v3857_v35  ;;  %vm4177_vm7 = vcmp.eq.s32.totalorder %v4127_v5, 1  ;;  %4676 = vrsqrt.f32 %v11715_v0 }
 0x77f   : > { %v3508_v6 = vmul.f32 %v13806_v20, %v10528_v25  ;;  %v3940_v12 = vadd.f32 %v11098_v61, %v3907_v46  ;;  %v4210_v19 = vsel %vm4177_vm7, %v11118_v32, %v3953_v8  ;;  %v3888_v4 = vmul.f32 %v3784_v7, %v13807_v23 }
 0x780   : > { %vm3812_vm12 = vweird.f32 %v11597_v24  ;;  %vm3831_vm2 = vweird.f32 %v11492_v60  ;;  %vm4164_vm8 = vcmp.eq.s32.totalorder %v4088_v57, 1  ;;  %4242 = vst.msk [vmem:[%s11136_s21 + $0xb0] sm:$0xff] %vm13808_vm11, %v4210_v19  ;;  %vm3731_vm0 = vweird.f32 %v11482_v51 }
 0x781   : > { %v3810_v16 = vmul.f32 %v11597_v24, %v3809_v3  ;;  %vm11745_vm1 = vmor %vm3831_vm2, %vm3832_vm15  ;;  %v4197_v45 = vsel %vm4164_vm8, %v11118_v32, %v3940_v12  ;;  %v3951_v63 = vadd.f32 %v11098_v61, %v3918_v33  ;;  %v3923_v60 = vmul.f32 %v11067_v50, %v3890_v28 }
 0x782   : > { %v3834_v52 = vsel %vm11745_vm1, %v11584_v49, %v3830_v55  ;;  %v3838_v41 = vmul.f32 0.5, %v3837_v39  ;;  %v3859_v37 = vsub.f32 1.5, %v3858_v40  ;;  %4229 = vst.msk [vmem:[%s11136_s21 + $0x48] sm:$0xff] %vm13811_vm9, %v4197_v45  ;;  %vm4175_vm4 = vcmp.eq.s32.totalorder %v4121_v18, 1  ;;  %v4130_v10 = vpop.permute.xlu0 %4129  ;;  %vm13823_vm1 = vmmov %vm13811_vm9 }
 0x783   : > { %vm3811_vm6 = vweird.f32 %v11507_v53  ;;  %v11758_v38 = vadd.f32 1e-05, %v3508_v6  ;;  %v4208_v30 = vsel %vm4175_vm4, %v11118_v32, %v3951_v63  ;;  %v3910_v2 = vmul.f32 %v11067_v50, %v3877_v44  ;;  %vm13824_vm4 = vmmov %vm13823_vm1 }
 0x784   : > { %v3880_v62 = vmul.f32 %v3704_v58, %v13812_v56  ;;  %v3730_v26 = vmul.f32 %v11535_v59, %v3729_v36  ;;  %vm3732_vm3 = vweird.f32 %v11535_v59  ;;  %v3757_v49 = vmul.f32 %v11671_v22, %v3756_v1  ;;  %vm11768_vm14 = vmor %vm3811_vm6, %vm3812_vm12  ;;  %4240 = vst.msk [vmem:[%s11136_s21 + $0xa0] sm:$0xff] %vm13815_vm10, %v4208_v30  ;;  %v11774_v53 = vpop.eup %4676  ;;  %v13818_v1 = vld [vmem:[#allocation34_spill] sm:$0xff] }
 0x785   : > { %v3814_v13 = vsel %vm11768_vm14, %v11597_v24, %v3810_v16  ;;  %v3893_v9 = vmul.f32 %v3834_v52, %v13816_v21  ;;  %v3921_v11 = vmul.f32 %v11067_v50, %v3888_v4  ;;  %v3956_v47 = vadd.f32 %v11098_v61, %v3923_v60  ;;  %v4136_v27 = vpop.permute.xlu2 %4135  ;;  %v4097_v24 = vpop.permute.xlu1 %4096  ;;  %vm13817_vm12 = vmmov %vm13811_vm9  ;;  %v13828_v4 = vld [vmem:[#allocation56_spill] sm:$0xff] }
 0x786   : > { %v3839_v35 = vsub.f32 1.5, %v3838_v41  ;;  %v3860_v29 = vmul.f32 %v11636_v17, %v3859_v37  ;;  %vm3862_vm5 = vweird.f32 %v11636_v17  ;;  %vm4180_vm13 = vcmp.eq.s32.totalorder %v4136_v27, 1  ;;  %vm11806_vm8 = vmor %vm3731_vm0, %vm3732_vm3 }
 0x787   : > { %4678 = vrsqrt.f32 %v11758_v38  ;;  %v3511_v44 = vmul.f32 %v11238_v34, %v10528_v25  ;;  %v3943_v58 = vadd.f32 %v11098_v61, %v3910_v2  ;;  %v4213_v42 = vsel %vm4180_vm13, %v11118_v32, %v3956_v47  ;;  %v13833_v47 = vld [vmem:[#allocation107_spill] sm:$0xff] }
 0x788   : > { %v3758_v46 = vmul.f32 0.5, %v3757_v49  ;;  %v3786_v36 = vmul.f32 %v11774_v53, %v11715_v0  ;;  %vm3861_vm15 = vweird.f32 %v11555_v43  ;;  %vm4167_vm7 = vcmp.eq.s32.totalorder %v4097_v24, 1  ;;  %4245 = vst.msk [vmem:[%s11136_s21 + $0xc8] sm:$0xff] %vm13817_vm12, %v4213_v42 }
 0x789   : > { %v3891_v7 = vmul.f32 %v3814_v13, %v13818_v1  ;;  %vm11795_vm2 = vmor %vm3861_vm15, %vm3862_vm5  ;;  %v4200_v25 = vsel %vm4167_vm7, %v11118_v32, %v3943_v58  ;;  %v3954_v34 = vadd.f32 %v11098_v61, %v3921_v11  ;;  %v3926_v28 = vmul.f32 %v11067_v50, %v3893_v9 }
 0x78a   : > { %v3840_v33 = vmul.f32 %v11662_v15, %v3839_v35  ;;  %vm3842_vm11 = vweird.f32 %v11662_v15  ;;  %v3864_v8 = vsel %vm11795_vm2, %v11636_v17, %v3860_v29  ;;  %4232 = vst.msk [vmem:[%s11136_s21 + $0x60] sm:$0xff] %vm13823_vm1, %v4200_v25  ;;  %vm4178_vm9 = vcmp.eq.s32.totalorder %v4130_v10, 1  ;;  %vm13829_vm5 = vmmov %vm13823_vm1  ;;  %v4139_v2 = vpop.permute.xlu0 %4138  ;;  %v13837_v10 = vld [vmem:[#allocation2_spill] sm:$0xff] }
 0x78b   : > { %v3734_v5 = vsel %vm11806_vm8, %v11535_v59, %v3730_v26  ;;  %v11820_v51 = vadd.f32 1e-05, %v3511_v44  ;;  %v4211_v55 = vsel %vm4178_vm9, %v11118_v32, %v3954_v34  ;;  %v3913_v39 = vmul.f32 %v11067_v50, %v3880_v62  ;;  %v13827_v59 = vld [vmem:[#allocation9_spill] sm:$0xff]  ;;  %vm13831_vm15 = vmmov %vm13823_vm1 }
 0x78c   : > { %v3759_v40 = vsub.f32 1.5, %v3758_v46  ;;  %v3787_v20 = vmul.f32 %v11774_v53, %v3786_v36  ;;  %vm3841_vm0 = vweird.f32 %v11599_v14  ;;  %4243 = vst.msk [vmem:[%s11136_s21 + $0xb8] sm:$0xff] %vm13824_vm4, %v4211_v55  ;;  %v3896_v57 = vmul.f32 %v3864_v8, %v13827_v59  ;;  %vm13832_vm2 = vmmov %vm13823_vm1 }
 0x78d   : > { %v11828_v17 = vpop.eup %4678  ;;  %vm11830_vm6 = vmor %vm3841_vm0, %vm3842_vm11  ;;  %v3924_v12 = vmul.f32 %v11067_v50, %v3891_v7  ;;  %v3959_v19 = vadd.f32 %v11098_v61, %v3926_v28  ;;  %v4145_v23 = vpop.permute.xlu2 %4144  ;;  %v3883_v16 = vmul.f32 %v3734_v5, %v13828_v4  ;;  %vm3762_vm14 = vweird.f32 %v11671_v22 }
 0x78e   : > { %v3844_v14 = vsel %vm11830_vm6, %v11662_v15, %v3840_v33  ;;  %vm4183_vm3 = vcmp.eq.s32.totalorder %v4145_v23, 1  ;;  %4680 = vrsqrt.f32 %v11820_v51  ;;  %v4106_v31 = vpop.permute.xlu1 %4105  ;;  %v3946_v45 = vadd.f32 %v11098_v61, %v3913_v39  ;;  %v13830_v15 = vld [vmem:[#allocation54_spill] sm:$0xff]  ;;  %vm13834_vm9 = vmmov %vm13832_vm2 }
 0x78f   : > { %v4216_v63 = vsel %vm4183_vm3, %v11118_v32, %v3959_v19  ;;  %v3760_v18 = vmul.f32 %v11671_v22, %v3759_v40  ;;  %v3788_v60 = vmul.f32 0.5, %v3787_v20  ;;  %v3816_v52 = vmul.f32 %v11828_v17, %v11758_v38  ;;  %vm13835_vm4 = vmmov %vm13832_vm2  ;;  %v13839_v40 = vld [vmem:[#allocation88_spill] sm:$0xff] }
 0x790   : > { %vm4170_vm10 = vcmp.eq.s32.totalorder %v4106_v31, 1  ;;  %4248 = vst.msk [vmem:[%s11136_s21 + $0xe0] sm:$0xff] %vm13829_vm5, %v4216_v63  ;;  %v3894_v41 = vmul.f32 %v3844_v14, %v13830_v15  ;;  %v3957_v30 = vadd.f32 %v11098_v61, %v3924_v12  ;;  %v3929_v56 = vmul.f32 %v11067_v50, %v3896_v57  ;;  %v13841_v19 = vld [vmem:[#allocation108_spill] sm:$0xff] }
 0x791   : > { %v4203_v37 = vsel %vm4170_vm10, %v11118_v32, %v3946_v45  ;;  %vm3761_vm13 = vweird.f32 %v11609_v54  ;;  %vm4181_vm7 = vcmp.eq.s32.totalorder %v4139_v2, 1  ;;  %v3916_v26 = vmul.f32 %v11067_v50, %v3883_v16 }
 0x792   : > { %4235 = vst.msk [vmem:[%s11136_s21 + $0x78] sm:$0xff] %vm13831_vm15, %v4203_v37  ;;  %vm3763_vm12 = vmor %vm3761_vm13, %vm3762_vm14  ;;  %v4214_v62 = vsel %vm4181_vm7, %v11118_v32, %v3957_v30  ;;  %v3789_v48 = vsub.f32 1.5, %v3788_v60  ;;  %v3817_v13 = vmul.f32 %v11828_v17, %v3816_v52  ;;  %v3927_v54 = vmul.f32 %v11067_v50, %v3894_v41  ;;  %v4148_v36 = vpop.permute.xlu0 %4147 }
 0x793   : > { %v3764_v49 = vsel %vm3763_vm12, %v11671_v22, %v3760_v18  ;;  %4246 = vst.msk [vmem:[%s11136_s21 + $0xd0] sm:$0xff] %vm13832_vm2, %v4214_v62  ;;  %v3962_v9 = vadd.f32 %v11098_v61, %v3929_v56  ;;  %vm3792_vm11 = vweird.f32 %v11774_v53  ;;  %v3949_v22 = vadd.f32 %v11098_v61, %v3916_v26  ;;  %vm13836_vm14 = vmmov %vm13832_vm2 }
 0x794   : > { %v4681_v21 = vpop.eup %4680  ;;  %v3886_v27 = vmul.f32 %v3764_v49, %v13833_v47  ;;  %v3790_v44 = vmul.f32 %v11774_v53, %v3789_v48  ;;  %v3818_v24 = vmul.f32 0.5, %v3817_v13  ;;  %v3960_v46 = vadd.f32 %v11098_v61, %v3927_v54  ;;  %vm13838_vm15 = vmmov %vm13832_vm2 }
 0x795   : > { %v4154_v11 = vpop.permute.xlu2 %4153  ;;  %v3846_v58 = vmul.f32 %v4681_v21, %v11820_v51  ;;  %vm3791_vm0 = vweird.f32 %v11715_v0  ;;  %vm4184_vm6 = vcmp.eq.s32.totalorder %v4148_v36, 1  ;;  %vm3822_vm10 = vweird.f32 %v11828_v17 }
 0x796   : > { %vm4186_vm8 = vcmp.eq.s32.totalorder %v4154_v11, 1  ;;  %v4115_v35 = vpop.permute.xlu1 %4114  ;;  %vm3793_vm3 = vmor %vm3791_vm0, %vm3792_vm11  ;;  %v4217_v1 = vsel %vm4184_vm6, %v11118_v32, %v3960_v46  ;;  %v3919_v7 = vmul.f32 %v11067_v50, %v3886_v27  ;;  %v3819_v25 = vsub.f32 1.5, %v3818_v24 }
 0x797   : > { %v4219_v29 = vsel %vm4186_vm8, %v11118_v32, %v3962_v9  ;;  %vm4173_vm1 = vcmp.eq.s32.totalorder %v4115_v35, 1  ;;  %v3794_v3 = vsel %vm3793_vm3, %v11774_v53, %v3790_v44  ;;  %v3847_v34 = vmul.f32 %v4681_v21, %v3846_v58  ;;  %4249 = vst.msk [vmem:[%s11136_s21 + $0xe8] sm:$0xff] %vm13836_vm14, %v4217_v1  ;;  %vm13840_vm11 = vmmov %vm13835_vm4 }
 0x798   : > { %4251 = vst.msk [vmem:[%s11136_s21 + $0xf8] sm:$0xff] %vm13834_vm9, %v4219_v29  ;;  %v4206_v42 = vsel %vm4173_vm1, %v11118_v32, %v3949_v22  ;;  %v3889_v28 = vmul.f32 %v3794_v3, %v13837_v10  ;;  %v3952_v43 = vadd.f32 %v11098_v61, %v3919_v7  ;;  %v3820_v33 = vmul.f32 %v11828_v17, %v3819_v25  ;;  %vm13842_vm0 = vmmov %vm13835_vm4 }
 0x799   : > { %4238 = vst.msk [vmem:[%s11136_s21 + $0x90] sm:$0xff] %vm13835_vm4, %v4206_v42  ;;  %v3848_v8 = vmul.f32 0.5, %v3847_v34  ;;  %vm3821_vm13 = vweird.f32 %v11758_v38  ;;  %vm3852_vm12 = vweird.f32 %v4681_v21  ;;  %vm3851_vm8 = vweird.f32 %v11820_v51  ;;  %vm13843_vm6 = vmmov %vm13842_vm0 }
 0x79a   : > { %vm3823_vm7 = vmor %vm3821_vm13, %vm3822_vm10  ;;  %v3922_v53 = vmul.f32 %v11067_v50, %v3889_v28 }
 0x79b   : > { %v3824_v55 = vsel %vm3823_vm7, %v11828_v17, %v3820_v33  ;;  %v3849_v39 = vsub.f32 1.5, %v3848_v8  ;;  %vm3853_vm1 = vmor %vm3851_vm8, %vm3852_vm12 }
 0x79c   : > { %v3892_v20 = vmul.f32 %v3824_v55, %v13839_v40  ;;  %v3955_v59 = vadd.f32 %v11098_v61, %v3922_v53 }
 0x79d   : > { %v3850_v57 = vmul.f32 %v4681_v21, %v3849_v39 }
 0x79e   : > { %v4124_v0 = vpop.permute.xlu1 %4123  ;;  %v3925_v38 = vmul.f32 %v11067_v50, %v3892_v20 }
 0x79f   : > { %vm4176_vm5 = vcmp.eq.s32.totalorder %v4124_v0, 1  ;;  %v3854_v17 = vsel %vm3853_vm1, %v4681_v21, %v3850_v57 }
 0x7a0   : > { %v4209_v5 = vsel %vm4176_vm5, %v11118_v32, %v3952_v43  ;;  %v3895_v23 = vmul.f32 %v3854_v17, %v13841_v19  ;;  %v3958_v16 = vadd.f32 %v11098_v61, %v3925_v38 }
 0x7a1   : > { %4241 = vst.msk [vmem:[%s11136_s21 + $0xa8] sm:$0xff] %vm13838_vm15, %v4209_v5 }
 0x7a2   : > { %v3928_v31 = vmul.f32 %v11067_v50, %v3895_v23 }
 0x7a4   : > { %v3961_v45 = vadd.f32 %v11098_v61, %v3928_v31 }
 0x7a6   : > { %v4133_v6 = vpop.permute.xlu1 %4132 }
 0x7a7   : > { %vm4179_vm2 = vcmp.eq.s32.totalorder %v4133_v6, 1 }
 0x7a8   : > { %v4212_v12 = vsel %vm4179_vm2, %v11118_v32, %v3955_v59 }
 0x7a9   : > { %4244 = vst.msk [vmem:[%s11136_s21 + $0xc0] sm:$0xff] %vm13840_vm11, %v4212_v12 }
 0x7ae   : > { %v4142_v4 = vpop.permute.xlu1 %4141 }
 0x7af   : > { %vm4182_vm9 = vcmp.eq.s32.totalorder %v4142_v4, 1 }
 0x7b0   : > { %v4215_v14 = vsel %vm4182_vm9, %v11118_v32, %v3958_v16 }
 0x7b1   : > { %4247 = vst.msk [vmem:[%s11136_s21 + $0xd8] sm:$0xff] %vm13842_vm0, %v4215_v14 }
 0x7b6   : > { %v4151_v51 = vpop.permute.xlu1 %4150 }
 0x7b7   : > { %vm4185_vm4 = vcmp.eq.s32.totalorder %v4151_v51, 1 }
 0x7b8   : > { %v4218_v63 = vsel %vm4185_vm4, %v11118_v32, %v3961_v45 }
 0x7b9   : > { %4250 = vst.msk [vmem:[%s11136_s21 + $0xf0] sm:$0xff] %vm13843_vm6, %v4218_v63 }
 0x7ba PF: > { %s18_s24 = sadd.s32 1, %s4720_s24  }
 0x7bb   : > { %p15_p4 = scmp.ge.s32.totalorder %s18_s24, 6  }
 0x7bd   :  { %17 = sbr.rel (!%p15_p4) target bundleno = 1 (0x1), region = 89 }

</bundles_post_ra>
